<compile_context>
chip_gen: v7x
topology: tpu7x:2x2x1
jax: 0.10.0
libtpu: 0.0.40
codegen_flags: <defaults>
</compile_context>

<pallas_src>
import functools
from typing import NamedTuple

import jax
import jax.numpy as jnp
from jax.experimental import pallas as pl
from jax.experimental.pallas import tpu as pltpu

IN_DIM = 3 * 32 * 32  # 3072
H1, H2, H3, OUT = 1024, 512, 256, 1
NEG_SLOPE = 0.2


def _round_up(n, m):
    return (n + m - 1) // m * m


def _cdiv(a, b):
    return (a + b - 1) // b


def _leaky_relu(x, negative_slope=NEG_SLOPE):
    return jnp.where(x > 0, x, negative_slope * x)


def _disc_kernel(x_ref, w1_ref, b1_ref, w2_ref, b2_ref,
                 w3_ref, b3_ref, w4_ref, b4_ref, o_ref):
    """Fused 4-layer MLP on one batch tile.

    Weights arrive in VMEM as bf16; the MXU accumulates in f32.  The 256->1
    head is computed as a transposed-RHS matmul so the result lands directly
    in a lane-dense (1, bt) row; sigmoid uses exp (EUP) + exact divide.
    """
    x = x_ref[...].astype(jnp.bfloat16)          # cast in-kernel (hidden under MXU)

    h = jnp.dot(x, w1_ref[...], preferred_element_type=jnp.float32) + b1_ref[...]
    h = _leaky_relu(h)

    h = jnp.dot(h.astype(jnp.bfloat16), w2_ref[...],
                preferred_element_type=jnp.float32) + b2_ref[...]
    h = _leaky_relu(h)

    h = jnp.dot(h.astype(jnp.bfloat16), w3_ref[...],
                preferred_element_type=jnp.float32) + b3_ref[...]
    h = _leaky_relu(h)

    # Head: w4 is pre-replicated to (8, 256) bf16 (all rows identical).
    # Contract on the minor dims of both operands (flash-attention style
    # transposed-RHS matmul) -> (8, bt); row 0 is the lane-dense result.
    z8 = jax.lax.dot_general(
        w4_ref[...], h.astype(jnp.bfloat16),
        dimension_numbers=(((1,), (1,)), ((), ())),
        preferred_element_type=jnp.float32)
    z = z8[0:1, :] + b4_ref[...]                 # (1, bt), b4 broadcasts from (1, 1)

    # Exact sigmoid: exp on the EUP, exact reciprocal (no approx drift >= 1.0).
    sig = 1.0 / (1.0 + jnp.exp(-z))
    o_ref[...] = sig.reshape(o_ref.shape).astype(o_ref.dtype)


def init_params(key):
    """Deterministic init mimicking nn.Linear's U(-1/sqrt(fan_in), 1/sqrt(fan_in))."""
    dims = [(IN_DIM, H1), (H1, H2), (H2, H3), (H3, OUT)]
    params = []
    for i, (fan_in, fan_out) in enumerate(dims):
        kw, kb = jax.random.split(jax.random.fold_in(key, i))
        bound = 1.0 / (fan_in ** 0.5)
        w = jax.random.uniform(kw, (fan_in, fan_out), jnp.float32, -bound, bound)
        b = jax.random.uniform(kb, (1, fan_out), jnp.float32, -bound, bound)
        params.append((w, b))
    return params


class _Config(NamedTuple):
    bt: int            # batch tile (multiple of 8)
    n_tiles: int       # grid size along batch
    vmem_limit: int    # scoped VMEM limit for this generation
    x_buffers: int     # pipeline depth for the activation input


def _tpu_vmem_bytes():
    try:
        return int(pltpu.get_tpu_info().vmem_capacity_bytes)
    except Exception:
        return 64 * 1024 * 1024   # conservative (v7x-sized) fallback


def _tile_config(B, batch_tile=None):
    vmem_phys = _tpu_vmem_bytes()
    big_vmem = vmem_phys >= 100 * 1024 * 1024     # v5e / v6e: 128 MiB physical
    if big_vmem:
        cap = 1024 if batch_tile is None else batch_tile
        vmem_limit = 96 * 1024 * 1024
    else:                                          # v7x: 64 MiB physical
        cap = 512 if batch_tile is None else batch_tile
        vmem_limit = 48 * 1024 * 1024

    cap = max(8, cap)
    n_tiles = max(1, _cdiv(B, cap))
    # v7x has 2 TensorCores: make sure "parallel" has at least 2 tiles to shard.
    if (not big_vmem) and B > 16 and n_tiles < 2:
        n_tiles = 2
    # Even split minimizes padding waste (e.g. B=300 -> two tiles of 152, not 512).
    bt = _round_up(_cdiv(B, n_tiles), 8)

    # Deeper input buffering only pays on v5e/v6e (VMEM headroom) with a real grid.
    x_buffers = 3 if (big_vmem and n_tiles >= 3) else 2
    return _Config(bt=bt, n_tiles=n_tiles, vmem_limit=vmem_limit, x_buffers=x_buffers)


@functools.partial(jax.jit, static_argnums=(2,))
def _forward_impl(x_nchw, params, cfg):
    B = x_nchw.shape[0]
    bt, n_tiles = cfg.bt, cfg.n_tiles
    Bp = bt * n_tiles

    # Same as torch `x.view(x.size(0), -1)`; keep f32 — bf16 cast happens in-kernel.
    x = x_nchw.reshape(B, -1).astype(jnp.float32)
    if Bp != B:
        x = jnp.pad(x, ((0, Bp - B), (0, 0)))

    (w1, b1), (w2, b2), (w3, b3), (w4, b4) = params
    # bf16 weights halve the HBM bytes of the resident weight DMA.
    w1b = w1.astype(jnp.bfloat16)
    w2b = w2.astype(jnp.bfloat16)
    w3b = w3.astype(jnp.bfloat16)
    # Head weight replicated to 8 sublanes so the transposed matmul has a clean M.
    w4r = jnp.broadcast_to(w4.reshape(1, H3), (8, H3)).astype(jnp.bfloat16)

    def _resident(arr):
        # Constant block across the grid: single-buffer it (no pointless 2x VMEM).
        nd = arr.ndim
        return pl.BlockSpec(arr.shape, lambda i, _n=nd: (0,) * _n,
                            pipeline_mode=pl.Buffered(1))

    x_spec_kwargs = {}
    if cfg.x_buffers != 2:
        x_spec_kwargs["pipeline_mode"] = pl.Buffered(cfg.x_buffers)
    x_spec = pl.BlockSpec((bt, IN_DIM), lambda i: (i, 0), **x_spec_kwargs)

    weight_bytes = (w1b.size + w2b.size + w3b.size + w4r.size) * 2 \
                 + (b1.size + b2.size + b3.size + b4.size) * 4
    flops = 2 * Bp * (IN_DIM * H1 + H1 * H2 + H2 * H3 + H3 * 8)
    bytes_accessed = weight_bytes + Bp * IN_DIM * 4 + Bp * 4

    out = pl.pallas_call(
        _disc_kernel,
        # Lane-dense output slab: batch lives in the lane dimension.
        out_shape=jax.ShapeDtypeStruct((n_tiles, 1, bt), jnp.float32),
        grid=(n_tiles,),
        in_specs=[
            x_spec,
            _resident(w1b), _resident(b1),
            _resident(w2b), _resident(b2),
            _resident(w3b), _resident(b3),
            _resident(w4r), _resident(b4),
        ],
        out_specs=pl.BlockSpec((1, 1, bt), lambda i: (i, 0, 0)),
        compiler_params=pltpu.CompilerParams(
            dimension_semantics=("parallel",),       # batch tiles -> megacore on v7x
            vmem_limit_bytes=cfg.vmem_limit,
        ),
        cost_estimate=pl.CostEstimate(
            flops=flops, transcendentals=Bp, bytes_accessed=bytes_accessed),
    )(x, w1b, b1, w2b, b2, w3b, b3, w4r, b4)

    return out.reshape(Bp)[:B].reshape(B, 1)


def discriminator_forward(x_nchw, params, *, batch_tile=None):
    """x_nchw: (B, 3, 32, 32) float32  ->  (B, 1) float32 in [0, 1]."""
    cfg = _tile_config(x_nchw.shape[0], batch_tile)
    return _forward_impl(x_nchw, params, cfg)


if __name__ == "__main__":
    key = jax.random.PRNGKey(0)
    pkey, xkey = jax.random.split(key)

    params = init_params(pkey)
    x = jax.random.normal(xkey, (2, 3, 32, 32), jnp.float32)  # small batch, CIFAR-like

    y = discriminator_forward(x, params)
    y = jax.block_until_ready(y)

    # sanity: shape and sigmoid range
    assert y.shape == (2, 1), y.shape
    assert bool(jnp.all((y >= 0.0) & (y <= 1.0))), y

    # cross-check against a plain-JAX reference that mirrors the kernel's
    # precision choices (bf16 weights/activations into the matmuls, f32 accum).
    # Note: this intentionally diverges from the f32 PyTorch module at ~1e-2
    # relative on layer 1 — acceptable for a GAN discriminator.
    def ref(x_nchw, params):
        (w1, b1), (w2, b2), (w3, b3), (w4, b4) = params
        bf = lambda a: a.astype(jnp.bfloat16)
        act = lambda t: jnp.where(t > 0, t, NEG_SLOPE * t)
        h = x_nchw.reshape(x_nchw.shape[0], -1)
        h = act(jnp.dot(bf(h), bf(w1), preferred_element_type=jnp.float32) + b1)
        h = act(jnp.dot(bf(h), bf(w2), preferred_element_type=jnp.float32) + b2)
        h = act(jnp.dot(bf(h), bf(w3), preferred_element_type=jnp.float32) + b3)
        z = jnp.dot(bf(h), bf(w4), preferred_element_type=jnp.float32) + b4
        return jax.nn.sigmoid(z)

    ref_y = ref(x, params)
    assert bool(jnp.allclose(y, ref_y, atol=5e-3, rtol=0.0)), (y, ref_y)

    print("KERNEL_OK")
</pallas_src>

<mosaic_0001>
module attributes {stable_mosaic.version = 11 : i64} {
  func.func @_disc_kernel(%arg0: i32, %arg1: memref<8x3072xf32, #tpu.memory_space<vmem>>, %arg2: memref<3072x1024xbf16, #tpu.memory_space<vmem>>, %arg3: memref<1x1024xf32, #tpu.memory_space<vmem>>, %arg4: memref<1024x512xbf16, #tpu.memory_space<vmem>>, %arg5: memref<1x512xf32, #tpu.memory_space<vmem>>, %arg6: memref<512x256xbf16, #tpu.memory_space<vmem>>, %arg7: memref<1x256xf32, #tpu.memory_space<vmem>>, %arg8: memref<8x256xbf16, #tpu.memory_space<vmem>>, %arg9: memref<1x1xf32, #tpu.memory_space<vmem>>, %arg10: memref<1x1x8xf32, #tpu.memory_space<vmem>>) attributes {dimension_semantics = [#tpu.dimension_semantics<parallel>], iteration_bounds = array<i64: 1>, scalar_prefetch = 0 : i64, scratch_operands = 0 : i64, tpu.core_type = #tpu.core_type<tc>, window_params = [{transform_indices = @transform_0, window_bounds = array<i64: 8, 3072>}, {pipeline_mode = #tpu.pipeline_mode<synchronous>, transform_indices = @transform_1, window_bounds = array<i64: 3072, 1024>}, {pipeline_mode = #tpu.pipeline_mode<synchronous>, transform_indices = @transform_2, window_bounds = array<i64: 1, 1024>}, {pipeline_mode = #tpu.pipeline_mode<synchronous>, transform_indices = @transform_3, window_bounds = array<i64: 1024, 512>}, {pipeline_mode = #tpu.pipeline_mode<synchronous>, transform_indices = @transform_4, window_bounds = array<i64: 1, 512>}, {pipeline_mode = #tpu.pipeline_mode<synchronous>, transform_indices = @transform_5, window_bounds = array<i64: 512, 256>}, {pipeline_mode = #tpu.pipeline_mode<synchronous>, transform_indices = @transform_6, window_bounds = array<i64: 1, 256>}, {pipeline_mode = #tpu.pipeline_mode<synchronous>, transform_indices = @transform_7, window_bounds = array<i64: 8, 256>}, {pipeline_mode = #tpu.pipeline_mode<synchronous>, transform_indices = @transform_8, window_bounds = array<i64: 1, 1>}, {transform_indices = @transform_9, window_bounds = array<i64: 1, 1, 8>}]} {
    %c0 = arith.constant 0 : index
    %c0_0 = arith.constant 0 : index
    %0 = vector.load %arg1[%c0, %c0_0] : memref<8x3072xf32, #tpu.memory_space<vmem>>, vector<8x3072xf32>
    %1 = arith.truncf %0 : vector<8x3072xf32> to vector<8x3072xbf16>
    %c0_1 = arith.constant 0 : index
    %c0_2 = arith.constant 0 : index
    %2 = vector.load %arg2[%c0_1, %c0_2] : memref<3072x1024xbf16, #tpu.memory_space<vmem>>, vector<3072x1024xbf16>
    %cst = arith.constant dense<0.000000e+00> : vector<8x1024xf32>
    %3 = tpu.matmul %1, %2, %cst {dimension_numbers = #tpu.dot_dimension_numbers<[1], [0], [0], [1], [0, 0, 1, 1], [], []>} : vector<8x3072xbf16>, vector<3072x1024xbf16>, vector<8x1024xf32> -> vector<8x1024xf32>
    %c0_3 = arith.constant 0 : index
    %c0_4 = arith.constant 0 : index
    %4 = vector.load %arg3[%c0_3, %c0_4] : memref<1x1024xf32, #tpu.memory_space<vmem>>, vector<1x1024xf32>
    %5 = vector.broadcast %4 : vector<1x1024xf32> to vector<8x1024xf32>
    %6 = arith.addf %3, %5 : vector<8x1024xf32>
    %cst_5 = arith.constant 0.000000e+00 : f32
    %7 = vector.broadcast %cst_5 : f32 to vector<8x1024xf32>
    %8 = arith.cmpf ogt, %6, %7 : vector<8x1024xf32>
    %cst_6 = arith.constant 2.000000e-01 : f32
    %9 = vector.broadcast %cst_6 : f32 to vector<8x1024xf32>
    %10 = arith.mulf %9, %6 : vector<8x1024xf32>
    %11 = arith.select %8, %6, %10 : vector<8x1024xi1>, vector<8x1024xf32>
    %12 = arith.truncf %11 : vector<8x1024xf32> to vector<8x1024xbf16>
    %c0_7 = arith.constant 0 : index
    %c0_8 = arith.constant 0 : index
    %13 = vector.load %arg4[%c0_7, %c0_8] : memref<1024x512xbf16, #tpu.memory_space<vmem>>, vector<1024x512xbf16>
    %cst_9 = arith.constant dense<0.000000e+00> : vector<8x512xf32>
    %14 = tpu.matmul %12, %13, %cst_9 {dimension_numbers = #tpu.dot_dimension_numbers<[1], [0], [0], [1], [0, 0, 1, 1], [], []>} : vector<8x1024xbf16>, vector<1024x512xbf16>, vector<8x512xf32> -> vector<8x512xf32>
    %c0_10 = arith.constant 0 : index
    %c0_11 = arith.constant 0 : index
    %15 = vector.load %arg5[%c0_10, %c0_11] : memref<1x512xf32, #tpu.memory_space<vmem>>, vector<1x512xf32>
    %16 = vector.broadcast %15 : vector<1x512xf32> to vector<8x512xf32>
    %17 = arith.addf %14, %16 : vector<8x512xf32>
    %cst_12 = arith.constant 0.000000e+00 : f32
    %18 = vector.broadcast %cst_12 : f32 to vector<8x512xf32>
    %19 = arith.cmpf ogt, %17, %18 : vector<8x512xf32>
    %cst_13 = arith.constant 2.000000e-01 : f32
    %20 = vector.broadcast %cst_13 : f32 to vector<8x512xf32>
    %21 = arith.mulf %20, %17 : vector<8x512xf32>
    %22 = arith.select %19, %17, %21 : vector<8x512xi1>, vector<8x512xf32>
    %23 = arith.truncf %22 : vector<8x512xf32> to vector<8x512xbf16>
    %c0_14 = arith.constant 0 : index
    %c0_15 = arith.constant 0 : index
    %24 = vector.load %arg6[%c0_14, %c0_15] : memref<512x256xbf16, #tpu.memory_space<vmem>>, vector<512x256xbf16>
    %cst_16 = arith.constant dense<0.000000e+00> : vector<8x256xf32>
    %25 = tpu.matmul %23, %24, %cst_16 {dimension_numbers = #tpu.dot_dimension_numbers<[1], [0], [0], [1], [0, 0, 1, 1], [], []>} : vector<8x512xbf16>, vector<512x256xbf16>, vector<8x256xf32> -> vector<8x256xf32>
    %c0_17 = arith.constant 0 : index
    %c0_18 = arith.constant 0 : index
    %26 = vector.load %arg7[%c0_17, %c0_18] : memref<1x256xf32, #tpu.memory_space<vmem>>, vector<1x256xf32>
    %27 = vector.broadcast %26 : vector<1x256xf32> to vector<8x256xf32>
    %28 = arith.addf %25, %27 : vector<8x256xf32>
    %cst_19 = arith.constant 0.000000e+00 : f32
    %29 = vector.broadcast %cst_19 : f32 to vector<8x256xf32>
    %30 = arith.cmpf ogt, %28, %29 : vector<8x256xf32>
    %cst_20 = arith.constant 2.000000e-01 : f32
    %31 = vector.broadcast %cst_20 : f32 to vector<8x256xf32>
    %32 = arith.mulf %31, %28 : vector<8x256xf32>
    %33 = arith.select %30, %28, %32 : vector<8x256xi1>, vector<8x256xf32>
    %c0_21 = arith.constant 0 : index
    %c0_22 = arith.constant 0 : index
    %34 = vector.load %arg8[%c0_21, %c0_22] : memref<8x256xbf16, #tpu.memory_space<vmem>>, vector<8x256xbf16>
    %35 = arith.truncf %33 : vector<8x256xf32> to vector<8x256xbf16>
    %cst_23 = arith.constant dense<0.000000e+00> : vector<8x8xf32>
    %36 = tpu.matmul %34, %35, %cst_23 {dimension_numbers = #tpu.dot_dimension_numbers<[1], [1], [0], [0], [0, 0, 1, 0], [], []>} : vector<8x256xbf16>, vector<8x256xbf16>, vector<8x8xf32> -> vector<8x8xf32>
    %37 = vector.extract_strided_slice %36 {offsets = [0, 0], sizes = [1, 8], strides = [1, 1]} : vector<8x8xf32> to vector<1x8xf32>
    %c0_24 = arith.constant 0 : index
    %c0_25 = arith.constant 0 : index
    %38 = vector.load %arg9[%c0_24, %c0_25] : memref<1x1xf32, #tpu.memory_space<vmem>>, vector<1x1xf32>
    %39 = vector.broadcast %38 : vector<1x1xf32> to vector<1x8xf32>
    %40 = arith.addf %37, %39 : vector<1x8xf32>
    %cst_26 = arith.constant 0.000000e+00 : f32
    %41 = vector.broadcast %cst_26 : f32 to vector<1x8xf32>
    %42 = arith.subf %41, %40 : vector<1x8xf32>
    %43 = math.exp %42 : vector<1x8xf32>
    %cst_27 = arith.constant 1.000000e+00 : f32
    %44 = vector.broadcast %cst_27 : f32 to vector<1x8xf32>
    %45 = arith.addf %44, %43 : vector<1x8xf32>
    %cst_28 = arith.constant 1.000000e+00 : f32
    %46 = vector.broadcast %cst_28 : f32 to vector<1x8xf32>
    %47 = arith.divf %46, %45 : vector<1x8xf32>
    %48 = vector.shape_cast %47 : vector<1x8xf32> to vector<1x1x8xf32>
    %c0_29 = arith.constant 0 : index
    %c0_30 = arith.constant 0 : index
    %c0_31 = arith.constant 0 : index
    %49 = vector.load %arg10[%c0_29, %c0_30, %c0_31] : memref<1x1x8xf32, #tpu.memory_space<vmem>>, vector<1x1x8xf32>
    tpu.vector_store %arg10[%c0_29, %c0_30, %c0_31], %48 {strides = array<i32>} : memref<1x1x8xf32, #tpu.memory_space<vmem>>, vector<1x1x8xf32>,
    return
  }
  func.func @transform_0(%arg0: i32) -> (i32, i32) {
    %c0_i32 = arith.constant 0 : i32
    %c0_i32_0 = arith.constant 0 : i32
    return %arg0, %c0_i32 : i32, i32
  }
  func.func @transform_1(%arg0: i32) -> (i32, i32) {
    %c0_i32 = arith.constant 0 : i32
    %c0_i32_0 = arith.constant 0 : i32
    %c0_i32_1 = arith.constant 0 : i32
    return %c0_i32, %c0_i32_0 : i32, i32
  }
  func.func @transform_2(%arg0: i32) -> (i32, i32) {
    %c0_i32 = arith.constant 0 : i32
    %c0_i32_0 = arith.constant 0 : i32
    %c0_i32_1 = arith.constant 0 : i32
    return %c0_i32, %c0_i32_0 : i32, i32
  }
  func.func @transform_3(%arg0: i32) -> (i32, i32) {
    %c0_i32 = arith.constant 0 : i32
    %c0_i32_0 = arith.constant 0 : i32
    %c0_i32_1 = arith.constant 0 : i32
    return %c0_i32, %c0_i32_0 : i32, i32
  }
  func.func @transform_4(%arg0: i32) -> (i32, i32) {
    %c0_i32 = arith.constant 0 : i32
    %c0_i32_0 = arith.constant 0 : i32
    %c0_i32_1 = arith.constant 0 : i32
    return %c0_i32, %c0_i32_0 : i32, i32
  }
  func.func @transform_5(%arg0: i32) -> (i32, i32) {
    %c0_i32 = arith.constant 0 : i32
    %c0_i32_0 = arith.constant 0 : i32
    %c0_i32_1 = arith.constant 0 : i32
    return %c0_i32, %c0_i32_0 : i32, i32
  }
  func.func @transform_6(%arg0: i32) -> (i32, i32) {
    %c0_i32 = arith.constant 0 : i32
    %c0_i32_0 = arith.constant 0 : i32
    %c0_i32_1 = arith.constant 0 : i32
    return %c0_i32, %c0_i32_0 : i32, i32
  }
  func.func @transform_7(%arg0: i32) -> (i32, i32) {
    %c0_i32 = arith.constant 0 : i32
    %c0_i32_0 = arith.constant 0 : i32
    %c0_i32_1 = arith.constant 0 : i32
    return %c0_i32, %c0_i32_0 : i32, i32
  }
  func.func @transform_8(%arg0: i32) -> (i32, i32) {
    %c0_i32 = arith.constant 0 : i32
    %c0_i32_0 = arith.constant 0 : i32
    %c0_i32_1 = arith.constant 0 : i32
    return %c0_i32, %c0_i32_0 : i32, i32
  }
  func.func @transform_9(%arg0: i32) -> (i32, i32, i32) {
    %c0_i32 = arith.constant 0 : i32
    %c0_i32_0 = arith.constant 0 : i32
    %c0_i32_1 = arith.constant 0 : i32
    return %arg0, %c0_i32, %c0_i32_0 : i32, i32, i32
  }
}

</mosaic_0001>

<bundles_post_ra>
// kernel: _forward_impl.1
= control target key start
LH: loop header
LB: loop body
LE: loop exit
PB: predicated region body
PF: predicated region fallthrough
CT: control target
= control target key end

     0   :  { %vm13794_vm14 = vcmask 57344   ;;  %s22314_s1 = inlined_call_operand.vmem [shape: bf16[3072,1024], index: 1, kind: input, shape index: {}]   ;;  %s22315_s0 = inlined_call_operand.vmem [shape: f32[8,3072], index: 0, kind: input, shape index: {}]   ;;  %s22316_s2 = inlined_call_operand.vmem [shape: f32[1,1024], index: 2, kind: input, shape index: {}]   ;;  %s22317_s3 = inlined_call_operand.vmem [shape: bf16[1024,512], index: 3, kind: input, shape index: {}]   ;;  %s22318_s5 = inlined_call_operand.vmem [shape: bf16[512,256], index: 5, kind: input, shape index: {}]   ;;  %s22319_s4 = inlined_call_operand.vmem [shape: f32[1,512], index: 4, kind: input, shape index: {}]   ;;  %s22320_s7 = inlined_call_operand.vmem [shape: bf16[8,256], index: 7, kind: input, shape index: {}]   ;;  %s22321_s8 = inlined_call_operand.<no memory space> [shape: f32[1,1], index: 8, kind: input, shape index: {}]   ;;  %s22322_s6 = inlined_call_operand.vmem [shape: f32[1,256], index: 6, kind: input, shape index: {}]   ;;  %s22323_s9 = inlined_call_operand.vmem [shape: f32[1,1,8], index: 9, kind: output, shape index: {}]  }
   0x1   :  { %v83_v0 = vld [vmem:[%s22314_s1] sm:$0xff]  ;;  %v36_v53 = vld [vmem:[%s22315_s0 + $0x8] sm:$0xff]  ;;  %v38_v58 = vld [vmem:[%s22315_s0 + $0x18] sm:$0xff] }
   0x2   :  { %v87_v1 = vld [vmem:[%s22314_s1 + $0x20] sm:$0xff]  ;;  %v16508_v57 = vpack.c.bf16 %v36_v53, %v36_v53  ;;  %v16519_v61 = vpack.c.bf16 %v38_v58, %v38_v58 }
   0x3   :  { %v211_v2 = vld [vmem:[%s22314_s1 + $0x400] sm:$0xff]  ;;  %v13801_v3 = vcombine.high %v83_v0, %v87_v1  ;;  %v13800_v5 = vcombine.low %v83_v0, %v87_v1 }
   0x4   :  { %v215_v4 = vld [vmem:[%s22314_s1 + $0x420] sm:$0xff]  ;;  %9373 = vmatprep.mubr.bf16.mxu1 %v16508_v57  ;;  %9414 = vmatprep.mubr.bf16.mxu0 %v16519_v61 }
   0x5   :  { %v91_v6 = vld [vmem:[%s22314_s1 + $0x40] sm:$0xff]  ;;  %v13929_v8 = vcombine.high %v211_v2, %v215_v4  ;;  %v13928_v9 = vcombine.low %v211_v2, %v215_v4  ;;  %9341 = vmatprep.subr.bf16.mxu1 %v13801_v3 }
   0x6   :  { %v95_v7 = vld [vmem:[%s22314_s1 + $0x60] sm:$0xff]  ;;  %9342 = vmatpush1.bf16.msra.mxu1 %v13800_v5 }
   0x7   :  { %v13809_v10 = vcombine.high %v91_v6, %v95_v7  ;;  %v219_v11 = vld [vmem:[%s22314_s1 + $0x440] sm:$0xff]  ;;  %9382 = vmatprep.subr.bf16.mxu0 %v13929_v8  ;;  %v13808_v18 = vcombine.low %v91_v6, %v95_v7 }
   0x8   :  { %v223_v12 = vld [vmem:[%s22314_s1 + $0x460] sm:$0xff]  ;;  %9383 = vmatpush1.bf16.msra.mxu0 %v13928_v9 }
   0x9   :  { %v99_v13 = vld [vmem:[%s22314_s1 + $0x80] sm:$0xff]  ;;  %v13937_v14 = vcombine.high %v219_v11, %v223_v12  ;;  %9343 = vmatprep.subr.bf16.mxu1 %v13809_v10  ;;  %v13936_v19 = vcombine.low %v219_v11, %v223_v12 }
   0xa   :  { %v103_v15 = vld [vmem:[%s22314_s1 + $0xa0] sm:$0xff]  ;;  %9344 = vmatpush1.bf16.msra.mxu1 %v13808_v18 }
   0xb   :  { %v227_v16 = vld [vmem:[%s22314_s1 + $0x480] sm:$0xff]  ;;  %v13817_v20 = vcombine.high %v99_v13, %v103_v15  ;;  %9384 = vmatprep.subr.bf16.mxu0 %v13937_v14  ;;  %v13816_v26 = vcombine.low %v99_v13, %v103_v15 }
   0xc   :  { %v231_v17 = vld [vmem:[%s22314_s1 + $0x4a0] sm:$0xff]  ;;  %9385 = vmatpush1.bf16.msra.mxu0 %v13936_v19 }
   0xd   :  { %v13945_v21 = vcombine.high %v227_v16, %v231_v17  ;;  %v107_v22 = vld [vmem:[%s22314_s1 + $0xc0] sm:$0xff]  ;;  %9345 = vmatprep.subr.bf16.mxu1 %v13817_v20  ;;  %v13944_v27 = vcombine.low %v227_v16, %v231_v17 }
   0xe   :  { %v111_v23 = vld [vmem:[%s22314_s1 + $0xe0] sm:$0xff]  ;;  %9346 = vmatpush1.bf16.msra.mxu1 %v13816_v26 }
   0xf   :  { %v235_v24 = vld [vmem:[%s22314_s1 + $0x4c0] sm:$0xff]  ;;  %v13825_v28 = vcombine.high %v107_v22, %v111_v23  ;;  %9386 = vmatprep.subr.bf16.mxu0 %v13945_v21  ;;  %v13824_v34 = vcombine.low %v107_v22, %v111_v23 }
  0x10   :  { %v239_v25 = vld [vmem:[%s22314_s1 + $0x4e0] sm:$0xff]  ;;  %9387 = vmatpush1.bf16.msra.mxu0 %v13944_v27 }
  0x11   :  { %v13953_v29 = vcombine.high %v235_v24, %v239_v25  ;;  %v115_v30 = vld [vmem:[%s22314_s1 + $0x100] sm:$0xff]  ;;  %9347 = vmatprep.subr.bf16.mxu1 %v13825_v28  ;;  %v13952_v35 = vcombine.low %v235_v24, %v239_v25 }
  0x12   :  { %v119_v31 = vld [vmem:[%s22314_s1 + $0x120] sm:$0xff]  ;;  %9348 = vmatpush1.bf16.msra.mxu1 %v13824_v34 }
  0x13   :  { %v243_v32 = vld [vmem:[%s22314_s1 + $0x500] sm:$0xff]  ;;  %v13833_v36 = vcombine.high %v115_v30, %v119_v31  ;;  %9388 = vmatprep.subr.bf16.mxu0 %v13953_v29  ;;  %v13832_v42 = vcombine.low %v115_v30, %v119_v31 }
  0x14   :  { %v247_v33 = vld [vmem:[%s22314_s1 + $0x520] sm:$0xff]  ;;  %9389 = vmatpush1.bf16.msra.mxu0 %v13952_v35 }
  0x15   :  { %v13961_v37 = vcombine.high %v243_v32, %v247_v33  ;;  %v123_v38 = vld [vmem:[%s22314_s1 + $0x140] sm:$0xff]  ;;  %9349 = vmatprep.subr.bf16.mxu1 %v13833_v36  ;;  %v13960_v43 = vcombine.low %v243_v32, %v247_v33 }
  0x16   :  { %v127_v39 = vld [vmem:[%s22314_s1 + $0x160] sm:$0xff]  ;;  %9350 = vmatpush1.bf16.msra.mxu1 %v13832_v42 }
  0x17   :  { %v251_v40 = vld [vmem:[%s22314_s1 + $0x540] sm:$0xff]  ;;  %v13841_v44 = vcombine.high %v123_v38, %v127_v39  ;;  %9390 = vmatprep.subr.bf16.mxu0 %v13961_v37  ;;  %v13840_v50 = vcombine.low %v123_v38, %v127_v39 }
  0x18   :  { %v255_v41 = vld [vmem:[%s22314_s1 + $0x560] sm:$0xff]  ;;  %9391 = vmatpush1.bf16.msra.mxu0 %v13960_v43 }
  0x19   :  { %v13969_v45 = vcombine.high %v251_v40, %v255_v41  ;;  %v131_v46 = vld [vmem:[%s22314_s1 + $0x180] sm:$0xff]  ;;  %9351 = vmatprep.subr.bf16.mxu1 %v13841_v44  ;;  %v13968_v51 = vcombine.low %v251_v40, %v255_v41 }
  0x1a   :  { %v135_v47 = vld [vmem:[%s22314_s1 + $0x1a0] sm:$0xff]  ;;  %9352 = vmatpush1.bf16.msra.mxu1 %v13840_v50 }
  0x1b   :  { %v259_v48 = vld [vmem:[%s22314_s1 + $0x580] sm:$0xff]  ;;  %v13849_v52 = vcombine.high %v131_v46, %v135_v47  ;;  %9392 = vmatprep.subr.bf16.mxu0 %v13969_v45  ;;  %v13848_v62 = vcombine.low %v131_v46, %v135_v47 }
  0x1c   :  { %v263_v49 = vld [vmem:[%s22314_s1 + $0x5a0] sm:$0xff]  ;;  %9393 = vmatpush1.bf16.msra.mxu0 %v13968_v51 }
  0x1d   :  { %v13977_v54 = vcombine.high %v259_v48, %v263_v49  ;;  %v139_v55 = vld [vmem:[%s22314_s1 + $0x1c0] sm:$0xff]  ;;  %9353 = vmatprep.subr.bf16.mxu1 %v13849_v52  ;;  %v13976_v63 = vcombine.low %v259_v48, %v263_v49 }
  0x1e   :  { %v143_v56 = vld [vmem:[%s22314_s1 + $0x1e0] sm:$0xff]  ;;  %9354 = vmatpush1.bf16.msra.mxu1 %v13848_v62 }
  0x1f   :  { %v267_v59 = vld [vmem:[%s22314_s1 + $0x5c0] sm:$0xff]  ;;  %v13857_v0 = vcombine.high %v139_v55, %v143_v56  ;;  %9394 = vmatprep.subr.bf16.mxu0 %v13977_v54  ;;  %v13856_v6 = vcombine.low %v139_v55, %v143_v56 }
  0x20   :  { %v271_v60 = vld [vmem:[%s22314_s1 + $0x5e0] sm:$0xff]  ;;  %9395 = vmatpush1.bf16.msra.mxu0 %v13976_v63 }
  0x21   :  { %v13985_v1 = vcombine.high %v267_v59, %v271_v60  ;;  %v147_v2 = vld [vmem:[%s22314_s1 + $0x200] sm:$0xff]  ;;  %9355 = vmatprep.subr.bf16.mxu1 %v13857_v0  ;;  %v13984_v7 = vcombine.low %v267_v59, %v271_v60 }
  0x22   :  { %v151_v3 = vld [vmem:[%s22314_s1 + $0x220] sm:$0xff]  ;;  %9356 = vmatpush1.bf16.msra.mxu1 %v13856_v6 }
  0x23   :  { %v275_v4 = vld [vmem:[%s22314_s1 + $0x600] sm:$0xff]  ;;  %v13865_v8 = vcombine.high %v147_v2, %v151_v3  ;;  %9396 = vmatprep.subr.bf16.mxu0 %v13985_v1  ;;  %v13864_v14 = vcombine.low %v147_v2, %v151_v3 }
  0x24   :  { %v279_v5 = vld [vmem:[%s22314_s1 + $0x620] sm:$0xff]  ;;  %9397 = vmatpush1.bf16.msra.mxu0 %v13984_v7 }
  0x25   :  { %v13993_v9 = vcombine.high %v275_v4, %v279_v5  ;;  %v155_v10 = vld [vmem:[%s22314_s1 + $0x240] sm:$0xff]  ;;  %9357 = vmatprep.subr.bf16.mxu1 %v13865_v8  ;;  %v13992_v15 = vcombine.low %v275_v4, %v279_v5  ;;  %v84_v4 = vld [vmem:[%s22314_s1 + $0x8] sm:$0xff] }
  0x26   :  { %v159_v11 = vld [vmem:[%s22314_s1 + $0x260] sm:$0xff]  ;;  %9358 = vmatpush1.bf16.msra.mxu1 %v13864_v14  ;;  %v88_v5 = vld [vmem:[%s22314_s1 + $0x28] sm:$0xff] }
  0x27   :  { %v283_v12 = vld [vmem:[%s22314_s1 + $0x640] sm:$0xff]  ;;  %v13873_v16 = vcombine.high %v155_v10, %v159_v11  ;;  %9398 = vmatprep.subr.bf16.mxu0 %v13993_v9  ;;  %v13872_v22 = vcombine.low %v155_v10, %v159_v11  ;;  %v13803_v11 = vcombine.high %v84_v4, %v88_v5  ;;  %v92_v14 = vld [vmem:[%s22314_s1 + $0x48] sm:$0xff] }
  0x28   :  { %v287_v13 = vld [vmem:[%s22314_s1 + $0x660] sm:$0xff]  ;;  %9399 = vmatpush1.bf16.msra.mxu0 %v13992_v15  ;;  %v96_v15 = vld [vmem:[%s22314_s1 + $0x68] sm:$0xff] }
  0x29   :  { %v14001_v17 = vcombine.high %v283_v12, %v287_v13  ;;  %v163_v18 = vld [vmem:[%s22314_s1 + $0x280] sm:$0xff]  ;;  %9359 = vmatprep.subr.bf16.mxu1 %v13873_v16  ;;  %v14000_v23 = vcombine.low %v283_v12, %v287_v13  ;;  %v37_v12 = vld [vmem:[%s22315_s0 + $0x10] sm:$0xff] }
  0x2a   :  { %v167_v19 = vld [vmem:[%s22314_s1 + $0x2a0] sm:$0xff]  ;;  %9360 = vmatpush1.bf16.msra.mxu1 %v13872_v22 }
  0x2b   :  { %v291_v20 = vld [vmem:[%s22314_s1 + $0x680] sm:$0xff]  ;;  %v13881_v24 = vcombine.high %v163_v18, %v167_v19  ;;  %9400 = vmatprep.subr.bf16.mxu0 %v14001_v17  ;;  %v13880_v30 = vcombine.low %v163_v18, %v167_v19  ;;  %v40_v19 = vld [vmem:[%s22315_s0 + $0x28] sm:$0xff] }
  0x2c   :  { %v295_v21 = vld [vmem:[%s22314_s1 + $0x6a0] sm:$0xff]  ;;  %9401 = vmatpush1.bf16.msra.mxu0 %v14000_v23  ;;  %v13811_v23 = vcombine.high %v92_v14, %v96_v15 }
  0x2d   :  { %v14009_v25 = vcombine.high %v291_v20, %v295_v21  ;;  %v171_v26 = vld [vmem:[%s22314_s1 + $0x2c0] sm:$0xff]  ;;  %9361 = vmatprep.subr.bf16.mxu1 %v13881_v24  ;;  %v14008_v31 = vcombine.low %v291_v20, %v295_v21  ;;  %v13802_v20 = vcombine.low %v84_v4, %v88_v5  ;;  %v16654_v21 = vpack.c.bf16 %v37_v12, %v37_v12  ;;  %v140_v4 = vld [vmem:[%s22314_s1 + $0x1c8] sm:$0xff] }
  0x2e   :  { %v175_v27 = vld [vmem:[%s22314_s1 + $0x2e0] sm:$0xff]  ;;  %9362 = vmatpush1.bf16.msra.mxu1 %v13880_v30  ;;  %v13810_v30 = vcombine.low %v92_v14, %v96_v15  ;;  %v144_v5 = vld [vmem:[%s22314_s1 + $0x1e8] sm:$0xff] }
  0x2f   :  { %v299_v28 = vld [vmem:[%s22314_s1 + $0x6c0] sm:$0xff]  ;;  %v13889_v32 = vcombine.high %v171_v26, %v175_v27  ;;  %9402 = vmatprep.subr.bf16.mxu0 %v14009_v25  ;;  %v13888_v38 = vcombine.low %v171_v26, %v175_v27  ;;  %v100_v25 = vld [vmem:[%s22314_s1 + $0x88] sm:$0xff]  ;;  %v16662_v27 = vpack.c.bf16 %v40_v19, %v40_v19 }
  0x30   :  { %v303_v29 = vld [vmem:[%s22314_s1 + $0x6e0] sm:$0xff]  ;;  %9403 = vmatpush1.bf16.msra.mxu0 %v14008_v31  ;;  %v104_v26 = vld [vmem:[%s22314_s1 + $0xa8] sm:$0xff] }
  0x31   :  { %v14017_v33 = vcombine.high %v299_v28, %v303_v29  ;;  %v179_v34 = vld [vmem:[%s22314_s1 + $0x300] sm:$0xff]  ;;  %9363 = vmatprep.subr.bf16.mxu1 %v13889_v32  ;;  %v14016_v39 = vcombine.low %v299_v28, %v303_v29  ;;  %v13819_v32 = vcombine.high %v100_v25, %v104_v26  ;;  %v148_v12 = vld [vmem:[%s22314_s1 + $0x208] sm:$0xff] }
  0x32   :  { %v183_v35 = vld [vmem:[%s22314_s1 + $0x320] sm:$0xff]  ;;  %9364 = vmatpush1.bf16.msra.mxu1 %v13888_v38  ;;  %v13818_v38 = vcombine.low %v100_v25, %v104_v26 }
  0x33   :  { %v307_v36 = vld [vmem:[%s22314_s1 + $0x700] sm:$0xff]  ;;  %v13897_v40 = vcombine.high %v179_v34, %v183_v35  ;;  %9404 = vmatprep.subr.bf16.mxu0 %v14017_v33  ;;  %v13896_v46 = vcombine.low %v179_v34, %v183_v35  ;;  %v108_v34 = vld [vmem:[%s22314_s1 + $0xc8] sm:$0xff] }
  0x34   :  { %v311_v37 = vld [vmem:[%s22314_s1 + $0x720] sm:$0xff]  ;;  %9405 = vmatpush1.bf16.msra.mxu0 %v14016_v39  ;;  %v112_v35 = vld [vmem:[%s22314_s1 + $0xe8] sm:$0xff] }
  0x35   :  { %v14025_v41 = vcombine.high %v307_v36, %v311_v37  ;;  %v187_v42 = vld [vmem:[%s22314_s1 + $0x340] sm:$0xff]  ;;  %9365 = vmatprep.subr.bf16.mxu1 %v13897_v40  ;;  %v14024_v47 = vcombine.low %v307_v36, %v311_v37  ;;  %v13827_v40 = vcombine.high %v108_v34, %v112_v35 }
  0x36   :  { %v191_v43 = vld [vmem:[%s22314_s1 + $0x360] sm:$0xff]  ;;  %9366 = vmatpush1.bf16.msra.mxu1 %v13896_v46  ;;  %v13826_v46 = vcombine.low %v108_v34, %v112_v35 }
  0x37   :  { %v315_v44 = vld [vmem:[%s22314_s1 + $0x740] sm:$0xff]  ;;  %v13905_v48 = vcombine.high %v187_v42, %v191_v43  ;;  %9406 = vmatprep.subr.bf16.mxu0 %v14025_v41  ;;  %v13904_v54 = vcombine.low %v187_v42, %v191_v43  ;;  %v116_v42 = vld [vmem:[%s22314_s1 + $0x108] sm:$0xff] }
  0x38   :  { %v319_v45 = vld [vmem:[%s22314_s1 + $0x760] sm:$0xff]  ;;  %9407 = vmatpush1.bf16.msra.mxu0 %v14024_v47  ;;  %v120_v43 = vld [vmem:[%s22314_s1 + $0x128] sm:$0xff] }
  0x39   :  { %v14033_v49 = vcombine.high %v315_v44, %v319_v45  ;;  %v195_v50 = vld [vmem:[%s22314_s1 + $0x380] sm:$0xff]  ;;  %9367 = vmatprep.subr.bf16.mxu1 %v13905_v48  ;;  %v14032_v55 = vcombine.low %v315_v44, %v319_v45  ;;  %v13835_v48 = vcombine.high %v116_v42, %v120_v43 }
  0x3a   :  { %v199_v51 = vld [vmem:[%s22314_s1 + $0x3a0] sm:$0xff]  ;;  %9368 = vmatpush1.bf16.msra.mxu1 %v13904_v54  ;;  %v13834_v54 = vcombine.low %v116_v42, %v120_v43 }
  0x3b   :  { %v323_v52 = vld [vmem:[%s22314_s1 + $0x780] sm:$0xff]  ;;  %v13913_v56 = vcombine.high %v195_v50, %v199_v51  ;;  %9408 = vmatprep.subr.bf16.mxu0 %v14033_v49  ;;  %v13912_v0 = vcombine.low %v195_v50, %v199_v51  ;;  %v124_v50 = vld [vmem:[%s22314_s1 + $0x148] sm:$0xff] }
  0x3c   :  { %v327_v53 = vld [vmem:[%s22314_s1 + $0x7a0] sm:$0xff]  ;;  %9409 = vmatpush1.bf16.msra.mxu0 %v14032_v55  ;;  %v128_v51 = vld [vmem:[%s22314_s1 + $0x168] sm:$0xff] }
  0x3d   :  { %v14041_v58 = vcombine.high %v323_v52, %v327_v53  ;;  %v203_v59 = vld [vmem:[%s22314_s1 + $0x3c0] sm:$0xff]  ;;  %9369 = vmatprep.subr.bf16.mxu1 %v13913_v56  ;;  %v14040_v1 = vcombine.low %v323_v52, %v327_v53  ;;  %v13843_v56 = vcombine.high %v124_v50, %v128_v51 }
  0x3e   :  { %v207_v60 = vld [vmem:[%s22314_s1 + $0x3e0] sm:$0xff]  ;;  %9370 = vmatpush1.bf16.msra.mxu1 %v13912_v0  ;;  %v13842_v0 = vcombine.low %v124_v50, %v128_v51 }
  0x3f   :  { %v331_v62 = vld [vmem:[%s22314_s1 + $0x7c0] sm:$0xff]  ;;  %v13921_v2 = vcombine.high %v203_v59, %v207_v60  ;;  %9410 = vmatprep.subr.bf16.mxu0 %v14041_v58  ;;  %v13920_v8 = vcombine.low %v203_v59, %v207_v60  ;;  %v132_v59 = vld [vmem:[%s22314_s1 + $0x188] sm:$0xff] }
  0x40   :  { %v335_v63 = vld [vmem:[%s22314_s1 + $0x7e0] sm:$0xff]  ;;  %9411 = vmatpush1.bf16.msra.mxu0 %v14040_v1  ;;  %v136_v60 = vld [vmem:[%s22314_s1 + $0x1a8] sm:$0xff] }
  0x41   :  { %v14049_v3 = vcombine.high %v331_v62, %v335_v63  ;;  %v339_v6 = vld [vmem:[%s22314_s1 + $0x800] sm:$0xff]  ;;  %9371 = vmatprep.subr.bf16.mxu1 %v13921_v2  ;;  %v14048_v10 = vcombine.low %v331_v62, %v335_v63  ;;  %v13851_v2 = vcombine.high %v132_v59, %v136_v60 }
  0x42   :  { %v343_v7 = vld [vmem:[%s22314_s1 + $0x820] sm:$0xff]  ;;  %9372 = vmatpush1.bf16.msra.mxu1 %v13920_v8  ;;  %v13850_v8 = vcombine.low %v132_v59, %v136_v60 }
  0x43   :  { %v35_v9 = vld [vmem:[%s22315_s0] sm:$0xff]  ;;  %9412 = vmatprep.subr.bf16.mxu0 %v14049_v3  ;;  %v14057_v13 = vcombine.high %v339_v6, %v343_v7  ;;  %v14056_v22 = vcombine.low %v339_v6, %v343_v7  ;;  %9833 = vmatprep.subr.bf16.mxu1 %v13803_v11 }
  0x44   :  { %v16643_v16 = vpack.c.bf16 %v35_v9, %v35_v9  ;;  %v347_v17 = vld [vmem:[%s22314_s1 + $0x840] sm:$0xff]  ;;  %9413 = vmatpush1.bf16.msra.mxu0 %v14048_v10  ;;  %v13859_v10 = vcombine.high %v140_v4, %v144_v5 }
  0x45   :  { %v351_v18 = vld [vmem:[%s22314_s1 + $0x860] sm:$0xff]  ;;  %9423 = vmatprep.subr.bf16.mxu0 %v14057_v13  ;;  %v152_v13 = vld [vmem:[%s22314_s1 + $0x228] sm:$0xff] }
  0x46   :  { %v14065_v24 = vcombine.high %v347_v17, %v351_v18  ;;  %9374 = vmatmul.mubr.bf16.vlgmr.msra.gmra.mrb[0].mxu1 %v16643_v16  ;;  %v355_v28 = vld [vmem:[%s22314_s1 + $0x880] sm:$0xff]  ;;  %v14064_v31 = vcombine.low %v347_v17, %v351_v18  ;;  %v13858_v17 = vcombine.low %v140_v4, %v144_v5  ;;  %v13867_v19 = vcombine.high %v148_v12, %v152_v13 }
  0x47   :  { %v359_v29 = vld [vmem:[%s22314_s1 + $0x8a0] sm:$0xff]  ;;  %9415 = vmatmul.mubr.bf16.vlgmr.msra.gmra.mrb[0].mxu0 %v16654_v21  ;;  %9834 = vmatpush1.bf16.msra.mxu1 %v13802_v20  ;;  %v13866_v26 = vcombine.low %v148_v12, %v152_v13 }
  0x48   :  { %9424 = vmatpush1.bf16.msra.mxu0 %v14056_v22  ;;  %9835 = vmatprep.subr.bf16.mxu1 %v13811_v23  ;;  %v14073_v33 = vcombine.high %v355_v28, %v359_v29  ;;  %v363_v36 = vld [vmem:[%s22314_s1 + $0x8c0] sm:$0xff]  ;;  %v14072_v39 = vcombine.low %v355_v28, %v359_v29  ;;  %v156_v22 = vld [vmem:[%s22314_s1 + $0x248] sm:$0xff] }
  0x49   :  { %9425 = vmatprep.subr.bf16.mxu0 %v14065_v24  ;;  %9455 = vmatprep.mubr.bf16.mxu0 %v16662_v27  ;;  %v367_v37 = vld [vmem:[%s22314_s1 + $0x8e0] sm:$0xff]  ;;  %v160_v23 = vld [vmem:[%s22314_s1 + $0x268] sm:$0xff] }
  0x4a   :  { %9865 = vmatprep.mubr.bf16.mxu1 %v16508_v57  ;;  %v14081_v41 = vcombine.high %v363_v36, %v367_v37  ;;  %v371_v44 = vld [vmem:[%s22314_s1 + $0x900] sm:$0xff]  ;;  %v14080_v47 = vcombine.low %v363_v36, %v367_v37  ;;  %v13875_v29 = vcombine.high %v156_v22, %v160_v23  ;;  %v13874_v35 = vcombine.low %v156_v22, %v160_v23 }
  0x4b   :  { %9836 = vmatpush1.bf16.msra.mxu1 %v13810_v30  ;;  %v375_v45 = vld [vmem:[%s22314_s1 + $0x920] sm:$0xff] }
  0x4c   :  { %9426 = vmatpush1.bf16.msra.mxu0 %v14064_v31  ;;  %9837 = vmatprep.subr.bf16.mxu1 %v13819_v32  ;;  %v14089_v49 = vcombine.high %v371_v44, %v375_v45  ;;  %v379_v52 = vld [vmem:[%s22314_s1 + $0x940] sm:$0xff]  ;;  %v14088_v55 = vcombine.low %v371_v44, %v375_v45  ;;  %v164_v31 = vld [vmem:[%s22314_s1 + $0x288] sm:$0xff] }
  0x4d   :  { %9427 = vmatprep.subr.bf16.mxu0 %v14073_v33  ;;  %v383_v53 = vld [vmem:[%s22314_s1 + $0x960] sm:$0xff]  ;;  %v168_v32 = vld [vmem:[%s22314_s1 + $0x2a8] sm:$0xff] }
  0x4e   :  { %v14097_v58 = vcombine.high %v379_v52, %v383_v53  ;;  %v387_v62 = vld [vmem:[%s22314_s1 + $0x980] sm:$0xff]  ;;  %v14096_v1 = vcombine.low %v379_v52, %v383_v53  ;;  %v13883_v37 = vcombine.high %v164_v31, %v168_v32  ;;  %v13882_v43 = vcombine.low %v164_v31, %v168_v32 }
  0x4f   :  { %9838 = vmatpush1.bf16.msra.mxu1 %v13818_v38  ;;  %v391_v63 = vld [vmem:[%s22314_s1 + $0x9a0] sm:$0xff] }
  0x50   :  { %9428 = vmatpush1.bf16.msra.mxu0 %v14072_v39  ;;  %9839 = vmatprep.subr.bf16.mxu1 %v13827_v40  ;;  %v14105_v3 = vcombine.high %v387_v62, %v391_v63  ;;  %v395_v6 = vld [vmem:[%s22314_s1 + $0x9c0] sm:$0xff]  ;;  %v14104_v9 = vcombine.low %v387_v62, %v391_v63  ;;  %v172_v39 = vld [vmem:[%s22314_s1 + $0x2c8] sm:$0xff] }
  0x51   :  { %9429 = vmatprep.subr.bf16.mxu0 %v14081_v41  ;;  %v399_v7 = vld [vmem:[%s22314_s1 + $0x9e0] sm:$0xff]  ;;  %v176_v40 = vld [vmem:[%s22314_s1 + $0x2e8] sm:$0xff] }
  0x52   :  { %v14113_v11 = vcombine.high %v395_v6, %v399_v7  ;;  %v403_v14 = vld [vmem:[%s22314_s1 + $0xa00] sm:$0xff]  ;;  %v14112_v18 = vcombine.low %v395_v6, %v399_v7  ;;  %v13891_v45 = vcombine.high %v172_v39, %v176_v40  ;;  %v13890_v51 = vcombine.low %v172_v39, %v176_v40  ;;  %v228_v39 = vld [vmem:[%s22314_s1 + $0x488] sm:$0xff] }
  0x53   :  { %9840 = vmatpush1.bf16.msra.mxu1 %v13826_v46  ;;  %v407_v15 = vld [vmem:[%s22314_s1 + $0xa20] sm:$0xff]  ;;  %v232_v40 = vld [vmem:[%s22314_s1 + $0x4a8] sm:$0xff] }
  0x54   :  { %9430 = vmatpush1.bf16.msra.mxu0 %v14080_v47  ;;  %9841 = vmatprep.subr.bf16.mxu1 %v13835_v48  ;;  %v14121_v20 = vcombine.high %v403_v14, %v407_v15  ;;  %v411_v24 = vld [vmem:[%s22314_s1 + $0xa40] sm:$0xff]  ;;  %v14120_v28 = vcombine.low %v403_v14, %v407_v15  ;;  %v180_v47 = vld [vmem:[%s22314_s1 + $0x308] sm:$0xff] }
  0x55   :  { %9431 = vmatprep.subr.bf16.mxu0 %v14089_v49  ;;  %v415_v25 = vld [vmem:[%s22314_s1 + $0xa60] sm:$0xff]  ;;  %v184_v48 = vld [vmem:[%s22314_s1 + $0x328] sm:$0xff] }
  0x56   :  { %v14129_v30 = vcombine.high %v411_v24, %v415_v25  ;;  %v419_v33 = vld [vmem:[%s22314_s1 + $0xa80] sm:$0xff]  ;;  %v14128_v36 = vcombine.low %v411_v24, %v415_v25  ;;  %v13899_v53 = vcombine.high %v180_v47, %v184_v48  ;;  %v13898_v60 = vcombine.low %v180_v47, %v184_v48  ;;  %v236_v48 = vld [vmem:[%s22314_s1 + $0x4c8] sm:$0xff] }
  0x57   :  { %9842 = vmatpush1.bf16.msra.mxu1 %v13834_v54  ;;  %v423_v34 = vld [vmem:[%s22314_s1 + $0xaa0] sm:$0xff] }
  0x58   :  { %9432 = vmatpush1.bf16.msra.mxu0 %v14088_v55  ;;  %9843 = vmatprep.subr.bf16.mxu1 %v13843_v56  ;;  %v14137_v38 = vcombine.high %v419_v33, %v423_v34  ;;  %v427_v41 = vld [vmem:[%s22314_s1 + $0xac0] sm:$0xff]  ;;  %v14136_v44 = vcombine.low %v419_v33, %v423_v34  ;;  %v188_v55 = vld [vmem:[%s22314_s1 + $0x348] sm:$0xff]  ;;  %v42_v33 = vld [vmem:[%s22315_s0 + $0x38] sm:$0xff] }
  0x59   :  { %9433 = vmatprep.subr.bf16.mxu0 %v14097_v58  ;;  %v431_v42 = vld [vmem:[%s22314_s1 + $0xae0] sm:$0xff]  ;;  %v192_v56 = vld [vmem:[%s22314_s1 + $0x368] sm:$0xff] }
  0x5a   :  { %v14145_v46 = vcombine.high %v427_v41, %v431_v42  ;;  %v435_v49 = vld [vmem:[%s22314_s1 + $0xb00] sm:$0xff]  ;;  %v14144_v52 = vcombine.low %v427_v41, %v431_v42  ;;  %v13907_v63 = vcombine.high %v188_v55, %v192_v56  ;;  %v13906_v5 = vcombine.low %v188_v55, %v192_v56  ;;  %v244_v56 = vld [vmem:[%s22314_s1 + $0x508] sm:$0xff] }
  0x5b   :  { %9844 = vmatpush1.bf16.msra.mxu1 %v13842_v0  ;;  %v439_v50 = vld [vmem:[%s22314_s1 + $0xb20] sm:$0xff]  ;;  %v16868_v41 = vpack.c.bf16 %v42_v33, %v42_v33 }
  0x5c   :  { %9434 = vmatpush1.bf16.msra.mxu0 %v14096_v1  ;;  %9845 = vmatprep.subr.bf16.mxu1 %v13851_v2  ;;  %v14153_v54 = vcombine.high %v435_v49, %v439_v50  ;;  %v443_v58 = vld [vmem:[%s22314_s1 + $0xb40] sm:$0xff]  ;;  %v14152_v62 = vcombine.low %v435_v49, %v439_v50  ;;  %v196_v1 = vld [vmem:[%s22314_s1 + $0x388] sm:$0xff] }
  0x5d   :  { %9435 = vmatprep.subr.bf16.mxu0 %v14105_v3  ;;  %v447_v59 = vld [vmem:[%s22314_s1 + $0xb60] sm:$0xff]  ;;  %v200_v2 = vld [vmem:[%s22314_s1 + $0x3a8] sm:$0xff] }
  0x5e   :  { %v14161_v0 = vcombine.high %v443_v58, %v447_v59  ;;  %v451_v3 = vld [vmem:[%s22314_s1 + $0xb80] sm:$0xff]  ;;  %v14160_v6 = vcombine.low %v443_v58, %v447_v59  ;;  %v13915_v7 = vcombine.high %v196_v1, %v200_v2  ;;  %v13914_v13 = vcombine.low %v196_v1, %v200_v2  ;;  %v240_v49 = vld [vmem:[%s22314_s1 + $0x4e8] sm:$0xff] }
  0x5f   :  { %9846 = vmatpush1.bf16.msra.mxu1 %v13850_v8  ;;  %v455_v4 = vld [vmem:[%s22314_s1 + $0xba0] sm:$0xff]  ;;  %v248_v58 = vld [vmem:[%s22314_s1 + $0x528] sm:$0xff] }
  0x60   :  { %9436 = vmatpush1.bf16.msra.mxu0 %v14104_v9  ;;  %9847 = vmatprep.subr.bf16.mxu1 %v13859_v10  ;;  %v14169_v8 = vcombine.high %v451_v3, %v455_v4  ;;  %v204_v9 = vld [vmem:[%s22314_s1 + $0x3c8] sm:$0xff]  ;;  %v463_v12 = vld [vmem:[%s22314_s1 + $0xbe0] sm:$0xff]  ;;  %v14168_v14 = vcombine.low %v451_v3, %v455_v4 }
  0x61   :  { %9437 = vmatprep.subr.bf16.mxu0 %v14113_v11  ;;  %v208_v10 = vld [vmem:[%s22314_s1 + $0x3e8] sm:$0xff]  ;;  %v459_v11 = vld [vmem:[%s22314_s1 + $0xbc0] sm:$0xff] }
  0x62   :  { %v13923_v15 = vcombine.high %v204_v9, %v208_v10  ;;  %v471_v22 = vld [vmem:[%s22314_s1 + $0xc20] sm:$0xff]  ;;  %v13922_v23 = vcombine.low %v204_v9, %v208_v10  ;;  %v14176_v24 = vcombine.low %v459_v11, %v463_v12  ;;  %v252_v2 = vld [vmem:[%s22314_s1 + $0x548] sm:$0xff] }
  0x63   :  { %9848 = vmatpush1.bf16.msra.mxu1 %v13858_v17  ;;  %v14177_v17 = vcombine.high %v459_v11, %v463_v12  ;;  %v475_v31 = vld [vmem:[%s22314_s1 + $0xc40] sm:$0xff]  ;;  %v256_v3 = vld [vmem:[%s22314_s1 + $0x568] sm:$0xff] }
  0x64   :  { %9438 = vmatpush1.bf16.msra.mxu0 %v14112_v18  ;;  %9849 = vmatprep.subr.bf16.mxu1 %v13867_v19  ;;  %v212_v18 = vld [vmem:[%s22314_s1 + $0x408] sm:$0xff]  ;;  %v479_v32 = vld [vmem:[%s22314_s1 + $0xc60] sm:$0xff] }
  0x65   :  { %9439 = vmatprep.subr.bf16.mxu0 %v14121_v20  ;;  %v216_v19 = vld [vmem:[%s22314_s1 + $0x428] sm:$0xff]  ;;  %v467_v20 = vld [vmem:[%s22314_s1 + $0xc00] sm:$0xff] }
  0x66   :  { %v13931_v25 = vcombine.high %v212_v18, %v216_v19  ;;  %v13930_v34 = vcombine.low %v212_v18, %v216_v19  ;;  %v483_v42 = vld [vmem:[%s22314_s1 + $0xc80] sm:$0xff]  ;;  %v260_v10 = vld [vmem:[%s22314_s1 + $0x588] sm:$0xff] }
  0x67   :  { %9850 = vmatpush1.bf16.msra.mxu1 %v13866_v26  ;;  %v39_v26 = vld [vmem:[%s22315_s0 + $0x20] sm:$0xff]  ;;  %v264_v11 = vld [vmem:[%s22314_s1 + $0x5a8] sm:$0xff] }
  0x68   :  { %9440 = vmatpush1.bf16.msra.mxu0 %v14120_v28  ;;  %9851 = vmatprep.subr.bf16.mxu1 %v13875_v29  ;;  %v14185_v28 = vcombine.high %v467_v20, %v471_v22  ;;  %v220_v29 = vld [vmem:[%s22314_s1 + $0x448] sm:$0xff]  ;;  %v491_v50 = vld [vmem:[%s22314_s1 + $0xcc0] sm:$0xff] }
  0x69   :  { %9441 = vmatprep.subr.bf16.mxu0 %v14129_v30  ;;  %v224_v30 = vld [vmem:[%s22314_s1 + $0x468] sm:$0xff]  ;;  %v499_v59 = vld [vmem:[%s22314_s1 + $0xd00] sm:$0xff] }
  0x6a   :  { %v507_v4 = vld [vmem:[%s22314_s1 + $0xd40] sm:$0xff]  ;;  %v268_v19 = vld [vmem:[%s22314_s1 + $0x5c8] sm:$0xff] }
  0x6b   :  { %9852 = vmatpush1.bf16.msra.mxu1 %v13874_v35  ;;  %v16860_v35 = vpack.c.bf16 %v39_v26, %v39_v26  ;;  %v515_v12 = vld [vmem:[%s22314_s1 + $0xd80] sm:$0xff] }
  0x6c   :  { %9442 = vmatpush1.bf16.msra.mxu0 %v14128_v36  ;;  %9853 = vmatprep.subr.bf16.mxu1 %v13883_v37  ;;  %v14184_v36 = vcombine.low %v467_v20, %v471_v22  ;;  %v13939_v37 = vcombine.high %v220_v29, %v224_v30  ;;  %v272_v20 = vld [vmem:[%s22314_s1 + $0x5e8] sm:$0xff]  ;;  %v523_v22 = vld [vmem:[%s22314_s1 + $0xdc0] sm:$0xff] }
  0x6d   :  { %9443 = vmatprep.subr.bf16.mxu0 %v14137_v38  ;;  %v14193_v38 = vcombine.high %v475_v31, %v479_v32  ;;  %v13987_v26 = vcombine.high %v268_v19, %v272_v20  ;;  %v13986_v33 = vcombine.low %v268_v19, %v272_v20  ;;  %v328_v19 = vld [vmem:[%s22314_s1 + $0x7a8] sm:$0xff]  ;;  %v579_v20 = vld [vmem:[%s22314_s1 + $0xf80] sm:$0xff] }
  0x6f   :  { %9854 = vmatpush1.bf16.msra.mxu1 %v13882_v43  ;;  %v487_v43 = vld [vmem:[%s22314_s1 + $0xca0] sm:$0xff] }
  0x70   :  { %9444 = vmatpush1.bf16.msra.mxu0 %v14136_v44  ;;  %9855 = vmatprep.subr.bf16.mxu1 %v13891_v45  ;;  %v13938_v44 = vcombine.low %v220_v29, %v224_v30  ;;  %v14192_v45 = vcombine.low %v475_v31, %v479_v32  ;;  %v14201_v47 = vcombine.high %v483_v42, %v487_v43  ;;  %v276_v29 = vld [vmem:[%s22314_s1 + $0x608] sm:$0xff]  ;;  %v531_v31 = vld [vmem:[%s22314_s1 + $0xe00] sm:$0xff] }
  0x71   :  { %9445 = vmatprep.subr.bf16.mxu0 %v14145_v46  ;;  %v13947_v46 = vcombine.high %v228_v39, %v232_v40  ;;  %v280_v30 = vld [vmem:[%s22314_s1 + $0x628] sm:$0xff]  ;;  %v535_v32 = vld [vmem:[%s22314_s1 + $0xe20] sm:$0xff] }
  0x73   :  { %9856 = vmatpush1.bf16.msra.mxu1 %v13890_v51  ;;  %v495_v51 = vld [vmem:[%s22314_s1 + $0xce0] sm:$0xff] }
  0x74   :  { %9446 = vmatpush1.bf16.msra.mxu0 %v14144_v52  ;;  %9857 = vmatprep.subr.bf16.mxu1 %v13899_v53  ;;  %v13946_v52 = vcombine.low %v228_v39, %v232_v40  ;;  %v14200_v53 = vcombine.low %v483_v42, %v487_v43  ;;  %v14209_v55 = vcombine.high %v491_v50, %v495_v51  ;;  %v288_v39 = vld [vmem:[%s22314_s1 + $0x668] sm:$0xff]  ;;  %v539_v40 = vld [vmem:[%s22314_s1 + $0xe40] sm:$0xff] }
  0x75   :  { %9447 = vmatprep.subr.bf16.mxu0 %v14153_v54  ;;  %v13955_v54 = vcombine.high %v236_v48, %v240_v49  ;;  %v543_v42 = vld [vmem:[%s22314_s1 + $0xe60] sm:$0xff]  ;;  %v13994_v43 = vcombine.low %v276_v29, %v280_v30 }
  0x77   :  { %9858 = vmatpush1.bf16.msra.mxu1 %v13898_v60  ;;  %v503_v60 = vld [vmem:[%s22314_s1 + $0xd20] sm:$0xff] }
  0x78   :  { %9448 = vmatpush1.bf16.msra.mxu0 %v14152_v62  ;;  %9859 = vmatprep.subr.bf16.mxu1 %v13907_v63  ;;  %v13954_v62 = vcombine.low %v236_v48, %v240_v49  ;;  %v14208_v63 = vcombine.low %v491_v50, %v495_v51  ;;  %v14217_v1 = vcombine.high %v499_v59, %v503_v60  ;;  %v296_v48 = vld [vmem:[%s22314_s1 + $0x6a8] sm:$0xff]  ;;  %v547_v49 = vld [vmem:[%s22314_s1 + $0xe80] sm:$0xff] }
  0x79   :  { %9449 = vmatprep.subr.bf16.mxu0 %v14161_v0  ;;  %v13963_v0 = vcombine.high %v244_v56, %v248_v58  ;;  %v551_v50 = vld [vmem:[%s22314_s1 + $0xea0] sm:$0xff] }
  0x7b   :  { %9860 = vmatpush1.bf16.msra.mxu1 %v13906_v5  ;;  %v511_v5 = vld [vmem:[%s22314_s1 + $0xd60] sm:$0xff] }
  0x7c   :  { %9450 = vmatpush1.bf16.msra.mxu0 %v14160_v6  ;;  %9861 = vmatprep.subr.bf16.mxu1 %v13915_v7  ;;  %v13962_v6 = vcombine.low %v244_v56, %v248_v58  ;;  %v14216_v7 = vcombine.low %v499_v59, %v503_v60  ;;  %v14225_v9 = vcombine.high %v507_v4, %v511_v5  ;;  %v304_v56 = vld [vmem:[%s22314_s1 + $0x6e8] sm:$0xff]  ;;  %v555_v58 = vld [vmem:[%s22314_s1 + $0xec0] sm:$0xff] }
  0x7d   :  { %9451 = vmatprep.subr.bf16.mxu0 %v14169_v8  ;;  %v13971_v8 = vcombine.high %v252_v2, %v256_v3  ;;  %v559_v59 = vld [vmem:[%s22314_s1 + $0xee0] sm:$0xff] }
  0x7f   :  { %9862 = vmatpush1.bf16.msra.mxu1 %v13914_v13  ;;  %v519_v13 = vld [vmem:[%s22314_s1 + $0xda0] sm:$0xff] }
  0x80   :  { %9452 = vmatpush1.bf16.msra.mxu0 %v14168_v14  ;;  %9863 = vmatprep.subr.bf16.mxu1 %v13923_v15  ;;  %v13970_v14 = vcombine.low %v252_v2, %v256_v3  ;;  %v14224_v15 = vcombine.low %v507_v4, %v511_v5  ;;  %v14233_v18 = vcombine.high %v515_v12, %v519_v13  ;;  %v312_v2 = vld [vmem:[%s22314_s1 + $0x728] sm:$0xff]  ;;  %v563_v3 = vld [vmem:[%s22314_s1 + $0xf00] sm:$0xff] }
  0x81   :  { %9453 = vmatprep.subr.bf16.mxu0 %v14177_v17  ;;  %v13979_v17 = vcombine.high %v260_v10, %v264_v11  ;;  %v567_v4 = vld [vmem:[%s22314_s1 + $0xf20] sm:$0xff] }
  0x83   :  { %9864 = vmatpush1.bf16.msra.mxu1 %v13922_v23  ;;  %v527_v23 = vld [vmem:[%s22314_s1 + $0xde0] sm:$0xff] }
  0x84   :  { %9454 = vmatpush1.bf16.msra.mxu0 %v14176_v24  ;;  %9874 = vmatprep.subr.bf16.mxu1 %v13931_v25  ;;  %v13978_v24 = vcombine.low %v260_v10, %v264_v11  ;;  %v14232_v25 = vcombine.low %v515_v12, %v519_v13  ;;  %v320_v10 = vld [vmem:[%s22314_s1 + $0x768] sm:$0xff]  ;;  %v571_v11 = vld [vmem:[%s22314_s1 + $0xf40] sm:$0xff] }
  0x85   :  { %9464 = vmatprep.subr.bf16.mxu0 %v14185_v28  ;;  %v14241_v28 = vcombine.high %v523_v22, %v527_v23  ;;  %v575_v12 = vld [vmem:[%s22314_s1 + $0xf60] sm:$0xff] }
  0x86   :  { %9866 = vmatmul.mubr.bf16.vlgmr.msra.gmra.mrb[4].mxu1 %v16643_v16 }
  0x87   :  { %9456 = vmatmul.mubr.bf16.vlgmr.msra.gmra.mrb[0].mxu0 %v16860_v35  ;;  %9875 = vmatpush1.bf16.msra.mxu1 %v13930_v34  ;;  %v14240_v34 = vcombine.low %v523_v22, %v527_v23  ;;  %v583_v22 = vld [vmem:[%s22314_s1 + $0xfa0] sm:$0xff] }
  0x88   :  { %9465 = vmatpush1.bf16.msra.mxu0 %v14184_v36  ;;  %9876 = vmatprep.subr.bf16.mxu1 %v13939_v37  ;;  %v13995_v36 = vcombine.high %v276_v29, %v280_v30  ;;  %v14249_v37 = vcombine.high %v531_v31, %v535_v32  ;;  %v336_v29 = vld [vmem:[%s22314_s1 + $0x7e8] sm:$0xff]  ;;  %v587_v30 = vld [vmem:[%s22314_s1 + $0xfc0] sm:$0xff] }
  0x89   :  { %9466 = vmatprep.subr.bf16.mxu0 %v14193_v38  ;;  %9496 = vmatprep.mubr.bf16.mxu0 %v16868_v41  ;;  %v284_v38 = vld [vmem:[%s22314_s1 + $0x648] sm:$0xff] }
  0x8a   :  { %9906 = vmatprep.mubr.bf16.mxu1 %v16519_v61  ;;  %v14002_v51 = vcombine.low %v284_v38, %v288_v39 }
  0x8b   :  { %9877 = vmatpush1.bf16.msra.mxu1 %v13938_v44  ;;  %v14248_v44 = vcombine.low %v531_v31, %v535_v32  ;;  %v591_v31 = vld [vmem:[%s22314_s1 + $0xfe0] sm:$0xff] }
  0x8c   :  { %9467 = vmatpush1.bf16.msra.mxu0 %v14192_v45  ;;  %9878 = vmatprep.subr.bf16.mxu1 %v13947_v46  ;;  %v14003_v45 = vcombine.high %v284_v38, %v288_v39  ;;  %v14257_v46 = vcombine.high %v539_v40, %v543_v42  ;;  %v344_v38 = vld [vmem:[%s22314_s1 + $0x828] sm:$0xff]  ;;  %v595_v39 = vld [vmem:[%s22314_s1 + $0x1000] sm:$0xff] }
  0x8d   :  { %9468 = vmatprep.subr.bf16.mxu0 %v14201_v47  ;;  %v292_v47 = vld [vmem:[%s22314_s1 + $0x688] sm:$0xff] }
  0x8e   :  { %v14010_v60 = vcombine.low %v292_v47, %v296_v48 }
  0x8f   :  { %9879 = vmatpush1.bf16.msra.mxu1 %v13946_v52  ;;  %v14256_v52 = vcombine.low %v539_v40, %v543_v42  ;;  %v599_v40 = vld [vmem:[%s22314_s1 + $0x1020] sm:$0xff] }
  0x90   :  { %9469 = vmatpush1.bf16.msra.mxu0 %v14200_v53  ;;  %9880 = vmatprep.subr.bf16.mxu1 %v13955_v54  ;;  %v14011_v53 = vcombine.high %v292_v47, %v296_v48  ;;  %v14265_v54 = vcombine.high %v547_v49, %v551_v50  ;;  %v348_v47 = vld [vmem:[%s22314_s1 + $0x848] sm:$0xff] }
  0x91   :  { %9470 = vmatprep.subr.bf16.mxu0 %v14209_v55  ;;  %v300_v55 = vld [vmem:[%s22314_s1 + $0x6c8] sm:$0xff] }
  0x92   :  { %v14018_v5 = vcombine.low %v300_v55, %v304_v56  ;;  %v352_v48 = vld [vmem:[%s22314_s1 + $0x868] sm:$0xff] }
  0x93   :  { %9881 = vmatpush1.bf16.msra.mxu1 %v13954_v62  ;;  %v14264_v62 = vcombine.low %v547_v49, %v551_v50  ;;  %v603_v49 = vld [vmem:[%s22314_s1 + $0x1040] sm:$0xff] }
  0x94   :  { %9471 = vmatpush1.bf16.msra.mxu0 %v14208_v63  ;;  %9882 = vmatprep.subr.bf16.mxu1 %v13963_v0  ;;  %v14019_v63 = vcombine.high %v300_v55, %v304_v56  ;;  %v14273_v0 = vcombine.high %v555_v58, %v559_v59  ;;  %v607_v50 = vld [vmem:[%s22314_s1 + $0x1060] sm:$0xff]  ;;  %v14067_v55 = vcombine.high %v348_v47, %v352_v48 }
  0x95   :  { %9472 = vmatprep.subr.bf16.mxu0 %v14217_v1  ;;  %v308_v1 = vld [vmem:[%s22314_s1 + $0x708] sm:$0xff]  ;;  %v14321_v56 = vcombine.high %v603_v49, %v607_v50 }
  0x96   :  { %v14026_v13 = vcombine.low %v308_v1, %v312_v2 }
  0x97   :  { %9883 = vmatpush1.bf16.msra.mxu1 %v13962_v6  ;;  %v14272_v6 = vcombine.low %v555_v58, %v559_v59  ;;  %v356_v58 = vld [vmem:[%s22314_s1 + $0x888] sm:$0xff] }
  0x98   :  { %9473 = vmatpush1.bf16.msra.mxu0 %v14216_v7  ;;  %9884 = vmatprep.subr.bf16.mxu1 %v13971_v8  ;;  %v14027_v7 = vcombine.high %v308_v1, %v312_v2  ;;  %v14281_v8 = vcombine.high %v563_v3, %v567_v4  ;;  %v360_v59 = vld [vmem:[%s22314_s1 + $0x8a8] sm:$0xff]  ;;  %v14320_v1 = vcombine.low %v603_v49, %v607_v50 }
  0x99   :  { %9474 = vmatprep.subr.bf16.mxu0 %v14225_v9  ;;  %v316_v9 = vld [vmem:[%s22314_s1 + $0x748] sm:$0xff]  ;;  %v14075_v2 = vcombine.high %v356_v58, %v360_v59 }
  0x9a   :  { %v14034_v23 = vcombine.low %v316_v9, %v320_v10  ;;  %v404_v49 = vld [vmem:[%s22314_s1 + $0xa08] sm:$0xff] }
  0x9b   :  { %9885 = vmatpush1.bf16.msra.mxu1 %v13970_v14  ;;  %v14280_v14 = vcombine.low %v563_v3, %v567_v4  ;;  %v364_v4 = vld [vmem:[%s22314_s1 + $0x8c8] sm:$0xff] }
  0x9c   :  { %9475 = vmatpush1.bf16.msra.mxu0 %v14224_v15  ;;  %9886 = vmatprep.subr.bf16.mxu1 %v13979_v17  ;;  %v14035_v15 = vcombine.high %v316_v9, %v320_v10  ;;  %v14289_v17 = vcombine.high %v571_v11, %v575_v12  ;;  %v408_v50 = vld [vmem:[%s22314_s1 + $0xa28] sm:$0xff] }
  0x9d   :  { %9476 = vmatprep.subr.bf16.mxu0 %v14233_v18  ;;  %v324_v18 = vld [vmem:[%s22314_s1 + $0x788] sm:$0xff] }
  0x9e   :  { %v14042_v32 = vcombine.low %v324_v18, %v328_v19 }
  0x9f   :  { %9887 = vmatpush1.bf16.msra.mxu1 %v13978_v24  ;;  %v14288_v24 = vcombine.low %v571_v11, %v575_v12  ;;  %v372_v12 = vld [vmem:[%s22314_s1 + $0x908] sm:$0xff] }
  0xa0   :  { %9477 = vmatpush1.bf16.msra.mxu0 %v14232_v25  ;;  %9888 = vmatprep.subr.bf16.mxu1 %v13987_v26  ;;  %v14043_v25 = vcombine.high %v324_v18, %v328_v19  ;;  %v14297_v26 = vcombine.high %v579_v20, %v583_v22 }
  0xa1   :  { %9478 = vmatprep.subr.bf16.mxu0 %v14241_v28  ;;  %v332_v28 = vld [vmem:[%s22314_s1 + $0x7c8] sm:$0xff] }
  0xa2   :  { %v14050_v42 = vcombine.low %v332_v28, %v336_v29 }
  0xa3   :  { %9889 = vmatpush1.bf16.msra.mxu1 %v13986_v33  ;;  %v14296_v33 = vcombine.low %v579_v20, %v583_v22  ;;  %v380_v22 = vld [vmem:[%s22314_s1 + $0x948] sm:$0xff] }
  0xa4   :  { %9479 = vmatpush1.bf16.msra.mxu0 %v14240_v34  ;;  %9890 = vmatprep.subr.bf16.mxu1 %v13995_v36  ;;  %v14051_v34 = vcombine.high %v332_v28, %v336_v29  ;;  %v14305_v36 = vcombine.high %v587_v30, %v591_v31 }
  0xa5   :  { %9480 = vmatprep.subr.bf16.mxu0 %v14249_v37  ;;  %v340_v37 = vld [vmem:[%s22314_s1 + $0x808] sm:$0xff] }
  0xa7   :  { %9891 = vmatpush1.bf16.msra.mxu1 %v13994_v43  ;;  %v14304_v43 = vcombine.low %v587_v30, %v591_v31  ;;  %v388_v31 = vld [vmem:[%s22314_s1 + $0x988] sm:$0xff] }
  0xa8   :  { %9481 = vmatpush1.bf16.msra.mxu0 %v14248_v44  ;;  %9892 = vmatprep.subr.bf16.mxu1 %v14003_v45  ;;  %v14059_v44 = vcombine.high %v340_v37, %v344_v38  ;;  %v41_v45 = vld [vmem:[%s22315_s0 + $0x30] sm:$0xff] }
  0xa9   :  { %9482 = vmatprep.subr.bf16.mxu0 %v14257_v46  ;;  %v14313_v46 = vcombine.high %v595_v39, %v599_v40 }
  0xab   :  { %9893 = vmatpush1.bf16.msra.mxu1 %v14002_v51  ;;  %v44_v51 = vld [vmem:[%s22315_s0 + $0x48] sm:$0xff] }
  0xac   :  { %9483 = vmatpush1.bf16.msra.mxu0 %v14256_v52  ;;  %9894 = vmatprep.subr.bf16.mxu1 %v14011_v53  ;;  %v14058_v52 = vcombine.low %v340_v37, %v344_v38  ;;  %v17066_v53 = vpack.c.bf16 %v41_v45, %v41_v45 }
  0xad   :  { %9484 = vmatprep.subr.bf16.mxu0 %v14265_v54  ;;  %v14312_v54 = vcombine.low %v595_v39, %v599_v40  ;;  %v396_v40 = vld [vmem:[%s22314_s1 + $0x9c8] sm:$0xff] }
  0xaf   :  { %9895 = vmatpush1.bf16.msra.mxu1 %v14010_v60  ;;  %v17074_v60 = vpack.c.bf16 %v44_v51, %v44_v51  ;;  %v659_v51 = vld [vmem:[%s22314_s1 + $0x1200] sm:$0xff] }
  0xb0   :  { %9485 = vmatpush1.bf16.msra.mxu0 %v14264_v62  ;;  %9896 = vmatprep.subr.bf16.mxu1 %v14019_v63  ;;  %v611_v62 = vld [vmem:[%s22314_s1 + $0x1080] sm:$0xff] }
  0xb1   :  { %9486 = vmatprep.subr.bf16.mxu0 %v14273_v0  ;;  %v615_v63 = vld [vmem:[%s22314_s1 + $0x10a0] sm:$0xff]  ;;  %v14066_v0 = vcombine.low %v348_v47, %v352_v48 }
  0xb2   :  { %v14329_v3 = vcombine.high %v611_v62, %v615_v63  ;;  %v14328_v9 = vcombine.low %v611_v62, %v615_v63  ;;  %v416_v62 = vld [vmem:[%s22314_s1 + $0xa68] sm:$0xff]  ;;  %v667_v63 = vld [vmem:[%s22314_s1 + $0x1240] sm:$0xff] }
  0xb3   :  { %9897 = vmatpush1.bf16.msra.mxu1 %v14018_v5  ;;  %v368_v5 = vld [vmem:[%s22314_s1 + $0x8e8] sm:$0xff] }
  0xb4   :  { %9487 = vmatpush1.bf16.msra.mxu0 %v14272_v6  ;;  %9898 = vmatprep.subr.bf16.mxu1 %v14027_v7  ;;  %v619_v6 = vld [vmem:[%s22314_s1 + $0x10c0] sm:$0xff]  ;;  %v14083_v10 = vcombine.high %v364_v4, %v368_v5 }
  0xb5   :  { %9488 = vmatprep.subr.bf16.mxu0 %v14281_v8  ;;  %v623_v7 = vld [vmem:[%s22314_s1 + $0x10e0] sm:$0xff]  ;;  %v14074_v8 = vcombine.low %v356_v58, %v360_v59  ;;  %v412_v59 = vld [vmem:[%s22314_s1 + $0xa48] sm:$0xff] }
  0xb6   :  { %v14337_v11 = vcombine.high %v619_v6, %v623_v7  ;;  %v14336_v18 = vcombine.low %v619_v6, %v623_v7  ;;  %v424_v6 = vld [vmem:[%s22314_s1 + $0xaa8] sm:$0xff]  ;;  %v675_v7 = vld [vmem:[%s22314_s1 + $0x1280] sm:$0xff] }
  0xb7   :  { %9899 = vmatpush1.bf16.msra.mxu1 %v14026_v13  ;;  %v376_v13 = vld [vmem:[%s22314_s1 + $0x928] sm:$0xff] }
  0xb8   :  { %9489 = vmatpush1.bf16.msra.mxu0 %v14280_v14  ;;  %9900 = vmatprep.subr.bf16.mxu1 %v14035_v15  ;;  %v627_v14 = vld [vmem:[%s22314_s1 + $0x1100] sm:$0xff]  ;;  %v14091_v19 = vcombine.high %v372_v12, %v376_v13 }
  0xb9   :  { %9490 = vmatprep.subr.bf16.mxu0 %v14289_v17  ;;  %v631_v15 = vld [vmem:[%s22314_s1 + $0x1120] sm:$0xff]  ;;  %v14082_v17 = vcombine.low %v364_v4, %v368_v5  ;;  %v420_v5 = vld [vmem:[%s22314_s1 + $0xa88] sm:$0xff] }
  0xba   :  { %v14345_v20 = vcombine.high %v627_v14, %v631_v15  ;;  %v14344_v28 = vcombine.low %v627_v14, %v631_v15  ;;  %v432_v14 = vld [vmem:[%s22314_s1 + $0xae8] sm:$0xff]  ;;  %v683_v15 = vld [vmem:[%s22314_s1 + $0x12c0] sm:$0xff] }
  0xbb   :  { %9901 = vmatpush1.bf16.msra.mxu1 %v14034_v23  ;;  %v384_v23 = vld [vmem:[%s22314_s1 + $0x968] sm:$0xff] }
  0xbc   :  { %9491 = vmatpush1.bf16.msra.mxu0 %v14288_v24  ;;  %9902 = vmatprep.subr.bf16.mxu1 %v14043_v25  ;;  %v635_v24 = vld [vmem:[%s22314_s1 + $0x1140] sm:$0xff]  ;;  %v14099_v29 = vcombine.high %v380_v22, %v384_v23 }
  0xbd   :  { %9492 = vmatprep.subr.bf16.mxu0 %v14297_v26  ;;  %v639_v25 = vld [vmem:[%s22314_s1 + $0x1160] sm:$0xff]  ;;  %v14090_v26 = vcombine.low %v372_v12, %v376_v13  ;;  %v428_v13 = vld [vmem:[%s22314_s1 + $0xac8] sm:$0xff] }
  0xbe   :  { %v14353_v30 = vcombine.high %v635_v24, %v639_v25  ;;  %v14352_v37 = vcombine.low %v635_v24, %v639_v25  ;;  %v440_v24 = vld [vmem:[%s22314_s1 + $0xb28] sm:$0xff]  ;;  %v691_v25 = vld [vmem:[%s22314_s1 + $0x1300] sm:$0xff] }
  0xbf   :  { %9903 = vmatpush1.bf16.msra.mxu1 %v14042_v32  ;;  %v392_v32 = vld [vmem:[%s22314_s1 + $0x9a8] sm:$0xff] }
  0xc0   :  { %9493 = vmatpush1.bf16.msra.mxu0 %v14296_v33  ;;  %9904 = vmatprep.subr.bf16.mxu1 %v14051_v34  ;;  %v643_v33 = vld [vmem:[%s22314_s1 + $0x1180] sm:$0xff]  ;;  %v14107_v38 = vcombine.high %v388_v31, %v392_v32  ;;  %v14106_v45 = vcombine.low %v388_v31, %v392_v32  ;;  %v444_v32 = vld [vmem:[%s22314_s1 + $0xb48] sm:$0xff] }
  0xc1   :  { %9494 = vmatprep.subr.bf16.mxu0 %v14305_v36  ;;  %v647_v34 = vld [vmem:[%s22314_s1 + $0x11a0] sm:$0xff]  ;;  %v14098_v36 = vcombine.low %v380_v22, %v384_v23  ;;  %v436_v23 = vld [vmem:[%s22314_s1 + $0xb08] sm:$0xff] }
  0xc2   :  { %v14361_v39 = vcombine.high %v643_v33, %v647_v34 }
  0xc3   :  { %9905 = vmatpush1.bf16.msra.mxu1 %v14050_v42  ;;  %v400_v42 = vld [vmem:[%s22314_s1 + $0x9e8] sm:$0xff] }
  0xc4   :  { %9495 = vmatpush1.bf16.msra.mxu0 %v14304_v43  ;;  %9915 = vmatprep.subr.bf16.mxu1 %v14059_v44  ;;  %v651_v43 = vld [vmem:[%s22314_s1 + $0x11c0] sm:$0xff]  ;;  %v14115_v47 = vcombine.high %v396_v40, %v400_v42 }
  0xc5   :  { %9505 = vmatprep.subr.bf16.mxu0 %v14313_v46  ;;  %v655_v44 = vld [vmem:[%s22314_s1 + $0x11e0] sm:$0xff]  ;;  %v14360_v46 = vcombine.low %v643_v33, %v647_v34  ;;  %v448_v33 = vld [vmem:[%s22314_s1 + $0xb68] sm:$0xff] }
  0xc6   :  { %9907 = vmatmul.mubr.bf16.vlgmr.msra.gmra.mrb[4].mxu1 %v16654_v21  ;;  %v14369_v48 = vcombine.high %v651_v43, %v655_v44  ;;  %v699_v34 = vld [vmem:[%s22314_s1 + $0x1340] sm:$0xff] }
  0xc7   :  { %9497 = vmatmul.mubr.bf16.vlgmr.msra.gmra.mrb[0].mxu0 %v17066_v53  ;;  %9916 = vmatpush1.bf16.msra.mxu1 %v14058_v52  ;;  %v663_v52 = vld [vmem:[%s22314_s1 + $0x1220] sm:$0xff] }
  0xc8   :  { %9506 = vmatpush1.bf16.msra.mxu0 %v14312_v54  ;;  %9917 = vmatprep.subr.bf16.mxu1 %v14067_v55  ;;  %v14114_v54 = vcombine.low %v396_v40, %v400_v42  ;;  %v14368_v55 = vcombine.low %v651_v43, %v655_v44  ;;  %v14377_v58 = vcombine.high %v659_v51, %v663_v52  ;;  %v452_v42 = vld [vmem:[%s22314_s1 + $0xb88] sm:$0xff]  ;;  %v707_v44 = vld [vmem:[%s22314_s1 + $0x1380] sm:$0xff] }
  0xc9   :  { %9507 = vmatprep.subr.bf16.mxu0 %v14321_v56  ;;  %9537 = vmatprep.mubr.bf16.mxu0 %v17074_v60  ;;  %v14123_v56 = vcombine.high %v404_v49, %v408_v50  ;;  %v456_v43 = vld [vmem:[%s22314_s1 + $0xba8] sm:$0xff] }
  0xca   :  { %9947 = vmatprep.mubr.bf16.mxu1 %v16662_v27 }
  0xcb   :  { %9918 = vmatpush1.bf16.msra.mxu1 %v14066_v0  ;;  %v671_v0 = vld [vmem:[%s22314_s1 + $0x1260] sm:$0xff] }
  0xcc   :  { %9508 = vmatpush1.bf16.msra.mxu0 %v14320_v1  ;;  %9919 = vmatprep.subr.bf16.mxu1 %v14075_v2  ;;  %v14122_v1 = vcombine.low %v404_v49, %v408_v50  ;;  %v14376_v2 = vcombine.low %v659_v51, %v663_v52  ;;  %v14385_v4 = vcombine.high %v667_v63, %v671_v0  ;;  %v460_v50 = vld [vmem:[%s22314_s1 + $0xbc8] sm:$0xff]  ;;  %v715_v52 = vld [vmem:[%s22314_s1 + $0x13c0] sm:$0xff] }
  0xcd   :  { %9509 = vmatprep.subr.bf16.mxu0 %v14329_v3  ;;  %v14131_v3 = vcombine.high %v412_v59, %v416_v62  ;;  %v464_v51 = vld [vmem:[%s22314_s1 + $0xbe8] sm:$0xff] }
  0xcf   :  { %9920 = vmatpush1.bf16.msra.mxu1 %v14074_v8  ;;  %v679_v8 = vld [vmem:[%s22314_s1 + $0x12a0] sm:$0xff] }
  0xd0   :  { %9510 = vmatpush1.bf16.msra.mxu0 %v14328_v9  ;;  %9921 = vmatprep.subr.bf16.mxu1 %v14083_v10  ;;  %v14130_v9 = vcombine.low %v412_v59, %v416_v62  ;;  %v14384_v10 = vcombine.low %v667_v63, %v671_v0  ;;  %v14393_v12 = vcombine.high %v675_v7, %v679_v8  ;;  %v468_v62 = vld [vmem:[%s22314_s1 + $0xc08] sm:$0xff]  ;;  %v723_v0 = vld [vmem:[%s22314_s1 + $0x1400] sm:$0xff] }
  0xd1   :  { %9511 = vmatprep.subr.bf16.mxu0 %v14337_v11  ;;  %v14139_v11 = vcombine.high %v420_v5, %v424_v6  ;;  %v472_v63 = vld [vmem:[%s22314_s1 + $0xc28] sm:$0xff] }
  0xd3   :  { %9922 = vmatpush1.bf16.msra.mxu1 %v14082_v17  ;;  %v687_v17 = vld [vmem:[%s22314_s1 + $0x12e0] sm:$0xff] }
  0xd4   :  { %9512 = vmatpush1.bf16.msra.mxu0 %v14336_v18  ;;  %9923 = vmatprep.subr.bf16.mxu1 %v14091_v19  ;;  %v14138_v18 = vcombine.low %v420_v5, %v424_v6  ;;  %v14392_v19 = vcombine.low %v675_v7, %v679_v8  ;;  %v14401_v22 = vcombine.high %v683_v15, %v687_v17  ;;  %v43_v5 = vld [vmem:[%s22315_s0 + $0x40] sm:$0xff]  ;;  %v476_v7 = vld [vmem:[%s22314_s1 + $0xc48] sm:$0xff] }
  0xd5   :  { %9513 = vmatprep.subr.bf16.mxu0 %v14345_v20  ;;  %v14147_v20 = vcombine.high %v428_v13, %v432_v14  ;;  %v480_v8 = vld [vmem:[%s22314_s1 + $0xc68] sm:$0xff] }
  0xd7   :  { %9924 = vmatpush1.bf16.msra.mxu1 %v14090_v26  ;;  %v695_v26 = vld [vmem:[%s22314_s1 + $0x1320] sm:$0xff] }
  0xd8   :  { %9514 = vmatpush1.bf16.msra.mxu0 %v14344_v28  ;;  %9925 = vmatprep.subr.bf16.mxu1 %v14099_v29  ;;  %v14146_v28 = vcombine.low %v428_v13, %v432_v14  ;;  %v14400_v29 = vcombine.low %v683_v15, %v687_v17  ;;  %v14409_v31 = vcombine.high %v691_v25, %v695_v26 }
  0xd9   :  { %9515 = vmatprep.subr.bf16.mxu0 %v14353_v30  ;;  %v14155_v30 = vcombine.high %v436_v23, %v440_v24  ;;  %v17272_v13 = vpack.c.bf16 %v43_v5, %v43_v5  ;;  %v14195_v15 = vcombine.high %v476_v7, %v480_v8  ;;  %v528_v5 = vld [vmem:[%s22314_s1 + $0xde8] sm:$0xff] }
  0xdb   :  { %9926 = vmatpush1.bf16.msra.mxu1 %v14098_v36  ;;  %v703_v36 = vld [vmem:[%s22314_s1 + $0x1360] sm:$0xff] }
  0xdc   :  { %9516 = vmatpush1.bf16.msra.mxu0 %v14352_v37  ;;  %9927 = vmatprep.subr.bf16.mxu1 %v14107_v38  ;;  %v14154_v37 = vcombine.low %v436_v23, %v440_v24  ;;  %v14408_v38 = vcombine.low %v691_v25, %v695_v26  ;;  %v14417_v40 = vcombine.high %v699_v34, %v703_v36  ;;  %v743_v23 = vld [vmem:[%s22314_s1 + $0x14a0] sm:$0xff] }
  0xdd   :  { %9517 = vmatprep.subr.bf16.mxu0 %v14361_v39  ;;  %v14163_v39 = vcombine.high %v444_v32, %v448_v33  ;;  %v14194_v24 = vcombine.low %v476_v7, %v480_v8  ;;  %v779_v7 = vld [vmem:[%s22314_s1 + $0x15c0] sm:$0xff] }
  0xde   :  { %v783_v8 = vld [vmem:[%s22314_s1 + $0x15e0] sm:$0xff] }
  0xdf   :  { %9928 = vmatpush1.bf16.msra.mxu1 %v14106_v45  ;;  %v711_v45 = vld [vmem:[%s22314_s1 + $0x13a0] sm:$0xff] }
  0xe0   :  { %9518 = vmatpush1.bf16.msra.mxu0 %v14360_v46  ;;  %9929 = vmatprep.subr.bf16.mxu1 %v14115_v47  ;;  %v14162_v46 = vcombine.low %v444_v32, %v448_v33  ;;  %v14416_v47 = vcombine.low %v699_v34, %v703_v36  ;;  %v14425_v49 = vcombine.high %v707_v44, %v711_v45  ;;  %v751_v32 = vld [vmem:[%s22314_s1 + $0x14e0] sm:$0xff] }
  0xe1   :  { %9519 = vmatprep.subr.bf16.mxu0 %v14369_v48  ;;  %v14171_v48 = vcombine.high %v452_v42, %v456_v43 }
  0xe3   :  { %9930 = vmatpush1.bf16.msra.mxu1 %v14114_v54  ;;  %v719_v54 = vld [vmem:[%s22314_s1 + $0x13e0] sm:$0xff] }
  0xe4   :  { %9520 = vmatpush1.bf16.msra.mxu0 %v14368_v55  ;;  %9931 = vmatprep.subr.bf16.mxu1 %v14123_v56  ;;  %v14170_v55 = vcombine.low %v452_v42, %v456_v43  ;;  %v14424_v56 = vcombine.low %v707_v44, %v711_v45  ;;  %v14433_v59 = vcombine.high %v715_v52, %v719_v54  ;;  %v759_v42 = vld [vmem:[%s22314_s1 + $0x1520] sm:$0xff] }
  0xe5   :  { %9521 = vmatprep.subr.bf16.mxu0 %v14377_v58  ;;  %v14179_v58 = vcombine.high %v460_v50, %v464_v51 }
  0xe7   :  { %9932 = vmatpush1.bf16.msra.mxu1 %v14122_v1  ;;  %v727_v1 = vld [vmem:[%s22314_s1 + $0x1420] sm:$0xff] }
  0xe8   :  { %9522 = vmatpush1.bf16.msra.mxu0 %v14376_v2  ;;  %9933 = vmatprep.subr.bf16.mxu1 %v14131_v3  ;;  %v14178_v2 = vcombine.low %v460_v50, %v464_v51  ;;  %v14432_v3 = vcombine.low %v715_v52, %v719_v54  ;;  %v14441_v6 = vcombine.high %v723_v0, %v727_v1  ;;  %v767_v50 = vld [vmem:[%s22314_s1 + $0x1560] sm:$0xff] }
  0xe9   :  { %9523 = vmatprep.subr.bf16.mxu0 %v14385_v4  ;;  %v14187_v4 = vcombine.high %v468_v62, %v472_v63  ;;  %v14440_v14 = vcombine.low %v723_v0, %v727_v1 }
  0xeb   :  { %9934 = vmatpush1.bf16.msra.mxu1 %v14130_v9  ;;  %v731_v9 = vld [vmem:[%s22314_s1 + $0x1440] sm:$0xff] }
  0xec   :  { %9524 = vmatpush1.bf16.msra.mxu0 %v14384_v10  ;;  %9935 = vmatprep.subr.bf16.mxu1 %v14139_v11  ;;  %v735_v10 = vld [vmem:[%s22314_s1 + $0x1460] sm:$0xff]  ;;  %v46_v11 = vld [vmem:[%s22315_s0 + $0x58] sm:$0xff] }
  0xed   :  { %9525 = vmatprep.subr.bf16.mxu0 %v14393_v12  ;;  %v14186_v12 = vcombine.low %v468_v62, %v472_v63  ;;  %v14449_v17 = vcombine.high %v731_v9, %v735_v10  ;;  %v14448_v25 = vcombine.low %v731_v9, %v735_v10  ;;  %v775_v62 = vld [vmem:[%s22314_s1 + $0x15a0] sm:$0xff] }
  0xef   :  { %9936 = vmatpush1.bf16.msra.mxu1 %v14138_v18  ;;  %v484_v18 = vld [vmem:[%s22314_s1 + $0xc88] sm:$0xff] }
  0xf0   :  { %9526 = vmatpush1.bf16.msra.mxu0 %v14392_v19  ;;  %9937 = vmatprep.subr.bf16.mxu1 %v14147_v20  ;;  %v488_v19 = vld [vmem:[%s22314_s1 + $0xca8] sm:$0xff]  ;;  %v17280_v20 = vpack.c.bf16 %v46_v11, %v46_v11 }
  0xf1   :  { %9527 = vmatprep.subr.bf16.mxu0 %v14401_v22  ;;  %v739_v22 = vld [vmem:[%s22314_s1 + $0x1480] sm:$0xff]  ;;  %v14203_v26 = vcombine.high %v484_v18, %v488_v19  ;;  %v14202_v33 = vcombine.low %v484_v18, %v488_v19  ;;  %v536_v18 = vld [vmem:[%s22314_s1 + $0xe28] sm:$0xff] }
  0xf2   :  { %v14456_v34 = vcombine.low %v739_v22, %v743_v23  ;;  %v787_v19 = vld [vmem:[%s22314_s1 + $0x1600] sm:$0xff] }
  0xf3   :  { %9938 = vmatpush1.bf16.msra.mxu1 %v14146_v28  ;;  %v14457_v28 = vcombine.high %v739_v22, %v743_v23  ;;  %v791_v22 = vld [vmem:[%s22314_s1 + $0x1620] sm:$0xff] }
  0xf4   :  { %9528 = vmatpush1.bf16.msra.mxu0 %v14400_v29  ;;  %9939 = vmatprep.subr.bf16.mxu1 %v14155_v30  ;;  %v492_v29 = vld [vmem:[%s22314_s1 + $0xcc8] sm:$0xff] }
  0xf5   :  { %9529 = vmatprep.subr.bf16.mxu0 %v14409_v31  ;;  %v496_v30 = vld [vmem:[%s22314_s1 + $0xce8] sm:$0xff]  ;;  %v747_v31 = vld [vmem:[%s22314_s1 + $0x14c0] sm:$0xff] }
  0xf6   :  { %v14211_v36 = vcombine.high %v492_v29, %v496_v30  ;;  %v14210_v43 = vcombine.low %v492_v29, %v496_v30  ;;  %v14464_v44 = vcombine.low %v747_v31, %v751_v32  ;;  %v544_v29 = vld [vmem:[%s22314_s1 + $0xe68] sm:$0xff]  ;;  %v795_v30 = vld [vmem:[%s22314_s1 + $0x1640] sm:$0xff] }
  0xf7   :  { %9940 = vmatpush1.bf16.msra.mxu1 %v14154_v37  ;;  %v14465_v37 = vcombine.high %v747_v31, %v751_v32  ;;  %v799_v31 = vld [vmem:[%s22314_s1 + $0x1660] sm:$0xff] }
  0xf8   :  { %9530 = vmatpush1.bf16.msra.mxu0 %v14408_v38  ;;  %9941 = vmatprep.subr.bf16.mxu1 %v14163_v39  ;;  %v500_v38 = vld [vmem:[%s22314_s1 + $0xd08] sm:$0xff] }
  0xf9   :  { %9531 = vmatprep.subr.bf16.mxu0 %v14417_v40  ;;  %v504_v39 = vld [vmem:[%s22314_s1 + $0xd28] sm:$0xff]  ;;  %v755_v40 = vld [vmem:[%s22314_s1 + $0x1500] sm:$0xff] }
  0xfa   :  { %v14219_v45 = vcombine.high %v500_v38, %v504_v39  ;;  %v14218_v51 = vcombine.low %v500_v38, %v504_v39  ;;  %v14472_v52 = vcombine.low %v755_v40, %v759_v42  ;;  %v552_v38 = vld [vmem:[%s22314_s1 + $0xea8] sm:$0xff]  ;;  %v803_v39 = vld [vmem:[%s22314_s1 + $0x1680] sm:$0xff] }
  0xfb   :  { %9942 = vmatpush1.bf16.msra.mxu1 %v14162_v46  ;;  %v14473_v46 = vcombine.high %v755_v40, %v759_v42  ;;  %v807_v40 = vld [vmem:[%s22314_s1 + $0x16a0] sm:$0xff] }
  0xfc   :  { %9532 = vmatpush1.bf16.msra.mxu0 %v14416_v47  ;;  %9943 = vmatprep.subr.bf16.mxu1 %v14171_v48  ;;  %v508_v47 = vld [vmem:[%s22314_s1 + $0xd48] sm:$0xff] }
  0xfd   :  { %9533 = vmatprep.subr.bf16.mxu0 %v14425_v49  ;;  %v512_v48 = vld [vmem:[%s22314_s1 + $0xd68] sm:$0xff]  ;;  %v763_v49 = vld [vmem:[%s22314_s1 + $0x1540] sm:$0xff] }
  0xfe   :  { %v14227_v54 = vcombine.high %v508_v47, %v512_v48  ;;  %v14226_v63 = vcombine.low %v508_v47, %v512_v48  ;;  %v14480_v0 = vcombine.low %v763_v49, %v767_v50  ;;  %v560_v47 = vld [vmem:[%s22314_s1 + $0xee8] sm:$0xff]  ;;  %v811_v48 = vld [vmem:[%s22314_s1 + $0x16c0] sm:$0xff] }
  0xff   :  { %9944 = vmatpush1.bf16.msra.mxu1 %v14170_v55  ;;  %v14481_v55 = vcombine.high %v763_v49, %v767_v50  ;;  %v815_v49 = vld [vmem:[%s22314_s1 + $0x16e0] sm:$0xff] }
 0x100   :  { %9534 = vmatpush1.bf16.msra.mxu0 %v14424_v56  ;;  %9945 = vmatprep.subr.bf16.mxu1 %v14179_v58  ;;  %v516_v56 = vld [vmem:[%s22314_s1 + $0xd88] sm:$0xff] }
 0x101   :  { %9535 = vmatprep.subr.bf16.mxu0 %v14433_v59  ;;  %v520_v58 = vld [vmem:[%s22314_s1 + $0xda8] sm:$0xff]  ;;  %v771_v59 = vld [vmem:[%s22314_s1 + $0x1580] sm:$0xff] }
 0x102   :  { %v14235_v1 = vcombine.high %v516_v56, %v520_v58  ;;  %v14234_v10 = vcombine.low %v516_v56, %v520_v58  ;;  %v568_v56 = vld [vmem:[%s22314_s1 + $0xf28] sm:$0xff]  ;;  %v819_v58 = vld [vmem:[%s22314_s1 + $0x1700] sm:$0xff] }
 0x103   :  { %9946 = vmatpush1.bf16.msra.mxu1 %v14178_v2 }
 0x104   :  { %9536 = vmatpush1.bf16.msra.mxu0 %v14432_v3  ;;  %9956 = vmatprep.subr.bf16.mxu1 %v14187_v4  ;;  %v14489_v3 = vcombine.high %v771_v59, %v775_v62  ;;  %v524_v4 = vld [vmem:[%s22314_s1 + $0xdc8] sm:$0xff] }
 0x105   :  { %9546 = vmatprep.subr.bf16.mxu0 %v14441_v6  ;;  %v14242_v23 = vcombine.low %v524_v4, %v528_v5 }
 0x106   :  { %9948 = vmatmul.mubr.bf16.vlgmr.msra.gmra.mrb[4].mxu1 %v16860_v35 }
 0x107   :  { %9538 = vmatmul.mubr.bf16.vlgmr.msra.gmra.mrb[0].mxu0 %v17272_v13  ;;  %9957 = vmatpush1.bf16.msra.mxu1 %v14186_v12  ;;  %v14488_v12 = vcombine.low %v771_v59, %v775_v62  ;;  %v823_v59 = vld [vmem:[%s22314_s1 + $0x1720] sm:$0xff] }
 0x108   :  { %9547 = vmatpush1.bf16.msra.mxu0 %v14440_v14  ;;  %9958 = vmatprep.subr.bf16.mxu1 %v14195_v15  ;;  %v14243_v14 = vcombine.high %v524_v4, %v528_v5  ;;  %v14497_v15 = vcombine.high %v779_v7, %v783_v8  ;;  %v576_v4 = vld [vmem:[%s22314_s1 + $0xf68] sm:$0xff]  ;;  %v827_v5 = vld [vmem:[%s22314_s1 + $0x1740] sm:$0xff] }
 0x109   :  { %9548 = vmatprep.subr.bf16.mxu0 %v14449_v17  ;;  %9578 = vmatprep.mubr.bf16.mxu0 %v17280_v20  ;;  %v532_v17 = vld [vmem:[%s22314_s1 + $0xe08] sm:$0xff] }
 0x10a   :  { %9988 = vmatprep.mubr.bf16.mxu1 %v16868_v41  ;;  %v14250_v32 = vcombine.low %v532_v17, %v536_v18 }
 0x10b   :  { %9959 = vmatpush1.bf16.msra.mxu1 %v14194_v24  ;;  %v14496_v24 = vcombine.low %v779_v7, %v783_v8  ;;  %v831_v7 = vld [vmem:[%s22314_s1 + $0x1760] sm:$0xff] }
 0x10c   :  { %9549 = vmatpush1.bf16.msra.mxu0 %v14448_v25  ;;  %9960 = vmatprep.subr.bf16.mxu1 %v14203_v26  ;;  %v14251_v25 = vcombine.high %v532_v17, %v536_v18  ;;  %v14505_v26 = vcombine.high %v787_v19, %v791_v22  ;;  %v839_v17 = vld [vmem:[%s22314_s1 + $0x17a0] sm:$0xff] }
 0x10d   :  { %9550 = vmatprep.subr.bf16.mxu0 %v14457_v28  ;;  %v540_v28 = vld [vmem:[%s22314_s1 + $0xe48] sm:$0xff] }
 0x10e   :  { %v14258_v42 = vcombine.low %v540_v28, %v544_v29 }
 0x10f   :  { %9961 = vmatpush1.bf16.msra.mxu1 %v14202_v33  ;;  %v14504_v33 = vcombine.low %v787_v19, %v791_v22  ;;  %v14544_v19 = vcombine.low %v827_v5, %v831_v7 }
 0x110   :  { %9551 = vmatpush1.bf16.msra.mxu0 %v14456_v34  ;;  %9962 = vmatprep.subr.bf16.mxu1 %v14211_v36  ;;  %v14259_v34 = vcombine.high %v540_v28, %v544_v29  ;;  %v14513_v36 = vcombine.high %v795_v30, %v799_v31  ;;  %v847_v28 = vld [vmem:[%s22314_s1 + $0x17e0] sm:$0xff] }
 0x111   :  { %9552 = vmatprep.subr.bf16.mxu0 %v14465_v37  ;;  %v548_v37 = vld [vmem:[%s22314_s1 + $0xe88] sm:$0xff] }
 0x112   :  { %v14266_v50 = vcombine.low %v548_v37, %v552_v38 }
 0x113   :  { %9963 = vmatpush1.bf16.msra.mxu1 %v14210_v43  ;;  %v14512_v43 = vcombine.low %v795_v30, %v799_v31 }
 0x114   :  { %9553 = vmatpush1.bf16.msra.mxu0 %v14464_v44  ;;  %9964 = vmatprep.subr.bf16.mxu1 %v14219_v45  ;;  %v14267_v44 = vcombine.high %v548_v37, %v552_v38  ;;  %v14521_v45 = vcombine.high %v803_v39, %v807_v40  ;;  %v855_v37 = vld [vmem:[%s22314_s1 + $0x1820] sm:$0xff] }
 0x115   :  { %9554 = vmatprep.subr.bf16.mxu0 %v14473_v46  ;;  %v556_v46 = vld [vmem:[%s22314_s1 + $0xec8] sm:$0xff] }
 0x116   :  { %v14274_v62 = vcombine.low %v556_v46, %v560_v47 }
 0x117   :  { %9965 = vmatpush1.bf16.msra.mxu1 %v14218_v51  ;;  %v14520_v51 = vcombine.low %v803_v39, %v807_v40 }
 0x118   :  { %9555 = vmatpush1.bf16.msra.mxu0 %v14472_v52  ;;  %9966 = vmatprep.subr.bf16.mxu1 %v14227_v54  ;;  %v14275_v52 = vcombine.high %v556_v46, %v560_v47  ;;  %v14529_v54 = vcombine.high %v811_v48, %v815_v49  ;;  %v859_v46 = vld [vmem:[%s22314_s1 + $0x1840] sm:$0xff] }
 0x119   :  { %v17340_v2 = vpop.f32.mrb[0].mxu1  ;;  %9556 = vmatprep.subr.bf16.mxu0 %v14481_v55  ;;  %v564_v55 = vld [vmem:[%s22314_s1 + $0xf08] sm:$0xff]  ;;  %v863_v47 = vld [vmem:[%s22314_s1 + $0x1860] sm:$0xff] }
 0x11a   :  { %v17348_v6 = vpop.f32.mrb[1].mxu1  ;;  %v14282_v8 = vcombine.low %v564_v55, %v568_v56 }
 0x11b   :  { %v9379_v9 = vpop.f32.mrb[2].mxu1  ;;  %9967 = vmatpush1.bf16.msra.mxu1 %v14226_v63  ;;  %v14528_v63 = vcombine.low %v811_v48, %v815_v49  ;;  %v48_v48 = vld [vmem:[%s22315_s0 + $0x68] sm:$0xff] }
 0x11c   :  { %9557 = vmatpush1.bf16.msra.mxu0 %v14480_v0  ;;  %v9380_v11 = vpop.f32.mrb[3].mxu1  ;;  %9968 = vmatprep.subr.bf16.mxu1 %v14235_v1  ;;  %v14283_v0 = vcombine.high %v564_v55, %v568_v56  ;;  %v14537_v1 = vcombine.high %v819_v58, %v823_v59  ;;  %v14536_v9 = vcombine.low %v819_v58, %v823_v59  ;;  %v612_v55 = vld [vmem:[%s22314_s1 + $0x1088] sm:$0xff]  ;;  %v867_v59 = vld [vmem:[%s22314_s1 + $0x1880] sm:$0xff] }
 0x11d   :  { %9558 = vmatprep.subr.bf16.mxu0 %v14489_v3  ;;  %v572_v3 = vld [vmem:[%s22314_s1 + $0xf48] sm:$0xff]  ;;  %v14545_v11 = vcombine.high %v827_v5, %v831_v7  ;;  %v17490_v58 = vpack.c.bf16 %v48_v48, %v48_v48  ;;  %v875_v7 = vld [vmem:[%s22314_s1 + $0x18c0] sm:$0xff] }
 0x11e   :  { %v14290_v18 = vcombine.low %v572_v3, %v576_v4  ;;  %v616_v56 = vld [vmem:[%s22314_s1 + $0x10a8] sm:$0xff] }
 0x11f   :  { %9969 = vmatpush1.bf16.msra.mxu1 %v14234_v10  ;;  %v14291_v10 = vcombine.high %v572_v3, %v576_v4  ;;  %v620_v4 = vld [vmem:[%s22314_s1 + $0x10c8] sm:$0xff] }
 0x120   :  { %9559 = vmatpush1.bf16.msra.mxu0 %v14488_v12  ;;  %9970 = vmatprep.subr.bf16.mxu1 %v14243_v14  ;;  %v580_v12 = vld [vmem:[%s22314_s1 + $0xf88] sm:$0xff] }
 0x121   :  { %9560 = vmatprep.subr.bf16.mxu0 %v14497_v15  ;;  %v584_v14 = vld [vmem:[%s22314_s1 + $0xfa8] sm:$0xff]  ;;  %v835_v15 = vld [vmem:[%s22314_s1 + $0x1780] sm:$0xff] }
 0x122   :  { %v14299_v22 = vcombine.high %v580_v12, %v584_v14  ;;  %v14298_v29 = vcombine.low %v580_v12, %v584_v14  ;;  %v14552_v30 = vcombine.low %v835_v15, %v839_v17  ;;  %v624_v5 = vld [vmem:[%s22314_s1 + $0x10e8] sm:$0xff] }
 0x123   :  { %9971 = vmatpush1.bf16.msra.mxu1 %v14242_v23  ;;  %v14553_v23 = vcombine.high %v835_v15, %v839_v17  ;;  %v628_v14 = vld [vmem:[%s22314_s1 + $0x1108] sm:$0xff]  ;;  %v883_v17 = vld [vmem:[%s22314_s1 + $0x1900] sm:$0xff] }
 0x124   :  { %9561 = vmatpush1.bf16.msra.mxu0 %v14496_v24  ;;  %9972 = vmatprep.subr.bf16.mxu1 %v14251_v25  ;;  %v588_v24 = vld [vmem:[%s22314_s1 + $0xfc8] sm:$0xff] }
 0x125   :  { %9562 = vmatprep.subr.bf16.mxu0 %v14505_v26  ;;  %v592_v25 = vld [vmem:[%s22314_s1 + $0xfe8] sm:$0xff]  ;;  %v843_v26 = vld [vmem:[%s22314_s1 + $0x17c0] sm:$0xff] }
 0x126   :  { %v14307_v31 = vcombine.high %v588_v24, %v592_v25  ;;  %v14306_v38 = vcombine.low %v588_v24, %v592_v25  ;;  %v14560_v39 = vcombine.low %v843_v26, %v847_v28  ;;  %v632_v15 = vld [vmem:[%s22314_s1 + $0x1128] sm:$0xff] }
 0x127   :  { %9973 = vmatpush1.bf16.msra.mxu1 %v14250_v32  ;;  %v14561_v32 = vcombine.high %v843_v26, %v847_v28  ;;  %v636_v25 = vld [vmem:[%s22314_s1 + $0x1148] sm:$0xff]  ;;  %v891_v28 = vld [vmem:[%s22314_s1 + $0x1940] sm:$0xff] }
 0x128   :  { %9563 = vmatpush1.bf16.msra.mxu0 %v14504_v33  ;;  %9974 = vmatprep.subr.bf16.mxu1 %v14259_v34  ;;  %v596_v33 = vld [vmem:[%s22314_s1 + $0x1008] sm:$0xff] }
 0x129   :  { %9564 = vmatprep.subr.bf16.mxu0 %v14513_v36  ;;  %v600_v34 = vld [vmem:[%s22314_s1 + $0x1028] sm:$0xff]  ;;  %v851_v36 = vld [vmem:[%s22314_s1 + $0x1800] sm:$0xff] }
 0x12a   :  { %v14315_v40 = vcombine.high %v596_v33, %v600_v34  ;;  %v14314_v49 = vcombine.low %v596_v33, %v600_v34  ;;  %v640_v26 = vld [vmem:[%s22314_s1 + $0x1168] sm:$0xff] }
 0x12b   :  { %9975 = vmatpush1.bf16.msra.mxu1 %v14258_v42  ;;  %v45_v42 = vld [vmem:[%s22315_s0 + $0x50] sm:$0xff]  ;;  %v644_v34 = vld [vmem:[%s22314_s1 + $0x1188] sm:$0xff] }
 0x12c   :  { %9565 = vmatpush1.bf16.msra.mxu0 %v14512_v43  ;;  %9976 = vmatprep.subr.bf16.mxu1 %v14267_v44  ;;  %v14569_v43 = vcombine.high %v851_v36, %v855_v37  ;;  %v604_v44 = vld [vmem:[%s22314_s1 + $0x1048] sm:$0xff] }
 0x12d   :  { %9566 = vmatprep.subr.bf16.mxu0 %v14521_v45  ;;  %v608_v45 = vld [vmem:[%s22314_s1 + $0x1068] sm:$0xff] }
 0x12f   :  { %9977 = vmatpush1.bf16.msra.mxu1 %v14266_v50  ;;  %v17482_v50 = vpack.c.bf16 %v45_v42, %v45_v42 }
 0x130   :  { %9567 = vmatpush1.bf16.msra.mxu0 %v14520_v51  ;;  %9978 = vmatprep.subr.bf16.mxu1 %v14275_v52  ;;  %v14568_v51 = vcombine.low %v851_v36, %v855_v37  ;;  %v14323_v52 = vcombine.high %v604_v44, %v608_v45  ;;  %v648_v36 = vld [vmem:[%s22314_s1 + $0x11a8] sm:$0xff]  ;;  %v899_v37 = vld [vmem:[%s22314_s1 + $0x1980] sm:$0xff] }
 0x131   :  { %9568 = vmatprep.subr.bf16.mxu0 %v14529_v54  ;;  %v14577_v54 = vcombine.high %v859_v46, %v863_v47  ;;  %v14363_v42 = vcombine.high %v644_v34, %v648_v36  ;;  %v14362_v48 = vcombine.low %v644_v34, %v648_v36  ;;  %v696_v34 = vld [vmem:[%s22314_s1 + $0x1328] sm:$0xff]  ;;  %v947_v36 = vld [vmem:[%s22314_s1 + $0x1b00] sm:$0xff] }
 0x133   :  { %9979 = vmatpush1.bf16.msra.mxu1 %v14274_v62  ;;  %v871_v62 = vld [vmem:[%s22314_s1 + $0x18a0] sm:$0xff] }
 0x134   :  { %9569 = vmatpush1.bf16.msra.mxu0 %v14528_v63  ;;  %9980 = vmatprep.subr.bf16.mxu1 %v14283_v0  ;;  %v14322_v63 = vcombine.low %v604_v44, %v608_v45  ;;  %v14576_v0 = vcombine.low %v859_v46, %v863_v47  ;;  %v14585_v3 = vcombine.high %v867_v59, %v871_v62  ;;  %v652_v44 = vld [vmem:[%s22314_s1 + $0x11c8] sm:$0xff]  ;;  %v907_v46 = vld [vmem:[%s22314_s1 + $0x19c0] sm:$0xff] }
 0x135   :  { %9570 = vmatprep.subr.bf16.mxu0 %v14537_v1  ;;  %v14331_v1 = vcombine.high %v612_v55, %v616_v56  ;;  %v656_v45 = vld [vmem:[%s22314_s1 + $0x11e8] sm:$0xff]  ;;  %v911_v47 = vld [vmem:[%s22314_s1 + $0x19e0] sm:$0xff] }
 0x137   :  { %9981 = vmatpush1.bf16.msra.mxu1 %v14282_v8  ;;  %v879_v8 = vld [vmem:[%s22314_s1 + $0x18e0] sm:$0xff] }
 0x138   :  { %9571 = vmatpush1.bf16.msra.mxu0 %v14536_v9  ;;  %9982 = vmatprep.subr.bf16.mxu1 %v14291_v10  ;;  %v14330_v9 = vcombine.low %v612_v55, %v616_v56  ;;  %v14584_v10 = vcombine.low %v867_v59, %v871_v62  ;;  %v14593_v12 = vcombine.high %v875_v7, %v879_v8  ;;  %v664_v55 = vld [vmem:[%s22314_s1 + $0x1228] sm:$0xff]  ;;  %v915_v56 = vld [vmem:[%s22314_s1 + $0x1a00] sm:$0xff] }
 0x139   :  { %9572 = vmatprep.subr.bf16.mxu0 %v14545_v11  ;;  %v14339_v11 = vcombine.high %v620_v4, %v624_v5  ;;  %v919_v59 = vld [vmem:[%s22314_s1 + $0x1a20] sm:$0xff]  ;;  %v14370_v62 = vcombine.low %v652_v44, %v656_v45 }
 0x13b   :  { %9983 = vmatpush1.bf16.msra.mxu1 %v14290_v18  ;;  %v887_v18 = vld [vmem:[%s22314_s1 + $0x1920] sm:$0xff] }
 0x13c   :  { %9573 = vmatpush1.bf16.msra.mxu0 %v14544_v19  ;;  %9984 = vmatprep.subr.bf16.mxu1 %v14299_v22  ;;  %v14338_v19 = vcombine.low %v620_v4, %v624_v5  ;;  %v14592_v22 = vcombine.low %v875_v7, %v879_v8  ;;  %v14601_v24 = vcombine.high %v883_v17, %v887_v18  ;;  %v672_v4 = vld [vmem:[%s22314_s1 + $0x1268] sm:$0xff]  ;;  %v923_v5 = vld [vmem:[%s22314_s1 + $0x1a40] sm:$0xff] }
 0x13d   :  { %9574 = vmatprep.subr.bf16.mxu0 %v14553_v23  ;;  %v14347_v23 = vcombine.high %v628_v14, %v632_v15  ;;  %v927_v7 = vld [vmem:[%s22314_s1 + $0x1a60] sm:$0xff] }
 0x13f   :  { %9985 = vmatpush1.bf16.msra.mxu1 %v14298_v29  ;;  %v895_v29 = vld [vmem:[%s22314_s1 + $0x1960] sm:$0xff] }
 0x140   :  { %9575 = vmatpush1.bf16.msra.mxu0 %v14552_v30  ;;  %9986 = vmatprep.subr.bf16.mxu1 %v14307_v31  ;;  %v14346_v30 = vcombine.low %v628_v14, %v632_v15  ;;  %v14600_v31 = vcombine.low %v883_v17, %v887_v18  ;;  %v14609_v33 = vcombine.high %v891_v28, %v895_v29  ;;  %v680_v14 = vld [vmem:[%s22314_s1 + $0x12a8] sm:$0xff]  ;;  %v931_v15 = vld [vmem:[%s22314_s1 + $0x1a80] sm:$0xff] }
 0x141   :  { %9576 = vmatprep.subr.bf16.mxu0 %v14561_v32  ;;  %v14355_v32 = vcombine.high %v636_v25, %v640_v26  ;;  %v935_v17 = vld [vmem:[%s22314_s1 + $0x1aa0] sm:$0xff] }
 0x143   :  { %9987 = vmatpush1.bf16.msra.mxu1 %v14306_v38  ;;  %v903_v38 = vld [vmem:[%s22314_s1 + $0x19a0] sm:$0xff] }
 0x144   :  { %9577 = vmatpush1.bf16.msra.mxu0 %v14560_v39  ;;  %9997 = vmatprep.subr.bf16.mxu1 %v14315_v40  ;;  %v14354_v39 = vcombine.low %v636_v25, %v640_v26  ;;  %v14608_v40 = vcombine.low %v891_v28, %v895_v29  ;;  %v688_v25 = vld [vmem:[%s22314_s1 + $0x12e8] sm:$0xff]  ;;  %v939_v26 = vld [vmem:[%s22314_s1 + $0x1ac0] sm:$0xff] }
 0x145   :  { %9587 = vmatprep.subr.bf16.mxu0 %v14569_v43  ;;  %v14617_v43 = vcombine.high %v899_v37, %v903_v38  ;;  %v943_v28 = vld [vmem:[%s22314_s1 + $0x1ae0] sm:$0xff] }
 0x146   :  { %9989 = vmatmul.mubr.bf16.vlgmr.msra.gmra.mrb[4].mxu1 %v17066_v53 }
 0x147   :  { %9579 = vmatmul.mubr.bf16.vlgmr.msra.gmra.mrb[0].mxu0 %v17482_v50  ;;  %9998 = vmatpush1.bf16.msra.mxu1 %v14314_v49  ;;  %v14616_v49 = vcombine.low %v899_v37, %v903_v38  ;;  %v951_v37 = vld [vmem:[%s22314_s1 + $0x1b20] sm:$0xff] }
 0x148   :  { %9588 = vmatpush1.bf16.msra.mxu0 %v14568_v51  ;;  %9999 = vmatprep.subr.bf16.mxu1 %v14323_v52  ;;  %v14371_v51 = vcombine.high %v652_v44, %v656_v45  ;;  %v14625_v52 = vcombine.high %v907_v46, %v911_v47  ;;  %v704_v44 = vld [vmem:[%s22314_s1 + $0x1368] sm:$0xff]  ;;  %v955_v45 = vld [vmem:[%s22314_s1 + $0x1b40] sm:$0xff] }
 0x149   :  { %9589 = vmatprep.subr.bf16.mxu0 %v14577_v54  ;;  %9619 = vmatprep.mubr.bf16.mxu0 %v17490_v58  ;;  %v660_v54 = vld [vmem:[%s22314_s1 + $0x1208] sm:$0xff] }
 0x14a   :  { %10029 = vmatprep.mubr.bf16.mxu1 %v17074_v60  ;;  %v14378_v8 = vcombine.low %v660_v54, %v664_v55 }
 0x14b   :  { %10000 = vmatpush1.bf16.msra.mxu1 %v14322_v63  ;;  %v14624_v63 = vcombine.low %v907_v46, %v911_v47  ;;  %v959_v46 = vld [vmem:[%s22314_s1 + $0x1b60] sm:$0xff] }
 0x14c   :  { %9590 = vmatpush1.bf16.msra.mxu0 %v14576_v0  ;;  %10001 = vmatprep.subr.bf16.mxu1 %v14331_v1  ;;  %v14379_v0 = vcombine.high %v660_v54, %v664_v55  ;;  %v14633_v1 = vcombine.high %v915_v56, %v919_v59  ;;  %v712_v54 = vld [vmem:[%s22314_s1 + $0x13a8] sm:$0xff]  ;;  %v963_v55 = vld [vmem:[%s22314_s1 + $0x1b80] sm:$0xff] }
 0x14d   :  { %9591 = vmatprep.subr.bf16.mxu0 %v14585_v3  ;;  %v668_v3 = vld [vmem:[%s22314_s1 + $0x1248] sm:$0xff] }
 0x14e   :  { %v14386_v18 = vcombine.low %v668_v3, %v672_v4 }
 0x14f   :  { %10002 = vmatpush1.bf16.msra.mxu1 %v14330_v9  ;;  %v14632_v9 = vcombine.low %v915_v56, %v919_v59  ;;  %v967_v56 = vld [vmem:[%s22314_s1 + $0x1ba0] sm:$0xff] }
 0x150   :  { %9592 = vmatpush1.bf16.msra.mxu0 %v14584_v10  ;;  %10003 = vmatprep.subr.bf16.mxu1 %v14339_v11  ;;  %v14387_v10 = vcombine.high %v668_v3, %v672_v4  ;;  %v14641_v11 = vcombine.high %v923_v5, %v927_v7  ;;  %v720_v3 = vld [vmem:[%s22314_s1 + $0x13e8] sm:$0xff]  ;;  %v971_v4 = vld [vmem:[%s22314_s1 + $0x1bc0] sm:$0xff] }
 0x151   :  { %9593 = vmatprep.subr.bf16.mxu0 %v14593_v12  ;;  %v676_v12 = vld [vmem:[%s22314_s1 + $0x1288] sm:$0xff] }
 0x152   :  { %v14394_v29 = vcombine.low %v676_v12, %v680_v14 }
 0x153   :  { %10004 = vmatpush1.bf16.msra.mxu1 %v14338_v19  ;;  %v14640_v19 = vcombine.low %v923_v5, %v927_v7  ;;  %v975_v5 = vld [vmem:[%s22314_s1 + $0x1be0] sm:$0xff] }
 0x154   :  { %9594 = vmatpush1.bf16.msra.mxu0 %v14592_v22  ;;  %10005 = vmatprep.subr.bf16.mxu1 %v14347_v23  ;;  %v14395_v22 = vcombine.high %v676_v12, %v680_v14  ;;  %v14649_v23 = vcombine.high %v931_v15, %v935_v17  ;;  %v728_v12 = vld [vmem:[%s22314_s1 + $0x1428] sm:$0xff]  ;;  %v979_v14 = vld [vmem:[%s22314_s1 + $0x1c00] sm:$0xff] }
 0x155   :  { %9595 = vmatprep.subr.bf16.mxu0 %v14601_v24  ;;  %v684_v24 = vld [vmem:[%s22314_s1 + $0x12c8] sm:$0xff] }
 0x156   :  { %v14402_v38 = vcombine.low %v684_v24, %v688_v25 }
 0x157   :  { %10006 = vmatpush1.bf16.msra.mxu1 %v14346_v30  ;;  %v14648_v30 = vcombine.low %v931_v15, %v935_v17  ;;  %v983_v15 = vld [vmem:[%s22314_s1 + $0x1c20] sm:$0xff] }
 0x158   :  { %9596 = vmatpush1.bf16.msra.mxu0 %v14600_v31  ;;  %10007 = vmatprep.subr.bf16.mxu1 %v14355_v32  ;;  %v14403_v31 = vcombine.high %v684_v24, %v688_v25  ;;  %v14657_v32 = vcombine.high %v939_v26, %v943_v28  ;;  %v732_v24 = vld [vmem:[%s22314_s1 + $0x1448] sm:$0xff] }
 0x159   :  { %9597 = vmatprep.subr.bf16.mxu0 %v14609_v33  ;;  %v692_v33 = vld [vmem:[%s22314_s1 + $0x1308] sm:$0xff] }
 0x15a   :  { %v14410_v47 = vcombine.low %v692_v33, %v696_v34  ;;  %v736_v25 = vld [vmem:[%s22314_s1 + $0x1468] sm:$0xff] }
 0x15b   :  { %10008 = vmatpush1.bf16.msra.mxu1 %v14354_v39  ;;  %v14656_v39 = vcombine.low %v939_v26, %v943_v28  ;;  %v987_v26 = vld [vmem:[%s22314_s1 + $0x1c40] sm:$0xff] }
 0x15c   :  { %9598 = vmatpush1.bf16.msra.mxu0 %v14608_v40  ;;  %10009 = vmatprep.subr.bf16.mxu1 %v14363_v42  ;;  %v14411_v40 = vcombine.high %v692_v33, %v696_v34  ;;  %v14665_v42 = vcombine.high %v947_v36, %v951_v37  ;;  %v991_v28 = vld [vmem:[%s22314_s1 + $0x1c60] sm:$0xff]  ;;  %v14451_v33 = vcombine.high %v732_v24, %v736_v25 }
 0x15d   :  { %9599 = vmatprep.subr.bf16.mxu0 %v14617_v43  ;;  %v700_v43 = vld [vmem:[%s22314_s1 + $0x1348] sm:$0xff]  ;;  %v14705_v34 = vcombine.high %v987_v26, %v991_v28 }
 0x15e   :  { %v14418_v59 = vcombine.low %v700_v43, %v704_v44 }
 0x15f   :  { %10010 = vmatpush1.bf16.msra.mxu1 %v14362_v48  ;;  %v14664_v48 = vcombine.low %v947_v36, %v951_v37  ;;  %v740_v36 = vld [vmem:[%s22314_s1 + $0x1488] sm:$0xff] }
 0x160   :  { %9600 = vmatpush1.bf16.msra.mxu0 %v14616_v49  ;;  %10011 = vmatprep.subr.bf16.mxu1 %v14371_v51  ;;  %v14419_v49 = vcombine.high %v700_v43, %v704_v44  ;;  %v14673_v51 = vcombine.high %v955_v45, %v959_v46  ;;  %v744_v37 = vld [vmem:[%s22314_s1 + $0x14a8] sm:$0xff]  ;;  %v14704_v43 = vcombine.low %v987_v26, %v991_v28 }
 0x161   :  { %9601 = vmatprep.subr.bf16.mxu0 %v14625_v52  ;;  %v708_v52 = vld [vmem:[%s22314_s1 + $0x1388] sm:$0xff]  ;;  %v14459_v44 = vcombine.high %v740_v36, %v744_v37 }
 0x162   :  { %v14426_v7 = vcombine.low %v708_v52, %v712_v54  ;;  %v780_v26 = vld [vmem:[%s22314_s1 + $0x15c8] sm:$0xff] }
 0x163   :  { %10012 = vmatpush1.bf16.msra.mxu1 %v14370_v62  ;;  %v14672_v62 = vcombine.low %v955_v45, %v959_v46  ;;  %v748_v46 = vld [vmem:[%s22314_s1 + $0x14c8] sm:$0xff] }
 0x164   :  { %9602 = vmatpush1.bf16.msra.mxu0 %v14624_v63  ;;  %10013 = vmatprep.subr.bf16.mxu1 %v14379_v0  ;;  %v14427_v63 = vcombine.high %v708_v52, %v712_v54  ;;  %v14681_v0 = vcombine.high %v963_v55, %v967_v56  ;;  %v784_v28 = vld [vmem:[%s22314_s1 + $0x15e8] sm:$0xff] }
 0x165   :  { %9603 = vmatprep.subr.bf16.mxu0 %v14633_v1  ;;  %v716_v1 = vld [vmem:[%s22314_s1 + $0x13c8] sm:$0xff] }
 0x166   :  { %v14434_v17 = vcombine.low %v716_v1, %v720_v3 }
 0x167   :  { %10014 = vmatpush1.bf16.msra.mxu1 %v14378_v8  ;;  %v14680_v8 = vcombine.low %v963_v55, %v967_v56  ;;  %v756_v56 = vld [vmem:[%s22314_s1 + $0x1508] sm:$0xff] }
 0x168   :  { %9604 = vmatpush1.bf16.msra.mxu0 %v14632_v9  ;;  %10015 = vmatprep.subr.bf16.mxu1 %v14387_v10  ;;  %v14435_v9 = vcombine.high %v716_v1, %v720_v3  ;;  %v14689_v10 = vcombine.high %v971_v4, %v975_v5 }
 0x169   :  { %9605 = vmatprep.subr.bf16.mxu0 %v14641_v11  ;;  %v724_v11 = vld [vmem:[%s22314_s1 + $0x1408] sm:$0xff] }
 0x16b   :  { %10016 = vmatpush1.bf16.msra.mxu1 %v14386_v18  ;;  %v14688_v18 = vcombine.low %v971_v4, %v975_v5  ;;  %v764_v5 = vld [vmem:[%s22314_s1 + $0x1548] sm:$0xff] }
 0x16c   :  { %9606 = vmatpush1.bf16.msra.mxu0 %v14640_v19  ;;  %10017 = vmatprep.subr.bf16.mxu1 %v14395_v22  ;;  %v14443_v19 = vcombine.high %v724_v11, %v728_v12  ;;  %v47_v22 = vld [vmem:[%s22315_s0 + $0x60] sm:$0xff] }
 0x16d   :  { %9607 = vmatprep.subr.bf16.mxu0 %v14649_v23  ;;  %v14697_v23 = vcombine.high %v979_v14, %v983_v15 }
 0x16f   :  { %10018 = vmatpush1.bf16.msra.mxu1 %v14394_v29  ;;  %v50_v29 = vld [vmem:[%s22315_s0 + $0x78] sm:$0xff] }
 0x170   :  { %9608 = vmatpush1.bf16.msra.mxu0 %v14648_v30  ;;  %10019 = vmatprep.subr.bf16.mxu1 %v14403_v31  ;;  %v14442_v30 = vcombine.low %v724_v11, %v728_v12  ;;  %v17688_v31 = vpack.c.bf16 %v47_v22, %v47_v22 }
 0x171   :  { %9609 = vmatprep.subr.bf16.mxu0 %v14657_v32  ;;  %v14696_v32 = vcombine.low %v979_v14, %v983_v15  ;;  %v772_v15 = vld [vmem:[%s22314_s1 + $0x1588] sm:$0xff] }
 0x173   :  { %10020 = vmatpush1.bf16.msra.mxu1 %v14402_v38  ;;  %v17696_v38 = vpack.c.bf16 %v50_v29, %v50_v29  ;;  %v1035_v29 = vld [vmem:[%s22314_s1 + $0x1dc0] sm:$0xff] }
 0x174   :  { %9610 = vmatpush1.bf16.msra.mxu0 %v14656_v39  ;;  %10021 = vmatprep.subr.bf16.mxu1 %v14411_v40  ;;  %v995_v39 = vld [vmem:[%s22314_s1 + $0x1c80] sm:$0xff] }
 0x175   :  { %9611 = vmatprep.subr.bf16.mxu0 %v14665_v42  ;;  %v999_v40 = vld [vmem:[%s22314_s1 + $0x1ca0] sm:$0xff]  ;;  %v14450_v42 = vcombine.low %v732_v24, %v736_v25 }
 0x176   :  { %v14713_v45 = vcombine.high %v995_v39, %v999_v40  ;;  %v14712_v52 = vcombine.low %v995_v39, %v999_v40  ;;  %v792_v39 = vld [vmem:[%s22314_s1 + $0x1628] sm:$0xff]  ;;  %v1043_v40 = vld [vmem:[%s22314_s1 + $0x1e00] sm:$0xff] }
 0x177   :  { %10022 = vmatpush1.bf16.msra.mxu1 %v14410_v47  ;;  %v752_v47 = vld [vmem:[%s22314_s1 + $0x14e8] sm:$0xff] }
 0x178   :  { %9612 = vmatpush1.bf16.msra.mxu0 %v14664_v48  ;;  %10023 = vmatprep.subr.bf16.mxu1 %v14419_v49  ;;  %v1003_v48 = vld [vmem:[%s22314_s1 + $0x1cc0] sm:$0xff]  ;;  %v14467_v54 = vcombine.high %v748_v46, %v752_v47 }
 0x179   :  { %9613 = vmatprep.subr.bf16.mxu0 %v14673_v51  ;;  %v1007_v49 = vld [vmem:[%s22314_s1 + $0x1ce0] sm:$0xff]  ;;  %v14458_v51 = vcombine.low %v740_v36, %v744_v37  ;;  %v788_v37 = vld [vmem:[%s22314_s1 + $0x1608] sm:$0xff] }
 0x17a   :  { %v14721_v55 = vcombine.high %v1003_v48, %v1007_v49  ;;  %v14720_v1 = vcombine.low %v1003_v48, %v1007_v49  ;;  %v800_v48 = vld [vmem:[%s22314_s1 + $0x1668] sm:$0xff]  ;;  %v1051_v49 = vld [vmem:[%s22314_s1 + $0x1e40] sm:$0xff] }
 0x17b   :  { %10024 = vmatpush1.bf16.msra.mxu1 %v14418_v59  ;;  %v760_v59 = vld [vmem:[%s22314_s1 + $0x1528] sm:$0xff] }
 0x17c   :  { %9614 = vmatpush1.bf16.msra.mxu0 %v14672_v62  ;;  %10025 = vmatprep.subr.bf16.mxu1 %v14427_v63  ;;  %v1011_v62 = vld [vmem:[%s22314_s1 + $0x1d00] sm:$0xff]  ;;  %v14475_v3 = vcombine.high %v756_v56, %v760_v59 }
 0x17d   :  { %9615 = vmatprep.subr.bf16.mxu0 %v14681_v0  ;;  %v1015_v63 = vld [vmem:[%s22314_s1 + $0x1d20] sm:$0xff]  ;;  %v14466_v0 = vcombine.low %v748_v46, %v752_v47  ;;  %v796_v47 = vld [vmem:[%s22314_s1 + $0x1648] sm:$0xff] }
 0x17e   :  { %v14729_v4 = vcombine.high %v1011_v62, %v1015_v63  ;;  %v14728_v11 = vcombine.low %v1011_v62, %v1015_v63  ;;  %v808_v62 = vld [vmem:[%s22314_s1 + $0x16a8] sm:$0xff]  ;;  %v1059_v63 = vld [vmem:[%s22314_s1 + $0x1e80] sm:$0xff] }
 0x17f   :  { %10026 = vmatpush1.bf16.msra.mxu1 %v14426_v7  ;;  %v768_v7 = vld [vmem:[%s22314_s1 + $0x1568] sm:$0xff] }
 0x180   :  { %9616 = vmatpush1.bf16.msra.mxu0 %v14680_v8  ;;  %10027 = vmatprep.subr.bf16.mxu1 %v14435_v9  ;;  %v1019_v8 = vld [vmem:[%s22314_s1 + $0x1d40] sm:$0xff]  ;;  %v14483_v12 = vcombine.high %v764_v5, %v768_v7  ;;  %v14482_v22 = vcombine.low %v764_v5, %v768_v7  ;;  %v812_v7 = vld [vmem:[%s22314_s1 + $0x16c8] sm:$0xff] }
 0x181   :  { %9617 = vmatprep.subr.bf16.mxu0 %v14689_v10  ;;  %v1023_v9 = vld [vmem:[%s22314_s1 + $0x1d60] sm:$0xff]  ;;  %v14474_v10 = vcombine.low %v756_v56, %v760_v59  ;;  %v804_v59 = vld [vmem:[%s22314_s1 + $0x1688] sm:$0xff] }
 0x182   :  { %v14737_v14 = vcombine.high %v1019_v8, %v1023_v9 }
 0x183   :  { %10028 = vmatpush1.bf16.msra.mxu1 %v14434_v17  ;;  %v776_v17 = vld [vmem:[%s22314_s1 + $0x15a8] sm:$0xff] }
 0x184   :  { %9618 = vmatpush1.bf16.msra.mxu0 %v14688_v18  ;;  %10038 = vmatprep.subr.bf16.mxu1 %v14443_v19  ;;  %v1027_v18 = vld [vmem:[%s22314_s1 + $0x1d80] sm:$0xff]  ;;  %v14491_v24 = vcombine.high %v772_v15, %v776_v17 }
 0x185   :  { %9628 = vmatprep.subr.bf16.mxu0 %v14697_v23  ;;  %v1031_v19 = vld [vmem:[%s22314_s1 + $0x1da0] sm:$0xff]  ;;  %v14736_v23 = vcombine.low %v1019_v8, %v1023_v9  ;;  %v816_v8 = vld [vmem:[%s22314_s1 + $0x16e8] sm:$0xff] }
 0x186   :  { %10030 = vmatmul.mubr.bf16.vlgmr.msra.gmra.mrb[4].mxu1 %v17272_v13  ;;  %v14745_v25 = vcombine.high %v1027_v18, %v1031_v19  ;;  %v1067_v9 = vld [vmem:[%s22314_s1 + $0x1ec0] sm:$0xff] }
 0x187   :  { %9620 = vmatmul.mubr.bf16.vlgmr.msra.gmra.mrb[0].mxu0 %v17688_v31  ;;  %10039 = vmatpush1.bf16.msra.mxu1 %v14442_v30  ;;  %v1039_v30 = vld [vmem:[%s22314_s1 + $0x1de0] sm:$0xff] }
 0x188   :  { %9629 = vmatpush1.bf16.msra.mxu0 %v14696_v32  ;;  %10040 = vmatprep.subr.bf16.mxu1 %v14451_v33  ;;  %v14490_v32 = vcombine.low %v772_v15, %v776_v17  ;;  %v14744_v33 = vcombine.low %v1027_v18, %v1031_v19  ;;  %v14753_v36 = vcombine.high %v1035_v29, %v1039_v30  ;;  %v820_v17 = vld [vmem:[%s22314_s1 + $0x1708] sm:$0xff]  ;;  %v1075_v19 = vld [vmem:[%s22314_s1 + $0x1f00] sm:$0xff] }
 0x189   :  { %9630 = vmatprep.subr.bf16.mxu0 %v14705_v34  ;;  %9660 = vmatprep.mubr.bf16.mxu0 %v17696_v38  ;;  %v14499_v34 = vcombine.high %v780_v26, %v784_v28  ;;  %v824_v18 = vld [vmem:[%s22314_s1 + $0x1728] sm:$0xff] }
 0x18a   :  { %10070 = vmatprep.mubr.bf16.mxu1 %v17280_v20 }
 0x18b   :  { %10041 = vmatpush1.bf16.msra.mxu1 %v14450_v42  ;;  %v1047_v42 = vld [vmem:[%s22314_s1 + $0x1e20] sm:$0xff] }
 0x18c   :  { %9631 = vmatpush1.bf16.msra.mxu0 %v14704_v43  ;;  %10042 = vmatprep.subr.bf16.mxu1 %v14459_v44  ;;  %v14498_v43 = vcombine.low %v780_v26, %v784_v28  ;;  %v14752_v44 = vcombine.low %v1035_v29, %v1039_v30  ;;  %v14761_v46 = vcombine.high %v1043_v40, %v1047_v42  ;;  %v828_v28 = vld [vmem:[%s22314_s1 + $0x1748] sm:$0xff]  ;;  %v1083_v30 = vld [vmem:[%s22314_s1 + $0x1f40] sm:$0xff] }
 0x18d   :  { %9632 = vmatprep.subr.bf16.mxu0 %v14713_v45  ;;  %v14507_v45 = vcombine.high %v788_v37, %v792_v39  ;;  %v832_v29 = vld [vmem:[%s22314_s1 + $0x1768] sm:$0xff] }
 0x18f   :  { %10043 = vmatpush1.bf16.msra.mxu1 %v14458_v51  ;;  %v1055_v51 = vld [vmem:[%s22314_s1 + $0x1e60] sm:$0xff] }
 0x190   :  { %9633 = vmatpush1.bf16.msra.mxu0 %v14712_v52  ;;  %10044 = vmatprep.subr.bf16.mxu1 %v14467_v54  ;;  %v14506_v52 = vcombine.low %v788_v37, %v792_v39  ;;  %v14760_v54 = vcombine.low %v1043_v40, %v1047_v42  ;;  %v14769_v56 = vcombine.high %v1051_v49, %v1055_v51  ;;  %v836_v39 = vld [vmem:[%s22314_s1 + $0x1788] sm:$0xff]  ;;  %v1091_v42 = vld [vmem:[%s22314_s1 + $0x1f80] sm:$0xff] }
 0x191   :  { %9634 = vmatprep.subr.bf16.mxu0 %v14721_v55  ;;  %v14515_v55 = vcombine.high %v796_v47, %v800_v48  ;;  %v840_v40 = vld [vmem:[%s22314_s1 + $0x17a8] sm:$0xff] }
 0x193   :  { %10045 = vmatpush1.bf16.msra.mxu1 %v14466_v0  ;;  %v1063_v0 = vld [vmem:[%s22314_s1 + $0x1ea0] sm:$0xff] }
 0x194   :  { %9635 = vmatpush1.bf16.msra.mxu0 %v14720_v1  ;;  %10046 = vmatprep.subr.bf16.mxu1 %v14475_v3  ;;  %v14514_v1 = vcombine.low %v796_v47, %v800_v48  ;;  %v14768_v3 = vcombine.low %v1051_v49, %v1055_v51  ;;  %v14777_v5 = vcombine.high %v1059_v63, %v1063_v0  ;;  %v844_v48 = vld [vmem:[%s22314_s1 + $0x17c8] sm:$0xff]  ;;  %v1099_v51 = vld [vmem:[%s22314_s1 + $0x1fc0] sm:$0xff] }
 0x195   :  { %9636 = vmatprep.subr.bf16.mxu0 %v14729_v4  ;;  %v14523_v4 = vcombine.high %v804_v59, %v808_v62  ;;  %v848_v49 = vld [vmem:[%s22314_s1 + $0x17e8] sm:$0xff] }
 0x197   :  { %10047 = vmatpush1.bf16.msra.mxu1 %v14474_v10  ;;  %v1071_v10 = vld [vmem:[%s22314_s1 + $0x1ee0] sm:$0xff] }
 0x198   :  { %9637 = vmatpush1.bf16.msra.mxu0 %v14728_v11  ;;  %10048 = vmatprep.subr.bf16.mxu1 %v14483_v12  ;;  %v14522_v11 = vcombine.low %v804_v59, %v808_v62  ;;  %v14776_v12 = vcombine.low %v1059_v63, %v1063_v0  ;;  %v14785_v15 = vcombine.high %v1067_v9, %v1071_v10  ;;  %v852_v62 = vld [vmem:[%s22314_s1 + $0x1808] sm:$0xff]  ;;  %v1107_v0 = vld [vmem:[%s22314_s1 + $0x2000] sm:$0xff] }
 0x199   :  { %9638 = vmatprep.subr.bf16.mxu0 %v14737_v14  ;;  %v14531_v14 = vcombine.high %v812_v7, %v816_v8  ;;  %v856_v63 = vld [vmem:[%s22314_s1 + $0x1828] sm:$0xff] }
 0x19b   :  { %10049 = vmatpush1.bf16.msra.mxu1 %v14482_v22  ;;  %v1079_v22 = vld [vmem:[%s22314_s1 + $0x1f20] sm:$0xff] }
 0x19c   :  { %9639 = vmatpush1.bf16.msra.mxu0 %v14736_v23  ;;  %10050 = vmatprep.subr.bf16.mxu1 %v14491_v24  ;;  %v14530_v23 = vcombine.low %v812_v7, %v816_v8  ;;  %v14784_v24 = vcombine.low %v1067_v9, %v1071_v10  ;;  %v14793_v26 = vcombine.high %v1075_v19, %v1079_v22  ;;  %v49_v7 = vld [vmem:[%s22315_s0 + $0x70] sm:$0xff]  ;;  %v860_v9 = vld [vmem:[%s22314_s1 + $0x1848] sm:$0xff] }
 0x19d   :  { %9640 = vmatprep.subr.bf16.mxu0 %v14745_v25  ;;  %v14539_v25 = vcombine.high %v820_v17, %v824_v18  ;;  %v864_v10 = vld [vmem:[%s22314_s1 + $0x1868] sm:$0xff] }
 0x19f   :  { %10051 = vmatpush1.bf16.msra.mxu1 %v14490_v32  ;;  %v1087_v32 = vld [vmem:[%s22314_s1 + $0x1f60] sm:$0xff] }
 0x1a0   :  { %9641 = vmatpush1.bf16.msra.mxu0 %v14744_v33  ;;  %10052 = vmatprep.subr.bf16.mxu1 %v14499_v34  ;;  %v14538_v33 = vcombine.low %v820_v17, %v824_v18  ;;  %v14792_v34 = vcombine.low %v1075_v19, %v1079_v22  ;;  %v14801_v37 = vcombine.high %v1083_v30, %v1087_v32 }
 0x1a1   :  { %9642 = vmatprep.subr.bf16.mxu0 %v14753_v36  ;;  %v14547_v36 = vcombine.high %v828_v28, %v832_v29  ;;  %v17894_v17 = vpack.c.bf16 %v49_v7, %v49_v7  ;;  %v14579_v19 = vcombine.high %v860_v9, %v864_v10  ;;  %v1155_v7 = vld [vmem:[%s22314_s1 + $0x2180] sm:$0xff] }
 0x1a3   :  { %10053 = vmatpush1.bf16.msra.mxu1 %v14498_v43  ;;  %v1095_v43 = vld [vmem:[%s22314_s1 + $0x1fa0] sm:$0xff] }
 0x1a4   :  { %9643 = vmatpush1.bf16.msra.mxu0 %v14752_v44  ;;  %10054 = vmatprep.subr.bf16.mxu1 %v14507_v45  ;;  %v14546_v44 = vcombine.low %v828_v28, %v832_v29  ;;  %v14800_v45 = vcombine.low %v1083_v30, %v1087_v32  ;;  %v14809_v47 = vcombine.high %v1091_v42, %v1095_v43  ;;  %v1127_v28 = vld [vmem:[%s22314_s1 + $0x20a0] sm:$0xff] }
 0x1a5   :  { %9644 = vmatprep.subr.bf16.mxu0 %v14761_v46  ;;  %v14555_v46 = vcombine.high %v836_v39, %v840_v40  ;;  %v14578_v29 = vcombine.low %v860_v9, %v864_v10 }
 0x1a7   :  { %10055 = vmatpush1.bf16.msra.mxu1 %v14506_v52  ;;  %v1103_v52 = vld [vmem:[%s22314_s1 + $0x1fe0] sm:$0xff] }
 0x1a8   :  { %9645 = vmatpush1.bf16.msra.mxu0 %v14760_v54  ;;  %10056 = vmatprep.subr.bf16.mxu1 %v14515_v55  ;;  %v14554_v54 = vcombine.low %v836_v39, %v840_v40  ;;  %v14808_v55 = vcombine.low %v1091_v42, %v1095_v43  ;;  %v14817_v59 = vcombine.high %v1099_v51, %v1103_v52  ;;  %v1135_v39 = vld [vmem:[%s22314_s1 + $0x20e0] sm:$0xff] }
 0x1a9   :  { %9646 = vmatprep.subr.bf16.mxu0 %v14769_v56  ;;  %v14563_v56 = vcombine.high %v844_v48, %v848_v49 }
 0x1ab   :  { %10057 = vmatpush1.bf16.msra.mxu1 %v14514_v1  ;;  %v1111_v1 = vld [vmem:[%s22314_s1 + $0x2020] sm:$0xff] }
 0x1ac   :  { %9647 = vmatpush1.bf16.msra.mxu0 %v14768_v3  ;;  %10058 = vmatprep.subr.bf16.mxu1 %v14523_v4  ;;  %v14562_v3 = vcombine.low %v844_v48, %v848_v49  ;;  %v14816_v4 = vcombine.low %v1099_v51, %v1103_v52  ;;  %v14825_v8 = vcombine.high %v1107_v0, %v1111_v1  ;;  %v1143_v48 = vld [vmem:[%s22314_s1 + $0x2120] sm:$0xff] }
 0x1ad   :  { %9648 = vmatprep.subr.bf16.mxu0 %v14777_v5  ;;  %v14571_v5 = vcombine.high %v852_v62, %v856_v63  ;;  %v14824_v18 = vcombine.low %v1107_v0, %v1111_v1 }
 0x1af   :  { %10059 = vmatpush1.bf16.msra.mxu1 %v14522_v11  ;;  %v1115_v11 = vld [vmem:[%s22314_s1 + $0x2040] sm:$0xff] }
 0x1b0   :  { %9649 = vmatpush1.bf16.msra.mxu0 %v14776_v12  ;;  %10060 = vmatprep.subr.bf16.mxu1 %v14531_v14  ;;  %v1119_v12 = vld [vmem:[%s22314_s1 + $0x2060] sm:$0xff]  ;;  %v52_v14 = vld [vmem:[%s22315_s0 + $0x88] sm:$0xff] }
 0x1b1   :  { %9650 = vmatprep.subr.bf16.mxu0 %v14785_v15  ;;  %v14570_v15 = vcombine.low %v852_v62, %v856_v63  ;;  %v14833_v22 = vcombine.high %v1115_v11, %v1119_v12  ;;  %v14832_v30 = vcombine.low %v1115_v11, %v1119_v12  ;;  %v1151_v62 = vld [vmem:[%s22314_s1 + $0x2160] sm:$0xff] }
 0x1b3   :  { %10061 = vmatpush1.bf16.msra.mxu1 %v14530_v23  ;;  %v868_v23 = vld [vmem:[%s22314_s1 + $0x1888] sm:$0xff] }
 0x1b4   :  { %9651 = vmatpush1.bf16.msra.mxu0 %v14784_v24  ;;  %10062 = vmatprep.subr.bf16.mxu1 %v14539_v25  ;;  %v872_v24 = vld [vmem:[%s22314_s1 + $0x18a8] sm:$0xff]  ;;  %v17902_v25 = vpack.c.bf16 %v52_v14, %v52_v14 }
 0x1b5   :  { %9652 = vmatprep.subr.bf16.mxu0 %v14793_v26  ;;  %v1123_v26 = vld [vmem:[%s22314_s1 + $0x2080] sm:$0xff]  ;;  %v14587_v32 = vcombine.high %v868_v23, %v872_v24  ;;  %v14586_v40 = vcombine.low %v868_v23, %v872_v24  ;;  %v908_v14 = vld [vmem:[%s22314_s1 + $0x19c8] sm:$0xff] }
 0x1b6   :  { %v14840_v42 = vcombine.low %v1123_v26, %v1127_v28 }
 0x1b7   :  { %10063 = vmatpush1.bf16.msra.mxu1 %v14538_v33  ;;  %v14841_v33 = vcombine.high %v1123_v26, %v1127_v28  ;;  %v916_v28 = vld [vmem:[%s22314_s1 + $0x1a08] sm:$0xff] }
 0x1b8   :  { %9653 = vmatpush1.bf16.msra.mxu0 %v14792_v34  ;;  %10064 = vmatprep.subr.bf16.mxu1 %v14547_v36  ;;  %v876_v34 = vld [vmem:[%s22314_s1 + $0x18c8] sm:$0xff] }
 0x1b9   :  { %9654 = vmatprep.subr.bf16.mxu0 %v14801_v37  ;;  %v880_v36 = vld [vmem:[%s22314_s1 + $0x18e8] sm:$0xff]  ;;  %v1131_v37 = vld [vmem:[%s22314_s1 + $0x20c0] sm:$0xff] }
 0x1ba   :  { %v14595_v43 = vcombine.high %v876_v34, %v880_v36  ;;  %v14594_v49 = vcombine.low %v876_v34, %v880_v36  ;;  %v14848_v51 = vcombine.low %v1131_v37, %v1135_v39 }
 0x1bb   :  { %10065 = vmatpush1.bf16.msra.mxu1 %v14546_v44  ;;  %v14849_v44 = vcombine.high %v1131_v37, %v1135_v39  ;;  %v924_v39 = vld [vmem:[%s22314_s1 + $0x1a48] sm:$0xff] }
 0x1bc   :  { %9655 = vmatpush1.bf16.msra.mxu0 %v14800_v45  ;;  %10066 = vmatprep.subr.bf16.mxu1 %v14555_v46  ;;  %v884_v45 = vld [vmem:[%s22314_s1 + $0x1908] sm:$0xff] }
 0x1bd   :  { %9656 = vmatprep.subr.bf16.mxu0 %v14809_v47  ;;  %v888_v46 = vld [vmem:[%s22314_s1 + $0x1928] sm:$0xff]  ;;  %v1139_v47 = vld [vmem:[%s22314_s1 + $0x2100] sm:$0xff] }
 0x1be   :  { %v14603_v52 = vcombine.high %v884_v45, %v888_v46  ;;  %v14602_v63 = vcombine.low %v884_v45, %v888_v46  ;;  %v14856_v0 = vcombine.low %v1139_v47, %v1143_v48 }
 0x1bf   :  { %10067 = vmatpush1.bf16.msra.mxu1 %v14554_v54  ;;  %v14857_v54 = vcombine.high %v1139_v47, %v1143_v48  ;;  %v932_v48 = vld [vmem:[%s22314_s1 + $0x1a88] sm:$0xff] }
 0x1c0   :  { %9657 = vmatpush1.bf16.msra.mxu0 %v14808_v55  ;;  %10068 = vmatprep.subr.bf16.mxu1 %v14563_v56  ;;  %v892_v55 = vld [vmem:[%s22314_s1 + $0x1948] sm:$0xff] }
 0x1c1   :  { %9658 = vmatprep.subr.bf16.mxu0 %v14817_v59  ;;  %v896_v56 = vld [vmem:[%s22314_s1 + $0x1968] sm:$0xff]  ;;  %v1147_v59 = vld [vmem:[%s22314_s1 + $0x2140] sm:$0xff] }
 0x1c2   :  { %v14611_v1 = vcombine.high %v892_v55, %v896_v56  ;;  %v14610_v9 = vcombine.low %v892_v55, %v896_v56  ;;  %v14864_v10 = vcombine.low %v1147_v59, %v1151_v62 }
 0x1c3   :  { %10069 = vmatpush1.bf16.msra.mxu1 %v14562_v3  ;;  %v14865_v3 = vcombine.high %v1147_v59, %v1151_v62  ;;  %v940_v62 = vld [vmem:[%s22314_s1 + $0x1ac8] sm:$0xff] }
 0x1c4   :  { %9659 = vmatpush1.bf16.msra.mxu0 %v14816_v4  ;;  %10079 = vmatprep.subr.bf16.mxu1 %v14571_v5  ;;  %v900_v4 = vld [vmem:[%s22314_s1 + $0x1988] sm:$0xff] }
 0x1c5   :  { %9669 = vmatprep.subr.bf16.mxu0 %v14825_v8  ;;  %v904_v5 = vld [vmem:[%s22314_s1 + $0x19a8] sm:$0xff]  ;;  %v1159_v8 = vld [vmem:[%s22314_s1 + $0x21a0] sm:$0xff] }
 0x1c6   :  { %10071 = vmatmul.mubr.bf16.vlgmr.msra.gmra.mrb[4].mxu1 %v17482_v50  ;;  %v14619_v11 = vcombine.high %v900_v4, %v904_v5  ;;  %v14873_v12 = vcombine.high %v1155_v7, %v1159_v8  ;;  %v14872_v23 = vcombine.low %v1155_v7, %v1159_v8  ;;  %v948_v8 = vld [vmem:[%s22314_s1 + $0x1b08] sm:$0xff] }
 0x1c7   :  { %9661 = vmatmul.mubr.bf16.vlgmr.msra.gmra.mrb[0].mxu0 %v17894_v17  ;;  %10080 = vmatpush1.bf16.msra.mxu1 %v14570_v15  ;;  %v912_v15 = vld [vmem:[%s22314_s1 + $0x19e8] sm:$0xff] }
 0x1c8   :  { %9670 = vmatpush1.bf16.msra.mxu0 %v14824_v18  ;;  %10081 = vmatprep.subr.bf16.mxu1 %v14579_v19  ;;  %v1163_v18 = vld [vmem:[%s22314_s1 + $0x21c0] sm:$0xff]  ;;  %v14627_v24 = vcombine.high %v908_v14, %v912_v15 }
 0x1c9   :  { %9671 = vmatprep.subr.bf16.mxu0 %v14833_v22  ;;  %9701 = vmatprep.mubr.bf16.mxu0 %v17902_v25  ;;  %v1167_v19 = vld [vmem:[%s22314_s1 + $0x21e0] sm:$0xff]  ;;  %v14618_v22 = vcombine.low %v900_v4, %v904_v5 }
 0x1ca   :  { %10111 = vmatprep.mubr.bf16.mxu1 %v17490_v58  ;;  %v14881_v26 = vcombine.high %v1163_v18, %v1167_v19  ;;  %v14880_v34 = vcombine.low %v1163_v18, %v1167_v19  ;;  %v956_v19 = vld [vmem:[%s22314_s1 + $0x1b48] sm:$0xff] }
 0x1cb   :  { %10082 = vmatpush1.bf16.msra.mxu1 %v14578_v29  ;;  %v920_v29 = vld [vmem:[%s22314_s1 + $0x1a28] sm:$0xff] }
 0x1cc   :  { %9672 = vmatpush1.bf16.msra.mxu0 %v14832_v30  ;;  %10083 = vmatprep.subr.bf16.mxu1 %v14587_v32  ;;  %v1171_v30 = vld [vmem:[%s22314_s1 + $0x2200] sm:$0xff]  ;;  %v14635_v36 = vcombine.high %v916_v28, %v920_v29 }
 0x1cd   :  { %9673 = vmatprep.subr.bf16.mxu0 %v14841_v33  ;;  %v1175_v32 = vld [vmem:[%s22314_s1 + $0x2220] sm:$0xff]  ;;  %v14626_v33 = vcombine.low %v908_v14, %v912_v15 }
 0x1ce   :  { %v14889_v37 = vcombine.high %v1171_v30, %v1175_v32  ;;  %v14888_v45 = vcombine.low %v1171_v30, %v1175_v32  ;;  %v964_v32 = vld [vmem:[%s22314_s1 + $0x1b88] sm:$0xff] }
 0x1cf   :  { %10084 = vmatpush1.bf16.msra.mxu1 %v14586_v40  ;;  %v928_v40 = vld [vmem:[%s22314_s1 + $0x1a68] sm:$0xff] }
 0x1d0   :  { %9674 = vmatpush1.bf16.msra.mxu0 %v14840_v42  ;;  %10085 = vmatprep.subr.bf16.mxu1 %v14595_v43  ;;  %v1179_v42 = vld [vmem:[%s22314_s1 + $0x2240] sm:$0xff]  ;;  %v14643_v46 = vcombine.high %v924_v39, %v928_v40 }
 0x1d1   :  { %9675 = vmatprep.subr.bf16.mxu0 %v14849_v44  ;;  %v1183_v43 = vld [vmem:[%s22314_s1 + $0x2260] sm:$0xff]  ;;  %v14634_v44 = vcombine.low %v916_v28, %v920_v29 }
 0x1d2   :  { %v14897_v47 = vcombine.high %v1179_v42, %v1183_v43  ;;  %v14896_v55 = vcombine.low %v1179_v42, %v1183_v43  ;;  %v972_v43 = vld [vmem:[%s22314_s1 + $0x1bc8] sm:$0xff] }
 0x1d3   :  { %10086 = vmatpush1.bf16.msra.mxu1 %v14594_v49  ;;  %v936_v49 = vld [vmem:[%s22314_s1 + $0x1aa8] sm:$0xff] }
 0x1d4   :  { %9676 = vmatpush1.bf16.msra.mxu0 %v14848_v51  ;;  %10087 = vmatprep.subr.bf16.mxu1 %v14603_v52  ;;  %v1187_v51 = vld [vmem:[%s22314_s1 + $0x2280] sm:$0xff]  ;;  %v14651_v56 = vcombine.high %v932_v48, %v936_v49 }
 0x1d5   :  { %9677 = vmatprep.subr.bf16.mxu0 %v14857_v54  ;;  %v1191_v52 = vld [vmem:[%s22314_s1 + $0x22a0] sm:$0xff]  ;;  %v14642_v54 = vcombine.low %v924_v39, %v928_v40 }
 0x1d6   :  { %v14905_v59 = vcombine.high %v1187_v51, %v1191_v52  ;;  %v14904_v4 = vcombine.low %v1187_v51, %v1191_v52  ;;  %v980_v52 = vld [vmem:[%s22314_s1 + $0x1c08] sm:$0xff] }
 0x1d7   :  { %10088 = vmatpush1.bf16.msra.mxu1 %v14602_v63  ;;  %v944_v63 = vld [vmem:[%s22314_s1 + $0x1ae8] sm:$0xff] }
 0x1d8   :  { %9678 = vmatpush1.bf16.msra.mxu0 %v14856_v0  ;;  %10089 = vmatprep.subr.bf16.mxu1 %v14611_v1  ;;  %v1195_v0 = vld [vmem:[%s22314_s1 + $0x22c0] sm:$0xff]  ;;  %v14659_v5 = vcombine.high %v940_v62, %v944_v63 }
 0x1d9   :  { %9679 = vmatprep.subr.bf16.mxu0 %v14865_v3  ;;  %v1199_v1 = vld [vmem:[%s22314_s1 + $0x22e0] sm:$0xff]  ;;  %v14650_v3 = vcombine.low %v932_v48, %v936_v49 }
 0x1da   :  { %v14913_v7 = vcombine.high %v1195_v0, %v1199_v1  ;;  %v14912_v14 = vcombine.low %v1195_v0, %v1199_v1  ;;  %v51_v0 = vld [vmem:[%s22315_s0 + $0x80] sm:$0xff] }
 0x1db   :  { %10090 = vmatpush1.bf16.msra.mxu1 %v14610_v9  ;;  %v952_v9 = vld [vmem:[%s22314_s1 + $0x1b28] sm:$0xff] }
 0x1dc   :  { %9680 = vmatpush1.bf16.msra.mxu0 %v14864_v10  ;;  %10091 = vmatprep.subr.bf16.mxu1 %v14619_v11  ;;  %v1203_v10 = vld [vmem:[%s22314_s1 + $0x2300] sm:$0xff]  ;;  %v14667_v15 = vcombine.high %v948_v8, %v952_v9 }
 0x1dd   :  { %9681 = vmatprep.subr.bf16.mxu0 %v14873_v12  ;;  %v1207_v11 = vld [vmem:[%s22314_s1 + $0x2320] sm:$0xff]  ;;  %v14658_v12 = vcombine.low %v940_v62, %v944_v63 }
 0x1de   :  { %v14921_v18 = vcombine.high %v1203_v10, %v1207_v11  ;;  %v14920_v28 = vcombine.low %v1203_v10, %v1207_v11  ;;  %v18100_v10 = vpack.c.bf16 %v51_v0, %v51_v0  ;;  %v1028_v0 = vld [vmem:[%s22314_s1 + $0x1d88] sm:$0xff] }
 0x1df   :  { %10092 = vmatpush1.bf16.msra.mxu1 %v14618_v22  ;;  %v960_v22 = vld [vmem:[%s22314_s1 + $0x1b68] sm:$0xff] }
 0x1e0   :  { %9682 = vmatpush1.bf16.msra.mxu0 %v14872_v23  ;;  %10093 = vmatprep.subr.bf16.mxu1 %v14627_v24  ;;  %v1211_v23 = vld [vmem:[%s22314_s1 + $0x2340] sm:$0xff]  ;;  %v14675_v29 = vcombine.high %v956_v19, %v960_v22 }
 0x1e1   :  { %9683 = vmatprep.subr.bf16.mxu0 %v14881_v26  ;;  %v1215_v24 = vld [vmem:[%s22314_s1 + $0x2360] sm:$0xff]  ;;  %v14666_v26 = vcombine.low %v948_v8, %v952_v9  ;;  %v54_v8 = vld [vmem:[%s22315_s0 + $0x98] sm:$0xff] }
 0x1e2   :  { %v14929_v30 = vcombine.high %v1211_v23, %v1215_v24  ;;  %v14928_v39 = vcombine.low %v1211_v23, %v1215_v24  ;;  %v1255_v23 = vld [vmem:[%s22314_s1 + $0x24a0] sm:$0xff] }
 0x1e3   :  { %10094 = vmatpush1.bf16.msra.mxu1 %v14626_v33  ;;  %v968_v33 = vld [vmem:[%s22314_s1 + $0x1ba8] sm:$0xff] }
 0x1e4   :  { %9684 = vmatpush1.bf16.msra.mxu0 %v14880_v34  ;;  %10095 = vmatprep.subr.bf16.mxu1 %v14635_v36  ;;  %v1219_v34 = vld [vmem:[%s22314_s1 + $0x2380] sm:$0xff]  ;;  %v14683_v40 = vcombine.high %v964_v32, %v968_v33 }
 0x1e5   :  { %9685 = vmatprep.subr.bf16.mxu0 %v14889_v37  ;;  %v1223_v36 = vld [vmem:[%s22314_s1 + $0x23a0] sm:$0xff]  ;;  %v14674_v37 = vcombine.low %v956_v19, %v960_v22  ;;  %v18108_v19 = vpack.c.bf16 %v54_v8, %v54_v8 }
 0x1e6   :  { %v14937_v42 = vcombine.high %v1219_v34, %v1223_v36  ;;  %v14936_v48 = vcombine.low %v1219_v34, %v1223_v36  ;;  %v1251_v22 = vld [vmem:[%s22314_s1 + $0x2480] sm:$0xff] }
 0x1e7   :  { %10096 = vmatpush1.bf16.msra.mxu1 %v14634_v44  ;;  %v976_v44 = vld [vmem:[%s22314_s1 + $0x1be8] sm:$0xff]  ;;  %v1263_v34 = vld [vmem:[%s22314_s1 + $0x24e0] sm:$0xff] }
 0x1e8   :  { %9686 = vmatpush1.bf16.msra.mxu0 %v14888_v45  ;;  %10097 = vmatprep.subr.bf16.mxu1 %v14643_v46  ;;  %v1227_v45 = vld [vmem:[%s22314_s1 + $0x23c0] sm:$0xff]  ;;  %v14691_v49 = vcombine.high %v972_v43, %v976_v44 }
 0x1e9   :  { %9687 = vmatprep.subr.bf16.mxu0 %v14897_v47  ;;  %v1231_v46 = vld [vmem:[%s22314_s1 + $0x23e0] sm:$0xff]  ;;  %v14682_v47 = vcombine.low %v964_v32, %v968_v33  ;;  %v1008_v32 = vld [vmem:[%s22314_s1 + $0x1ce8] sm:$0xff] }
 0x1ea   :  { %v14945_v51 = vcombine.high %v1227_v45, %v1231_v46  ;;  %v14944_v62 = vcombine.low %v1227_v45, %v1231_v46  ;;  %v1259_v33 = vld [vmem:[%s22314_s1 + $0x24c0] sm:$0xff] }
 0x1eb   :  { %10098 = vmatpush1.bf16.msra.mxu1 %v14642_v54  ;;  %v984_v54 = vld [vmem:[%s22314_s1 + $0x1c28] sm:$0xff]  ;;  %v1271_v45 = vld [vmem:[%s22314_s1 + $0x2520] sm:$0xff] }
 0x1ec   :  { %9688 = vmatpush1.bf16.msra.mxu0 %v14896_v55  ;;  %10099 = vmatprep.subr.bf16.mxu1 %v14651_v56  ;;  %v1235_v55 = vld [vmem:[%s22314_s1 + $0x2400] sm:$0xff]  ;;  %v14699_v63 = vcombine.high %v980_v52, %v984_v54  ;;  %v14698_v9 = vcombine.low %v980_v52, %v984_v54  ;;  %v1024_v52 = vld [vmem:[%s22314_s1 + $0x1d68] sm:$0xff] }
 0x1ed   :  { %9689 = vmatprep.subr.bf16.mxu0 %v14905_v59  ;;  %v1239_v56 = vld [vmem:[%s22314_s1 + $0x2420] sm:$0xff]  ;;  %v14690_v59 = vcombine.low %v972_v43, %v976_v44  ;;  %v1016_v43 = vld [vmem:[%s22314_s1 + $0x1d28] sm:$0xff] }
 0x1ee   :  { %v14953_v1 = vcombine.high %v1235_v55, %v1239_v56  ;;  %v14952_v11 = vcombine.low %v1235_v55, %v1239_v56  ;;  %v1267_v44 = vld [vmem:[%s22314_s1 + $0x2500] sm:$0xff] }
 0x1ef   :  { %10100 = vmatpush1.bf16.msra.mxu1 %v14650_v3  ;;  %v988_v3 = vld [vmem:[%s22314_s1 + $0x1c48] sm:$0xff]  ;;  %v1275_v54 = vld [vmem:[%s22314_s1 + $0x2540] sm:$0xff] }
 0x1f0   :  { %9690 = vmatpush1.bf16.msra.mxu0 %v14904_v4  ;;  %10101 = vmatprep.subr.bf16.mxu1 %v14659_v5  ;;  %v992_v4 = vld [vmem:[%s22314_s1 + $0x1c68] sm:$0xff]  ;;  %v1243_v5 = vld [vmem:[%s22314_s1 + $0x2440] sm:$0xff] }
 0x1f1   :  { %9691 = vmatprep.subr.bf16.mxu0 %v14913_v7  ;;  %v1247_v7 = vld [vmem:[%s22314_s1 + $0x2460] sm:$0xff]  ;;  %v14706_v24 = vcombine.low %v988_v3, %v992_v4 }
 0x1f2   :  { %v1279_v55 = vld [vmem:[%s22314_s1 + $0x2560] sm:$0xff] }
 0x1f3   :  { %10102 = vmatpush1.bf16.msra.mxu1 %v14658_v12  ;;  %v14707_v12 = vcombine.high %v988_v3, %v992_v4  ;;  %v1283_v3 = vld [vmem:[%s22314_s1 + $0x2580] sm:$0xff] }
 0x1f4   :  { %9692 = vmatpush1.bf16.msra.mxu0 %v14912_v14  ;;  %10103 = vmatprep.subr.bf16.mxu1 %v14667_v15  ;;  %v14961_v14 = vcombine.high %v1243_v5, %v1247_v7  ;;  %v996_v15 = vld [vmem:[%s22314_s1 + $0x1c88] sm:$0xff]  ;;  %v1287_v4 = vld [vmem:[%s22314_s1 + $0x25a0] sm:$0xff] }
 0x1f5   :  { %9693 = vmatprep.subr.bf16.mxu0 %v14921_v18  ;;  %v1000_v18 = vld [vmem:[%s22314_s1 + $0x1ca8] sm:$0xff] }
 0x1f6   :  { %v14714_v36 = vcombine.low %v996_v15, %v1000_v18 }
 0x1f7   :  { %10104 = vmatpush1.bf16.msra.mxu1 %v14666_v26  ;;  %v14960_v26 = vcombine.low %v1243_v5, %v1247_v7  ;;  %v14992_v7 = vcombine.low %v1275_v54, %v1279_v55 }
 0x1f8   :  { %9694 = vmatpush1.bf16.msra.mxu0 %v14920_v28  ;;  %10105 = vmatprep.subr.bf16.mxu1 %v14675_v29  ;;  %v14715_v28 = vcombine.high %v996_v15, %v1000_v18  ;;  %v14969_v29 = vcombine.high %v1251_v22, %v1255_v23  ;;  %v1295_v15 = vld [vmem:[%s22314_s1 + $0x25e0] sm:$0xff] }
 0x1f9   :  { %9695 = vmatprep.subr.bf16.mxu0 %v14929_v30  ;;  %v1004_v30 = vld [vmem:[%s22314_s1 + $0x1cc8] sm:$0xff] }
 0x1fa   :  { %v14722_v46 = vcombine.low %v1004_v30, %v1008_v32 }
 0x1fb   :  { %10106 = vmatpush1.bf16.msra.mxu1 %v14674_v37  ;;  %v14968_v37 = vcombine.low %v1251_v22, %v1255_v23  ;;  %v15000_v22 = vcombine.low %v1283_v3, %v1287_v4 }
 0x1fc   :  { %9696 = vmatpush1.bf16.msra.mxu0 %v14928_v39  ;;  %10107 = vmatprep.subr.bf16.mxu1 %v14683_v40  ;;  %v14723_v39 = vcombine.high %v1004_v30, %v1008_v32  ;;  %v14977_v40 = vcombine.high %v1259_v33, %v1263_v34  ;;  %v1303_v30 = vld [vmem:[%s22314_s1 + $0x2620] sm:$0xff] }
 0x1fd   :  { %9697 = vmatprep.subr.bf16.mxu0 %v14937_v42  ;;  %v1012_v42 = vld [vmem:[%s22314_s1 + $0x1d08] sm:$0xff] }
 0x1fe   :  { %v14730_v56 = vcombine.low %v1012_v42, %v1016_v43 }
 0x1ff   :  { %10108 = vmatpush1.bf16.msra.mxu1 %v14682_v47  ;;  %v14976_v47 = vcombine.low %v1259_v33, %v1263_v34 }
 0x200   :  { %9698 = vmatpush1.bf16.msra.mxu0 %v14936_v48  ;;  %10109 = vmatprep.subr.bf16.mxu1 %v14691_v49  ;;  %v14731_v48 = vcombine.high %v1012_v42, %v1016_v43  ;;  %v14985_v49 = vcombine.high %v1267_v44, %v1271_v45  ;;  %v1311_v42 = vld [vmem:[%s22314_s1 + $0x2660] sm:$0xff] }
 0x201   :  { %9699 = vmatprep.subr.bf16.mxu0 %v14945_v51  ;;  %v1020_v51 = vld [vmem:[%s22314_s1 + $0x1d48] sm:$0xff] }
 0x202   :  { %v14738_v5 = vcombine.low %v1020_v51, %v1024_v52 }
 0x203   :  { %10110 = vmatpush1.bf16.msra.mxu1 %v14690_v59  ;;  %v14984_v59 = vcombine.low %v1267_v44, %v1271_v45 }
 0x204   :  { %9700 = vmatpush1.bf16.msra.mxu0 %v14944_v62  ;;  %10120 = vmatprep.subr.bf16.mxu1 %v14699_v63  ;;  %v14739_v62 = vcombine.high %v1020_v51, %v1024_v52  ;;  %v14993_v63 = vcombine.high %v1275_v54, %v1279_v55  ;;  %v1319_v51 = vld [vmem:[%s22314_s1 + $0x26a0] sm:$0xff] }
 0x205   :  { %9710 = vmatprep.subr.bf16.mxu0 %v14953_v1  ;;  %v1032_v1 = vld [vmem:[%s22314_s1 + $0x1da8] sm:$0xff] }
 0x206   :  { %10112 = vmatmul.mubr.bf16.vlgmr.msra.gmra.mrb[4].mxu1 %v17688_v31  ;;  %v14747_v8 = vcombine.high %v1028_v0, %v1032_v1  ;;  %v14746_v18 = vcombine.low %v1028_v0, %v1032_v1  ;;  %v1327_v0 = vld [vmem:[%s22314_s1 + $0x26e0] sm:$0xff] }
 0x207   :  { %9702 = vmatmul.mubr.bf16.vlgmr.msra.gmra.mrb[0].mxu0 %v18100_v10  ;;  %10121 = vmatpush1.bf16.msra.mxu1 %v14698_v9  ;;  %v15001_v9 = vcombine.high %v1283_v3, %v1287_v4 }
 0x208   :  { %9711 = vmatpush1.bf16.msra.mxu0 %v14952_v11  ;;  %10122 = vmatprep.subr.bf16.mxu1 %v14707_v12  ;;  %v1036_v11 = vld [vmem:[%s22314_s1 + $0x1dc8] sm:$0xff] }
 0x209   :  { %9712 = vmatprep.subr.bf16.mxu0 %v14961_v14  ;;  %9742 = vmatprep.mubr.bf16.mxu0 %v18108_v19  ;;  %v1040_v12 = vld [vmem:[%s22314_s1 + $0x1de8] sm:$0xff]  ;;  %v1291_v14 = vld [vmem:[%s22314_s1 + $0x25c0] sm:$0xff] }
 0x20a   :  { %10152 = vmatprep.mubr.bf16.mxu1 %v17696_v38  ;;  %v14755_v23 = vcombine.high %v1036_v11, %v1040_v12  ;;  %v14754_v32 = vcombine.low %v1036_v11, %v1040_v12  ;;  %v15008_v33 = vcombine.low %v1291_v14, %v1295_v15  ;;  %v1335_v11 = vld [vmem:[%s22314_s1 + $0x2720] sm:$0xff] }
 0x20b   :  { %10123 = vmatpush1.bf16.msra.mxu1 %v14706_v24  ;;  %v15009_v24 = vcombine.high %v1291_v14, %v1295_v15 }
 0x20c   :  { %9713 = vmatpush1.bf16.msra.mxu0 %v14960_v26  ;;  %10124 = vmatprep.subr.bf16.mxu1 %v14715_v28  ;;  %v1044_v26 = vld [vmem:[%s22314_s1 + $0x1e08] sm:$0xff] }
 0x20d   :  { %9714 = vmatprep.subr.bf16.mxu0 %v14969_v29  ;;  %v1048_v28 = vld [vmem:[%s22314_s1 + $0x1e28] sm:$0xff]  ;;  %v1299_v29 = vld [vmem:[%s22314_s1 + $0x2600] sm:$0xff] }
 0x20e   :  { %v14763_v34 = vcombine.high %v1044_v26, %v1048_v28  ;;  %v14762_v43 = vcombine.low %v1044_v26, %v1048_v28  ;;  %v15016_v44 = vcombine.low %v1299_v29, %v1303_v30  ;;  %v1343_v26 = vld [vmem:[%s22314_s1 + $0x2760] sm:$0xff] }
 0x20f   :  { %10125 = vmatpush1.bf16.msra.mxu1 %v14714_v36  ;;  %v15017_v36 = vcombine.high %v1299_v29, %v1303_v30 }
 0x210   :  { %9715 = vmatpush1.bf16.msra.mxu0 %v14968_v37  ;;  %10126 = vmatprep.subr.bf16.mxu1 %v14723_v39  ;;  %v1052_v37 = vld [vmem:[%s22314_s1 + $0x1e48] sm:$0xff] }
 0x211   :  { %9716 = vmatprep.subr.bf16.mxu0 %v14977_v40  ;;  %v1056_v39 = vld [vmem:[%s22314_s1 + $0x1e68] sm:$0xff]  ;;  %v1307_v40 = vld [vmem:[%s22314_s1 + $0x2640] sm:$0xff] }
 0x212   :  { %v14771_v45 = vcombine.high %v1052_v37, %v1056_v39  ;;  %v14770_v52 = vcombine.low %v1052_v37, %v1056_v39  ;;  %v15024_v54 = vcombine.low %v1307_v40, %v1311_v42  ;;  %v1351_v37 = vld [vmem:[%s22314_s1 + $0x27a0] sm:$0xff] }
 0x213   :  { %10127 = vmatpush1.bf16.msra.mxu1 %v14722_v46  ;;  %v15025_v46 = vcombine.high %v1307_v40, %v1311_v42 }
 0x214   :  { %9717 = vmatpush1.bf16.msra.mxu0 %v14976_v47  ;;  %10128 = vmatprep.subr.bf16.mxu1 %v14731_v48  ;;  %v1060_v47 = vld [vmem:[%s22314_s1 + $0x1e88] sm:$0xff] }
 0x215   :  { %9718 = vmatprep.subr.bf16.mxu0 %v14985_v49  ;;  %v1064_v48 = vld [vmem:[%s22314_s1 + $0x1ea8] sm:$0xff]  ;;  %v1315_v49 = vld [vmem:[%s22314_s1 + $0x2680] sm:$0xff] }
 0x216   :  { %v14779_v55 = vcombine.high %v1060_v47, %v1064_v48  ;;  %v14778_v1 = vcombine.low %v1060_v47, %v1064_v48  ;;  %v15032_v3 = vcombine.low %v1315_v49, %v1319_v51  ;;  %v1359_v47 = vld [vmem:[%s22314_s1 + $0x27e0] sm:$0xff] }
 0x217   :  { %10129 = vmatpush1.bf16.msra.mxu1 %v14730_v56  ;;  %v15033_v56 = vcombine.high %v1315_v49, %v1319_v51 }
 0x218   :  { %9719 = vmatpush1.bf16.msra.mxu0 %v14984_v59  ;;  %10130 = vmatprep.subr.bf16.mxu1 %v14739_v62  ;;  %v1068_v59 = vld [vmem:[%s22314_s1 + $0x1ec8] sm:$0xff] }
 0x219   :  { %9720 = vmatprep.subr.bf16.mxu0 %v14993_v63  ;;  %v1072_v62 = vld [vmem:[%s22314_s1 + $0x1ee8] sm:$0xff]  ;;  %v1323_v63 = vld [vmem:[%s22314_s1 + $0x26c0] sm:$0xff] }
 0x21a   :  { %v14787_v4 = vcombine.high %v1068_v59, %v1072_v62  ;;  %v14786_v12 = vcombine.low %v1068_v59, %v1072_v62  ;;  %v15040_v14 = vcombine.low %v1323_v63, %v1327_v0  ;;  %v1367_v59 = vld [vmem:[%s22314_s1 + $0x2820] sm:$0xff] }
 0x21b   :  { %10131 = vmatpush1.bf16.msra.mxu1 %v14738_v5  ;;  %v15041_v5 = vcombine.high %v1323_v63, %v1327_v0 }
 0x21c   :  { %9721 = vmatpush1.bf16.msra.mxu0 %v14992_v7  ;;  %10132 = vmatprep.subr.bf16.mxu1 %v14747_v8  ;;  %v1076_v7 = vld [vmem:[%s22314_s1 + $0x1f08] sm:$0xff] }
 0x21d   :  { %9722 = vmatprep.subr.bf16.mxu0 %v15001_v9  ;;  %v1080_v8 = vld [vmem:[%s22314_s1 + $0x1f28] sm:$0xff]  ;;  %v1331_v9 = vld [vmem:[%s22314_s1 + $0x2700] sm:$0xff] }
 0x21e   :  { %v14795_v15 = vcombine.high %v1076_v7, %v1080_v8  ;;  %v14794_v28 = vcombine.low %v1076_v7, %v1080_v8  ;;  %v15048_v29 = vcombine.low %v1331_v9, %v1335_v11  ;;  %v1371_v7 = vld [vmem:[%s22314_s1 + $0x2840] sm:$0xff] }
 0x21f   :  { %10133 = vmatpush1.bf16.msra.mxu1 %v14746_v18  ;;  %v15049_v18 = vcombine.high %v1331_v9, %v1335_v11  ;;  %v1375_v8 = vld [vmem:[%s22314_s1 + $0x2860] sm:$0xff]  ;;  %v56_v9 = vld [vmem:[%s22315_s0 + $0xa8] sm:$0xff] }
 0x220   :  { %9723 = vmatpush1.bf16.msra.mxu0 %v15000_v22  ;;  %10134 = vmatprep.subr.bf16.mxu1 %v14755_v23  ;;  %v1084_v22 = vld [vmem:[%s22314_s1 + $0x1f48] sm:$0xff] }
 0x221   :  { %9724 = vmatprep.subr.bf16.mxu0 %v15009_v24  ;;  %v1088_v23 = vld [vmem:[%s22314_s1 + $0x1f68] sm:$0xff]  ;;  %v1339_v24 = vld [vmem:[%s22314_s1 + $0x2740] sm:$0xff] }
 0x222   :  { %v14803_v30 = vcombine.high %v1084_v22, %v1088_v23  ;;  %v14802_v39 = vcombine.low %v1084_v22, %v1088_v23  ;;  %v15056_v40 = vcombine.low %v1339_v24, %v1343_v26  ;;  %v1124_v22 = vld [vmem:[%s22314_s1 + $0x2088] sm:$0xff] }
 0x223   :  { %10135 = vmatpush1.bf16.msra.mxu1 %v14754_v32  ;;  %v15057_v32 = vcombine.high %v1339_v24, %v1343_v26  ;;  %v1128_v23 = vld [vmem:[%s22314_s1 + $0x20a8] sm:$0xff]  ;;  %v18314_v24 = vpack.c.bf16 %v56_v9, %v56_v9  ;;  %v1379_v26 = vld [vmem:[%s22314_s1 + $0x2880] sm:$0xff] }
 0x224   :  { %9725 = vmatpush1.bf16.msra.mxu0 %v15008_v33  ;;  %10136 = vmatprep.subr.bf16.mxu1 %v14763_v34  ;;  %v1092_v33 = vld [vmem:[%s22314_s1 + $0x1f88] sm:$0xff] }
 0x225   :  { %9726 = vmatprep.subr.bf16.mxu0 %v15017_v36  ;;  %v1096_v34 = vld [vmem:[%s22314_s1 + $0x1fa8] sm:$0xff]  ;;  %v1347_v36 = vld [vmem:[%s22314_s1 + $0x2780] sm:$0xff] }
 0x226   :  { %v14811_v42 = vcombine.high %v1092_v33, %v1096_v34  ;;  %v14810_v48 = vcombine.low %v1092_v33, %v1096_v34  ;;  %v15064_v49 = vcombine.low %v1347_v36, %v1351_v37  ;;  %v1132_v34 = vld [vmem:[%s22314_s1 + $0x20c8] sm:$0xff] }
 0x227   :  { %10137 = vmatpush1.bf16.msra.mxu1 %v14762_v43  ;;  %v15065_v43 = vcombine.high %v1347_v36, %v1351_v37  ;;  %v1136_v36 = vld [vmem:[%s22314_s1 + $0x20e8] sm:$0xff]  ;;  %v1387_v37 = vld [vmem:[%s22314_s1 + $0x28c0] sm:$0xff] }
 0x228   :  { %9727 = vmatpush1.bf16.msra.mxu0 %v15016_v44  ;;  %10138 = vmatprep.subr.bf16.mxu1 %v14771_v45  ;;  %v1100_v44 = vld [vmem:[%s22314_s1 + $0x1fc8] sm:$0xff] }
 0x229   :  { %9728 = vmatprep.subr.bf16.mxu0 %v15025_v46  ;;  %v1104_v45 = vld [vmem:[%s22314_s1 + $0x1fe8] sm:$0xff]  ;;  %v1355_v46 = vld [vmem:[%s22314_s1 + $0x27c0] sm:$0xff] }
 0x22a   :  { %v14819_v51 = vcombine.high %v1100_v44, %v1104_v45  ;;  %v14818_v62 = vcombine.low %v1100_v44, %v1104_v45  ;;  %v15072_v63 = vcombine.low %v1355_v46, %v1359_v47  ;;  %v1140_v45 = vld [vmem:[%s22314_s1 + $0x2108] sm:$0xff] }
 0x22b   :  { %10139 = vmatpush1.bf16.msra.mxu1 %v14770_v52  ;;  %v15073_v52 = vcombine.high %v1355_v46, %v1359_v47  ;;  %v1144_v46 = vld [vmem:[%s22314_s1 + $0x2128] sm:$0xff]  ;;  %v1395_v47 = vld [vmem:[%s22314_s1 + $0x2900] sm:$0xff] }
 0x22c   :  { %9729 = vmatpush1.bf16.msra.mxu0 %v15024_v54  ;;  %10140 = vmatprep.subr.bf16.mxu1 %v14779_v55  ;;  %v1108_v54 = vld [vmem:[%s22314_s1 + $0x2008] sm:$0xff] }
 0x22d   :  { %9730 = vmatprep.subr.bf16.mxu0 %v15033_v56  ;;  %v1112_v55 = vld [vmem:[%s22314_s1 + $0x2028] sm:$0xff]  ;;  %v1363_v56 = vld [vmem:[%s22314_s1 + $0x2800] sm:$0xff] }
 0x22e   :  { %v14827_v0 = vcombine.high %v1108_v54, %v1112_v55  ;;  %v14826_v11 = vcombine.low %v1108_v54, %v1112_v55  ;;  %v1148_v55 = vld [vmem:[%s22314_s1 + $0x2148] sm:$0xff] }
 0x22f   :  { %10141 = vmatpush1.bf16.msra.mxu1 %v14778_v1  ;;  %v53_v1 = vld [vmem:[%s22315_s0 + $0x90] sm:$0xff] }
 0x230   :  { %9731 = vmatpush1.bf16.msra.mxu0 %v15032_v3  ;;  %10142 = vmatprep.subr.bf16.mxu1 %v14787_v4  ;;  %v15081_v3 = vcombine.high %v1363_v56, %v1367_v59  ;;  %v1116_v4 = vld [vmem:[%s22314_s1 + $0x2048] sm:$0xff] }
 0x231   :  { %9732 = vmatprep.subr.bf16.mxu0 %v15041_v5  ;;  %v1120_v5 = vld [vmem:[%s22314_s1 + $0x2068] sm:$0xff] }
 0x233   :  { %10143 = vmatpush1.bf16.msra.mxu1 %v14786_v12  ;;  %v18306_v12 = vpack.c.bf16 %v53_v1, %v53_v1 }
 0x234   :  { %9733 = vmatpush1.bf16.msra.mxu0 %v15040_v14  ;;  %10144 = vmatprep.subr.bf16.mxu1 %v14795_v15  ;;  %v15080_v14 = vcombine.low %v1363_v56, %v1367_v59  ;;  %v14835_v15 = vcombine.high %v1116_v4, %v1120_v5  ;;  %v1152_v56 = vld [vmem:[%s22314_s1 + $0x2168] sm:$0xff]  ;;  %v1403_v59 = vld [vmem:[%s22314_s1 + $0x2940] sm:$0xff] }
 0x235   :  { %9734 = vmatprep.subr.bf16.mxu0 %v15049_v18  ;;  %v15089_v18 = vcombine.high %v1371_v7, %v1375_v8  ;;  %v14867_v1 = vcombine.high %v1148_v55, %v1152_v56  ;;  %v14866_v9 = vcombine.low %v1148_v55, %v1152_v56  ;;  %v1192_v55 = vld [vmem:[%s22314_s1 + $0x22a8] sm:$0xff]  ;;  %v1443_v56 = vld [vmem:[%s22314_s1 + $0x2a80] sm:$0xff] }
 0x237   :  { %10145 = vmatpush1.bf16.msra.mxu1 %v14794_v28  ;;  %v1383_v28 = vld [vmem:[%s22314_s1 + $0x28a0] sm:$0xff] }
 0x238   :  { %9735 = vmatpush1.bf16.msra.mxu0 %v15048_v29  ;;  %10146 = vmatprep.subr.bf16.mxu1 %v14803_v30  ;;  %v14834_v29 = vcombine.low %v1116_v4, %v1120_v5  ;;  %v15088_v30 = vcombine.low %v1371_v7, %v1375_v8  ;;  %v15097_v33 = vcombine.high %v1379_v26, %v1383_v28  ;;  %v1156_v4 = vld [vmem:[%s22314_s1 + $0x2188] sm:$0xff]  ;;  %v1411_v7 = vld [vmem:[%s22314_s1 + $0x2980] sm:$0xff] }
 0x239   :  { %9736 = vmatprep.subr.bf16.mxu0 %v15057_v32  ;;  %v14843_v32 = vcombine.high %v1124_v22, %v1128_v23  ;;  %v1160_v5 = vld [vmem:[%s22314_s1 + $0x21a8] sm:$0xff]  ;;  %v1415_v8 = vld [vmem:[%s22314_s1 + $0x29a0] sm:$0xff] }
 0x23b   :  { %10147 = vmatpush1.bf16.msra.mxu1 %v14802_v39  ;;  %v1391_v39 = vld [vmem:[%s22314_s1 + $0x28e0] sm:$0xff] }
 0x23c   :  { %9737 = vmatpush1.bf16.msra.mxu0 %v15056_v40  ;;  %10148 = vmatprep.subr.bf16.mxu1 %v14811_v42  ;;  %v14842_v40 = vcombine.low %v1124_v22, %v1128_v23  ;;  %v15096_v42 = vcombine.low %v1379_v26, %v1383_v28  ;;  %v15105_v44 = vcombine.high %v1387_v37, %v1391_v39  ;;  %v1168_v22 = vld [vmem:[%s22314_s1 + $0x21e8] sm:$0xff]  ;;  %v1419_v23 = vld [vmem:[%s22314_s1 + $0x29c0] sm:$0xff] }
 0x23d   :  { %9738 = vmatprep.subr.bf16.mxu0 %v15065_v43  ;;  %v14851_v43 = vcombine.high %v1132_v34, %v1136_v36  ;;  %v1423_v26 = vld [vmem:[%s22314_s1 + $0x29e0] sm:$0xff]  ;;  %v14874_v28 = vcombine.low %v1156_v4, %v1160_v5 }
 0x23f   :  { %10149 = vmatpush1.bf16.msra.mxu1 %v14810_v48  ;;  %v1399_v48 = vld [vmem:[%s22314_s1 + $0x2920] sm:$0xff] }
 0x240   :  { %9739 = vmatpush1.bf16.msra.mxu0 %v15064_v49  ;;  %10150 = vmatprep.subr.bf16.mxu1 %v14819_v51  ;;  %v14850_v49 = vcombine.low %v1132_v34, %v1136_v36  ;;  %v15104_v51 = vcombine.low %v1387_v37, %v1391_v39  ;;  %v15113_v54 = vcombine.high %v1395_v47, %v1399_v48  ;;  %v1176_v34 = vld [vmem:[%s22314_s1 + $0x2228] sm:$0xff]  ;;  %v1427_v36 = vld [vmem:[%s22314_s1 + $0x2a00] sm:$0xff] }
 0x241   :  { %9740 = vmatprep.subr.bf16.mxu0 %v15073_v52  ;;  %v14859_v52 = vcombine.high %v1140_v45, %v1144_v46  ;;  %v1431_v37 = vld [vmem:[%s22314_s1 + $0x2a20] sm:$0xff] }
 0x243   :  { %10151 = vmatpush1.bf16.msra.mxu1 %v14818_v62  ;;  %v1407_v62 = vld [vmem:[%s22314_s1 + $0x2960] sm:$0xff] }
 0x244   :  { %9741 = vmatpush1.bf16.msra.mxu0 %v15072_v63  ;;  %10161 = vmatprep.subr.bf16.mxu1 %v14827_v0  ;;  %v14858_v63 = vcombine.low %v1140_v45, %v1144_v46  ;;  %v15112_v0 = vcombine.low %v1395_v47, %v1399_v48  ;;  %v1184_v45 = vld [vmem:[%s22314_s1 + $0x2268] sm:$0xff]  ;;  %v1435_v46 = vld [vmem:[%s22314_s1 + $0x2a40] sm:$0xff] }
 0x245   :  { %9751 = vmatprep.subr.bf16.mxu0 %v15081_v3  ;;  %v15121_v3 = vcombine.high %v1403_v59, %v1407_v62  ;;  %v1439_v47 = vld [vmem:[%s22314_s1 + $0x2a60] sm:$0xff] }
 0x246   :  { %10153 = vmatmul.mubr.bf16.vlgmr.msra.gmra.mrb[4].mxu1 %v17894_v17 }
 0x247   :  { %9743 = vmatmul.mubr.bf16.vlgmr.msra.gmra.mrb[0].mxu0 %v18306_v12  ;;  %10162 = vmatpush1.bf16.msra.mxu1 %v14826_v11  ;;  %v15120_v11 = vcombine.low %v1403_v59, %v1407_v62  ;;  %v1447_v59 = vld [vmem:[%s22314_s1 + $0x2aa0] sm:$0xff] }
 0x248   :  { %9752 = vmatpush1.bf16.msra.mxu0 %v15080_v14  ;;  %10163 = vmatprep.subr.bf16.mxu1 %v14835_v15  ;;  %v14875_v14 = vcombine.high %v1156_v4, %v1160_v5  ;;  %v15129_v15 = vcombine.high %v1411_v7, %v1415_v8  ;;  %v1200_v4 = vld [vmem:[%s22314_s1 + $0x22e8] sm:$0xff]  ;;  %v1451_v5 = vld [vmem:[%s22314_s1 + $0x2ac0] sm:$0xff] }
 0x249   :  { %9753 = vmatprep.subr.bf16.mxu0 %v15089_v18  ;;  %9783 = vmatprep.mubr.bf16.mxu0 %v18314_v24  ;;  %v1164_v18 = vld [vmem:[%s22314_s1 + $0x21c8] sm:$0xff] }
 0x24a   :  { %10193 = vmatprep.mubr.bf16.mxu1 %v17902_v25  ;;  %v14882_v39 = vcombine.low %v1164_v18, %v1168_v22 }
 0x24b   :  { %10164 = vmatpush1.bf16.msra.mxu1 %v14834_v29  ;;  %v15128_v29 = vcombine.low %v1411_v7, %v1415_v8  ;;  %v1455_v7 = vld [vmem:[%s22314_s1 + $0x2ae0] sm:$0xff] }
 0x24c   :  { %9754 = vmatpush1.bf16.msra.mxu0 %v15088_v30  ;;  %10165 = vmatprep.subr.bf16.mxu1 %v14843_v32  ;;  %v14883_v30 = vcombine.high %v1164_v18, %v1168_v22  ;;  %v15137_v32 = vcombine.high %v1419_v23, %v1423_v26  ;;  %v1208_v18 = vld [vmem:[%s22314_s1 + $0x2328] sm:$0xff]  ;;  %v1459_v22 = vld [vmem:[%s22314_s1 + $0x2b00] sm:$0xff] }
 0x24d   :  { %9755 = vmatprep.subr.bf16.mxu0 %v15097_v33  ;;  %v1172_v33 = vld [vmem:[%s22314_s1 + $0x2208] sm:$0xff] }
 0x24e   :  { %v14890_v48 = vcombine.low %v1172_v33, %v1176_v34 }
 0x24f   :  { %10166 = vmatpush1.bf16.msra.mxu1 %v14842_v40  ;;  %v15136_v40 = vcombine.low %v1419_v23, %v1423_v26  ;;  %v1463_v23 = vld [vmem:[%s22314_s1 + $0x2b20] sm:$0xff] }
 0x250   :  { %9756 = vmatpush1.bf16.msra.mxu0 %v15096_v42  ;;  %10167 = vmatprep.subr.bf16.mxu1 %v14851_v43  ;;  %v14891_v42 = vcombine.high %v1172_v33, %v1176_v34  ;;  %v15145_v43 = vcombine.high %v1427_v36, %v1431_v37  ;;  %v1216_v33 = vld [vmem:[%s22314_s1 + $0x2368] sm:$0xff]  ;;  %v1467_v34 = vld [vmem:[%s22314_s1 + $0x2b40] sm:$0xff] }
 0x251   :  { %9757 = vmatprep.subr.bf16.mxu0 %v15105_v44  ;;  %v1180_v44 = vld [vmem:[%s22314_s1 + $0x2248] sm:$0xff] }
 0x252   :  { %v14898_v62 = vcombine.low %v1180_v44, %v1184_v45 }
 0x253   :  { %10168 = vmatpush1.bf16.msra.mxu1 %v14850_v49  ;;  %v15144_v49 = vcombine.low %v1427_v36, %v1431_v37  ;;  %v1471_v36 = vld [vmem:[%s22314_s1 + $0x2b60] sm:$0xff] }
 0x254   :  { %9758 = vmatpush1.bf16.msra.mxu0 %v15104_v51  ;;  %10169 = vmatprep.subr.bf16.mxu1 %v14859_v52  ;;  %v14899_v51 = vcombine.high %v1180_v44, %v1184_v45  ;;  %v15153_v52 = vcombine.high %v1435_v46, %v1439_v47  ;;  %v1224_v44 = vld [vmem:[%s22314_s1 + $0x23a8] sm:$0xff]  ;;  %v1475_v45 = vld [vmem:[%s22314_s1 + $0x2b80] sm:$0xff] }
 0x255   :  { %9759 = vmatprep.subr.bf16.mxu0 %v15113_v54  ;;  %v1188_v54 = vld [vmem:[%s22314_s1 + $0x2288] sm:$0xff] }
 0x256   :  { %v14906_v8 = vcombine.low %v1188_v54, %v1192_v55 }
 0x257   :  { %10170 = vmatpush1.bf16.msra.mxu1 %v14858_v63  ;;  %v15152_v63 = vcombine.low %v1435_v46, %v1439_v47  ;;  %v1479_v46 = vld [vmem:[%s22314_s1 + $0x2ba0] sm:$0xff] }
 0x258   :  { %9760 = vmatpush1.bf16.msra.mxu0 %v15112_v0  ;;  %10171 = vmatprep.subr.bf16.mxu1 %v14867_v1  ;;  %v14907_v0 = vcombine.high %v1188_v54, %v1192_v55  ;;  %v15161_v1 = vcombine.high %v1443_v56, %v1447_v59  ;;  %v1232_v54 = vld [vmem:[%s22314_s1 + $0x23e8] sm:$0xff]  ;;  %v1483_v55 = vld [vmem:[%s22314_s1 + $0x2bc0] sm:$0xff] }
 0x259   :  { %9761 = vmatprep.subr.bf16.mxu0 %v15121_v3  ;;  %v1196_v3 = vld [vmem:[%s22314_s1 + $0x22c8] sm:$0xff] }
 0x25a   :  { %v14914_v26 = vcombine.low %v1196_v3, %v1200_v4 }
 0x25b   :  { %10172 = vmatpush1.bf16.msra.mxu1 %v14866_v9  ;;  %v15160_v9 = vcombine.low %v1443_v56, %v1447_v59  ;;  %v1487_v56 = vld [vmem:[%s22314_s1 + $0x2be0] sm:$0xff] }
 0x25c   :  { %9762 = vmatpush1.bf16.msra.mxu0 %v15120_v11  ;;  %10173 = vmatprep.subr.bf16.mxu1 %v14875_v14  ;;  %v14915_v11 = vcombine.high %v1196_v3, %v1200_v4  ;;  %v15169_v14 = vcombine.high %v1451_v5, %v1455_v7  ;;  %v1240_v3 = vld [vmem:[%s22314_s1 + $0x2428] sm:$0xff]  ;;  %v1491_v4 = vld [vmem:[%s22314_s1 + $0x2c00] sm:$0xff] }
 0x25d   :  { %9763 = vmatprep.subr.bf16.mxu0 %v15129_v15  ;;  %v1204_v15 = vld [vmem:[%s22314_s1 + $0x2308] sm:$0xff] }
 0x25e   :  { %v14922_v37 = vcombine.low %v1204_v15, %v1208_v18 }
 0x25f   :  { %10174 = vmatpush1.bf16.msra.mxu1 %v14874_v28  ;;  %v15168_v28 = vcombine.low %v1451_v5, %v1455_v7  ;;  %v1495_v5 = vld [vmem:[%s22314_s1 + $0x2c20] sm:$0xff] }
 0x260   :  { %9764 = vmatpush1.bf16.msra.mxu0 %v15128_v29  ;;  %10175 = vmatprep.subr.bf16.mxu1 %v14883_v30  ;;  %v14923_v29 = vcombine.high %v1204_v15, %v1208_v18  ;;  %v15177_v30 = vcombine.high %v1459_v22, %v1463_v23  ;;  %v1244_v15 = vld [vmem:[%s22314_s1 + $0x2448] sm:$0xff] }
 0x261   :  { %9765 = vmatprep.subr.bf16.mxu0 %v15137_v32  ;;  %v1212_v32 = vld [vmem:[%s22314_s1 + $0x2348] sm:$0xff] }
 0x262   :  { %v14930_v47 = vcombine.low %v1212_v32, %v1216_v33  ;;  %v1248_v18 = vld [vmem:[%s22314_s1 + $0x2468] sm:$0xff] }
 0x263   :  { %10176 = vmatpush1.bf16.msra.mxu1 %v14882_v39  ;;  %v15176_v39 = vcombine.low %v1459_v22, %v1463_v23  ;;  %v1499_v22 = vld [vmem:[%s22314_s1 + $0x2c40] sm:$0xff] }
 0x264   :  { %9766 = vmatpush1.bf16.msra.mxu0 %v15136_v40  ;;  %10177 = vmatprep.subr.bf16.mxu1 %v14891_v42  ;;  %v14931_v40 = vcombine.high %v1212_v32, %v1216_v33  ;;  %v15185_v42 = vcombine.high %v1467_v34, %v1471_v36  ;;  %v1503_v23 = vld [vmem:[%s22314_s1 + $0x2c60] sm:$0xff]  ;;  %v14963_v32 = vcombine.high %v1244_v15, %v1248_v18 }
 0x265   :  { %9767 = vmatprep.subr.bf16.mxu0 %v15145_v43  ;;  %v1220_v43 = vld [vmem:[%s22314_s1 + $0x2388] sm:$0xff]  ;;  %v15217_v33 = vcombine.high %v1499_v22, %v1503_v23 }
 0x266   :  { %v14938_v59 = vcombine.low %v1220_v43, %v1224_v44 }
 0x267   :  { %10178 = vmatpush1.bf16.msra.mxu1 %v14890_v48  ;;  %v15184_v48 = vcombine.low %v1467_v34, %v1471_v36  ;;  %v1252_v34 = vld [vmem:[%s22314_s1 + $0x2488] sm:$0xff] }
 0x268   :  { %9768 = vmatpush1.bf16.msra.mxu0 %v15144_v49  ;;  %10179 = vmatprep.subr.bf16.mxu1 %v14899_v51  ;;  %v14939_v49 = vcombine.high %v1220_v43, %v1224_v44  ;;  %v15193_v51 = vcombine.high %v1475_v45, %v1479_v46  ;;  %v1256_v36 = vld [vmem:[%s22314_s1 + $0x24a8] sm:$0xff]  ;;  %v15216_v43 = vcombine.low %v1499_v22, %v1503_v23 }
 0x269   :  { %9769 = vmatprep.subr.bf16.mxu0 %v15153_v52  ;;  %v1228_v52 = vld [vmem:[%s22314_s1 + $0x23c8] sm:$0xff]  ;;  %v14971_v44 = vcombine.high %v1252_v34, %v1256_v36 }
 0x26a   :  { %v14946_v7 = vcombine.low %v1228_v52, %v1232_v54  ;;  %v1284_v22 = vld [vmem:[%s22314_s1 + $0x2588] sm:$0xff] }
 0x26b   :  { %10180 = vmatpush1.bf16.msra.mxu1 %v14898_v62  ;;  %v15192_v62 = vcombine.low %v1475_v45, %v1479_v46  ;;  %v1260_v46 = vld [vmem:[%s22314_s1 + $0x24c8] sm:$0xff] }
 0x26c   :  { %9770 = vmatpush1.bf16.msra.mxu0 %v15152_v63  ;;  %10181 = vmatprep.subr.bf16.mxu1 %v14907_v0  ;;  %v14947_v63 = vcombine.high %v1228_v52, %v1232_v54  ;;  %v15201_v0 = vcombine.high %v1483_v55, %v1487_v56  ;;  %v1288_v23 = vld [vmem:[%s22314_s1 + $0x25a8] sm:$0xff] }
 0x26d   :  { %9771 = vmatprep.subr.bf16.mxu0 %v15161_v1  ;;  %v1236_v1 = vld [vmem:[%s22314_s1 + $0x2408] sm:$0xff] }
 0x26f   :  { %10182 = vmatpush1.bf16.msra.mxu1 %v14906_v8  ;;  %v15200_v8 = vcombine.low %v1483_v55, %v1487_v56  ;;  %v1268_v56 = vld [vmem:[%s22314_s1 + $0x2508] sm:$0xff] }
 0x270   :  { %9772 = vmatpush1.bf16.msra.mxu0 %v15160_v9  ;;  %10183 = vmatprep.subr.bf16.mxu1 %v14915_v11  ;;  %v14955_v9 = vcombine.high %v1236_v1, %v1240_v3  ;;  %v55_v11 = vld [vmem:[%s22315_s0 + $0xa0] sm:$0xff] }
 0x271   :  { %9773 = vmatprep.subr.bf16.mxu0 %v15169_v14  ;;  %v15209_v14 = vcombine.high %v1491_v4, %v1495_v5 }
 0x273   :  { %10184 = vmatpush1.bf16.msra.mxu1 %v14914_v26  ;;  %v58_v26 = vld [vmem:[%s22315_s0 + $0xb8] sm:$0xff] }
 0x274   :  { %9774 = vmatpush1.bf16.msra.mxu0 %v15168_v28  ;;  %10185 = vmatprep.subr.bf16.mxu1 %v14923_v29  ;;  %v14954_v28 = vcombine.low %v1236_v1, %v1240_v3  ;;  %v18512_v29 = vpack.c.bf16 %v55_v11, %v55_v11 }
 0x275   :  { %9775 = vmatprep.subr.bf16.mxu0 %v15177_v30  ;;  %v15208_v30 = vcombine.low %v1491_v4, %v1495_v5  ;;  %v1276_v5 = vld [vmem:[%s22314_s1 + $0x2548] sm:$0xff] }
 0x277   :  { %10186 = vmatpush1.bf16.msra.mxu1 %v14922_v37  ;;  %v18520_v37 = vpack.c.bf16 %v58_v26, %v58_v26  ;;  %v1539_v26 = vld [vmem:[%s22314_s1 + $0x2d80] sm:$0xff] }
 0x278   :  { %9776 = vmatpush1.bf16.msra.mxu0 %v15176_v39  ;;  %10187 = vmatprep.subr.bf16.mxu1 %v14931_v40  ;;  %v1507_v39 = vld [vmem:[%s22314_s1 + $0x2c80] sm:$0xff] }
 0x279   :  { %9777 = vmatprep.subr.bf16.mxu0 %v15185_v42  ;;  %v1511_v40 = vld [vmem:[%s22314_s1 + $0x2ca0] sm:$0xff]  ;;  %v14962_v42 = vcombine.low %v1244_v15, %v1248_v18 }
 0x27a   :  { %v15225_v45 = vcombine.high %v1507_v39, %v1511_v40  ;;  %v15224_v52 = vcombine.low %v1507_v39, %v1511_v40  ;;  %v1296_v39 = vld [vmem:[%s22314_s1 + $0x25e8] sm:$0xff]  ;;  %v1547_v40 = vld [vmem:[%s22314_s1 + $0x2dc0] sm:$0xff] }
 0x27b   :  { %10188 = vmatpush1.bf16.msra.mxu1 %v14930_v47  ;;  %v1264_v47 = vld [vmem:[%s22314_s1 + $0x24e8] sm:$0xff] }
 0x27c   :  { %9778 = vmatpush1.bf16.msra.mxu0 %v15184_v48  ;;  %10189 = vmatprep.subr.bf16.mxu1 %v14939_v49  ;;  %v1515_v48 = vld [vmem:[%s22314_s1 + $0x2cc0] sm:$0xff]  ;;  %v14979_v54 = vcombine.high %v1260_v46, %v1264_v47 }
 0x27d   :  { %9779 = vmatprep.subr.bf16.mxu0 %v15193_v51  ;;  %v1519_v49 = vld [vmem:[%s22314_s1 + $0x2ce0] sm:$0xff]  ;;  %v14970_v51 = vcombine.low %v1252_v34, %v1256_v36  ;;  %v1292_v36 = vld [vmem:[%s22314_s1 + $0x25c8] sm:$0xff] }
 0x27e   :  { %v15233_v55 = vcombine.high %v1515_v48, %v1519_v49  ;;  %v15232_v1 = vcombine.low %v1515_v48, %v1519_v49  ;;  %v1304_v48 = vld [vmem:[%s22314_s1 + $0x2628] sm:$0xff]  ;;  %v1555_v49 = vld [vmem:[%s22314_s1 + $0x2e00] sm:$0xff] }
 0x27f   :  { %10190 = vmatpush1.bf16.msra.mxu1 %v14938_v59  ;;  %v1272_v59 = vld [vmem:[%s22314_s1 + $0x2528] sm:$0xff] }
 0x280   :  { %9780 = vmatpush1.bf16.msra.mxu0 %v15192_v62  ;;  %10191 = vmatprep.subr.bf16.mxu1 %v14947_v63  ;;  %v1523_v62 = vld [vmem:[%s22314_s1 + $0x2d00] sm:$0xff]  ;;  %v14987_v3 = vcombine.high %v1268_v56, %v1272_v59  ;;  %v14986_v11 = vcombine.low %v1268_v56, %v1272_v59  ;;  %v1308_v59 = vld [vmem:[%s22314_s1 + $0x2648] sm:$0xff] }
 0x281   :  { %9781 = vmatprep.subr.bf16.mxu0 %v15201_v0  ;;  %v1527_v63 = vld [vmem:[%s22314_s1 + $0x2d20] sm:$0xff]  ;;  %v14978_v0 = vcombine.low %v1260_v46, %v1264_v47  ;;  %v1300_v47 = vld [vmem:[%s22314_s1 + $0x2608] sm:$0xff] }
 0x282   :  { %v15241_v4 = vcombine.high %v1523_v62, %v1527_v63 }
 0x283   :  { %10192 = vmatpush1.bf16.msra.mxu1 %v14946_v7  ;;  %v1280_v7 = vld [vmem:[%s22314_s1 + $0x2568] sm:$0xff] }
 0x284   :  { %9782 = vmatpush1.bf16.msra.mxu0 %v15200_v8  ;;  %10202 = vmatprep.subr.bf16.mxu1 %v14955_v9  ;;  %v1531_v8 = vld [vmem:[%s22314_s1 + $0x2d40] sm:$0xff]  ;;  %v14995_v15 = vcombine.high %v1276_v5, %v1280_v7 }
 0x285   :  { %9792 = vmatprep.subr.bf16.mxu0 %v15209_v14  ;;  %v1535_v9 = vld [vmem:[%s22314_s1 + $0x2d60] sm:$0xff]  ;;  %v15240_v14 = vcombine.low %v1523_v62, %v1527_v63  ;;  %v1312_v62 = vld [vmem:[%s22314_s1 + $0x2668] sm:$0xff] }
 0x286   :  { %10194 = vmatmul.mubr.bf16.vlgmr.msra.gmra.mrb[4].mxu1 %v18100_v10  ;;  %v15249_v18 = vcombine.high %v1531_v8, %v1535_v9  ;;  %v1563_v63 = vld [vmem:[%s22314_s1 + $0x2e40] sm:$0xff] }
 0x287   :  { %9784 = vmatmul.mubr.bf16.vlgmr.msra.gmra.mrb[0].mxu0 %v18512_v29  ;;  %10203 = vmatpush1.bf16.msra.mxu1 %v14954_v28  ;;  %v1543_v28 = vld [vmem:[%s22314_s1 + $0x2da0] sm:$0xff] }
 0x288   :  { %9793 = vmatpush1.bf16.msra.mxu0 %v15208_v30  ;;  %10204 = vmatprep.subr.bf16.mxu1 %v14963_v32  ;;  %v14994_v30 = vcombine.low %v1276_v5, %v1280_v7  ;;  %v15248_v32 = vcombine.low %v1531_v8, %v1535_v9  ;;  %v15257_v34 = vcombine.high %v1539_v26, %v1543_v28  ;;  %v1316_v7 = vld [vmem:[%s22314_s1 + $0x2688] sm:$0xff]  ;;  %v1571_v9 = vld [vmem:[%s22314_s1 + $0x2e80] sm:$0xff] }
 0x289   :  { %9794 = vmatprep.subr.bf16.mxu0 %v15217_v33  ;;  %9824 = vmatprep.mubr.bf16.mxu0 %v18520_v37  ;;  %v15003_v33 = vcombine.high %v1284_v22, %v1288_v23  ;;  %v1320_v8 = vld [vmem:[%s22314_s1 + $0x26a8] sm:$0xff] }
 0x28a   :  { %10234 = vmatprep.mubr.bf16.mxu1 %v18108_v19 }
 0x28b   :  { %10205 = vmatpush1.bf16.msra.mxu1 %v14962_v42  ;;  %v1551_v42 = vld [vmem:[%s22314_s1 + $0x2de0] sm:$0xff] }
 0x28c   :  { %9795 = vmatpush1.bf16.msra.mxu0 %v15216_v43  ;;  %10206 = vmatprep.subr.bf16.mxu1 %v14971_v44  ;;  %v15002_v43 = vcombine.low %v1284_v22, %v1288_v23  ;;  %v15256_v44 = vcombine.low %v1539_v26, %v1543_v28  ;;  %v15265_v46 = vcombine.high %v1547_v40, %v1551_v42  ;;  %v1324_v23 = vld [vmem:[%s22314_s1 + $0x26c8] sm:$0xff]  ;;  %v1579_v28 = vld [vmem:[%s22314_s1 + $0x2ec0] sm:$0xff] }
 0x28d   :  { %9796 = vmatprep.subr.bf16.mxu0 %v15225_v45  ;;  %v15011_v45 = vcombine.high %v1292_v36, %v1296_v39  ;;  %v1328_v26 = vld [vmem:[%s22314_s1 + $0x26e8] sm:$0xff] }
 0x28f   :  { %10207 = vmatpush1.bf16.msra.mxu1 %v14970_v51  ;;  %v1559_v51 = vld [vmem:[%s22314_s1 + $0x2e20] sm:$0xff] }
 0x290   :  { %9797 = vmatpush1.bf16.msra.mxu0 %v15224_v52  ;;  %10208 = vmatprep.subr.bf16.mxu1 %v14979_v54  ;;  %v15010_v52 = vcombine.low %v1292_v36, %v1296_v39  ;;  %v15264_v54 = vcombine.low %v1547_v40, %v1551_v42  ;;  %v15273_v56 = vcombine.high %v1555_v49, %v1559_v51  ;;  %v1332_v39 = vld [vmem:[%s22314_s1 + $0x2708] sm:$0xff]  ;;  %v1587_v42 = vld [vmem:[%s22314_s1 + $0x2f00] sm:$0xff] }
 0x291   :  { %9798 = vmatprep.subr.bf16.mxu0 %v15233_v55  ;;  %v15019_v55 = vcombine.high %v1300_v47, %v1304_v48  ;;  %v1336_v40 = vld [vmem:[%s22314_s1 + $0x2728] sm:$0xff] }
 0x293   :  { %10209 = vmatpush1.bf16.msra.mxu1 %v14978_v0  ;;  %v1567_v0 = vld [vmem:[%s22314_s1 + $0x2e60] sm:$0xff] }
 0x294   :  { %9799 = vmatpush1.bf16.msra.mxu0 %v15232_v1  ;;  %10210 = vmatprep.subr.bf16.mxu1 %v14987_v3  ;;  %v15018_v1 = vcombine.low %v1300_v47, %v1304_v48  ;;  %v15272_v3 = vcombine.low %v1555_v49, %v1559_v51  ;;  %v15281_v5 = vcombine.high %v1563_v63, %v1567_v0  ;;  %v1340_v48 = vld [vmem:[%s22314_s1 + $0x2748] sm:$0xff]  ;;  %v1595_v51 = vld [vmem:[%s22314_s1 + $0x2f40] sm:$0xff] }
 0x295   :  { %9800 = vmatprep.subr.bf16.mxu0 %v15241_v4  ;;  %v15027_v4 = vcombine.high %v1308_v59, %v1312_v62  ;;  %v1344_v49 = vld [vmem:[%s22314_s1 + $0x2768] sm:$0xff] }
 0x297   :  { %10211 = vmatpush1.bf16.msra.mxu1 %v14986_v11  ;;  %v1575_v11 = vld [vmem:[%s22314_s1 + $0x2ea0] sm:$0xff] }
 0x298   :  { %9801 = vmatpush1.bf16.msra.mxu0 %v15240_v14  ;;  %10212 = vmatprep.subr.bf16.mxu1 %v14995_v15  ;;  %v15026_v14 = vcombine.low %v1308_v59, %v1312_v62  ;;  %v15280_v15 = vcombine.low %v1563_v63, %v1567_v0  ;;  %v15289_v22 = vcombine.high %v1571_v9, %v1575_v11  ;;  %v1348_v62 = vld [vmem:[%s22314_s1 + $0x2788] sm:$0xff]  ;;  %v1603_v0 = vld [vmem:[%s22314_s1 + $0x2f80] sm:$0xff] }
 0x299   :  { %9802 = vmatprep.subr.bf16.mxu0 %v15249_v18  ;;  %v15035_v18 = vcombine.high %v1316_v7, %v1320_v8  ;;  %v1352_v63 = vld [vmem:[%s22314_s1 + $0x27a8] sm:$0xff] }
 0x29b   :  { %10213 = vmatpush1.bf16.msra.mxu1 %v14994_v30  ;;  %v1583_v30 = vld [vmem:[%s22314_s1 + $0x2ee0] sm:$0xff] }
 0x29c   :  { %9803 = vmatpush1.bf16.msra.mxu0 %v15248_v32  ;;  %10214 = vmatprep.subr.bf16.mxu1 %v15003_v33  ;;  %v15034_v32 = vcombine.low %v1316_v7, %v1320_v8  ;;  %v15288_v33 = vcombine.low %v1571_v9, %v1575_v11  ;;  %v15297_v36 = vcombine.high %v1579_v28, %v1583_v30  ;;  %v1356_v8 = vld [vmem:[%s22314_s1 + $0x27c8] sm:$0xff]  ;;  %v1611_v11 = vld [vmem:[%s22314_s1 + $0x2fc0] sm:$0xff] }
 0x29d   :  { %9804 = vmatprep.subr.bf16.mxu0 %v15257_v34  ;;  %v15043_v34 = vcombine.high %v1324_v23, %v1328_v26  ;;  %v1360_v9 = vld [vmem:[%s22314_s1 + $0x27e8] sm:$0xff] }
 0x29f   :  { %10215 = vmatpush1.bf16.msra.mxu1 %v15002_v43  ;;  %v1591_v43 = vld [vmem:[%s22314_s1 + $0x2f20] sm:$0xff] }
 0x2a0   :  { %9805 = vmatpush1.bf16.msra.mxu0 %v15256_v44  ;;  %10216 = vmatprep.subr.bf16.mxu1 %v15011_v45  ;;  %v15042_v44 = vcombine.low %v1324_v23, %v1328_v26  ;;  %v15296_v45 = vcombine.low %v1579_v28, %v1583_v30  ;;  %v15305_v47 = vcombine.high %v1587_v42, %v1591_v43  ;;  %v1364_v26 = vld [vmem:[%s22314_s1 + $0x2808] sm:$0xff]  ;;  %v85_v30 = vld [vmem:[%s22314_s1 + $0x10] sm:$0xff] }
 0x2a1   :  { %9806 = vmatprep.subr.bf16.mxu0 %v15265_v46  ;;  %v15051_v46 = vcombine.high %v1332_v39, %v1336_v40  ;;  %v1368_v28 = vld [vmem:[%s22314_s1 + $0x2828] sm:$0xff] }
 0x2a3   :  { %10217 = vmatpush1.bf16.msra.mxu1 %v15010_v52  ;;  %v1599_v52 = vld [vmem:[%s22314_s1 + $0x2f60] sm:$0xff] }
 0x2a4   :  { %9807 = vmatpush1.bf16.msra.mxu0 %v15264_v54  ;;  %10218 = vmatprep.subr.bf16.mxu1 %v15019_v55  ;;  %v15050_v54 = vcombine.low %v1332_v39, %v1336_v40  ;;  %v15304_v55 = vcombine.low %v1587_v42, %v1591_v43  ;;  %v15313_v59 = vcombine.high %v1595_v51, %v1599_v52  ;;  %v1372_v42 = vld [vmem:[%s22314_s1 + $0x2848] sm:$0xff] }
 0x2a5   :  { %9808 = vmatprep.subr.bf16.mxu0 %v15273_v56  ;;  %v15059_v56 = vcombine.high %v1340_v48, %v1344_v49  ;;  %v15083_v39 = vcombine.high %v1364_v26, %v1368_v28  ;;  %v1376_v43 = vld [vmem:[%s22314_s1 + $0x2868] sm:$0xff] }
 0x2a7   :  { %10219 = vmatpush1.bf16.msra.mxu1 %v15018_v1  ;;  %v1607_v1 = vld [vmem:[%s22314_s1 + $0x2fa0] sm:$0xff] }
 0x2a8   :  { %9809 = vmatpush1.bf16.msra.mxu0 %v15272_v3  ;;  %10220 = vmatprep.subr.bf16.mxu1 %v15027_v4  ;;  %v15058_v3 = vcombine.low %v1340_v48, %v1344_v49  ;;  %v15312_v4 = vcombine.low %v1595_v51, %v1599_v52  ;;  %v15321_v7 = vcombine.high %v1603_v0, %v1607_v1  ;;  %v1380_v52 = vld [vmem:[%s22314_s1 + $0x2888] sm:$0xff] }
 0x2a9   :  { %9810 = vmatprep.subr.bf16.mxu0 %v15281_v5  ;;  %v15067_v5 = vcombine.high %v1348_v62, %v1352_v63  ;;  %v15091_v49 = vcombine.high %v1372_v42, %v1376_v43 }
 0x2ab   :  { %10221 = vmatpush1.bf16.msra.mxu1 %v15026_v14  ;;  %v1615_v14 = vld [vmem:[%s22314_s1 + $0x2fe0] sm:$0xff] }
 0x2ac   :  { %9811 = vmatpush1.bf16.msra.mxu0 %v15280_v15  ;;  %10222 = vmatprep.subr.bf16.mxu1 %v15035_v18  ;;  %v15066_v15 = vcombine.low %v1348_v62, %v1352_v63  ;;  %v15320_v18 = vcombine.low %v1603_v0, %v1607_v1  ;;  %v15329_v23 = vcombine.high %v1611_v11, %v1615_v14  ;;  %v1388_v1 = vld [vmem:[%s22314_s1 + $0x28c8] sm:$0xff] }
 0x2ad   :  { %9812 = vmatprep.subr.bf16.mxu0 %v15289_v22  ;;  %v15075_v22 = vcombine.high %v1356_v8, %v1360_v9 }
 0x2af   :  { %10223 = vmatpush1.bf16.msra.mxu1 %v15034_v32  ;;  %v89_v32 = vld [vmem:[%s22314_s1 + $0x30] sm:$0xff] }
 0x2b0   :  { %9813 = vmatpush1.bf16.msra.mxu0 %v15288_v33  ;;  %10224 = vmatprep.subr.bf16.mxu1 %v15043_v34  ;;  %v15074_v33 = vcombine.low %v1356_v8, %v1360_v9  ;;  %v15328_v34 = vcombine.low %v1611_v11, %v1615_v14  ;;  %v13805_v40 = vcombine.high %v85_v30, %v89_v32  ;;  %v1396_v14 = vld [vmem:[%s22314_s1 + $0x2908] sm:$0xff] }
 0x2b1   :  { %9814 = vmatprep.subr.bf16.mxu0 %v15297_v36  ;;  %v57_v36 = vld [vmem:[%s22315_s0 + $0xb0] sm:$0xff]  ;;  %v13804_v48 = vcombine.low %v85_v30, %v89_v32  ;;  %v1404_v32 = vld [vmem:[%s22314_s1 + $0x2948] sm:$0xff] }
 0x2b3   :  { %10225 = vmatpush1.bf16.msra.mxu1 %v15042_v44  ;;  %v93_v44 = vld [vmem:[%s22314_s1 + $0x50] sm:$0xff] }
 0x2b4   :  { %9815 = vmatpush1.bf16.msra.mxu0 %v15296_v45  ;;  %10226 = vmatprep.subr.bf16.mxu1 %v15051_v46  ;;  %v97_v45 = vld [vmem:[%s22314_s1 + $0x70] sm:$0xff]  ;;  %v18715_v46 = vpack.c.bf16 %v57_v36, %v57_v36 }
 0x2b5   :  { %9816 = vmatprep.subr.bf16.mxu0 %v15305_v47  ;;  %v15082_v47 = vcombine.low %v1364_v26, %v1368_v28  ;;  %v13813_v51 = vcombine.high %v93_v44, %v97_v45  ;;  %v13812_v62 = vcombine.low %v93_v44, %v97_v45  ;;  %v129_v36 = vld [vmem:[%s22314_s1 + $0x170] sm:$0xff]  ;;  %v1412_v44 = vld [vmem:[%s22314_s1 + $0x2988] sm:$0xff] }
 0x2b6   :  { %v1416_v45 = vld [vmem:[%s22314_s1 + $0x29a8] sm:$0xff] }
 0x2b7   :  { %10227 = vmatpush1.bf16.msra.mxu1 %v15050_v54  ;;  %v1384_v54 = vld [vmem:[%s22314_s1 + $0x28a8] sm:$0xff] }
 0x2b8   :  { %9817 = vmatpush1.bf16.msra.mxu0 %v15304_v55  ;;  %10228 = vmatprep.subr.bf16.mxu1 %v15059_v56  ;;  %v101_v55 = vld [vmem:[%s22314_s1 + $0x90] sm:$0xff]  ;;  %v15099_v63 = vcombine.high %v1380_v52, %v1384_v54 }
 0x2b9   :  { %9818 = vmatprep.subr.bf16.mxu0 %v15313_v59  ;;  %v105_v56 = vld [vmem:[%s22314_s1 + $0xb0] sm:$0xff]  ;;  %v15090_v59 = vcombine.low %v1372_v42, %v1376_v43 }
 0x2ba   :  { %v13821_v0 = vcombine.high %v101_v55, %v105_v56  ;;  %v13820_v8 = vcombine.low %v101_v55, %v105_v56  ;;  %v1420_v55 = vld [vmem:[%s22314_s1 + $0x29c8] sm:$0xff] }
 0x2bb   :  { %10229 = vmatpush1.bf16.msra.mxu1 %v15058_v3  ;;  %v1392_v3 = vld [vmem:[%s22314_s1 + $0x28e8] sm:$0xff] }
 0x2bc   :  { %9819 = vmatpush1.bf16.msra.mxu0 %v15312_v4  ;;  %10230 = vmatprep.subr.bf16.mxu1 %v15067_v5  ;;  %v109_v4 = vld [vmem:[%s22314_s1 + $0xd0] sm:$0xff]  ;;  %v15107_v9 = vcombine.high %v1388_v1, %v1392_v3  ;;  %v1424_v56 = vld [vmem:[%s22314_s1 + $0x29e8] sm:$0xff] }
 0x2bd   :  { %9820 = vmatprep.subr.bf16.mxu0 %v15321_v7  ;;  %v113_v5 = vld [vmem:[%s22314_s1 + $0xf0] sm:$0xff]  ;;  %v15098_v7 = vcombine.low %v1380_v52, %v1384_v54  ;;  %v15131_v52 = vcombine.high %v1412_v44, %v1416_v45 }
 0x2be   :  { %v13829_v11 = vcombine.high %v109_v4, %v113_v5  ;;  %v13828_v26 = vcombine.low %v109_v4, %v113_v5  ;;  %v1428_v4 = vld [vmem:[%s22314_s1 + $0x2a08] sm:$0xff] }
 0x2bf   :  { %10231 = vmatpush1.bf16.msra.mxu1 %v15066_v15  ;;  %v1400_v15 = vld [vmem:[%s22314_s1 + $0x2928] sm:$0xff] }
 0x2c0   :  { %9821 = vmatpush1.bf16.msra.mxu0 %v15320_v18  ;;  %10232 = vmatprep.subr.bf16.mxu1 %v15075_v22  ;;  %v117_v18 = vld [vmem:[%s22314_s1 + $0x110] sm:$0xff]  ;;  %v15115_v28 = vcombine.high %v1396_v14, %v1400_v15  ;;  %v1432_v5 = vld [vmem:[%s22314_s1 + $0x2a28] sm:$0xff] }
 0x2c1   :  { %9822 = vmatprep.subr.bf16.mxu0 %v15329_v23  ;;  %v121_v22 = vld [vmem:[%s22314_s1 + $0x130] sm:$0xff]  ;;  %v15106_v23 = vcombine.low %v1388_v1, %v1392_v3  ;;  %v15139_v1 = vcombine.high %v1420_v55, %v1424_v56 }
 0x2c2   :  { %v13837_v30 = vcombine.high %v117_v18, %v121_v22 }
 0x2c3   :  { %10233 = vmatpush1.bf16.msra.mxu1 %v15074_v33  ;;  %v1408_v33 = vld [vmem:[%s22314_s1 + $0x2968] sm:$0xff] }
 0x2c4   :  { %9823 = vmatpush1.bf16.msra.mxu0 %v15328_v34  ;;  %10243 = vmatprep.subr.bf16.mxu1 %v15083_v39  ;;  %v125_v34 = vld [vmem:[%s22314_s1 + $0x150] sm:$0xff]  ;;  %v15114_v39 = vcombine.low %v1396_v14, %v1400_v15  ;;  %v15123_v42 = vcombine.high %v1404_v32, %v1408_v33  ;;  %v15147_v14 = vcombine.high %v1428_v4, %v1432_v5 }
 0x2c5   :  { %10325 = vmatprep.subr.bf16.mxu0 %v13805_v40  ;;  %v13836_v40 = vcombine.low %v117_v18, %v121_v22  ;;  %v13845_v43 = vcombine.high %v125_v34, %v129_v36  ;;  %v1436_v18 = vld [vmem:[%s22314_s1 + $0x2a48] sm:$0xff] }
 0x2c6   :  { %10235 = vmatmul.mubr.bf16.vlgmr.msra.gmra.mrb[4].mxu1 %v18306_v12  ;;  %v1440_v22 = vld [vmem:[%s22314_s1 + $0x2a68] sm:$0xff] }
 0x2c7   :  { %9825 = vmatmul.mubr.bf16.vlgmr.msra.gmra.mrb[0].mxu0 %v18715_v46  ;;  %10244 = vmatpush1.bf16.msra.mxu1 %v15082_v47  ;;  %v133_v47 = vld [vmem:[%s22314_s1 + $0x190] sm:$0xff] }
 0x2c8   :  { %10326 = vmatpush1.bf16.msra.mxu0 %v13804_v48  ;;  %10245 = vmatprep.subr.bf16.mxu1 %v15091_v49  ;;  %v137_v48 = vld [vmem:[%s22314_s1 + $0x1b0] sm:$0xff]  ;;  %v15122_v49 = vcombine.low %v1404_v32, %v1408_v33  ;;  %v15155_v32 = vcombine.high %v1436_v18, %v1440_v22 }
 0x2c9   :  { %10327 = vmatprep.subr.bf16.mxu0 %v13813_v51  ;;  %10275 = vmatprep.mubr.bf16.mxu1 %v18314_v24  ;;  %v13844_v51 = vcombine.low %v125_v34, %v129_v36  ;;  %v13853_v54 = vcombine.high %v133_v47, %v137_v48  ;;  %v1444_v34 = vld [vmem:[%s22314_s1 + $0x2a88] sm:$0xff] }
 0x2ca   :  { %10357 = vmatprep.mubr.bf16.mxu0 %v16508_v57  ;;  %v1448_v36 = vld [vmem:[%s22314_s1 + $0x2aa8] sm:$0xff] }
 0x2cb   :  { %10246 = vmatpush1.bf16.msra.mxu1 %v15090_v59  ;;  %v141_v59 = vld [vmem:[%s22314_s1 + $0x1d0] sm:$0xff] }
 0x2cc   :  { %10328 = vmatpush1.bf16.msra.mxu0 %v13812_v62  ;;  %10247 = vmatprep.subr.bf16.mxu1 %v15099_v63  ;;  %v145_v62 = vld [vmem:[%s22314_s1 + $0x1f0] sm:$0xff]  ;;  %v15130_v63 = vcombine.low %v1412_v44, %v1416_v45  ;;  %v15163_v44 = vcombine.high %v1444_v34, %v1448_v36 }
 0x2cd   :  { %10329 = vmatprep.subr.bf16.mxu0 %v13821_v0  ;;  %v13852_v0 = vcombine.low %v133_v47, %v137_v48  ;;  %v13861_v3 = vcombine.high %v141_v59, %v145_v62  ;;  %v1452_v47 = vld [vmem:[%s22314_s1 + $0x2ac8] sm:$0xff] }
 0x2ce   :  { %v1456_v48 = vld [vmem:[%s22314_s1 + $0x2ae8] sm:$0xff] }
 0x2cf   :  { %10248 = vmatpush1.bf16.msra.mxu1 %v15098_v7  ;;  %v149_v7 = vld [vmem:[%s22314_s1 + $0x210] sm:$0xff] }
 0x2d0   :  { %10330 = vmatpush1.bf16.msra.mxu0 %v13820_v8  ;;  %10249 = vmatprep.subr.bf16.mxu1 %v15107_v9  ;;  %v153_v8 = vld [vmem:[%s22314_s1 + $0x230] sm:$0xff]  ;;  %v15138_v9 = vcombine.low %v1420_v55, %v1424_v56  ;;  %v15171_v55 = vcombine.high %v1452_v47, %v1456_v48 }
 0x2d1   :  { %10331 = vmatprep.subr.bf16.mxu0 %v13829_v11  ;;  %v13860_v11 = vcombine.low %v141_v59, %v145_v62  ;;  %v13869_v15 = vcombine.high %v149_v7, %v153_v8  ;;  %v1460_v59 = vld [vmem:[%s22314_s1 + $0x2b08] sm:$0xff] }
 0x2d2   :  { %v1464_v62 = vld [vmem:[%s22314_s1 + $0x2b28] sm:$0xff] }
 0x2d3   :  { %10250 = vmatpush1.bf16.msra.mxu1 %v15106_v23  ;;  %v157_v23 = vld [vmem:[%s22314_s1 + $0x250] sm:$0xff] }
 0x2d4   :  { %10332 = vmatpush1.bf16.msra.mxu0 %v13828_v26  ;;  %10251 = vmatprep.subr.bf16.mxu1 %v15115_v28  ;;  %v161_v26 = vld [vmem:[%s22314_s1 + $0x270] sm:$0xff]  ;;  %v15146_v28 = vcombine.low %v1428_v4, %v1432_v5  ;;  %v15179_v4 = vcombine.high %v1460_v59, %v1464_v62 }
 0x2d5   :  { %10333 = vmatprep.subr.bf16.mxu0 %v13837_v30  ;;  %v13868_v30 = vcombine.low %v149_v7, %v153_v8  ;;  %v13877_v33 = vcombine.high %v157_v23, %v161_v26  ;;  %v1468_v7 = vld [vmem:[%s22314_s1 + $0x2b48] sm:$0xff] }
 0x2d6   :  { %v1472_v8 = vld [vmem:[%s22314_s1 + $0x2b68] sm:$0xff] }
 0x2d7   :  { %10252 = vmatpush1.bf16.msra.mxu1 %v15114_v39  ;;  %v165_v39 = vld [vmem:[%s22314_s1 + $0x290] sm:$0xff] }
 0x2d8   :  { %10334 = vmatpush1.bf16.msra.mxu0 %v13836_v40  ;;  %10253 = vmatprep.subr.bf16.mxu1 %v15123_v42  ;;  %v169_v40 = vld [vmem:[%s22314_s1 + $0x2b0] sm:$0xff]  ;;  %v15154_v42 = vcombine.low %v1436_v18, %v1440_v22  ;;  %v15187_v18 = vcombine.high %v1468_v7, %v1472_v8 }
 0x2d9   :  { %10335 = vmatprep.subr.bf16.mxu0 %v13845_v43  ;;  %v13876_v43 = vcombine.low %v157_v23, %v161_v26  ;;  %v13885_v45 = vcombine.high %v165_v39, %v169_v40  ;;  %v1476_v23 = vld [vmem:[%s22314_s1 + $0x2b88] sm:$0xff] }
 0x2da   :  { %v1480_v26 = vld [vmem:[%s22314_s1 + $0x2ba8] sm:$0xff] }
 0x2db   :  { %10254 = vmatpush1.bf16.msra.mxu1 %v15122_v49  ;;  %v173_v49 = vld [vmem:[%s22314_s1 + $0x2d0] sm:$0xff] }
 0x2dc   :  { %10336 = vmatpush1.bf16.msra.mxu0 %v13844_v51  ;;  %10255 = vmatprep.subr.bf16.mxu1 %v15131_v52  ;;  %v177_v51 = vld [vmem:[%s22314_s1 + $0x2f0] sm:$0xff]  ;;  %v15162_v52 = vcombine.low %v1444_v34, %v1448_v36  ;;  %v15195_v34 = vcombine.high %v1476_v23, %v1480_v26 }
 0x2dd   :  { %10337 = vmatprep.subr.bf16.mxu0 %v13853_v54  ;;  %v13884_v54 = vcombine.low %v165_v39, %v169_v40  ;;  %v13893_v56 = vcombine.high %v173_v49, %v177_v51  ;;  %v1484_v39 = vld [vmem:[%s22314_s1 + $0x2bc8] sm:$0xff] }
 0x2de   :  { %v1488_v40 = vld [vmem:[%s22314_s1 + $0x2be8] sm:$0xff] }
 0x2df   :  { %10256 = vmatpush1.bf16.msra.mxu1 %v15130_v63  ;;  %v181_v63 = vld [vmem:[%s22314_s1 + $0x310] sm:$0xff] }
 0x2e0   :  { %10338 = vmatpush1.bf16.msra.mxu0 %v13852_v0  ;;  %10257 = vmatprep.subr.bf16.mxu1 %v15139_v1  ;;  %v185_v0 = vld [vmem:[%s22314_s1 + $0x330] sm:$0xff]  ;;  %v15170_v1 = vcombine.low %v1452_v47, %v1456_v48  ;;  %v15203_v47 = vcombine.high %v1484_v39, %v1488_v40 }
 0x2e1   :  { %10339 = vmatprep.subr.bf16.mxu0 %v13861_v3  ;;  %v13892_v3 = vcombine.low %v173_v49, %v177_v51  ;;  %v13901_v5 = vcombine.high %v181_v63, %v185_v0  ;;  %v1492_v49 = vld [vmem:[%s22314_s1 + $0x2c08] sm:$0xff] }
 0x2e2   :  { %v1496_v51 = vld [vmem:[%s22314_s1 + $0x2c28] sm:$0xff] }
 0x2e3   :  { %10258 = vmatpush1.bf16.msra.mxu1 %v15138_v9  ;;  %v189_v9 = vld [vmem:[%s22314_s1 + $0x350] sm:$0xff] }
 0x2e4   :  { %10340 = vmatpush1.bf16.msra.mxu0 %v13860_v11  ;;  %10259 = vmatprep.subr.bf16.mxu1 %v15147_v14  ;;  %v193_v11 = vld [vmem:[%s22314_s1 + $0x370] sm:$0xff]  ;;  %v15178_v14 = vcombine.low %v1460_v59, %v1464_v62  ;;  %v15211_v59 = vcombine.high %v1492_v49, %v1496_v51 }
 0x2e5   :  { %10341 = vmatprep.subr.bf16.mxu0 %v13869_v15  ;;  %v13900_v15 = vcombine.low %v181_v63, %v185_v0  ;;  %v13909_v22 = vcombine.high %v189_v9, %v193_v11  ;;  %v1500_v63 = vld [vmem:[%s22314_s1 + $0x2c48] sm:$0xff] }
 0x2e6   :  { %v1504_v0 = vld [vmem:[%s22314_s1 + $0x2c68] sm:$0xff] }
 0x2e7   :  { %10260 = vmatpush1.bf16.msra.mxu1 %v15146_v28  ;;  %v197_v28 = vld [vmem:[%s22314_s1 + $0x390] sm:$0xff] }
 0x2e8   :  { %10342 = vmatpush1.bf16.msra.mxu0 %v13868_v30  ;;  %10261 = vmatprep.subr.bf16.mxu1 %v15155_v32  ;;  %v201_v30 = vld [vmem:[%s22314_s1 + $0x3b0] sm:$0xff]  ;;  %v15186_v32 = vcombine.low %v1468_v7, %v1472_v8  ;;  %v15219_v7 = vcombine.high %v1500_v63, %v1504_v0 }
 0x2e9   :  { %10343 = vmatprep.subr.bf16.mxu0 %v13877_v33  ;;  %v13908_v33 = vcombine.low %v189_v9, %v193_v11  ;;  %v13917_v36 = vcombine.high %v197_v28, %v201_v30  ;;  %v1508_v9 = vld [vmem:[%s22314_s1 + $0x2c88] sm:$0xff] }
 0x2ea   :  { %v1512_v11 = vld [vmem:[%s22314_s1 + $0x2ca8] sm:$0xff] }
 0x2eb   :  { %10262 = vmatpush1.bf16.msra.mxu1 %v15154_v42  ;;  %v205_v42 = vld [vmem:[%s22314_s1 + $0x3d0] sm:$0xff] }
 0x2ec   :  { %10344 = vmatpush1.bf16.msra.mxu0 %v13876_v43  ;;  %10263 = vmatprep.subr.bf16.mxu1 %v15163_v44  ;;  %v209_v43 = vld [vmem:[%s22314_s1 + $0x3f0] sm:$0xff]  ;;  %v15194_v44 = vcombine.low %v1476_v23, %v1480_v26  ;;  %v15227_v23 = vcombine.high %v1508_v9, %v1512_v11 }
 0x2ed   :  { %10345 = vmatprep.subr.bf16.mxu0 %v13885_v45  ;;  %v13916_v45 = vcombine.low %v197_v28, %v201_v30  ;;  %v13925_v48 = vcombine.high %v205_v42, %v209_v43  ;;  %v1516_v28 = vld [vmem:[%s22314_s1 + $0x2cc8] sm:$0xff] }
 0x2ee   :  { %v1520_v30 = vld [vmem:[%s22314_s1 + $0x2ce8] sm:$0xff] }
 0x2ef   :  { %10264 = vmatpush1.bf16.msra.mxu1 %v15162_v52  ;;  %v213_v52 = vld [vmem:[%s22314_s1 + $0x410] sm:$0xff] }
 0x2f0   :  { %10346 = vmatpush1.bf16.msra.mxu0 %v13884_v54  ;;  %10265 = vmatprep.subr.bf16.mxu1 %v15171_v55  ;;  %v217_v54 = vld [vmem:[%s22314_s1 + $0x430] sm:$0xff]  ;;  %v15202_v55 = vcombine.low %v1484_v39, %v1488_v40  ;;  %v15235_v39 = vcombine.high %v1516_v28, %v1520_v30 }
 0x2f1   :  { %10347 = vmatprep.subr.bf16.mxu0 %v13893_v56  ;;  %v13924_v56 = vcombine.low %v205_v42, %v209_v43  ;;  %v13933_v62 = vcombine.high %v213_v52, %v217_v54  ;;  %v1524_v42 = vld [vmem:[%s22314_s1 + $0x2d08] sm:$0xff] }
 0x2f2   :  { %v1528_v43 = vld [vmem:[%s22314_s1 + $0x2d28] sm:$0xff] }
 0x2f3   :  { %10266 = vmatpush1.bf16.msra.mxu1 %v15170_v1  ;;  %v221_v1 = vld [vmem:[%s22314_s1 + $0x450] sm:$0xff] }
 0x2f4   :  { %10348 = vmatpush1.bf16.msra.mxu0 %v13892_v3  ;;  %10267 = vmatprep.subr.bf16.mxu1 %v15179_v4  ;;  %v225_v3 = vld [vmem:[%s22314_s1 + $0x470] sm:$0xff]  ;;  %v15210_v4 = vcombine.low %v1492_v49, %v1496_v51  ;;  %v15243_v49 = vcombine.high %v1524_v42, %v1528_v43 }
 0x2f5   :  { %10349 = vmatprep.subr.bf16.mxu0 %v13901_v5  ;;  %v13932_v5 = vcombine.low %v213_v52, %v217_v54  ;;  %v13941_v8 = vcombine.high %v221_v1, %v225_v3  ;;  %v1532_v52 = vld [vmem:[%s22314_s1 + $0x2d48] sm:$0xff] }
 0x2f6   :  { %v1536_v54 = vld [vmem:[%s22314_s1 + $0x2d68] sm:$0xff] }
 0x2f7   :  { %10268 = vmatpush1.bf16.msra.mxu1 %v15178_v14  ;;  %v229_v14 = vld [vmem:[%s22314_s1 + $0x490] sm:$0xff] }
 0x2f8   :  { %10350 = vmatpush1.bf16.msra.mxu0 %v13900_v15  ;;  %10269 = vmatprep.subr.bf16.mxu1 %v15187_v18  ;;  %v233_v15 = vld [vmem:[%s22314_s1 + $0x4b0] sm:$0xff]  ;;  %v15218_v18 = vcombine.low %v1500_v63, %v1504_v0  ;;  %v15251_v63 = vcombine.high %v1532_v52, %v1536_v54 }
 0x2f9   :  { %10351 = vmatprep.subr.bf16.mxu0 %v13909_v22  ;;  %v13940_v22 = vcombine.low %v221_v1, %v225_v3  ;;  %v13949_v26 = vcombine.high %v229_v14, %v233_v15  ;;  %v1540_v1 = vld [vmem:[%s22314_s1 + $0x2d88] sm:$0xff] }
 0x2fa   :  { %v1544_v3 = vld [vmem:[%s22314_s1 + $0x2da8] sm:$0xff] }
 0x2fb   :  { %10270 = vmatpush1.bf16.msra.mxu1 %v15186_v32  ;;  %v237_v32 = vld [vmem:[%s22314_s1 + $0x4d0] sm:$0xff] }
 0x2fc   :  { %10352 = vmatpush1.bf16.msra.mxu0 %v13908_v33  ;;  %10271 = vmatprep.subr.bf16.mxu1 %v15195_v34  ;;  %v241_v33 = vld [vmem:[%s22314_s1 + $0x4f0] sm:$0xff]  ;;  %v15226_v34 = vcombine.low %v1508_v9, %v1512_v11  ;;  %v15259_v9 = vcombine.high %v1540_v1, %v1544_v3 }
 0x2fd   :  { %10353 = vmatprep.subr.bf16.mxu0 %v13917_v36  ;;  %v13948_v36 = vcombine.low %v229_v14, %v233_v15  ;;  %v13957_v40 = vcombine.high %v237_v32, %v241_v33  ;;  %v1548_v14 = vld [vmem:[%s22314_s1 + $0x2dc8] sm:$0xff] }
 0x2fe   :  { %v1552_v15 = vld [vmem:[%s22314_s1 + $0x2de8] sm:$0xff] }
 0x2ff   :  { %10272 = vmatpush1.bf16.msra.mxu1 %v15194_v44  ;;  %v245_v44 = vld [vmem:[%s22314_s1 + $0x510] sm:$0xff] }
 0x300   :  { %10354 = vmatpush1.bf16.msra.mxu0 %v13916_v45  ;;  %10273 = vmatprep.subr.bf16.mxu1 %v15203_v47  ;;  %v249_v45 = vld [vmem:[%s22314_s1 + $0x530] sm:$0xff]  ;;  %v15234_v47 = vcombine.low %v1516_v28, %v1520_v30  ;;  %v15267_v28 = vcombine.high %v1548_v14, %v1552_v15 }
 0x301   :  { %10355 = vmatprep.subr.bf16.mxu0 %v13925_v48  ;;  %v13956_v48 = vcombine.low %v237_v32, %v241_v33  ;;  %v13965_v51 = vcombine.high %v245_v44, %v249_v45  ;;  %v1556_v32 = vld [vmem:[%s22314_s1 + $0x2e08] sm:$0xff] }
 0x302   :  { %v1560_v33 = vld [vmem:[%s22314_s1 + $0x2e28] sm:$0xff] }
 0x303   :  { %10274 = vmatpush1.bf16.msra.mxu1 %v15202_v55  ;;  %v253_v55 = vld [vmem:[%s22314_s1 + $0x550] sm:$0xff] }
 0x304   :  { %10356 = vmatpush1.bf16.msra.mxu0 %v13924_v56  ;;  %10284 = vmatprep.subr.bf16.mxu1 %v15211_v59  ;;  %v257_v56 = vld [vmem:[%s22314_s1 + $0x570] sm:$0xff]  ;;  %v15242_v59 = vcombine.low %v1524_v42, %v1528_v43  ;;  %v15275_v42 = vcombine.high %v1556_v32, %v1560_v33 }
 0x305   :  { %10366 = vmatprep.subr.bf16.mxu0 %v13933_v62  ;;  %v13964_v62 = vcombine.low %v245_v44, %v249_v45  ;;  %v13973_v0 = vcombine.high %v253_v55, %v257_v56  ;;  %v1564_v44 = vld [vmem:[%s22314_s1 + $0x2e48] sm:$0xff] }
 0x306   :  { %10276 = vmatmul.mubr.bf16.vlgmr.msra.gmra.mrb[4].mxu1 %v18512_v29  ;;  %v1568_v45 = vld [vmem:[%s22314_s1 + $0x2e68] sm:$0xff] }
 0x307   :  { %10285 = vmatpush1.bf16.msra.mxu1 %v15210_v4  ;;  %10358 = vmatmul.mubr.bf16.vlgmr.msra.gmra.mrb[4].mxu0 %v16643_v16  ;;  %v261_v4 = vld [vmem:[%s22314_s1 + $0x590] sm:$0xff] }
 0x308   :  { %10367 = vmatpush1.bf16.msra.mxu0 %v13932_v5  ;;  %10286 = vmatprep.subr.bf16.mxu1 %v15219_v7  ;;  %v265_v5 = vld [vmem:[%s22314_s1 + $0x5b0] sm:$0xff]  ;;  %v15250_v7 = vcombine.low %v1532_v52, %v1536_v54  ;;  %v15283_v52 = vcombine.high %v1564_v44, %v1568_v45 }
 0x309   :  { %10368 = vmatprep.subr.bf16.mxu0 %v13941_v8  ;;  %10316 = vmatprep.mubr.bf16.mxu1 %v18520_v37  ;;  %v13972_v8 = vcombine.low %v253_v55, %v257_v56  ;;  %v13981_v11 = vcombine.high %v261_v4, %v265_v5  ;;  %v1572_v55 = vld [vmem:[%s22314_s1 + $0x2e88] sm:$0xff] }
 0x30a   :  { %10398 = vmatprep.mubr.bf16.mxu0 %v16519_v61  ;;  %v1576_v56 = vld [vmem:[%s22314_s1 + $0x2ea8] sm:$0xff] }
 0x30b   :  { %10287 = vmatpush1.bf16.msra.mxu1 %v15218_v18  ;;  %v269_v18 = vld [vmem:[%s22314_s1 + $0x5d0] sm:$0xff] }
 0x30c   :  { %10369 = vmatpush1.bf16.msra.mxu0 %v13940_v22  ;;  %10288 = vmatprep.subr.bf16.mxu1 %v15227_v23  ;;  %v273_v22 = vld [vmem:[%s22314_s1 + $0x5f0] sm:$0xff]  ;;  %v15258_v23 = vcombine.low %v1540_v1, %v1544_v3  ;;  %v15291_v1 = vcombine.high %v1572_v55, %v1576_v56 }
 0x30d   :  { %10370 = vmatprep.subr.bf16.mxu0 %v13949_v26  ;;  %v13980_v26 = vcombine.low %v261_v4, %v265_v5  ;;  %v13989_v30 = vcombine.high %v269_v18, %v273_v22  ;;  %v1580_v4 = vld [vmem:[%s22314_s1 + $0x2ec8] sm:$0xff] }
 0x30e   :  { %v1584_v5 = vld [vmem:[%s22314_s1 + $0x2ee8] sm:$0xff] }
 0x30f   :  { %10289 = vmatpush1.bf16.msra.mxu1 %v15226_v34  ;;  %v277_v34 = vld [vmem:[%s22314_s1 + $0x610] sm:$0xff] }
 0x310   :  { %10371 = vmatpush1.bf16.msra.mxu0 %v13948_v36  ;;  %10290 = vmatprep.subr.bf16.mxu1 %v15235_v39  ;;  %v281_v36 = vld [vmem:[%s22314_s1 + $0x630] sm:$0xff]  ;;  %v15266_v39 = vcombine.low %v1548_v14, %v1552_v15  ;;  %v15299_v14 = vcombine.high %v1580_v4, %v1584_v5 }
 0x311   :  { %10372 = vmatprep.subr.bf16.mxu0 %v13957_v40  ;;  %v13988_v40 = vcombine.low %v269_v18, %v273_v22  ;;  %v13997_v43 = vcombine.high %v277_v34, %v281_v36  ;;  %v1588_v18 = vld [vmem:[%s22314_s1 + $0x2f08] sm:$0xff] }
 0x312   :  { %v1592_v22 = vld [vmem:[%s22314_s1 + $0x2f28] sm:$0xff] }
 0x313   :  { %10291 = vmatpush1.bf16.msra.mxu1 %v15234_v47  ;;  %v285_v47 = vld [vmem:[%s22314_s1 + $0x650] sm:$0xff] }
 0x314   :  { %10373 = vmatpush1.bf16.msra.mxu0 %v13956_v48  ;;  %10292 = vmatprep.subr.bf16.mxu1 %v15243_v49  ;;  %v289_v48 = vld [vmem:[%s22314_s1 + $0x670] sm:$0xff]  ;;  %v15274_v49 = vcombine.low %v1556_v32, %v1560_v33  ;;  %v15307_v32 = vcombine.high %v1588_v18, %v1592_v22 }
 0x315   :  { %10374 = vmatprep.subr.bf16.mxu0 %v13965_v51  ;;  %v13996_v51 = vcombine.low %v277_v34, %v281_v36  ;;  %v14005_v54 = vcombine.high %v285_v47, %v289_v48  ;;  %v1596_v34 = vld [vmem:[%s22314_s1 + $0x2f48] sm:$0xff] }
 0x316   :  { %v1600_v36 = vld [vmem:[%s22314_s1 + $0x2f68] sm:$0xff] }
 0x317   :  { %10293 = vmatpush1.bf16.msra.mxu1 %v15242_v59  ;;  %v293_v59 = vld [vmem:[%s22314_s1 + $0x690] sm:$0xff] }
 0x318   :  { %10375 = vmatpush1.bf16.msra.mxu0 %v13964_v62  ;;  %10294 = vmatprep.subr.bf16.mxu1 %v15251_v63  ;;  %v297_v62 = vld [vmem:[%s22314_s1 + $0x6b0] sm:$0xff]  ;;  %v15282_v63 = vcombine.low %v1564_v44, %v1568_v45  ;;  %v15315_v44 = vcombine.high %v1596_v34, %v1600_v36 }
 0x319   :  { %10376 = vmatprep.subr.bf16.mxu0 %v13973_v0  ;;  %v14004_v0 = vcombine.low %v285_v47, %v289_v48  ;;  %v14013_v3 = vcombine.high %v293_v59, %v297_v62  ;;  %v1604_v47 = vld [vmem:[%s22314_s1 + $0x2f88] sm:$0xff] }
 0x31a   :  { %v1608_v48 = vld [vmem:[%s22314_s1 + $0x2fa8] sm:$0xff] }
 0x31b   :  { %10295 = vmatpush1.bf16.msra.mxu1 %v15250_v7  ;;  %v301_v7 = vld [vmem:[%s22314_s1 + $0x6d0] sm:$0xff] }
 0x31c   :  { %10377 = vmatpush1.bf16.msra.mxu0 %v13972_v8  ;;  %10296 = vmatprep.subr.bf16.mxu1 %v15259_v9  ;;  %v305_v8 = vld [vmem:[%s22314_s1 + $0x6f0] sm:$0xff]  ;;  %v15290_v9 = vcombine.low %v1572_v55, %v1576_v56  ;;  %v15323_v55 = vcombine.high %v1604_v47, %v1608_v48 }
 0x31d   :  { %10378 = vmatprep.subr.bf16.mxu0 %v13981_v11  ;;  %v14012_v11 = vcombine.low %v293_v59, %v297_v62  ;;  %v14021_v15 = vcombine.high %v301_v7, %v305_v8  ;;  %v1612_v59 = vld [vmem:[%s22314_s1 + $0x2fc8] sm:$0xff] }
 0x31e   :  { %v1616_v62 = vld [vmem:[%s22314_s1 + $0x2fe8] sm:$0xff] }
 0x31f   :  { %10297 = vmatpush1.bf16.msra.mxu1 %v15258_v23  ;;  %v309_v23 = vld [vmem:[%s22314_s1 + $0x710] sm:$0xff] }
 0x320   :  { %10379 = vmatpush1.bf16.msra.mxu0 %v13980_v26  ;;  %10298 = vmatprep.subr.bf16.mxu1 %v15267_v28  ;;  %v313_v26 = vld [vmem:[%s22314_s1 + $0x730] sm:$0xff]  ;;  %v15298_v28 = vcombine.low %v1580_v4, %v1584_v5  ;;  %v15331_v4 = vcombine.high %v1612_v59, %v1616_v62 }
 0x321   :  { %10380 = vmatprep.subr.bf16.mxu0 %v13989_v30  ;;  %v14020_v30 = vcombine.low %v301_v7, %v305_v8  ;;  %v14029_v33 = vcombine.high %v309_v23, %v313_v26  ;;  %v86_v7 = vld [vmem:[%s22314_s1 + $0x18] sm:$0xff] }
 0x322   :  { %v90_v8 = vld [vmem:[%s22314_s1 + $0x38] sm:$0xff] }
 0x323   :  { %10299 = vmatpush1.bf16.msra.mxu1 %v15266_v39  ;;  %v317_v39 = vld [vmem:[%s22314_s1 + $0x750] sm:$0xff] }
 0x324   :  { %10381 = vmatpush1.bf16.msra.mxu0 %v13988_v40  ;;  %10300 = vmatprep.subr.bf16.mxu1 %v15275_v42  ;;  %v321_v40 = vld [vmem:[%s22314_s1 + $0x770] sm:$0xff]  ;;  %v15306_v42 = vcombine.low %v1588_v18, %v1592_v22  ;;  %v13807_v18 = vcombine.high %v86_v7, %v90_v8 }
 0x325   :  { %10382 = vmatprep.subr.bf16.mxu0 %v13997_v43  ;;  %v14028_v43 = vcombine.low %v309_v23, %v313_v26  ;;  %v14037_v45 = vcombine.high %v317_v39, %v321_v40  ;;  %v94_v23 = vld [vmem:[%s22314_s1 + $0x58] sm:$0xff] }
 0x326   :  { %v98_v26 = vld [vmem:[%s22314_s1 + $0x78] sm:$0xff] }
 0x327   :  { %10301 = vmatpush1.bf16.msra.mxu1 %v15274_v49  ;;  %v325_v49 = vld [vmem:[%s22314_s1 + $0x790] sm:$0xff] }
 0x328   :  { %10383 = vmatpush1.bf16.msra.mxu0 %v13996_v51  ;;  %10302 = vmatprep.subr.bf16.mxu1 %v15283_v52  ;;  %v329_v51 = vld [vmem:[%s22314_s1 + $0x7b0] sm:$0xff]  ;;  %v15314_v52 = vcombine.low %v1596_v34, %v1600_v36  ;;  %v13815_v34 = vcombine.high %v94_v23, %v98_v26 }
 0x329   :  { %10384 = vmatprep.subr.bf16.mxu0 %v14005_v54  ;;  %v14036_v54 = vcombine.low %v317_v39, %v321_v40  ;;  %v14045_v56 = vcombine.high %v325_v49, %v329_v51  ;;  %v102_v39 = vld [vmem:[%s22314_s1 + $0x98] sm:$0xff] }
 0x32a   :  { %v106_v40 = vld [vmem:[%s22314_s1 + $0xb8] sm:$0xff] }
 0x32b   :  { %10303 = vmatpush1.bf16.msra.mxu1 %v15282_v63  ;;  %v333_v63 = vld [vmem:[%s22314_s1 + $0x7d0] sm:$0xff] }
 0x32c   :  { %10385 = vmatpush1.bf16.msra.mxu0 %v14004_v0  ;;  %10304 = vmatprep.subr.bf16.mxu1 %v15291_v1  ;;  %v337_v0 = vld [vmem:[%s22314_s1 + $0x7f0] sm:$0xff]  ;;  %v15322_v1 = vcombine.low %v1604_v47, %v1608_v48  ;;  %v13823_v47 = vcombine.high %v102_v39, %v106_v40 }
 0x32d   :  { %10386 = vmatprep.subr.bf16.mxu0 %v14013_v3  ;;  %v14044_v3 = vcombine.low %v325_v49, %v329_v51  ;;  %v14053_v5 = vcombine.high %v333_v63, %v337_v0  ;;  %v110_v49 = vld [vmem:[%s22314_s1 + $0xd8] sm:$0xff] }
 0x32e   :  { %v114_v51 = vld [vmem:[%s22314_s1 + $0xf8] sm:$0xff] }
 0x32f   :  { %10305 = vmatpush1.bf16.msra.mxu1 %v15290_v9  ;;  %v341_v9 = vld [vmem:[%s22314_s1 + $0x810] sm:$0xff] }
 0x330   :  { %10387 = vmatpush1.bf16.msra.mxu0 %v14012_v11  ;;  %10306 = vmatprep.subr.bf16.mxu1 %v15299_v14  ;;  %v345_v11 = vld [vmem:[%s22314_s1 + $0x830] sm:$0xff]  ;;  %v15330_v14 = vcombine.low %v1612_v59, %v1616_v62  ;;  %v13831_v59 = vcombine.high %v110_v49, %v114_v51 }
 0x331   :  { %10388 = vmatprep.subr.bf16.mxu0 %v14021_v15  ;;  %v14052_v15 = vcombine.low %v333_v63, %v337_v0  ;;  %v14061_v22 = vcombine.high %v341_v9, %v345_v11  ;;  %v118_v63 = vld [vmem:[%s22314_s1 + $0x118] sm:$0xff] }
 0x332   :  { %v122_v0 = vld [vmem:[%s22314_s1 + $0x138] sm:$0xff] }
 0x333   :  { %10307 = vmatpush1.bf16.msra.mxu1 %v15298_v28  ;;  %v349_v28 = vld [vmem:[%s22314_s1 + $0x850] sm:$0xff] }
 0x334   :  { %10389 = vmatpush1.bf16.msra.mxu0 %v14020_v30  ;;  %10308 = vmatprep.subr.bf16.mxu1 %v15307_v32  ;;  %v353_v30 = vld [vmem:[%s22314_s1 + $0x870] sm:$0xff]  ;;  %v13806_v32 = vcombine.low %v86_v7, %v90_v8  ;;  %v126_v8 = vld [vmem:[%s22314_s1 + $0x158] sm:$0xff] }
 0x335   :  { %10390 = vmatprep.subr.bf16.mxu0 %v14029_v33  ;;  %v14060_v33 = vcombine.low %v341_v9, %v345_v11  ;;  %v14069_v36 = vcombine.high %v349_v28, %v353_v30  ;;  %v130_v9 = vld [vmem:[%s22314_s1 + $0x178] sm:$0xff]  ;;  %v381_v11 = vld [vmem:[%s22314_s1 + $0x950] sm:$0xff] }
 0x337   :  { %10309 = vmatpush1.bf16.msra.mxu1 %v15306_v42  ;;  %v357_v42 = vld [vmem:[%s22314_s1 + $0x890] sm:$0xff] }
 0x338   :  { %10391 = vmatpush1.bf16.msra.mxu0 %v14028_v43  ;;  %10310 = vmatprep.subr.bf16.mxu1 %v15315_v44  ;;  %v361_v43 = vld [vmem:[%s22314_s1 + $0x8b0] sm:$0xff]  ;;  %v13814_v44 = vcombine.low %v94_v23, %v98_v26  ;;  %v134_v26 = vld [vmem:[%s22314_s1 + $0x198] sm:$0xff] }
 0x339   :  { %10392 = vmatprep.subr.bf16.mxu0 %v14037_v45  ;;  %v14068_v45 = vcombine.low %v349_v28, %v353_v30  ;;  %v14077_v48 = vcombine.high %v357_v42, %v361_v43  ;;  %v138_v28 = vld [vmem:[%s22314_s1 + $0x1b8] sm:$0xff]  ;;  %v389_v30 = vld [vmem:[%s22314_s1 + $0x990] sm:$0xff] }
 0x33b   :  { %10311 = vmatpush1.bf16.msra.mxu1 %v15314_v52  ;;  %v365_v52 = vld [vmem:[%s22314_s1 + $0x8d0] sm:$0xff] }
 0x33c   :  { %10393 = vmatpush1.bf16.msra.mxu0 %v14036_v54  ;;  %10312 = vmatprep.subr.bf16.mxu1 %v15323_v55  ;;  %v369_v54 = vld [vmem:[%s22314_s1 + $0x8f0] sm:$0xff]  ;;  %v13822_v55 = vcombine.low %v102_v39, %v106_v40  ;;  %v142_v40 = vld [vmem:[%s22314_s1 + $0x1d8] sm:$0xff] }
 0x33d   :  { %10394 = vmatprep.subr.bf16.mxu0 %v14045_v56  ;;  %v14076_v56 = vcombine.low %v357_v42, %v361_v43  ;;  %v14085_v62 = vcombine.high %v365_v52, %v369_v54  ;;  %v146_v42 = vld [vmem:[%s22314_s1 + $0x1f8] sm:$0xff]  ;;  %v397_v43 = vld [vmem:[%s22314_s1 + $0x9d0] sm:$0xff] }
 0x33f   :  { %10313 = vmatpush1.bf16.msra.mxu1 %v15322_v1  ;;  %v377_v1 = vld [vmem:[%s22314_s1 + $0x930] sm:$0xff] }
 0x340   :  { %10395 = vmatpush1.bf16.msra.mxu0 %v14044_v3  ;;  %10314 = vmatprep.subr.bf16.mxu1 %v15331_v4  ;;  %v13830_v3 = vcombine.low %v110_v49, %v114_v51  ;;  %v14084_v4 = vcombine.low %v365_v52, %v369_v54  ;;  %v150_v51 = vld [vmem:[%s22314_s1 + $0x218] sm:$0xff]  ;;  %v405_v54 = vld [vmem:[%s22314_s1 + $0xa10] sm:$0xff] }
 0x341   :  { %10396 = vmatprep.subr.bf16.mxu0 %v14053_v5  ;;  %v13839_v5 = vcombine.high %v118_v63, %v122_v0  ;;  %v154_v52 = vld [vmem:[%s22314_s1 + $0x238] sm:$0xff] }
 0x343   :  { %10315 = vmatpush1.bf16.msra.mxu1 %v15330_v14  ;;  %v385_v14 = vld [vmem:[%s22314_s1 + $0x970] sm:$0xff] }
 0x344   :  { %10397 = vmatpush1.bf16.msra.mxu0 %v14052_v15  ;;  %10817 = vmatprep.subr.bf16.mxu1 %v13807_v18  ;;  %v13838_v15 = vcombine.low %v118_v63, %v122_v0  ;;  %v14101_v23 = vcombine.high %v381_v11, %v385_v14  ;;  %v158_v0 = vld [vmem:[%s22314_s1 + $0x258] sm:$0xff] }
 0x345   :  { %10407 = vmatprep.subr.bf16.mxu0 %v14061_v22  ;;  %v13847_v22 = vcombine.high %v126_v8, %v130_v9 }
 0x346   :  { %10317 = vmatmul.mubr.bf16.vlgmr.msra.gmra.mrb[4].mxu1 %v18715_v46 }
 0x347   :  { %10399 = vmatmul.mubr.bf16.vlgmr.msra.gmra.mrb[4].mxu0 %v16654_v21  ;;  %10818 = vmatpush1.bf16.msra.mxu1 %v13806_v32  ;;  %v393_v32 = vld [vmem:[%s22314_s1 + $0x9b0] sm:$0xff] }
 0x348   :  { %10408 = vmatpush1.bf16.msra.mxu0 %v14060_v33  ;;  %10819 = vmatprep.subr.bf16.mxu1 %v13815_v34  ;;  %v13846_v33 = vcombine.low %v126_v8, %v130_v9  ;;  %v14100_v34 = vcombine.low %v381_v11, %v385_v14  ;;  %v14109_v39 = vcombine.high %v389_v30, %v393_v32  ;;  %v166_v9 = vld [vmem:[%s22314_s1 + $0x298] sm:$0xff]  ;;  %v421_v14 = vld [vmem:[%s22314_s1 + $0xa90] sm:$0xff] }
 0x349   :  { %10409 = vmatprep.subr.bf16.mxu0 %v14069_v36  ;;  %10439 = vmatprep.mubr.bf16.mxu0 %v16662_v27  ;;  %v13855_v36 = vcombine.high %v134_v26, %v138_v28  ;;  %v170_v11 = vld [vmem:[%s22314_s1 + $0x2b8] sm:$0xff] }
 0x34a   :  { %10849 = vmatprep.mubr.bf16.mxu1 %v16508_v57  ;;  %v373_v57 = vld [vmem:[%s22314_s1 + $0x910] sm:$0xff] }
 0x34b   :  { %10820 = vmatpush1.bf16.msra.mxu1 %v13814_v44  ;;  %v14093_v7 = vcombine.high %v373_v57, %v377_v1  ;;  %v14092_v18 = vcombine.low %v373_v57, %v377_v1  ;;  %v401_v44 = vld [vmem:[%s22314_s1 + $0x9f0] sm:$0xff]  ;;  %v162_v57 = vld [vmem:[%s22314_s1 + $0x278] sm:$0xff] }
 0x34c   :  { %10410 = vmatpush1.bf16.msra.mxu0 %v14068_v45  ;;  %10821 = vmatprep.subr.bf16.mxu1 %v13823_v47  ;;  %v13854_v45 = vcombine.low %v134_v26, %v138_v28  ;;  %v14108_v47 = vcombine.low %v389_v30, %v393_v32  ;;  %v14117_v49 = vcombine.high %v397_v43, %v401_v44  ;;  %v413_v1 = vld [vmem:[%s22314_s1 + $0xa50] sm:$0xff]  ;;  %v174_v28 = vld [vmem:[%s22314_s1 + $0x2d8] sm:$0xff] }
 0x34d   :  { %10411 = vmatprep.subr.bf16.mxu0 %v14077_v48  ;;  %v13863_v48 = vcombine.high %v142_v40, %v146_v42  ;;  %v178_v30 = vld [vmem:[%s22314_s1 + $0x2f8] sm:$0xff]  ;;  %v429_v32 = vld [vmem:[%s22314_s1 + $0xad0] sm:$0xff] }
 0x34f   :  { %10822 = vmatpush1.bf16.msra.mxu1 %v13822_v55  ;;  %v409_v55 = vld [vmem:[%s22314_s1 + $0xa30] sm:$0xff] }
 0x350   :  { %10412 = vmatpush1.bf16.msra.mxu0 %v14076_v56  ;;  %10823 = vmatprep.subr.bf16.mxu1 %v13831_v59  ;;  %v13862_v56 = vcombine.low %v142_v40, %v146_v42  ;;  %v14116_v59 = vcombine.low %v397_v43, %v401_v44  ;;  %v14125_v63 = vcombine.high %v405_v54, %v409_v55  ;;  %v182_v42 = vld [vmem:[%s22314_s1 + $0x318] sm:$0xff]  ;;  %v437_v44 = vld [vmem:[%s22314_s1 + $0xb10] sm:$0xff] }
 0x351   :  { %10413 = vmatprep.subr.bf16.mxu0 %v14085_v62  ;;  %v13871_v62 = vcombine.high %v150_v51, %v154_v52  ;;  %v186_v43 = vld [vmem:[%s22314_s1 + $0x338] sm:$0xff] }
 0x353   :  { %10824 = vmatpush1.bf16.msra.mxu1 %v13830_v3  ;;  %v417_v3 = vld [vmem:[%s22314_s1 + $0xa70] sm:$0xff] }
 0x354   :  { %10414 = vmatpush1.bf16.msra.mxu0 %v14084_v4  ;;  %10825 = vmatprep.subr.bf16.mxu1 %v13839_v5  ;;  %v13870_v4 = vcombine.low %v150_v51, %v154_v52  ;;  %v14124_v5 = vcombine.low %v405_v54, %v409_v55  ;;  %v14133_v8 = vcombine.high %v413_v1, %v417_v3  ;;  %v190_v52 = vld [vmem:[%s22314_s1 + $0x358] sm:$0xff]  ;;  %v445_v55 = vld [vmem:[%s22314_s1 + $0xb50] sm:$0xff] }
 0x355   :  { %10415 = vmatprep.subr.bf16.mxu0 %v14093_v7  ;;  %v13879_v7 = vcombine.high %v158_v0, %v162_v57  ;;  %v194_v54 = vld [vmem:[%s22314_s1 + $0x378] sm:$0xff] }
 0x357   :  { %10826 = vmatpush1.bf16.msra.mxu1 %v13838_v15  ;;  %v425_v15 = vld [vmem:[%s22314_s1 + $0xab0] sm:$0xff] }
 0x358   :  { %10416 = vmatpush1.bf16.msra.mxu0 %v14092_v18  ;;  %10827 = vmatprep.subr.bf16.mxu1 %v13847_v22  ;;  %v13878_v18 = vcombine.low %v158_v0, %v162_v57  ;;  %v14132_v22 = vcombine.low %v413_v1, %v417_v3  ;;  %v14141_v26 = vcombine.high %v421_v14, %v425_v15  ;;  %v198_v57 = vld [vmem:[%s22314_s1 + $0x398] sm:$0xff]  ;;  %v453_v3 = vld [vmem:[%s22314_s1 + $0xb90] sm:$0xff] }
 0x359   :  { %10417 = vmatprep.subr.bf16.mxu0 %v14101_v23  ;;  %v13887_v23 = vcombine.high %v166_v9, %v170_v11  ;;  %v202_v1 = vld [vmem:[%s22314_s1 + $0x3b8] sm:$0xff] }
 0x35b   :  { %10828 = vmatpush1.bf16.msra.mxu1 %v13846_v33  ;;  %v433_v33 = vld [vmem:[%s22314_s1 + $0xaf0] sm:$0xff] }
 0x35c   :  { %10418 = vmatpush1.bf16.msra.mxu0 %v14100_v34  ;;  %10829 = vmatprep.subr.bf16.mxu1 %v13855_v36  ;;  %v13886_v34 = vcombine.low %v166_v9, %v170_v11  ;;  %v14140_v36 = vcombine.low %v421_v14, %v425_v15  ;;  %v14149_v40 = vcombine.high %v429_v32, %v433_v33  ;;  %v206_v11 = vld [vmem:[%s22314_s1 + $0x3d8] sm:$0xff]  ;;  %v461_v15 = vld [vmem:[%s22314_s1 + $0xbd0] sm:$0xff] }
 0x35d   :  { %10419 = vmatprep.subr.bf16.mxu0 %v14109_v39  ;;  %v13895_v39 = vcombine.high %v174_v28, %v178_v30  ;;  %v210_v14 = vld [vmem:[%s22314_s1 + $0x3f8] sm:$0xff] }
 0x35f   :  { %10830 = vmatpush1.bf16.msra.mxu1 %v13854_v45  ;;  %v441_v45 = vld [vmem:[%s22314_s1 + $0xb30] sm:$0xff] }
 0x360   :  { %10420 = vmatpush1.bf16.msra.mxu0 %v14108_v47  ;;  %10831 = vmatprep.subr.bf16.mxu1 %v13863_v48  ;;  %v13894_v47 = vcombine.low %v174_v28, %v178_v30  ;;  %v14148_v48 = vcombine.low %v429_v32, %v433_v33  ;;  %v14157_v51 = vcombine.high %v437_v44, %v441_v45  ;;  %v214_v30 = vld [vmem:[%s22314_s1 + $0x418] sm:$0xff]  ;;  %v469_v33 = vld [vmem:[%s22314_s1 + $0xc10] sm:$0xff] }
 0x361   :  { %10421 = vmatprep.subr.bf16.mxu0 %v14117_v49  ;;  %v13903_v49 = vcombine.high %v182_v42, %v186_v43  ;;  %v218_v32 = vld [vmem:[%s22314_s1 + $0x438] sm:$0xff] }
 0x363   :  { %10832 = vmatpush1.bf16.msra.mxu1 %v13862_v56  ;;  %v449_v56 = vld [vmem:[%s22314_s1 + $0xb70] sm:$0xff] }
 0x364   :  { %10422 = vmatpush1.bf16.msra.mxu0 %v14116_v59  ;;  %10833 = vmatprep.subr.bf16.mxu1 %v13871_v62  ;;  %v13902_v59 = vcombine.low %v182_v42, %v186_v43  ;;  %v14156_v62 = vcombine.low %v437_v44, %v441_v45  ;;  %v14165_v0 = vcombine.high %v445_v55, %v449_v56  ;;  %v222_v43 = vld [vmem:[%s22314_s1 + $0x458] sm:$0xff]  ;;  %v477_v45 = vld [vmem:[%s22314_s1 + $0xc50] sm:$0xff] }
 0x365   :  { %10423 = vmatprep.subr.bf16.mxu0 %v14125_v63  ;;  %v13911_v63 = vcombine.high %v190_v52, %v194_v54  ;;  %v226_v44 = vld [vmem:[%s22314_s1 + $0x478] sm:$0xff] }
 0x367   :  { %10834 = vmatpush1.bf16.msra.mxu1 %v13870_v4  ;;  %v457_v4 = vld [vmem:[%s22314_s1 + $0xbb0] sm:$0xff] }
 0x368   :  { %10424 = vmatpush1.bf16.msra.mxu0 %v14124_v5  ;;  %10835 = vmatprep.subr.bf16.mxu1 %v13879_v7  ;;  %v13910_v5 = vcombine.low %v190_v52, %v194_v54  ;;  %v14164_v7 = vcombine.low %v445_v55, %v449_v56  ;;  %v14173_v9 = vcombine.high %v453_v3, %v457_v4  ;;  %v230_v54 = vld [vmem:[%s22314_s1 + $0x498] sm:$0xff]  ;;  %v485_v56 = vld [vmem:[%s22314_s1 + $0xc90] sm:$0xff] }
 0x369   :  { %10425 = vmatprep.subr.bf16.mxu0 %v14133_v8  ;;  %v13919_v8 = vcombine.high %v198_v57, %v202_v1  ;;  %v234_v55 = vld [vmem:[%s22314_s1 + $0x4b8] sm:$0xff] }
 0x36b   :  { %10836 = vmatpush1.bf16.msra.mxu1 %v13878_v18  ;;  %v465_v18 = vld [vmem:[%s22314_s1 + $0xbf0] sm:$0xff] }
 0x36c   :  { %10426 = vmatpush1.bf16.msra.mxu0 %v14132_v22  ;;  %10837 = vmatprep.subr.bf16.mxu1 %v13887_v23  ;;  %v13918_v22 = vcombine.low %v198_v57, %v202_v1  ;;  %v14172_v23 = vcombine.low %v453_v3, %v457_v4  ;;  %v14181_v28 = vcombine.high %v461_v15, %v465_v18  ;;  %v1621_v57 = vlaneseq  ;;  %v242_v3 = vld [vmem:[%s22314_s1 + $0x4f8] sm:$0xff]  ;;  %v493_v4 = vld [vmem:[%s22314_s1 + $0xcd0] sm:$0xff] }
 0x36d   :  { %10427 = vmatprep.subr.bf16.mxu0 %v14141_v26  ;;  %v13927_v26 = vcombine.high %v206_v11, %v210_v14 }
 0x36f   :  { %10838 = vmatpush1.bf16.msra.mxu1 %v13886_v34  ;;  %v473_v34 = vld [vmem:[%s22314_s1 + $0xc30] sm:$0xff] }
 0x370   :  { %10428 = vmatpush1.bf16.msra.mxu0 %v14140_v36  ;;  %10839 = vmatprep.subr.bf16.mxu1 %v13895_v39  ;;  %v13926_v36 = vcombine.low %v206_v11, %v210_v14  ;;  %v14180_v39 = vcombine.low %v461_v15, %v465_v18  ;;  %v14189_v42 = vcombine.high %v469_v33, %v473_v34  ;;  %v19333_v11 = vshrl.u32 %v1621_v57, 7  ;;  %v246_v15 = vld [vmem:[%s22314_s1 + $0x518] sm:$0xff] }
 0x371   :  { %10429 = vmatprep.subr.bf16.mxu0 %v14149_v40  ;;  %v13935_v40 = vcombine.high %v214_v30, %v218_v32  ;;  %v250_v18 = vld [vmem:[%s22314_s1 + $0x538] sm:$0xff] }
 0x372   :  { %v270_v57 = vld [vmem:[%s22314_s1 + $0x5d8] sm:$0xff] }
 0x373   :  { %10840 = vmatpush1.bf16.msra.mxu1 %v13894_v47  ;;  %v481_v47 = vld [vmem:[%s22314_s1 + $0xc70] sm:$0xff] }
 0x374   :  { %10430 = vmatpush1.bf16.msra.mxu0 %v14148_v48  ;;  %10841 = vmatprep.subr.bf16.mxu1 %v13903_v49  ;;  %v13934_v48 = vcombine.low %v214_v30, %v218_v32  ;;  %v14188_v49 = vcombine.low %v469_v33, %v473_v34  ;;  %v14197_v52 = vcombine.high %v477_v45, %v481_v47  ;;  %v19348_v30 = vsub.s32 0, %v19333_v11  ;;  %v254_v33 = vld [vmem:[%s22314_s1 + $0x558] sm:$0xff] }
 0x375   :  { %10431 = vmatprep.subr.bf16.mxu0 %v14157_v51  ;;  %v13943_v51 = vcombine.high %v222_v43, %v226_v44  ;;  %v258_v34 = vld [vmem:[%s22314_s1 + $0x578] sm:$0xff] }
 0x377   :  { %10842 = vmatpush1.bf16.msra.mxu1 %v13902_v59  ;;  %v489_v59 = vld [vmem:[%s22314_s1 + $0xcb0] sm:$0xff] }
 0x378   :  { %10432 = vmatpush1.bf16.msra.mxu0 %v14156_v62  ;;  %10843 = vmatprep.subr.bf16.mxu1 %v13911_v63  ;;  %v13942_v62 = vcombine.low %v222_v43, %v226_v44  ;;  %v14196_v63 = vcombine.low %v477_v45, %v481_v47  ;;  %v14205_v1 = vcombine.high %v485_v56, %v489_v59 }
 0x379   :  { %10433 = vmatprep.subr.bf16.mxu0 %v14165_v0  ;;  %v13951_v0 = vcombine.high %v230_v54, %v234_v55  ;;  %v13966_v43 = vcombine.low %v246_v15, %v250_v18  ;;  %v13975_v45 = vcombine.high %v254_v33, %v258_v34 }
 0x37b   :  { %10844 = vmatpush1.bf16.msra.mxu1 %v13910_v5  ;;  %v497_v5 = vld [vmem:[%s22314_s1 + $0xcf0] sm:$0xff] }
 0x37c   :  { %10434 = vmatpush1.bf16.msra.mxu0 %v14164_v7  ;;  %10845 = vmatprep.subr.bf16.mxu1 %v13919_v8  ;;  %v13950_v7 = vcombine.low %v230_v54, %v234_v55  ;;  %v14204_v8 = vcombine.low %v485_v56, %v489_v59  ;;  %v14213_v14 = vcombine.high %v493_v4, %v497_v5  ;;  %v517_v54 = vld [vmem:[%s22314_s1 + $0xd90] sm:$0xff] }
 0x37d   :  { %10435 = vmatprep.subr.bf16.mxu0 %v14173_v9  ;;  %v521_v55 = vld [vmem:[%s22314_s1 + $0xdb0] sm:$0xff]  ;;  %v13974_v56 = vcombine.low %v254_v33, %v258_v34 }
 0x37f   :  { %10846 = vmatpush1.bf16.msra.mxu1 %v13918_v22  ;;  %v505_v22 = vld [vmem:[%s22314_s1 + $0xd30] sm:$0xff] }
 0x380   :  { %10436 = vmatpush1.bf16.msra.mxu0 %v14172_v23  ;;  %10847 = vmatprep.subr.bf16.mxu1 %v13927_v26  ;;  %v14212_v26 = vcombine.low %v493_v4, %v497_v5  ;;  %v525_v4 = vld [vmem:[%s22314_s1 + $0xdd0] sm:$0xff] }
 0x381   :  { %10437 = vmatprep.subr.bf16.mxu0 %v14181_v28  ;;  %v13967_v28 = vcombine.high %v246_v15, %v250_v18  ;;  %v14236_v15 = vcombine.low %v517_v54, %v521_v55 }
 0x383   :  { %10848 = vmatpush1.bf16.msra.mxu1 %v13926_v36  ;;  %v1619_v36 = vld [vmem:[%s22316_s2] sm:$0xff] }
 0x384   :  { %10438 = vmatpush1.bf16.msra.mxu0 %v14180_v39  ;;  %10858 = vmatprep.subr.bf16.mxu1 %v13935_v40  ;;  %v19360_v39 = vsub.s32 1, %v19333_v11  ;;  %v509_v40 = vld [vmem:[%s22314_s1 + $0xd50] sm:$0xff]  ;;  %v1624_v47 = vrot.slane %v1619_v36, %v19348_v30 }
 0x385   :  { %10448 = vmatprep.subr.bf16.mxu0 %v14189_v42  ;;  %v513_v42 = vld [vmem:[%s22314_s1 + $0xd70] sm:$0xff] }
 0x386   :  { %10850 = vmatmul.mubr.bf16.vlgmr.msra.gmra.mrb[8].mxu1 %v16643_v16  ;;  %v238_v16 = vld [vmem:[%s22314_s1 + $0x4d8] sm:$0xff]  ;;  %v14228_v59 = vcombine.low %v509_v40, %v513_v42 }
 0x387   :  { %10440 = vmatmul.mubr.bf16.vlgmr.msra.gmra.mrb[4].mxu0 %v16860_v35  ;;  %10859 = vmatpush1.bf16.msra.mxu1 %v13934_v48  ;;  %v13959_v9 = vcombine.high %v238_v16, %v242_v3  ;;  %v13958_v23 = vcombine.low %v238_v16, %v242_v3  ;;  %v14229_v48 = vcombine.high %v509_v40, %v513_v42  ;;  %v286_v40 = vld [vmem:[%s22314_s1 + $0x658] sm:$0xff] }
 0x388   :  { %10449 = vmatpush1.bf16.msra.mxu0 %v14188_v49  ;;  %10860 = vmatprep.subr.bf16.mxu1 %v13943_v51  ;;  %v262_v49 = vld [vmem:[%s22314_s1 + $0x598] sm:$0xff] }
 0x389   :  { %10450 = vmatprep.subr.bf16.mxu0 %v14197_v52  ;;  %10480 = vmatprep.mubr.bf16.mxu0 %v16868_v41  ;;  %v266_v51 = vld [vmem:[%s22314_s1 + $0x5b8] sm:$0xff]  ;;  %v1628_v52 = vrot.slane %v1619_v36, %v19360_v39 }
 0x38a   :  { %10890 = vmatprep.mubr.bf16.mxu1 %v16519_v61  ;;  %v501_v61 = vld [vmem:[%s22314_s1 + $0xd10] sm:$0xff]  ;;  %v290_v42 = vld [vmem:[%s22314_s1 + $0x678] sm:$0xff] }
 0x38b   :  { %10861 = vmatpush1.bf16.msra.mxu1 %v13942_v62  ;;  %v14221_v32 = vcombine.high %v501_v61, %v505_v22  ;;  %v14220_v44 = vcombine.low %v501_v61, %v505_v22  ;;  %v13983_v62 = vcombine.high %v262_v49, %v266_v51  ;;  %v9378_v16 = vadd.f32 %v17348_v6, %v1628_v52  ;;  %v278_v22 = vld [vmem:[%s22314_s1 + $0x618] sm:$0xff] }
 0x38c   :  { %10451 = vmatpush1.bf16.msra.mxu0 %v14196_v63  ;;  %10862 = vmatprep.subr.bf16.mxu1 %v13951_v0  ;;  %v9376_v63 = vadd.f32 %v17340_v2, %v1624_v47  ;;  %v14237_v0 = vcombine.high %v517_v54, %v521_v55  ;;  %v529_v2 = vld [vmem:[%s22314_s1 + $0xdf0] sm:$0xff]  ;;  %v298_v52 = vld [vmem:[%s22314_s1 + $0x6b8] sm:$0xff] }
 0x38d   :  { %10452 = vmatprep.subr.bf16.mxu0 %v14205_v1  ;;  %v274_v1 = vld [vmem:[%s22314_s1 + $0x5f8] sm:$0xff]  ;;  %v14245_v61 = vcombine.high %v525_v4, %v529_v2  ;;  %v14244_v33 = vcombine.low %v525_v4, %v529_v2  ;;  %v549_v54 = vld [vmem:[%s22314_s1 + $0xe90] sm:$0xff] }
 0x38e   :  { %v13991_v6 = vcombine.high %v270_v57, %v274_v1  ;;  %v553_v55 = vld [vmem:[%s22314_s1 + $0xeb0] sm:$0xff] }
 0x38f   :  { %10863 = vmatpush1.bf16.msra.mxu1 %v13950_v7  ;;  %v14268_v4 = vcombine.low %v549_v54, %v553_v55 }
 0x390   :  { %10453 = vmatpush1.bf16.msra.mxu0 %v14204_v8  ;;  %10864 = vmatprep.subr.bf16.mxu1 %v13959_v9  ;;  %v13982_v8 = vcombine.low %v262_v49, %v266_v51  ;;  %v294_v51 = vld [vmem:[%s22314_s1 + $0x698] sm:$0xff] }
 0x391   :  { %10454 = vmatprep.subr.bf16.mxu0 %v14213_v14 }
 0x393   :  { %10865 = vmatpush1.bf16.msra.mxu1 %v13958_v23  ;;  %v282_v23 = vld [vmem:[%s22314_s1 + $0x638] sm:$0xff] }
 0x394   :  { %10455 = vmatpush1.bf16.msra.mxu0 %v14212_v26  ;;  %10866 = vmatprep.subr.bf16.mxu1 %v13967_v28  ;;  %v533_v26 = vld [vmem:[%s22314_s1 + $0xe10] sm:$0xff]  ;;  %v13999_v34 = vcombine.high %v278_v22, %v282_v23 }
 0x395   :  { %10456 = vmatprep.subr.bf16.mxu0 %v14221_v32  ;;  %v537_v28 = vld [vmem:[%s22314_s1 + $0xe30] sm:$0xff]  ;;  %v13990_v32 = vcombine.low %v270_v57, %v274_v1  ;;  %v306_v57 = vld [vmem:[%s22314_s1 + $0x6f8] sm:$0xff] }
 0x396   :  { %v14253_v36 = vcombine.high %v533_v26, %v537_v28  ;;  %v14252_v47 = vcombine.low %v533_v26, %v537_v28  ;;  %v557_v1 = vld [vmem:[%s22314_s1 + $0xed0] sm:$0xff]  ;;  %v318_v26 = vld [vmem:[%s22314_s1 + $0x758] sm:$0xff] }
 0x397   :  { %10867 = vmatpush1.bf16.msra.mxu1 %v13966_v43  ;;  %v541_v43 = vld [vmem:[%s22314_s1 + $0xe50] sm:$0xff]  ;;  %v322_v28 = vld [vmem:[%s22314_s1 + $0x778] sm:$0xff] }
 0x398   :  { %10457 = vmatpush1.bf16.msra.mxu0 %v14220_v44  ;;  %10868 = vmatprep.subr.bf16.mxu1 %v13975_v45  ;;  %v545_v44 = vld [vmem:[%s22314_s1 + $0xe70] sm:$0xff]  ;;  %v13998_v45 = vcombine.low %v278_v22, %v282_v23 }
 0x399   :  { %10458 = vmatprep.subr.bf16.mxu0 %v14229_v48  ;;  %v14007_v48 = vcombine.high %v286_v40, %v290_v42  ;;  %v14261_v49 = vcombine.high %v541_v43, %v545_v44 }
 0x39a   :  { %v9826_v3 = vpop.f32.mrb[0].mxu0 }
 0x39b   :  { %v19396_v5 = vadd.f32 %v9826_v3, %v9376_v63  ;;  %v9828_v7 = vpop.f32.mrb[1].mxu0  ;;  %10869 = vmatpush1.bf16.msra.mxu1 %v13974_v56  ;;  %v14006_v56 = vcombine.low %v286_v40, %v290_v42  ;;  %v14269_v63 = vcombine.high %v549_v54, %v553_v55  ;;  %v14014_v3 = vcombine.low %v294_v51, %v298_v52  ;;  %v334_v54 = vld [vmem:[%s22314_s1 + $0x7d8] sm:$0xff] }
 0x39c   :  { %v19398_v9 = vadd.f32 %v9828_v7, %v9378_v16  ;;  %v9830_v14 = vpop.f32.mrb[2].mxu0  ;;  %10459 = vmatpush1.bf16.msra.mxu0 %v14228_v59  ;;  %10870 = vmatprep.subr.bf16.mxu1 %v13983_v62  ;;  %v14260_v59 = vcombine.low %v541_v43, %v545_v44  ;;  %v14015_v62 = vcombine.high %v294_v51, %v298_v52  ;;  %v561_v16 = vld [vmem:[%s22314_s1 + $0xef0] sm:$0xff]  ;;  %v326_v43 = vld [vmem:[%s22314_s1 + $0x798] sm:$0xff] }
 0x39d   :  { %v9831_v18 = vpop.f32.mrb[3].mxu0  ;;  %10460 = vmatprep.subr.bf16.mxu0 %v14237_v0  ;;  %v302_v0 = vld [vmem:[%s22314_s1 + $0x6d8] sm:$0xff]  ;;  %v14277_v7 = vcombine.high %v557_v1, %v561_v16  ;;  %v14039_v40 = vcombine.high %v318_v26, %v322_v28  ;;  %vm11309_vm1 = vcmp.gt.f32.partialorder %v19396_v5, 0.0 }
 0x39e   :  { %v14023_v2 = vcombine.high %v302_v0, %v306_v57  ;;  %v314_v14 = vld [vmem:[%s22314_s1 + $0x738] sm:$0xff]  ;;  %v14022_v18 = vcombine.low %v302_v0, %v306_v57  ;;  %vm11310_vm0 = vcmp.gt.f32.partialorder %v19398_v9, 0.0 }
 0x39f   :  { %10871 = vmatpush1.bf16.msra.mxu1 %v13982_v8  ;;  %v310_v8 = vld [vmem:[%s22314_s1 + $0x718] sm:$0xff] }
 0x3a0   :  { %10461 = vmatpush1.bf16.msra.mxu0 %v14236_v15  ;;  %10872 = vmatprep.subr.bf16.mxu1 %v13991_v6  ;;  %v565_v15 = vld [vmem:[%s22314_s1 + $0xf10] sm:$0xff]  ;;  %v14031_v22 = vcombine.high %v310_v8, %v314_v14  ;;  %v330_v44 = vld [vmem:[%s22314_s1 + $0x7b8] sm:$0xff] }
 0x3a1   :  { %10462 = vmatprep.subr.bf16.mxu0 %v14245_v61  ;;  %v569_v6 = vld [vmem:[%s22314_s1 + $0xf30] sm:$0xff]  ;;  %v14276_v61 = vcombine.low %v557_v1, %v561_v16  ;;  %v14047_v51 = vcombine.high %v326_v43, %v330_v44  ;;  %v338_v55 = vld [vmem:[%s22314_s1 + $0x7f8] sm:$0xff] }
 0x3a2   :  { %v14285_v23 = vcombine.high %v565_v15, %v569_v6  ;;  %v14055_v0 = vcombine.high %v334_v54, %v338_v55  ;;  %v342_v1 = vld [vmem:[%s22314_s1 + $0x818] sm:$0xff] }
 0x3a3   :  { %10873 = vmatpush1.bf16.msra.mxu1 %v13990_v32  ;;  %v573_v32 = vld [vmem:[%s22314_s1 + $0xf50] sm:$0xff]  ;;  %v346_v16 = vld [vmem:[%s22314_s1 + $0x838] sm:$0xff] }
 0x3a4   :  { %10463 = vmatpush1.bf16.msra.mxu0 %v14244_v33  ;;  %10874 = vmatprep.subr.bf16.mxu1 %v13999_v34  ;;  %v577_v33 = vld [vmem:[%s22314_s1 + $0xf70] sm:$0xff]  ;;  %v14030_v34 = vcombine.low %v310_v8, %v314_v14  ;;  %v14063_v8 = vcombine.high %v342_v1, %v346_v16 }
 0x3a5   :  { %10464 = vmatprep.subr.bf16.mxu0 %v14253_v36  ;;  %v14284_v36 = vcombine.low %v565_v15, %v569_v6  ;;  %v14293_v42 = vcombine.high %v573_v32, %v577_v33  ;;  %v350_v15 = vld [vmem:[%s22314_s1 + $0x858] sm:$0xff] }
 0x3a6   :  { %v354_v6 = vld [vmem:[%s22314_s1 + $0x878] sm:$0xff] }
 0x3a7   :  { %10875 = vmatpush1.bf16.msra.mxu1 %v13998_v45  ;;  %v581_v45 = vld [vmem:[%s22314_s1 + $0xf90] sm:$0xff] }
 0x3a8   :  { %10465 = vmatpush1.bf16.msra.mxu0 %v14252_v47  ;;  %10876 = vmatprep.subr.bf16.mxu1 %v14007_v48  ;;  %v585_v47 = vld [vmem:[%s22314_s1 + $0xfb0] sm:$0xff]  ;;  %v14038_v48 = vcombine.low %v318_v26, %v322_v28  ;;  %v14071_v26 = vcombine.high %v350_v15, %v354_v6 }
 0x3a9   :  { %10466 = vmatprep.subr.bf16.mxu0 %v14261_v49  ;;  %v14292_v49 = vcombine.low %v573_v32, %v577_v33  ;;  %v14301_v52 = vcombine.high %v581_v45, %v585_v47  ;;  %v358_v32 = vld [vmem:[%s22314_s1 + $0x898] sm:$0xff] }
 0x3aa   :  { %v362_v33 = vld [vmem:[%s22314_s1 + $0x8b8] sm:$0xff] }
 0x3ab   :  { %10877 = vmatpush1.bf16.msra.mxu1 %v14006_v56  ;;  %v589_v56 = vld [vmem:[%s22314_s1 + $0xfd0] sm:$0xff] }
 0x3ac   :  { %10467 = vmatpush1.bf16.msra.mxu0 %v14260_v59  ;;  %10878 = vmatprep.subr.bf16.mxu1 %v14015_v62  ;;  %v593_v59 = vld [vmem:[%s22314_s1 + $0xff0] sm:$0xff]  ;;  %v14046_v62 = vcombine.low %v326_v43, %v330_v44  ;;  %v14079_v43 = vcombine.high %v358_v32, %v362_v33 }
 0x3ad   :  { %10468 = vmatprep.subr.bf16.mxu0 %v14269_v63  ;;  %v14300_v63 = vcombine.low %v581_v45, %v585_v47  ;;  %v14309_v57 = vcombine.high %v589_v56, %v593_v59  ;;  %v370_v45 = vld [vmem:[%s22314_s1 + $0x8f8] sm:$0xff]  ;;  %v621_v47 = vld [vmem:[%s22314_s1 + $0x10d0] sm:$0xff] }
 0x3af   :  { %10879 = vmatpush1.bf16.msra.mxu1 %v14014_v3  ;;  %v597_v3 = vld [vmem:[%s22314_s1 + $0x1010] sm:$0xff] }
 0x3b0   :  { %10469 = vmatpush1.bf16.msra.mxu0 %v14268_v4  ;;  %10880 = vmatprep.subr.bf16.mxu1 %v14023_v2  ;;  %v601_v4 = vld [vmem:[%s22314_s1 + $0x1030] sm:$0xff]  ;;  %v14054_v2 = vcombine.low %v334_v54, %v338_v55  ;;  %v374_v55 = vld [vmem:[%s22314_s1 + $0x918] sm:$0xff] }
 0x3b1   :  { %10470 = vmatprep.subr.bf16.mxu0 %v14277_v7  ;;  %v14308_v7 = vcombine.low %v589_v56, %v593_v59  ;;  %v14317_v14 = vcombine.high %v597_v3, %v601_v4  ;;  %v378_v56 = vld [vmem:[%s22314_s1 + $0x938] sm:$0xff]  ;;  %v633_v59 = vld [vmem:[%s22314_s1 + $0x1130] sm:$0xff] }
 0x3b3   :  { %10881 = vmatpush1.bf16.msra.mxu1 %v14022_v18  ;;  %v605_v18 = vld [vmem:[%s22314_s1 + $0x1050] sm:$0xff] }
 0x3b4   :  { %10471 = vmatpush1.bf16.msra.mxu0 %v14276_v61  ;;  %10882 = vmatprep.subr.bf16.mxu1 %v14031_v22  ;;  %v609_v61 = vld [vmem:[%s22314_s1 + $0x1070] sm:$0xff]  ;;  %v14062_v22 = vcombine.low %v342_v1, %v346_v16  ;;  %v382_v1 = vld [vmem:[%s22314_s1 + $0x958] sm:$0xff] }
 0x3b5   :  { %10472 = vmatprep.subr.bf16.mxu0 %v14285_v23  ;;  %v14316_v23 = vcombine.low %v597_v3, %v601_v4  ;;  %v14325_v28 = vcombine.high %v605_v18, %v609_v61  ;;  %v386_v16 = vld [vmem:[%s22314_s1 + $0x978] sm:$0xff]  ;;  %v637_v3 = vld [vmem:[%s22314_s1 + $0x1150] sm:$0xff] }
 0x3b6   :  { %v641_v4 = vld [vmem:[%s22314_s1 + $0x1170] sm:$0xff] }
 0x3b7   :  { %10883 = vmatpush1.bf16.msra.mxu1 %v14030_v34  ;;  %v613_v34 = vld [vmem:[%s22314_s1 + $0x1090] sm:$0xff] }
 0x3b8   :  { %10473 = vmatpush1.bf16.msra.mxu0 %v14284_v36  ;;  %10884 = vmatprep.subr.bf16.mxu1 %v14039_v40  ;;  %v617_v36 = vld [vmem:[%s22314_s1 + $0x10b0] sm:$0xff]  ;;  %v14070_v40 = vcombine.low %v350_v15, %v354_v6  ;;  %v390_v15 = vld [vmem:[%s22314_s1 + $0x998] sm:$0xff] }
 0x3b9   :  { %10474 = vmatprep.subr.bf16.mxu0 %v14293_v42  ;;  %v14324_v42 = vcombine.low %v605_v18, %v609_v61  ;;  %v14333_v44 = vcombine.high %v613_v34, %v617_v36  ;;  %v394_v6 = vld [vmem:[%s22314_s1 + $0x9b8] sm:$0xff]  ;;  %v645_v18 = vld [vmem:[%s22314_s1 + $0x1190] sm:$0xff] }
 0x3ba   :  { %v649_v61 = vld [vmem:[%s22314_s1 + $0x11b0] sm:$0xff] }
 0x3bb   :  { %10885 = vmatpush1.bf16.msra.mxu1 %v14038_v48  ;;  %v625_v48 = vld [vmem:[%s22314_s1 + $0x10f0] sm:$0xff] }
 0x3bc   :  { %10475 = vmatpush1.bf16.msra.mxu0 %v14292_v49  ;;  %10886 = vmatprep.subr.bf16.mxu1 %v14047_v51  ;;  %v14078_v49 = vcombine.low %v358_v32, %v362_v33  ;;  %v14332_v51 = vcombine.low %v613_v34, %v617_v36  ;;  %v14341_v54 = vcombine.high %v621_v47, %v625_v48  ;;  %v398_v32 = vld [vmem:[%s22314_s1 + $0x9d8] sm:$0xff]  ;;  %v653_v34 = vld [vmem:[%s22314_s1 + $0x11d0] sm:$0xff] }
 0x3bd   :  { %10476 = vmatprep.subr.bf16.mxu0 %v14301_v52  ;;  %v402_v33 = vld [vmem:[%s22314_s1 + $0x9f8] sm:$0xff]  ;;  %v657_v36 = vld [vmem:[%s22314_s1 + $0x11f0] sm:$0xff] }
 0x3bf   :  { %10887 = vmatpush1.bf16.msra.mxu1 %v14046_v62 }
 0x3c0   :  { %10477 = vmatpush1.bf16.msra.mxu0 %v14300_v63  ;;  %10888 = vmatprep.subr.bf16.mxu1 %v14055_v0  ;;  %v14340_v63 = vcombine.low %v621_v47, %v625_v48  ;;  %v14095_v0 = vcombine.high %v374_v55, %v378_v56  ;;  %v661_v47 = vld [vmem:[%s22314_s1 + $0x1210] sm:$0xff] }
 0x3c1   :  { %10478 = vmatprep.subr.bf16.mxu0 %v14309_v57  ;;  %v665_v48 = vld [vmem:[%s22314_s1 + $0x1230] sm:$0xff] }
 0x3c3   :  { %10889 = vmatpush1.bf16.msra.mxu1 %v14054_v2  ;;  %v14094_v2 = vcombine.low %v374_v55, %v378_v56  ;;  %v414_v55 = vld [vmem:[%s22314_s1 + $0xa58] sm:$0xff] }
 0x3c4   :  { %10479 = vmatpush1.bf16.msra.mxu0 %v14308_v7  ;;  %10899 = vmatprep.subr.bf16.mxu1 %v14063_v8  ;;  %v14103_v8 = vcombine.high %v382_v1, %v386_v16  ;;  %v418_v56 = vld [vmem:[%s22314_s1 + $0xa78] sm:$0xff] }
 0x3c5   :  { %10489 = vmatprep.subr.bf16.mxu0 %v14317_v14  ;;  %v14357_v14 = vcombine.high %v637_v3, %v641_v4 }
 0x3c6   :  { %10891 = vmatmul.mubr.bf16.vlgmr.msra.gmra.mrb[8].mxu1 %v16654_v21  ;;  %v366_v21 = vld [vmem:[%s22314_s1 + $0x8d8] sm:$0xff] }
 0x3c7   :  { %10481 = vmatmul.mubr.bf16.vlgmr.msra.gmra.mrb[4].mxu0 %v17066_v53  ;;  %10900 = vmatpush1.bf16.msra.mxu1 %v14062_v22  ;;  %v14087_v52 = vcombine.high %v366_v21, %v370_v45  ;;  %v14086_v62 = vcombine.low %v366_v21, %v370_v45  ;;  %v14102_v22 = vcombine.low %v382_v1, %v386_v16  ;;  %v406_v21 = vld [vmem:[%s22314_s1 + $0xa18] sm:$0xff] }
 0x3c8   :  { %10490 = vmatpush1.bf16.msra.mxu0 %v14316_v23  ;;  %10901 = vmatprep.subr.bf16.mxu1 %v14071_v26  ;;  %v14356_v23 = vcombine.low %v637_v3, %v641_v4  ;;  %v14111_v26 = vcombine.high %v390_v15, %v394_v6  ;;  %v410_v45 = vld [vmem:[%s22314_s1 + $0xa38] sm:$0xff]  ;;  %v677_v3 = vld [vmem:[%s22314_s1 + $0x1290] sm:$0xff] }
 0x3c9   :  { %10491 = vmatprep.subr.bf16.mxu0 %v14325_v28  ;;  %10521 = vmatprep.mubr.bf16.mxu0 %v17074_v60  ;;  %v14365_v28 = vcombine.high %v645_v18, %v649_v61  ;;  %v422_v1 = vld [vmem:[%s22314_s1 + $0xa98] sm:$0xff]  ;;  %v681_v4 = vld [vmem:[%s22314_s1 + $0x12b0] sm:$0xff] }
 0x3ca   :  { %10931 = vmatprep.mubr.bf16.mxu1 %v16662_v27  ;;  %v629_v27 = vld [vmem:[%s22314_s1 + $0x1110] sm:$0xff]  ;;  %v426_v16 = vld [vmem:[%s22314_s1 + $0xab8] sm:$0xff] }
 0x3cb   :  { %10902 = vmatpush1.bf16.msra.mxu1 %v14070_v40  ;;  %v14349_v57 = vcombine.high %v629_v27, %v633_v59  ;;  %v14348_v7 = vcombine.low %v629_v27, %v633_v59  ;;  %v14110_v40 = vcombine.low %v390_v15, %v394_v6  ;;  %v669_v27 = vld [vmem:[%s22314_s1 + $0x1250] sm:$0xff]  ;;  %v430_v15 = vld [vmem:[%s22314_s1 + $0xad8] sm:$0xff] }
 0x3cc   :  { %10492 = vmatpush1.bf16.msra.mxu0 %v14324_v42  ;;  %10903 = vmatprep.subr.bf16.mxu1 %v14079_v43  ;;  %v14364_v42 = vcombine.low %v645_v18, %v649_v61  ;;  %v14119_v43 = vcombine.high %v398_v32, %v402_v33  ;;  %v673_v59 = vld [vmem:[%s22314_s1 + $0x1270] sm:$0xff]  ;;  %v434_v6 = vld [vmem:[%s22314_s1 + $0xaf8] sm:$0xff] }
 0x3cd   :  { %10493 = vmatprep.subr.bf16.mxu0 %v14333_v44  ;;  %v14373_v44 = vcombine.high %v653_v34, %v657_v36  ;;  %v685_v18 = vld [vmem:[%s22314_s1 + $0x12d0] sm:$0xff] }
 0x3ce   :  { %v689_v61 = vld [vmem:[%s22314_s1 + $0x12f0] sm:$0xff] }
 0x3cf   :  { %10904 = vmatpush1.bf16.msra.mxu1 %v14078_v49  ;;  %v14118_v49 = vcombine.low %v398_v32, %v402_v33  ;;  %v438_v32 = vld [vmem:[%s22314_s1 + $0xb18] sm:$0xff] }
 0x3d0   :  { %10494 = vmatpush1.bf16.msra.mxu0 %v14332_v51  ;;  %10905 = vmatprep.subr.bf16.mxu1 %v14087_v52  ;;  %v14372_v51 = vcombine.low %v653_v34, %v657_v36  ;;  %v14127_v52 = vcombine.high %v406_v21, %v410_v45  ;;  %v442_v33 = vld [vmem:[%s22314_s1 + $0xb38] sm:$0xff]  ;;  %v693_v34 = vld [vmem:[%s22314_s1 + $0x1310] sm:$0xff] }
 0x3d1   :  { %10495 = vmatprep.subr.bf16.mxu0 %v14341_v54  ;;  %v14381_v54 = vcombine.high %v661_v47, %v665_v48  ;;  %v697_v36 = vld [vmem:[%s22314_s1 + $0x1330] sm:$0xff] }
 0x3d3   :  { %10906 = vmatpush1.bf16.msra.mxu1 %v14086_v62  ;;  %v14126_v62 = vcombine.low %v406_v21, %v410_v45  ;;  %v446_v21 = vld [vmem:[%s22314_s1 + $0xb58] sm:$0xff] }
 0x3d4   :  { %10496 = vmatpush1.bf16.msra.mxu0 %v14340_v63  ;;  %10907 = vmatprep.subr.bf16.mxu1 %v14095_v0  ;;  %v14380_v63 = vcombine.low %v661_v47, %v665_v48  ;;  %v14135_v0 = vcombine.high %v414_v55, %v418_v56  ;;  %v450_v45 = vld [vmem:[%s22314_s1 + $0xb78] sm:$0xff]  ;;  %v701_v47 = vld [vmem:[%s22314_s1 + $0x1350] sm:$0xff] }
 0x3d5   :  { %10497 = vmatprep.subr.bf16.mxu0 %v14349_v57  ;;  %v14389_v57 = vcombine.high %v669_v27, %v673_v59  ;;  %v705_v48 = vld [vmem:[%s22314_s1 + $0x1370] sm:$0xff] }
 0x3d7   :  { %10908 = vmatpush1.bf16.msra.mxu1 %v14094_v2  ;;  %v14134_v2 = vcombine.low %v414_v55, %v418_v56  ;;  %v454_v55 = vld [vmem:[%s22314_s1 + $0xb98] sm:$0xff] }
 0x3d8   :  { %10498 = vmatpush1.bf16.msra.mxu0 %v14348_v7  ;;  %10909 = vmatprep.subr.bf16.mxu1 %v14103_v8  ;;  %v14388_v7 = vcombine.low %v669_v27, %v673_v59  ;;  %v14143_v8 = vcombine.high %v422_v1, %v426_v16  ;;  %v458_v56 = vld [vmem:[%s22314_s1 + $0xbb8] sm:$0xff]  ;;  %v709_v27 = vld [vmem:[%s22314_s1 + $0x1390] sm:$0xff] }
 0x3d9   :  { %10499 = vmatprep.subr.bf16.mxu0 %v14357_v14  ;;  %v14397_v14 = vcombine.high %v677_v3, %v681_v4  ;;  %v713_v59 = vld [vmem:[%s22314_s1 + $0x13b0] sm:$0xff] }
 0x3db   :  { %10910 = vmatpush1.bf16.msra.mxu1 %v14102_v22  ;;  %v14142_v22 = vcombine.low %v422_v1, %v426_v16  ;;  %v462_v1 = vld [vmem:[%s22314_s1 + $0xbd8] sm:$0xff] }
 0x3dc   :  { %10500 = vmatpush1.bf16.msra.mxu0 %v14356_v23  ;;  %10911 = vmatprep.subr.bf16.mxu1 %v14111_v26  ;;  %v14396_v23 = vcombine.low %v677_v3, %v681_v4  ;;  %v14151_v26 = vcombine.high %v430_v15, %v434_v6  ;;  %v466_v16 = vld [vmem:[%s22314_s1 + $0xbf8] sm:$0xff]  ;;  %v717_v3 = vld [vmem:[%s22314_s1 + $0x13d0] sm:$0xff] }
 0x3dd   :  { %10501 = vmatprep.subr.bf16.mxu0 %v14365_v28  ;;  %v14405_v28 = vcombine.high %v685_v18, %v689_v61  ;;  %v721_v4 = vld [vmem:[%s22314_s1 + $0x13f0] sm:$0xff] }
 0x3df   :  { %10912 = vmatpush1.bf16.msra.mxu1 %v14110_v40  ;;  %v14150_v40 = vcombine.low %v430_v15, %v434_v6  ;;  %v470_v15 = vld [vmem:[%s22314_s1 + $0xc18] sm:$0xff] }
 0x3e0   :  { %10502 = vmatpush1.bf16.msra.mxu0 %v14364_v42  ;;  %10913 = vmatprep.subr.bf16.mxu1 %v14119_v43  ;;  %v14404_v42 = vcombine.low %v685_v18, %v689_v61  ;;  %v14159_v43 = vcombine.high %v438_v32, %v442_v33  ;;  %v474_v6 = vld [vmem:[%s22314_s1 + $0xc38] sm:$0xff]  ;;  %v725_v18 = vld [vmem:[%s22314_s1 + $0x1410] sm:$0xff] }
 0x3e1   :  { %10503 = vmatprep.subr.bf16.mxu0 %v14373_v44  ;;  %v14413_v44 = vcombine.high %v693_v34, %v697_v36  ;;  %v729_v61 = vld [vmem:[%s22314_s1 + $0x1430] sm:$0xff] }
 0x3e3   :  { %10914 = vmatpush1.bf16.msra.mxu1 %v14118_v49  ;;  %v14158_v49 = vcombine.low %v438_v32, %v442_v33  ;;  %v478_v32 = vld [vmem:[%s22314_s1 + $0xc58] sm:$0xff] }
 0x3e4   :  { %10504 = vmatpush1.bf16.msra.mxu0 %v14372_v51  ;;  %10915 = vmatprep.subr.bf16.mxu1 %v14127_v52  ;;  %v14412_v51 = vcombine.low %v693_v34, %v697_v36  ;;  %v14167_v52 = vcombine.high %v446_v21, %v450_v45  ;;  %v482_v33 = vld [vmem:[%s22314_s1 + $0xc78] sm:$0xff]  ;;  %v733_v34 = vld [vmem:[%s22314_s1 + $0x1450] sm:$0xff] }
 0x3e5   :  { %10505 = vmatprep.subr.bf16.mxu0 %v14381_v54  ;;  %v14421_v54 = vcombine.high %v701_v47, %v705_v48  ;;  %v737_v36 = vld [vmem:[%s22314_s1 + $0x1470] sm:$0xff] }
 0x3e7   :  { %10916 = vmatpush1.bf16.msra.mxu1 %v14126_v62  ;;  %v14166_v62 = vcombine.low %v446_v21, %v450_v45  ;;  %v486_v21 = vld [vmem:[%s22314_s1 + $0xc98] sm:$0xff] }
 0x3e8   :  { %10506 = vmatpush1.bf16.msra.mxu0 %v14380_v63  ;;  %10917 = vmatprep.subr.bf16.mxu1 %v14135_v0  ;;  %v14420_v63 = vcombine.low %v701_v47, %v705_v48  ;;  %v14175_v0 = vcombine.high %v454_v55, %v458_v56  ;;  %v490_v45 = vld [vmem:[%s22314_s1 + $0xcb8] sm:$0xff]  ;;  %v741_v47 = vld [vmem:[%s22314_s1 + $0x1490] sm:$0xff] }
 0x3e9   :  { %10507 = vmatprep.subr.bf16.mxu0 %v14389_v57  ;;  %v14429_v57 = vcombine.high %v709_v27, %v713_v59  ;;  %v745_v48 = vld [vmem:[%s22314_s1 + $0x14b0] sm:$0xff] }
 0x3eb   :  { %10918 = vmatpush1.bf16.msra.mxu1 %v14134_v2  ;;  %v14174_v2 = vcombine.low %v454_v55, %v458_v56  ;;  %v498_v55 = vld [vmem:[%s22314_s1 + $0xcf8] sm:$0xff]  ;;  %v749_v56 = vld [vmem:[%s22314_s1 + $0x14d0] sm:$0xff] }
 0x3ec   :  { %10508 = vmatpush1.bf16.msra.mxu0 %v14388_v7  ;;  %10919 = vmatprep.subr.bf16.mxu1 %v14143_v8  ;;  %v14428_v7 = vcombine.low %v709_v27, %v713_v59  ;;  %v14183_v8 = vcombine.high %v462_v1, %v466_v16  ;;  %v753_v27 = vld [vmem:[%s22314_s1 + $0x14f0] sm:$0xff]  ;;  %v14206_v59 = vcombine.low %v486_v21, %v490_v45 }
 0x3ed   :  { %10509 = vmatprep.subr.bf16.mxu0 %v14397_v14  ;;  %v14437_v14 = vcombine.high %v717_v3, %v721_v4 }
 0x3ef   :  { %10920 = vmatpush1.bf16.msra.mxu1 %v14142_v22  ;;  %v14182_v22 = vcombine.low %v462_v1, %v466_v16  ;;  %v506_v1 = vld [vmem:[%s22314_s1 + $0xd38] sm:$0xff]  ;;  %v761_v16 = vld [vmem:[%s22314_s1 + $0x1530] sm:$0xff] }
 0x3f0   :  { %10510 = vmatpush1.bf16.msra.mxu0 %v14396_v23  ;;  %10921 = vmatprep.subr.bf16.mxu1 %v14151_v26  ;;  %v14436_v23 = vcombine.low %v717_v3, %v721_v4  ;;  %v14191_v26 = vcombine.high %v470_v15, %v474_v6  ;;  %v14468_v4 = vcombine.low %v749_v56, %v753_v27 }
 0x3f1   :  { %10511 = vmatprep.subr.bf16.mxu0 %v14405_v28  ;;  %v14445_v28 = vcombine.high %v725_v18, %v729_v61 }
 0x3f3   :  { %10922 = vmatpush1.bf16.msra.mxu1 %v14150_v40  ;;  %v14190_v40 = vcombine.low %v470_v15, %v474_v6  ;;  %v765_v15 = vld [vmem:[%s22314_s1 + $0x1550] sm:$0xff] }
 0x3f4   :  { %10512 = vmatpush1.bf16.msra.mxu0 %v14404_v42  ;;  %10923 = vmatprep.subr.bf16.mxu1 %v14159_v43  ;;  %v14444_v42 = vcombine.low %v725_v18, %v729_v61  ;;  %v14199_v43 = vcombine.high %v478_v32, %v482_v33  ;;  %v769_v6 = vld [vmem:[%s22314_s1 + $0x1570] sm:$0xff] }
 0x3f5   :  { %10513 = vmatprep.subr.bf16.mxu0 %v14413_v44  ;;  %v14453_v44 = vcombine.high %v733_v34, %v737_v36 }
 0x3f7   :  { %10924 = vmatpush1.bf16.msra.mxu1 %v14158_v49  ;;  %v14198_v49 = vcombine.low %v478_v32, %v482_v33  ;;  %v773_v32 = vld [vmem:[%s22314_s1 + $0x1590] sm:$0xff] }
 0x3f8   :  { %10514 = vmatpush1.bf16.msra.mxu0 %v14412_v51  ;;  %10925 = vmatprep.subr.bf16.mxu1 %v14167_v52  ;;  %v14452_v51 = vcombine.low %v733_v34, %v737_v36  ;;  %v14207_v52 = vcombine.high %v486_v21, %v490_v45  ;;  %v777_v33 = vld [vmem:[%s22314_s1 + $0x15b0] sm:$0xff]  ;;  %v14484_v36 = vcombine.low %v765_v15, %v769_v6  ;;  %v530_v21 = vld [vmem:[%s22314_s1 + $0xdf8] sm:$0xff] }
 0x3f9   :  { %10515 = vmatprep.subr.bf16.mxu0 %v14421_v54  ;;  %v14461_v54 = vcombine.high %v741_v47, %v745_v48 }
 0x3fb   :  { %10926 = vmatpush1.bf16.msra.mxu1 %v14166_v62  ;;  %v14460_v62 = vcombine.low %v741_v47, %v745_v48  ;;  %v781_v47 = vld [vmem:[%s22314_s1 + $0x15d0] sm:$0xff] }
 0x3fc   :  { %10516 = vmatpush1.bf16.msra.mxu0 %v14420_v63  ;;  %10927 = vmatprep.subr.bf16.mxu1 %v14175_v0  ;;  %v14469_v0 = vcombine.high %v749_v56, %v753_v27  ;;  %v785_v48 = vld [vmem:[%s22314_s1 + $0x15f0] sm:$0xff]  ;;  %v534_v56 = vld [vmem:[%s22314_s1 + $0xe18] sm:$0xff] }
 0x3fd   :  { %10517 = vmatprep.subr.bf16.mxu0 %v14429_v57  ;;  %v502_v57 = vld [vmem:[%s22314_s1 + $0xd18] sm:$0xff] }
 0x3fe   :  { %v14222_v18 = vcombine.low %v502_v57, %v506_v1  ;;  %v538_v27 = vld [vmem:[%s22314_s1 + $0xe38] sm:$0xff] }
 0x3ff   :  { %10928 = vmatpush1.bf16.msra.mxu1 %v14174_v2  ;;  %v14223_v2 = vcombine.high %v502_v57, %v506_v1  ;;  %v14255_v57 = vcombine.high %v534_v56, %v538_v27 }
 0x400   :  { %10518 = vmatpush1.bf16.msra.mxu0 %v14428_v7  ;;  %10929 = vmatprep.subr.bf16.mxu1 %v14183_v8  ;;  %v510_v8 = vld [vmem:[%s22314_s1 + $0xd58] sm:$0xff] }
 0x401   :  { %10519 = vmatprep.subr.bf16.mxu0 %v14437_v14  ;;  %v514_v14 = vld [vmem:[%s22314_s1 + $0xd78] sm:$0xff] }
 0x402   :  { %v14230_v34 = vcombine.low %v510_v8, %v514_v14 }
 0x403   :  { %10930 = vmatpush1.bf16.msra.mxu1 %v14182_v22  ;;  %v14231_v22 = vcombine.high %v510_v8, %v514_v14 }
 0x404   :  { %10520 = vmatpush1.bf16.msra.mxu0 %v14436_v23  ;;  %10940 = vmatprep.subr.bf16.mxu1 %v14191_v26  ;;  %v14485_v23 = vcombine.high %v765_v15, %v769_v6  ;;  %v518_v26 = vld [vmem:[%s22314_s1 + $0xd98] sm:$0xff] }
 0x405   :  { %10530 = vmatprep.subr.bf16.mxu0 %v14445_v28  ;;  %v522_v28 = vld [vmem:[%s22314_s1 + $0xdb8] sm:$0xff] }
 0x406   :  { %10932 = vmatmul.mubr.bf16.vlgmr.msra.gmra.mrb[8].mxu1 %v16860_v35  ;;  %v494_v35 = vld [vmem:[%s22314_s1 + $0xcd8] sm:$0xff] }
 0x407   :  { %10522 = vmatmul.mubr.bf16.vlgmr.msra.gmra.mrb[4].mxu0 %v17272_v13  ;;  %10941 = vmatpush1.bf16.msra.mxu1 %v14190_v40  ;;  %v14215_v63 = vcombine.high %v494_v35, %v498_v55  ;;  %v14214_v3 = vcombine.low %v494_v35, %v498_v55  ;;  %v14239_v40 = vcombine.high %v518_v26, %v522_v28  ;;  %v550_v15 = vld [vmem:[%s22314_s1 + $0xe98] sm:$0xff] }
 0x408   :  { %10531 = vmatpush1.bf16.msra.mxu0 %v14444_v42  ;;  %10942 = vmatprep.subr.bf16.mxu1 %v14199_v43  ;;  %v14493_v43 = vcombine.high %v773_v32, %v777_v33  ;;  %v14501_v55 = vcombine.high %v781_v47, %v785_v48  ;;  %v554_v6 = vld [vmem:[%s22314_s1 + $0xeb8] sm:$0xff] }
 0x409   :  { %10532 = vmatprep.subr.bf16.mxu0 %v14453_v44  ;;  %10562 = vmatprep.mubr.bf16.mxu0 %v17280_v20  ;;  %v526_v44 = vld [vmem:[%s22314_s1 + $0xdd8] sm:$0xff] }
 0x40a   :  { %10972 = vmatprep.mubr.bf16.mxu1 %v16868_v41  ;;  %v757_v41 = vld [vmem:[%s22314_s1 + $0x1510] sm:$0xff]  ;;  %v14247_v35 = vcombine.high %v526_v44, %v530_v21 }
 0x40b   :  { %10943 = vmatpush1.bf16.msra.mxu1 %v14198_v49  ;;  %v14477_v7 = vcombine.high %v757_v41, %v761_v16  ;;  %v14476_v61 = vcombine.low %v757_v41, %v761_v16  ;;  %v542_v41 = vld [vmem:[%s22314_s1 + $0xe58] sm:$0xff] }
 0x40c   :  { %10533 = vmatpush1.bf16.msra.mxu0 %v14452_v51  ;;  %10944 = vmatprep.subr.bf16.mxu1 %v14207_v52  ;;  %v14238_v51 = vcombine.low %v518_v26, %v522_v28  ;;  %v546_v16 = vld [vmem:[%s22314_s1 + $0xe78] sm:$0xff]  ;;  %v14271_v26 = vcombine.high %v550_v15, %v554_v6 }
 0x40d   :  { %10534 = vmatprep.subr.bf16.mxu0 %v14461_v54  ;;  %v14492_v54 = vcombine.low %v773_v32, %v777_v33  ;;  %v14263_v8 = vcombine.high %v542_v41, %v546_v16  ;;  %v558_v32 = vld [vmem:[%s22314_s1 + $0xed8] sm:$0xff] }
 0x40e   :  { %v562_v33 = vld [vmem:[%s22314_s1 + $0xef8] sm:$0xff] }
 0x40f   :  { %10945 = vmatpush1.bf16.msra.mxu1 %v14206_v59  ;;  %v789_v59 = vld [vmem:[%s22314_s1 + $0x1610] sm:$0xff] }
 0x410   :  { %10535 = vmatpush1.bf16.msra.mxu0 %v14460_v62  ;;  %10946 = vmatprep.subr.bf16.mxu1 %v14215_v63  ;;  %v793_v62 = vld [vmem:[%s22314_s1 + $0x1630] sm:$0xff]  ;;  %v14246_v63 = vcombine.low %v526_v44, %v530_v21  ;;  %v14279_v44 = vcombine.high %v558_v32, %v562_v33 }
 0x411   :  { %10536 = vmatprep.subr.bf16.mxu0 %v14469_v0  ;;  %v14500_v0 = vcombine.low %v781_v47, %v785_v48  ;;  %v14509_v1 = vcombine.high %v789_v59, %v793_v62  ;;  %v566_v47 = vld [vmem:[%s22314_s1 + $0xf18] sm:$0xff] }
 0x412   :  { %v570_v48 = vld [vmem:[%s22314_s1 + $0xf38] sm:$0xff] }
 0x413   :  { %10947 = vmatpush1.bf16.msra.mxu1 %v14214_v3  ;;  %v797_v3 = vld [vmem:[%s22314_s1 + $0x1650] sm:$0xff] }
 0x414   :  { %10537 = vmatpush1.bf16.msra.mxu0 %v14468_v4  ;;  %10948 = vmatprep.subr.bf16.mxu1 %v14223_v2  ;;  %v801_v4 = vld [vmem:[%s22314_s1 + $0x1670] sm:$0xff]  ;;  %v14254_v2 = vcombine.low %v534_v56, %v538_v27  ;;  %v574_v56 = vld [vmem:[%s22314_s1 + $0xf58] sm:$0xff] }
 0x415   :  { %10538 = vmatprep.subr.bf16.mxu0 %v14477_v7  ;;  %v14508_v7 = vcombine.low %v789_v59, %v793_v62  ;;  %v14517_v14 = vcombine.high %v797_v3, %v801_v4  ;;  %v578_v27 = vld [vmem:[%s22314_s1 + $0xf78] sm:$0xff]  ;;  %v829_v59 = vld [vmem:[%s22314_s1 + $0x1750] sm:$0xff] }
 0x416   :  { %v833_v62 = vld [vmem:[%s22314_s1 + $0x1770] sm:$0xff] }
 0x417   :  { %10949 = vmatpush1.bf16.msra.mxu1 %v14222_v18  ;;  %v805_v18 = vld [vmem:[%s22314_s1 + $0x1690] sm:$0xff] }
 0x418   :  { %10539 = vmatpush1.bf16.msra.mxu0 %v14476_v61  ;;  %10950 = vmatprep.subr.bf16.mxu1 %v14231_v22  ;;  %v809_v61 = vld [vmem:[%s22314_s1 + $0x16b0] sm:$0xff]  ;;  %v14262_v22 = vcombine.low %v542_v41, %v546_v16  ;;  %v582_v41 = vld [vmem:[%s22314_s1 + $0xf98] sm:$0xff] }
 0x419   :  { %v19780_v42 = vpop.f32.mrb[4].mxu1  ;;  %10540 = vmatprep.subr.bf16.mxu0 %v14485_v23  ;;  %v14516_v23 = vcombine.low %v797_v3, %v801_v4  ;;  %v14525_v28 = vcombine.high %v805_v18, %v809_v61  ;;  %v586_v16 = vld [vmem:[%s22314_s1 + $0xfb8] sm:$0xff]  ;;  %v837_v3 = vld [vmem:[%s22314_s1 + $0x1790] sm:$0xff] }
 0x41a   :  { %v19788_v45 = vpop.f32.mrb[5].mxu1  ;;  %v841_v4 = vld [vmem:[%s22314_s1 + $0x17b0] sm:$0xff] }
 0x41b   :  { %v10322_v49 = vpop.f32.mrb[6].mxu1  ;;  %10951 = vmatpush1.bf16.msra.mxu1 %v14230_v34  ;;  %v813_v34 = vld [vmem:[%s22314_s1 + $0x16d0] sm:$0xff] }
 0x41c   :  { %10541 = vmatpush1.bf16.msra.mxu0 %v14484_v36  ;;  %v10323_v52 = vpop.f32.mrb[7].mxu1  ;;  %10952 = vmatprep.subr.bf16.mxu1 %v14239_v40  ;;  %v817_v36 = vld [vmem:[%s22314_s1 + $0x16f0] sm:$0xff]  ;;  %v14270_v40 = vcombine.low %v550_v15, %v554_v6  ;;  %v590_v15 = vld [vmem:[%s22314_s1 + $0xfd8] sm:$0xff] }
 0x41d   :  { %10542 = vmatprep.subr.bf16.mxu0 %v14493_v43  ;;  %v14524_v43 = vcombine.low %v805_v18, %v809_v61  ;;  %v14533_v21 = vcombine.high %v813_v34, %v817_v36  ;;  %v821_v49 = vld [vmem:[%s22314_s1 + $0x1710] sm:$0xff]  ;;  %v14278_v52 = vcombine.low %v558_v32, %v562_v33  ;;  %v594_v6 = vld [vmem:[%s22314_s1 + $0xff8] sm:$0xff] }
 0x41e   :  { %v845_v18 = vld [vmem:[%s22314_s1 + $0x17d0] sm:$0xff]  ;;  %v598_v32 = vld [vmem:[%s22314_s1 + $0x1018] sm:$0xff] }
 0x41f   :  { %10953 = vmatpush1.bf16.msra.mxu1 %v14238_v51  ;;  %v825_v51 = vld [vmem:[%s22314_s1 + $0x1730] sm:$0xff]  ;;  %v602_v33 = vld [vmem:[%s22314_s1 + $0x1038] sm:$0xff] }
 0x420   :  { %10543 = vmatpush1.bf16.msra.mxu0 %v14492_v54  ;;  %10954 = vmatprep.subr.bf16.mxu1 %v14247_v35  ;;  %v14532_v54 = vcombine.low %v813_v34, %v817_v36  ;;  %v14287_v35 = vcombine.high %v566_v47, %v570_v48  ;;  %v849_v61 = vld [vmem:[%s22314_s1 + $0x17f0] sm:$0xff] }
 0x421   :  { %10544 = vmatprep.subr.bf16.mxu0 %v14501_v55  ;;  %v14541_v55 = vcombine.high %v821_v49, %v825_v51  ;;  %v853_v34 = vld [vmem:[%s22314_s1 + $0x1810] sm:$0xff] }
 0x422   :  { %v857_v36 = vld [vmem:[%s22314_s1 + $0x1830] sm:$0xff] }
 0x423   :  { %10955 = vmatpush1.bf16.msra.mxu1 %v14246_v63  ;;  %v14286_v63 = vcombine.low %v566_v47, %v570_v48  ;;  %v606_v47 = vld [vmem:[%s22314_s1 + $0x1058] sm:$0xff] }
 0x424   :  { %10545 = vmatpush1.bf16.msra.mxu0 %v14500_v0  ;;  %10956 = vmatprep.subr.bf16.mxu1 %v14255_v57  ;;  %v14540_v0 = vcombine.low %v821_v49, %v825_v51  ;;  %v14295_v57 = vcombine.high %v574_v56, %v578_v27  ;;  %v610_v48 = vld [vmem:[%s22314_s1 + $0x1078] sm:$0xff]  ;;  %v861_v49 = vld [vmem:[%s22314_s1 + $0x1850] sm:$0xff] }
 0x425   :  { %10546 = vmatprep.subr.bf16.mxu0 %v14509_v1  ;;  %v14549_v1 = vcombine.high %v829_v59, %v833_v62  ;;  %v865_v51 = vld [vmem:[%s22314_s1 + $0x1870] sm:$0xff] }
 0x427   :  { %10957 = vmatpush1.bf16.msra.mxu1 %v14254_v2  ;;  %v14294_v2 = vcombine.low %v574_v56, %v578_v27  ;;  %v614_v56 = vld [vmem:[%s22314_s1 + $0x1098] sm:$0xff] }
 0x428   :  { %10547 = vmatpush1.bf16.msra.mxu0 %v14508_v7  ;;  %10958 = vmatprep.subr.bf16.mxu1 %v14263_v8  ;;  %v14548_v7 = vcombine.low %v829_v59, %v833_v62  ;;  %v14303_v8 = vcombine.high %v582_v41, %v586_v16  ;;  %v618_v27 = vld [vmem:[%s22314_s1 + $0x10b8] sm:$0xff]  ;;  %v869_v59 = vld [vmem:[%s22314_s1 + $0x1890] sm:$0xff] }
 0x429   :  { %10548 = vmatprep.subr.bf16.mxu0 %v14517_v14  ;;  %v14557_v14 = vcombine.high %v837_v3, %v841_v4  ;;  %v873_v62 = vld [vmem:[%s22314_s1 + $0x18b0] sm:$0xff] }
 0x42b   :  { %10959 = vmatpush1.bf16.msra.mxu1 %v14262_v22  ;;  %v14302_v22 = vcombine.low %v582_v41, %v586_v16  ;;  %v626_v41 = vld [vmem:[%s22314_s1 + $0x10f8] sm:$0xff]  ;;  %v877_v16 = vld [vmem:[%s22314_s1 + $0x18d0] sm:$0xff] }
 0x42c   :  { %10549 = vmatpush1.bf16.msra.mxu0 %v14516_v23  ;;  %10960 = vmatprep.subr.bf16.mxu1 %v14271_v26  ;;  %v14556_v23 = vcombine.low %v837_v3, %v841_v4  ;;  %v14311_v26 = vcombine.high %v590_v15, %v594_v6  ;;  %v881_v3 = vld [vmem:[%s22314_s1 + $0x18f0] sm:$0xff]  ;;  %v14334_v4 = vcombine.low %v614_v56, %v618_v27 }
 0x42d   :  { %10550 = vmatprep.subr.bf16.mxu0 %v14525_v28  ;;  %v14565_v28 = vcombine.high %v845_v18, %v849_v61 }
 0x42f   :  { %10961 = vmatpush1.bf16.msra.mxu1 %v14270_v40  ;;  %v14310_v40 = vcombine.low %v590_v15, %v594_v6  ;;  %v634_v15 = vld [vmem:[%s22314_s1 + $0x1138] sm:$0xff]  ;;  %v889_v6 = vld [vmem:[%s22314_s1 + $0x1930] sm:$0xff] }
 0x430   :  { %10551 = vmatpush1.bf16.msra.mxu0 %v14524_v43  ;;  %10962 = vmatprep.subr.bf16.mxu1 %v14279_v44  ;;  %v14564_v43 = vcombine.low %v845_v18, %v849_v61  ;;  %v14319_v44 = vcombine.high %v598_v32, %v602_v33  ;;  %v14596_v61 = vcombine.low %v877_v16, %v881_v3 }
 0x431   :  { %10552 = vmatprep.subr.bf16.mxu0 %v14533_v21  ;;  %v14573_v21 = vcombine.high %v853_v34, %v857_v36 }
 0x433   :  { %10963 = vmatpush1.bf16.msra.mxu1 %v14278_v52  ;;  %v14318_v52 = vcombine.low %v598_v32, %v602_v33  ;;  %v893_v32 = vld [vmem:[%s22314_s1 + $0x1950] sm:$0xff] }
 0x434   :  { %10553 = vmatpush1.bf16.msra.mxu0 %v14532_v54  ;;  %10964 = vmatprep.subr.bf16.mxu1 %v14287_v35  ;;  %v14572_v54 = vcombine.low %v853_v34, %v857_v36  ;;  %v14327_v35 = vcombine.high %v606_v47, %v610_v48  ;;  %v897_v33 = vld [vmem:[%s22314_s1 + $0x1970] sm:$0xff] }
 0x435   :  { %10554 = vmatprep.subr.bf16.mxu0 %v14541_v55  ;;  %v14581_v55 = vcombine.high %v861_v49, %v865_v51 }
 0x437   :  { %10965 = vmatpush1.bf16.msra.mxu1 %v14286_v63  ;;  %v14326_v63 = vcombine.low %v606_v47, %v610_v48  ;;  %v901_v47 = vld [vmem:[%s22314_s1 + $0x1990] sm:$0xff] }
 0x438   :  { %10555 = vmatpush1.bf16.msra.mxu0 %v14540_v0  ;;  %10966 = vmatprep.subr.bf16.mxu1 %v14295_v57  ;;  %v14580_v0 = vcombine.low %v861_v49, %v865_v51  ;;  %v14335_v57 = vcombine.high %v614_v56, %v618_v27  ;;  %v905_v48 = vld [vmem:[%s22314_s1 + $0x19b0] sm:$0xff]  ;;  %v14612_v51 = vcombine.low %v893_v32, %v897_v33 }
 0x439   :  { %10556 = vmatprep.subr.bf16.mxu0 %v14549_v1  ;;  %v14589_v1 = vcombine.high %v869_v59, %v873_v62  ;;  %v909_v56 = vld [vmem:[%s22314_s1 + $0x19d0] sm:$0xff] }
 0x43a   :  { %v913_v27 = vld [vmem:[%s22314_s1 + $0x19f0] sm:$0xff] }
 0x43b   :  { %10967 = vmatpush1.bf16.msra.mxu1 %v14294_v2  ;;  %v14588_v2 = vcombine.low %v869_v59, %v873_v62  ;;  %v14620_v62 = vcombine.low %v901_v47, %v905_v48 }
 0x43c   :  { %10557 = vmatpush1.bf16.msra.mxu0 %v14548_v7  ;;  %10968 = vmatprep.subr.bf16.mxu1 %v14303_v8  ;;  %v14597_v8 = vcombine.high %v877_v16, %v881_v3  ;;  %v14628_v3 = vcombine.low %v909_v56, %v913_v27 }
 0x43d   :  { %10558 = vmatprep.subr.bf16.mxu0 %v14557_v14  ;;  %v630_v14 = vld [vmem:[%s22314_s1 + $0x1118] sm:$0xff] }
 0x43e   :  { %v14350_v34 = vcombine.low %v630_v14, %v634_v15 }
 0x43f   :  { %10969 = vmatpush1.bf16.msra.mxu1 %v14302_v22  ;;  %v14351_v22 = vcombine.high %v630_v14, %v634_v15  ;;  %v925_v14 = vld [vmem:[%s22314_s1 + $0x1a50] sm:$0xff] }
 0x440   :  { %10559 = vmatpush1.bf16.msra.mxu0 %v14556_v23  ;;  %10970 = vmatprep.subr.bf16.mxu1 %v14311_v26  ;;  %v638_v26 = vld [vmem:[%s22314_s1 + $0x1158] sm:$0xff]  ;;  %v929_v15 = vld [vmem:[%s22314_s1 + $0x1a70] sm:$0xff] }
 0x441   :  { %10560 = vmatprep.subr.bf16.mxu0 %v14565_v28  ;;  %v642_v28 = vld [vmem:[%s22314_s1 + $0x1178] sm:$0xff] }
 0x442   :  { %v14358_v49 = vcombine.low %v638_v26, %v642_v28 }
 0x443   :  { %10971 = vmatpush1.bf16.msra.mxu1 %v14310_v40  ;;  %v14359_v40 = vcombine.high %v638_v26, %v642_v28  ;;  %v933_v26 = vld [vmem:[%s22314_s1 + $0x1a90] sm:$0xff] }
 0x444   :  { %10561 = vmatpush1.bf16.msra.mxu0 %v14564_v43  ;;  %10981 = vmatprep.subr.bf16.mxu1 %v14319_v44  ;;  %v14613_v43 = vcombine.high %v893_v32, %v897_v33  ;;  %v646_v44 = vld [vmem:[%s22314_s1 + $0x1198] sm:$0xff]  ;;  %v937_v28 = vld [vmem:[%s22314_s1 + $0x1ab0] sm:$0xff]  ;;  %v14644_v33 = vcombine.low %v925_v14, %v929_v15 }
 0x445   :  { %10571 = vmatprep.subr.bf16.mxu0 %v14573_v21  ;;  %v650_v21 = vld [vmem:[%s22314_s1 + $0x11b8] sm:$0xff] }
 0x446   :  { %10973 = vmatmul.mubr.bf16.vlgmr.msra.gmra.mrb[8].mxu1 %v17066_v53  ;;  %v622_v53 = vld [vmem:[%s22314_s1 + $0x10d8] sm:$0xff]  ;;  %v14366_v59 = vcombine.low %v646_v44, %v650_v21 }
 0x447   :  { %10563 = vmatmul.mubr.bf16.vlgmr.msra.gmra.mrb[4].mxu0 %v17482_v50  ;;  %10982 = vmatpush1.bf16.msra.mxu1 %v14318_v52  ;;  %v14343_v7 = vcombine.high %v622_v53, %v626_v41  ;;  %v14342_v18 = vcombine.low %v622_v53, %v626_v41  ;;  %v14367_v52 = vcombine.high %v646_v44, %v650_v21  ;;  %v917_v53 = vld [vmem:[%s22314_s1 + $0x1a10] sm:$0xff] }
 0x448   :  { %10572 = vmatpush1.bf16.msra.mxu0 %v14572_v54  ;;  %10983 = vmatprep.subr.bf16.mxu1 %v14327_v35  ;;  %v14621_v54 = vcombine.high %v901_v47, %v905_v48  ;;  %v654_v35 = vld [vmem:[%s22314_s1 + $0x11d8] sm:$0xff]  ;;  %v921_v41 = vld [vmem:[%s22314_s1 + $0x1a30] sm:$0xff]  ;;  %v14652_v48 = vcombine.low %v933_v26, %v937_v28 }
 0x449   :  { %10573 = vmatprep.subr.bf16.mxu0 %v14581_v55  ;;  %10603 = vmatprep.mubr.bf16.mxu0 %v17490_v58  ;;  %v658_v55 = vld [vmem:[%s22314_s1 + $0x11f8] sm:$0xff]  ;;  %v941_v44 = vld [vmem:[%s22314_s1 + $0x1ad0] sm:$0xff] }
 0x44a   :  { %11013 = vmatprep.mubr.bf16.mxu1 %v17074_v60  ;;  %v885_v60 = vld [vmem:[%s22314_s1 + $0x1910] sm:$0xff]  ;;  %v14374_v16 = vcombine.low %v654_v35, %v658_v55 }
 0x44b   :  { %10984 = vmatpush1.bf16.msra.mxu1 %v14326_v63  ;;  %v14605_v23 = vcombine.high %v885_v60, %v889_v6  ;;  %v14604_v36 = vcombine.low %v885_v60, %v889_v6  ;;  %v14375_v63 = vcombine.high %v654_v35, %v658_v55  ;;  %v14636_v6 = vcombine.low %v917_v53, %v921_v41  ;;  %v945_v21 = vld [vmem:[%s22314_s1 + $0x1af0] sm:$0xff] }
 0x44c   :  { %10574 = vmatpush1.bf16.msra.mxu0 %v14580_v0  ;;  %10985 = vmatprep.subr.bf16.mxu1 %v14335_v57  ;;  %v14629_v0 = vcombine.high %v909_v56, %v913_v27  ;;  %v662_v57 = vld [vmem:[%s22314_s1 + $0x1218] sm:$0xff]  ;;  %v949_v35 = vld [vmem:[%s22314_s1 + $0x1b10] sm:$0xff]  ;;  %v14660_v27 = vcombine.low %v941_v44, %v945_v21 }
 0x44d   :  { %10575 = vmatprep.subr.bf16.mxu0 %v14589_v1  ;;  %v666_v1 = vld [vmem:[%s22314_s1 + $0x1238] sm:$0xff]  ;;  %v953_v55 = vld [vmem:[%s22314_s1 + $0x1b30] sm:$0xff] }
 0x44e   :  { %v14382_v60 = vcombine.low %v662_v57, %v666_v1 }
 0x44f   :  { %10986 = vmatpush1.bf16.msra.mxu1 %v14334_v4  ;;  %v14383_v4 = vcombine.high %v662_v57, %v666_v1  ;;  %v957_v57 = vld [vmem:[%s22314_s1 + $0x1b50] sm:$0xff] }
 0x450   :  { %10576 = vmatpush1.bf16.msra.mxu0 %v14588_v2  ;;  %10987 = vmatprep.subr.bf16.mxu1 %v14343_v7  ;;  %v14637_v2 = vcombine.high %v917_v53, %v921_v41  ;;  %v670_v7 = vld [vmem:[%s22314_s1 + $0x1258] sm:$0xff]  ;;  %v961_v1 = vld [vmem:[%s22314_s1 + $0x1b70] sm:$0xff]  ;;  %v14668_v41 = vcombine.low %v949_v35, %v953_v55 }
 0x451   :  { %10577 = vmatprep.subr.bf16.mxu0 %v14597_v8  ;;  %v674_v8 = vld [vmem:[%s22314_s1 + $0x1278] sm:$0xff] }
 0x452   :  { %v14390_v32 = vcombine.low %v670_v7, %v674_v8 }
 0x453   :  { %10988 = vmatpush1.bf16.msra.mxu1 %v14342_v18  ;;  %v14391_v18 = vcombine.high %v670_v7, %v674_v8  ;;  %v965_v7 = vld [vmem:[%s22314_s1 + $0x1b90] sm:$0xff] }
 0x454   :  { %10578 = vmatpush1.bf16.msra.mxu0 %v14596_v61  ;;  %10989 = vmatprep.subr.bf16.mxu1 %v14351_v22  ;;  %v14645_v61 = vcombine.high %v925_v14, %v929_v15  ;;  %v678_v22 = vld [vmem:[%s22314_s1 + $0x1298] sm:$0xff]  ;;  %v969_v8 = vld [vmem:[%s22314_s1 + $0x1bb0] sm:$0xff]  ;;  %v14676_v15 = vcombine.low %v957_v57, %v961_v1 }
 0x455   :  { %10579 = vmatprep.subr.bf16.mxu0 %v14605_v23  ;;  %v682_v23 = vld [vmem:[%s22314_s1 + $0x12b8] sm:$0xff] }
 0x456   :  { %v14398_v47 = vcombine.low %v678_v22, %v682_v23 }
 0x457   :  { %10990 = vmatpush1.bf16.msra.mxu1 %v14350_v34  ;;  %v14399_v34 = vcombine.high %v678_v22, %v682_v23  ;;  %v973_v22 = vld [vmem:[%s22314_s1 + $0x1bd0] sm:$0xff] }
 0x458   :  { %10580 = vmatpush1.bf16.msra.mxu0 %v14604_v36  ;;  %10991 = vmatprep.subr.bf16.mxu1 %v14359_v40  ;;  %v14653_v36 = vcombine.high %v933_v26, %v937_v28  ;;  %v686_v40 = vld [vmem:[%s22314_s1 + $0x12d8] sm:$0xff]  ;;  %v977_v23 = vld [vmem:[%s22314_s1 + $0x1bf0] sm:$0xff]  ;;  %v14684_v28 = vcombine.low %v965_v7, %v969_v8 }
 0x459   :  { %10581 = vmatprep.subr.bf16.mxu0 %v14613_v43  ;;  %v690_v43 = vld [vmem:[%s22314_s1 + $0x12f8] sm:$0xff] }
 0x45a   :  { %v14406_v56 = vcombine.low %v686_v40, %v690_v43 }
 0x45b   :  { %10992 = vmatpush1.bf16.msra.mxu1 %v14358_v49  ;;  %v14407_v49 = vcombine.high %v686_v40, %v690_v43  ;;  %v981_v40 = vld [vmem:[%s22314_s1 + $0x1c10] sm:$0xff] }
 0x45c   :  { %10582 = vmatpush1.bf16.msra.mxu0 %v14612_v51  ;;  %10993 = vmatprep.subr.bf16.mxu1 %v14367_v52  ;;  %v14661_v51 = vcombine.high %v941_v44, %v945_v21  ;;  %v694_v52 = vld [vmem:[%s22314_s1 + $0x1318] sm:$0xff]  ;;  %v985_v43 = vld [vmem:[%s22314_s1 + $0x1c30] sm:$0xff]  ;;  %v14692_v21 = vcombine.low %v973_v22, %v977_v23 }
 0x45d   :  { %10583 = vmatprep.subr.bf16.mxu0 %v14621_v54  ;;  %v698_v54 = vld [vmem:[%s22314_s1 + $0x1338] sm:$0xff] }
 0x45e   :  { %v14414_v53 = vcombine.low %v694_v52, %v698_v54 }
 0x45f   :  { %10994 = vmatpush1.bf16.msra.mxu1 %v14366_v59  ;;  %v14415_v59 = vcombine.high %v694_v52, %v698_v54  ;;  %v989_v52 = vld [vmem:[%s22314_s1 + $0x1c50] sm:$0xff] }
 0x460   :  { %10584 = vmatpush1.bf16.msra.mxu0 %v14620_v62  ;;  %10995 = vmatprep.subr.bf16.mxu1 %v14375_v63  ;;  %v14669_v62 = vcombine.high %v949_v35, %v953_v55  ;;  %v702_v63 = vld [vmem:[%s22314_s1 + $0x1358] sm:$0xff]  ;;  %v993_v54 = vld [vmem:[%s22314_s1 + $0x1c70] sm:$0xff]  ;;  %v14700_v55 = vcombine.low %v981_v40, %v985_v43 }
 0x461   :  { %10585 = vmatprep.subr.bf16.mxu0 %v14629_v0  ;;  %v706_v0 = vld [vmem:[%s22314_s1 + $0x1378] sm:$0xff] }
 0x462   :  { %v14422_v14 = vcombine.low %v702_v63, %v706_v0 }
 0x463   :  { %10996 = vmatpush1.bf16.msra.mxu1 %v14374_v16  ;;  %v14423_v16 = vcombine.high %v702_v63, %v706_v0  ;;  %v997_v63 = vld [vmem:[%s22314_s1 + $0x1c90] sm:$0xff] }
 0x464   :  { %10586 = vmatpush1.bf16.msra.mxu0 %v14628_v3  ;;  %10997 = vmatprep.subr.bf16.mxu1 %v14383_v4  ;;  %v14677_v3 = vcombine.high %v957_v57, %v961_v1  ;;  %v710_v4 = vld [vmem:[%s22314_s1 + $0x1398] sm:$0xff]  ;;  %v1001_v0 = vld [vmem:[%s22314_s1 + $0x1cb0] sm:$0xff]  ;;  %v14708_v1 = vcombine.low %v989_v52, %v993_v54 }
 0x465   :  { %10587 = vmatprep.subr.bf16.mxu0 %v14637_v2  ;;  %v714_v2 = vld [vmem:[%s22314_s1 + $0x13b8] sm:$0xff] }
 0x466   :  { %v14430_v26 = vcombine.low %v710_v4, %v714_v2 }
 0x467   :  { %10998 = vmatpush1.bf16.msra.mxu1 %v14382_v60  ;;  %v14431_v60 = vcombine.high %v710_v4, %v714_v2  ;;  %v1009_v4 = vld [vmem:[%s22314_s1 + $0x1cf0] sm:$0xff] }
 0x468   :  { %10588 = vmatpush1.bf16.msra.mxu0 %v14636_v6  ;;  %10999 = vmatprep.subr.bf16.mxu1 %v14391_v18  ;;  %v14685_v6 = vcombine.high %v965_v7, %v969_v8  ;;  %v718_v18 = vld [vmem:[%s22314_s1 + $0x13d8] sm:$0xff]  ;;  %v14716_v7 = vcombine.low %v997_v63, %v1001_v0 }
 0x469   :  { %10589 = vmatprep.subr.bf16.mxu0 %v14645_v61  ;;  %v722_v61 = vld [vmem:[%s22314_s1 + $0x13f8] sm:$0xff] }
 0x46a   :  { %v14438_v44 = vcombine.low %v718_v18, %v722_v61 }
 0x46b   :  { %11000 = vmatpush1.bf16.msra.mxu1 %v14390_v32  ;;  %v14439_v32 = vcombine.high %v718_v18, %v722_v61 }
 0x46c   :  { %10590 = vmatpush1.bf16.msra.mxu0 %v14644_v33  ;;  %11001 = vmatprep.subr.bf16.mxu1 %v14399_v34  ;;  %v14693_v33 = vcombine.high %v973_v22, %v977_v23  ;;  %v726_v34 = vld [vmem:[%s22314_s1 + $0x1418] sm:$0xff] }
 0x46d   :  { %10591 = vmatprep.subr.bf16.mxu0 %v14653_v36  ;;  %v730_v36 = vld [vmem:[%s22314_s1 + $0x1438] sm:$0xff] }
 0x46e   :  { %v14446_v35 = vcombine.low %v726_v34, %v730_v36 }
 0x46f   :  { %11002 = vmatpush1.bf16.msra.mxu1 %v14398_v47  ;;  %v14447_v47 = vcombine.high %v726_v34, %v730_v36 }
 0x470   :  { %10592 = vmatpush1.bf16.msra.mxu0 %v14652_v48  ;;  %11003 = vmatprep.subr.bf16.mxu1 %v14407_v49  ;;  %v14701_v48 = vcombine.high %v981_v40, %v985_v43  ;;  %v734_v49 = vld [vmem:[%s22314_s1 + $0x1458] sm:$0xff] }
 0x471   :  { %10593 = vmatprep.subr.bf16.mxu0 %v14661_v51  ;;  %v738_v51 = vld [vmem:[%s22314_s1 + $0x1478] sm:$0xff] }
 0x472   :  { %v14454_v57 = vcombine.low %v734_v49, %v738_v51 }
 0x473   :  { %11004 = vmatpush1.bf16.msra.mxu1 %v14406_v56  ;;  %v14455_v56 = vcombine.high %v734_v49, %v738_v51 }
 0x474   :  { %10594 = vmatpush1.bf16.msra.mxu0 %v14660_v27  ;;  %11005 = vmatprep.subr.bf16.mxu1 %v14415_v59  ;;  %v14709_v27 = vcombine.high %v989_v52, %v993_v54  ;;  %v742_v59 = vld [vmem:[%s22314_s1 + $0x1498] sm:$0xff] }
 0x475   :  { %10595 = vmatprep.subr.bf16.mxu0 %v14669_v62  ;;  %v746_v62 = vld [vmem:[%s22314_s1 + $0x14b8] sm:$0xff] }
 0x476   :  { %v14462_v2 = vcombine.low %v742_v59, %v746_v62 }
 0x477   :  { %11006 = vmatpush1.bf16.msra.mxu1 %v14414_v53  ;;  %v14463_v53 = vcombine.high %v742_v59, %v746_v62 }
 0x478   :  { %10596 = vmatpush1.bf16.msra.mxu0 %v14668_v41  ;;  %11007 = vmatprep.subr.bf16.mxu1 %v14423_v16  ;;  %v14717_v41 = vcombine.high %v997_v63, %v1001_v0  ;;  %v754_v16 = vld [vmem:[%s22314_s1 + $0x14f8] sm:$0xff] }
 0x479   :  { %10597 = vmatprep.subr.bf16.mxu0 %v14677_v3  ;;  %v1005_v3 = vld [vmem:[%s22314_s1 + $0x1cd0] sm:$0xff] }
 0x47a   :  { %v14724_v61 = vcombine.low %v1005_v3, %v1009_v4 }
 0x47b   :  { %11008 = vmatpush1.bf16.msra.mxu1 %v14422_v14  ;;  %v14725_v14 = vcombine.high %v1005_v3, %v1009_v4 }
 0x47c   :  { %10598 = vmatpush1.bf16.msra.mxu0 %v14676_v15  ;;  %11009 = vmatprep.subr.bf16.mxu1 %v14431_v60  ;;  %v758_v15 = vld [vmem:[%s22314_s1 + $0x1518] sm:$0xff] }
 0x47d   :  { %10599 = vmatprep.subr.bf16.mxu0 %v14685_v6  ;;  %v762_v60 = vld [vmem:[%s22314_s1 + $0x1538] sm:$0xff]  ;;  %v1017_v6 = vld [vmem:[%s22314_s1 + $0x1d30] sm:$0xff] }
 0x47e   :  { %v14479_v22 = vcombine.high %v758_v15, %v762_v60  ;;  %v14478_v34 = vcombine.low %v758_v15, %v762_v60 }
 0x47f   :  { %11010 = vmatpush1.bf16.msra.mxu1 %v14430_v26  ;;  %v766_v26 = vld [vmem:[%s22314_s1 + $0x1558] sm:$0xff] }
 0x480   :  { %10600 = vmatpush1.bf16.msra.mxu0 %v14684_v28  ;;  %11011 = vmatprep.subr.bf16.mxu1 %v14439_v32  ;;  %v770_v28 = vld [vmem:[%s22314_s1 + $0x1578] sm:$0xff]  ;;  %v1021_v32 = vld [vmem:[%s22314_s1 + $0x1d50] sm:$0xff] }
 0x481   :  { %10601 = vmatprep.subr.bf16.mxu0 %v14693_v33  ;;  %v1025_v33 = vld [vmem:[%s22314_s1 + $0x1d70] sm:$0xff]  ;;  %v14487_v40 = vcombine.high %v766_v26, %v770_v28  ;;  %v14486_v49 = vcombine.low %v766_v26, %v770_v28 }
 0x482   :  { %v14741_v43 = vcombine.high %v1021_v32, %v1025_v33  ;;  %v14740_v51 = vcombine.low %v1021_v32, %v1025_v33 }
 0x483   :  { %11012 = vmatpush1.bf16.msra.mxu1 %v14438_v44  ;;  %v774_v44 = vld [vmem:[%s22314_s1 + $0x1598] sm:$0xff] }
 0x484   :  { %10602 = vmatpush1.bf16.msra.mxu0 %v14692_v21  ;;  %11022 = vmatprep.subr.bf16.mxu1 %v14447_v47  ;;  %v778_v21 = vld [vmem:[%s22314_s1 + $0x15b8] sm:$0xff]  ;;  %v1029_v47 = vld [vmem:[%s22314_s1 + $0x1d90] sm:$0xff] }
 0x485   :  { %10612 = vmatprep.subr.bf16.mxu0 %v14701_v48  ;;  %v1033_v48 = vld [vmem:[%s22314_s1 + $0x1db0] sm:$0xff]  ;;  %v14495_v52 = vcombine.high %v774_v44, %v778_v21  ;;  %v14494_v59 = vcombine.low %v774_v44, %v778_v21 }
 0x486   :  { %11014 = vmatmul.mubr.bf16.vlgmr.msra.gmra.mrb[8].mxu1 %v17272_v13  ;;  %v750_v13 = vld [vmem:[%s22314_s1 + $0x14d8] sm:$0xff]  ;;  %v14749_v54 = vcombine.high %v1029_v47, %v1033_v48  ;;  %v14748_v62 = vcombine.low %v1029_v47, %v1033_v48 }
 0x487   :  { %10604 = vmatmul.mubr.bf16.vlgmr.msra.gmra.mrb[4].mxu0 %v17688_v31  ;;  %11023 = vmatpush1.bf16.msra.mxu1 %v14446_v35  ;;  %v14471_v8 = vcombine.high %v750_v13, %v754_v16  ;;  %v14470_v18 = vcombine.low %v750_v13, %v754_v16  ;;  %v782_v35 = vld [vmem:[%s22314_s1 + $0x15d8] sm:$0xff] }
 0x488   :  { %10613 = vmatpush1.bf16.msra.mxu0 %v14700_v55  ;;  %11024 = vmatprep.subr.bf16.mxu1 %v14455_v56  ;;  %v786_v55 = vld [vmem:[%s22314_s1 + $0x15f8] sm:$0xff]  ;;  %v1037_v56 = vld [vmem:[%s22314_s1 + $0x1dd0] sm:$0xff] }
 0x489   :  { %10614 = vmatprep.subr.bf16.mxu0 %v14709_v27  ;;  %10644 = vmatprep.mubr.bf16.mxu0 %v17696_v38  ;;  %v1041_v27 = vld [vmem:[%s22314_s1 + $0x1df0] sm:$0xff]  ;;  %v14503_v63 = vcombine.high %v782_v35, %v786_v55  ;;  %v14502_v13 = vcombine.low %v782_v35, %v786_v55 }
 0x48a   :  { %11054 = vmatprep.mubr.bf16.mxu1 %v17280_v20  ;;  %v1013_v20 = vld [vmem:[%s22314_s1 + $0x1d10] sm:$0xff]  ;;  %v14757_v0 = vcombine.high %v1037_v56, %v1041_v27  ;;  %v14756_v16 = vcombine.low %v1037_v56, %v1041_v27 }
 0x48b   :  { %11025 = vmatpush1.bf16.msra.mxu1 %v14454_v57  ;;  %v14733_v23 = vcombine.high %v1013_v20, %v1017_v6  ;;  %v14732_v36 = vcombine.low %v1013_v20, %v1017_v6  ;;  %v790_v57 = vld [vmem:[%s22314_s1 + $0x1618] sm:$0xff] }
 0x48c   :  { %10615 = vmatpush1.bf16.msra.mxu0 %v14708_v1  ;;  %11026 = vmatprep.subr.bf16.mxu1 %v14463_v53  ;;  %v794_v1 = vld [vmem:[%s22314_s1 + $0x1638] sm:$0xff]  ;;  %v1045_v53 = vld [vmem:[%s22314_s1 + $0x1e10] sm:$0xff] }
 0x48d   :  { %10616 = vmatprep.subr.bf16.mxu0 %v14717_v41  ;;  %v1049_v41 = vld [vmem:[%s22314_s1 + $0x1e30] sm:$0xff]  ;;  %v14511_v3 = vcombine.high %v790_v57, %v794_v1  ;;  %v14510_v15 = vcombine.low %v790_v57, %v794_v1 }
 0x48e   :  { %v14765_v4 = vcombine.high %v1045_v53, %v1049_v41  ;;  %v14764_v60 = vcombine.low %v1045_v53, %v1049_v41 }
 0x48f   :  { %11027 = vmatpush1.bf16.msra.mxu1 %v14462_v2  ;;  %v798_v2 = vld [vmem:[%s22314_s1 + $0x1658] sm:$0xff] }
 0x490   :  { %10617 = vmatpush1.bf16.msra.mxu0 %v14716_v7  ;;  %11028 = vmatprep.subr.bf16.mxu1 %v14471_v8  ;;  %v802_v7 = vld [vmem:[%s22314_s1 + $0x1678] sm:$0xff]  ;;  %v1053_v8 = vld [vmem:[%s22314_s1 + $0x1e50] sm:$0xff] }
 0x491   :  { %10618 = vmatprep.subr.bf16.mxu0 %v14725_v14  ;;  %v1057_v14 = vld [vmem:[%s22314_s1 + $0x1e70] sm:$0xff]  ;;  %v14519_v20 = vcombine.high %v798_v2, %v802_v7  ;;  %v14518_v26 = vcombine.low %v798_v2, %v802_v7 }
 0x492   :  { %v14773_v6 = vcombine.high %v1053_v8, %v1057_v14  ;;  %v14772_v28 = vcombine.low %v1053_v8, %v1057_v14 }
 0x493   :  { %11029 = vmatpush1.bf16.msra.mxu1 %v14470_v18  ;;  %v806_v18 = vld [vmem:[%s22314_s1 + $0x1698] sm:$0xff] }
 0x494   :  { %10619 = vmatpush1.bf16.msra.mxu0 %v14724_v61  ;;  %11030 = vmatprep.subr.bf16.mxu1 %v14479_v22  ;;  %v810_v61 = vld [vmem:[%s22314_s1 + $0x16b8] sm:$0xff]  ;;  %v1061_v22 = vld [vmem:[%s22314_s1 + $0x1e90] sm:$0xff] }
 0x495   :  { %10620 = vmatprep.subr.bf16.mxu0 %v14733_v23  ;;  %v1065_v23 = vld [vmem:[%s22314_s1 + $0x1eb0] sm:$0xff]  ;;  %v14527_v32 = vcombine.high %v806_v18, %v810_v61  ;;  %v14526_v44 = vcombine.low %v806_v18, %v810_v61 }
 0x496   :  { %v14781_v33 = vcombine.high %v1061_v22, %v1065_v23  ;;  %v14780_v21 = vcombine.low %v1061_v22, %v1065_v23 }
 0x497   :  { %11031 = vmatpush1.bf16.msra.mxu1 %v14478_v34  ;;  %v814_v34 = vld [vmem:[%s22314_s1 + $0x16d8] sm:$0xff] }
 0x498   :  { %10621 = vmatpush1.bf16.msra.mxu0 %v14732_v36  ;;  %11032 = vmatprep.subr.bf16.mxu1 %v14487_v40  ;;  %v818_v36 = vld [vmem:[%s22314_s1 + $0x16f8] sm:$0xff]  ;;  %v1069_v40 = vld [vmem:[%s22314_s1 + $0x1ed0] sm:$0xff] }
 0x499   :  { %10622 = vmatprep.subr.bf16.mxu0 %v14741_v43  ;;  %v1073_v43 = vld [vmem:[%s22314_s1 + $0x1ef0] sm:$0xff]  ;;  %v14535_v47 = vcombine.high %v814_v34, %v818_v36  ;;  %v14534_v35 = vcombine.low %v814_v34, %v818_v36 }
 0x49a   :  { %v14789_v48 = vcombine.high %v1069_v40, %v1073_v43  ;;  %v14788_v55 = vcombine.low %v1069_v40, %v1073_v43 }
 0x49b   :  { %11033 = vmatpush1.bf16.msra.mxu1 %v14486_v49  ;;  %v822_v49 = vld [vmem:[%s22314_s1 + $0x1718] sm:$0xff] }
 0x49c   :  { %10623 = vmatpush1.bf16.msra.mxu0 %v14740_v51  ;;  %11034 = vmatprep.subr.bf16.mxu1 %v14495_v52  ;;  %v826_v51 = vld [vmem:[%s22314_s1 + $0x1738] sm:$0xff]  ;;  %v1077_v52 = vld [vmem:[%s22314_s1 + $0x1f10] sm:$0xff] }
 0x49d   :  { %10624 = vmatprep.subr.bf16.mxu0 %v14749_v54  ;;  %v1081_v54 = vld [vmem:[%s22314_s1 + $0x1f30] sm:$0xff]  ;;  %v14543_v56 = vcombine.high %v822_v49, %v826_v51  ;;  %v14542_v57 = vcombine.low %v822_v49, %v826_v51 }
 0x49e   :  { %v14797_v27 = vcombine.high %v1077_v52, %v1081_v54  ;;  %v14796_v1 = vcombine.low %v1077_v52, %v1081_v54 }
 0x49f   :  { %11035 = vmatpush1.bf16.msra.mxu1 %v14494_v59  ;;  %v830_v59 = vld [vmem:[%s22314_s1 + $0x1758] sm:$0xff] }
 0x4a0   :  { %10625 = vmatpush1.bf16.msra.mxu0 %v14748_v62  ;;  %11036 = vmatprep.subr.bf16.mxu1 %v14503_v63  ;;  %v834_v62 = vld [vmem:[%s22314_s1 + $0x1778] sm:$0xff]  ;;  %v1085_v63 = vld [vmem:[%s22314_s1 + $0x1f50] sm:$0xff] }
 0x4a1   :  { %10626 = vmatprep.subr.bf16.mxu0 %v14757_v0  ;;  %v1089_v0 = vld [vmem:[%s22314_s1 + $0x1f70] sm:$0xff]  ;;  %v14551_v53 = vcombine.high %v830_v59, %v834_v62  ;;  %v14550_v2 = vcombine.low %v830_v59, %v834_v62 }
 0x4a2   :  { %v14805_v41 = vcombine.high %v1085_v63, %v1089_v0  ;;  %v14804_v7 = vcombine.low %v1085_v63, %v1089_v0 }
 0x4a3   :  { %11037 = vmatpush1.bf16.msra.mxu1 %v14502_v13  ;;  %v838_v13 = vld [vmem:[%s22314_s1 + $0x1798] sm:$0xff] }
 0x4a4   :  { %10627 = vmatpush1.bf16.msra.mxu0 %v14756_v16  ;;  %11038 = vmatprep.subr.bf16.mxu1 %v14511_v3  ;;  %v842_v16 = vld [vmem:[%s22314_s1 + $0x17b8] sm:$0xff]  ;;  %v1093_v3 = vld [vmem:[%s22314_s1 + $0x1f90] sm:$0xff] }
 0x4a5   :  { %10628 = vmatprep.subr.bf16.mxu0 %v14765_v4  ;;  %v1097_v4 = vld [vmem:[%s22314_s1 + $0x1fb0] sm:$0xff]  ;;  %v14559_v8 = vcombine.high %v838_v13, %v842_v16  ;;  %v14558_v18 = vcombine.low %v838_v13, %v842_v16 }
 0x4a6   :  { %v14813_v14 = vcombine.high %v1093_v3, %v1097_v4  ;;  %v14812_v61 = vcombine.low %v1093_v3, %v1097_v4  ;;  %v886_v4 = vld [vmem:[%s22314_s1 + $0x1918] sm:$0xff] }
 0x4a7   :  { %11039 = vmatpush1.bf16.msra.mxu1 %v14510_v15  ;;  %v846_v15 = vld [vmem:[%s22314_s1 + $0x17d8] sm:$0xff] }
 0x4a8   :  { %10629 = vmatpush1.bf16.msra.mxu0 %v14764_v60  ;;  %11040 = vmatprep.subr.bf16.mxu1 %v14519_v20  ;;  %v850_v60 = vld [vmem:[%s22314_s1 + $0x17f8] sm:$0xff]  ;;  %v1101_v20 = vld [vmem:[%s22314_s1 + $0x1fd0] sm:$0xff] }
 0x4a9   :  { %10630 = vmatprep.subr.bf16.mxu0 %v14773_v6  ;;  %v1105_v6 = vld [vmem:[%s22314_s1 + $0x1ff0] sm:$0xff]  ;;  %v14567_v22 = vcombine.high %v846_v15, %v850_v60  ;;  %v14566_v34 = vcombine.low %v846_v15, %v850_v60 }
 0x4aa   :  { %v14821_v23 = vcombine.high %v1101_v20, %v1105_v6  ;;  %v14820_v36 = vcombine.low %v1101_v20, %v1105_v6  ;;  %v894_v20 = vld [vmem:[%s22314_s1 + $0x1958] sm:$0xff] }
 0x4ab   :  { %11041 = vmatpush1.bf16.msra.mxu1 %v14518_v26  ;;  %v854_v26 = vld [vmem:[%s22314_s1 + $0x1818] sm:$0xff] }
 0x4ac   :  { %10631 = vmatpush1.bf16.msra.mxu0 %v14772_v28  ;;  %11042 = vmatprep.subr.bf16.mxu1 %v14527_v32  ;;  %v858_v28 = vld [vmem:[%s22314_s1 + $0x1838] sm:$0xff]  ;;  %v1109_v32 = vld [vmem:[%s22314_s1 + $0x2010] sm:$0xff] }
 0x4ad   :  { %10632 = vmatprep.subr.bf16.mxu0 %v14781_v33  ;;  %v1113_v33 = vld [vmem:[%s22314_s1 + $0x2030] sm:$0xff]  ;;  %v14575_v40 = vcombine.high %v854_v26, %v858_v28  ;;  %v14574_v49 = vcombine.low %v854_v26, %v858_v28  ;;  %v898_v6 = vld [vmem:[%s22314_s1 + $0x1978] sm:$0xff] }
 0x4ae   :  { %v14829_v43 = vcombine.high %v1109_v32, %v1113_v33  ;;  %v14828_v51 = vcombine.low %v1109_v32, %v1113_v33  ;;  %v14615_v26 = vcombine.high %v894_v20, %v898_v6  ;;  %v902_v32 = vld [vmem:[%s22314_s1 + $0x1998] sm:$0xff] }
 0x4af   :  { %11043 = vmatpush1.bf16.msra.mxu1 %v14526_v44  ;;  %v862_v44 = vld [vmem:[%s22314_s1 + $0x1858] sm:$0xff] }
 0x4b0   :  { %10633 = vmatpush1.bf16.msra.mxu0 %v14780_v21  ;;  %11044 = vmatprep.subr.bf16.mxu1 %v14535_v47  ;;  %v866_v21 = vld [vmem:[%s22314_s1 + $0x1878] sm:$0xff]  ;;  %v1117_v47 = vld [vmem:[%s22314_s1 + $0x2050] sm:$0xff] }
 0x4b1   :  { %10634 = vmatprep.subr.bf16.mxu0 %v14789_v48  ;;  %v1121_v48 = vld [vmem:[%s22314_s1 + $0x2070] sm:$0xff]  ;;  %v14583_v52 = vcombine.high %v862_v44, %v866_v21  ;;  %v14582_v59 = vcombine.low %v862_v44, %v866_v21  ;;  %v906_v33 = vld [vmem:[%s22314_s1 + $0x19b8] sm:$0xff] }
 0x4b2   :  { %v14837_v54 = vcombine.high %v1117_v47, %v1121_v48  ;;  %v14836_v62 = vcombine.low %v1117_v47, %v1121_v48  ;;  %v14623_v44 = vcombine.high %v902_v32, %v906_v33  ;;  %v910_v47 = vld [vmem:[%s22314_s1 + $0x19d8] sm:$0xff] }
 0x4b3   :  { %11045 = vmatpush1.bf16.msra.mxu1 %v14534_v35  ;;  %v870_v35 = vld [vmem:[%s22314_s1 + $0x1898] sm:$0xff] }
 0x4b4   :  { %10635 = vmatpush1.bf16.msra.mxu0 %v14788_v55  ;;  %11046 = vmatprep.subr.bf16.mxu1 %v14543_v56  ;;  %v874_v55 = vld [vmem:[%s22314_s1 + $0x18b8] sm:$0xff]  ;;  %v1125_v56 = vld [vmem:[%s22314_s1 + $0x2090] sm:$0xff] }
 0x4b5   :  { %10636 = vmatprep.subr.bf16.mxu0 %v14797_v27  ;;  %v1129_v27 = vld [vmem:[%s22314_s1 + $0x20b0] sm:$0xff]  ;;  %v14591_v63 = vcombine.high %v870_v35, %v874_v55  ;;  %v914_v48 = vld [vmem:[%s22314_s1 + $0x19f8] sm:$0xff] }
 0x4b6   :  { %v14845_v0 = vcombine.high %v1125_v56, %v1129_v27  ;;  %v14844_v13 = vcombine.low %v1125_v56, %v1129_v27  ;;  %v918_v56 = vld [vmem:[%s22314_s1 + $0x1a18] sm:$0xff] }
 0x4b7   :  { %11047 = vmatpush1.bf16.msra.mxu1 %v14542_v57  ;;  %v882_v57 = vld [vmem:[%s22314_s1 + $0x18f8] sm:$0xff] }
 0x4b8   :  { %10637 = vmatpush1.bf16.msra.mxu0 %v14796_v1  ;;  %11048 = vmatprep.subr.bf16.mxu1 %v14551_v53  ;;  %v1133_v1 = vld [vmem:[%s22314_s1 + $0x20d0] sm:$0xff]  ;;  %v922_v27 = vld [vmem:[%s22314_s1 + $0x1a38] sm:$0xff] }
 0x4b9   :  { %10638 = vmatprep.subr.bf16.mxu0 %v14805_v41  ;;  %v1137_v53 = vld [vmem:[%s22314_s1 + $0x20f0] sm:$0xff]  ;;  %v14590_v41 = vcombine.low %v870_v35, %v874_v55  ;;  %v14631_v35 = vcombine.high %v910_v47, %v914_v48 }
 0x4ba   :  { %v14853_v3 = vcombine.high %v1133_v1, %v1137_v53 }
 0x4bb   :  { %11049 = vmatpush1.bf16.msra.mxu1 %v14550_v2  ;;  %v890_v2 = vld [vmem:[%s22314_s1 + $0x1938] sm:$0xff] }
 0x4bc   :  { %10639 = vmatpush1.bf16.msra.mxu0 %v14804_v7  ;;  %11050 = vmatprep.subr.bf16.mxu1 %v14559_v8  ;;  %v1145_v7 = vld [vmem:[%s22314_s1 + $0x2130] sm:$0xff]  ;;  %v14607_v15 = vcombine.high %v886_v4, %v890_v2 }
 0x4bd   :  { %10640 = vmatprep.subr.bf16.mxu0 %v14813_v14  ;;  %v14852_v14 = vcombine.low %v1133_v1, %v1137_v53  ;;  %v926_v1 = vld [vmem:[%s22314_s1 + $0x1a58] sm:$0xff] }
 0x4be   :  { %v930_v53 = vld [vmem:[%s22314_s1 + $0x1a78] sm:$0xff] }
 0x4bf   :  { %11051 = vmatpush1.bf16.msra.mxu1 %v14558_v18  ;;  %v1149_v18 = vld [vmem:[%s22314_s1 + $0x2150] sm:$0xff] }
 0x4c0   :  { %10641 = vmatpush1.bf16.msra.mxu0 %v14812_v61  ;;  %11052 = vmatprep.subr.bf16.mxu1 %v14567_v22  ;;  %v1153_v61 = vld [vmem:[%s22314_s1 + $0x2170] sm:$0xff]  ;;  %v14606_v22 = vcombine.low %v886_v4, %v890_v2  ;;  %v14647_v4 = vcombine.high %v926_v1, %v930_v53 }
 0x4c1   :  { %10642 = vmatprep.subr.bf16.mxu0 %v14821_v23  ;;  %v14869_v28 = vcombine.high %v1149_v18, %v1153_v61 }
 0x4c3   :  { %11053 = vmatpush1.bf16.msra.mxu1 %v14566_v34  ;;  %v1157_v34 = vld [vmem:[%s22314_s1 + $0x2190] sm:$0xff] }
 0x4c4   :  { %10643 = vmatpush1.bf16.msra.mxu0 %v14820_v36  ;;  %11063 = vmatprep.subr.bf16.mxu1 %v14575_v40  ;;  %v1161_v36 = vld [vmem:[%s22314_s1 + $0x21b0] sm:$0xff]  ;;  %v14614_v40 = vcombine.low %v894_v20, %v898_v6 }
 0x4c5   :  { %10653 = vmatprep.subr.bf16.mxu0 %v14829_v43  ;;  %v14868_v43 = vcombine.low %v1149_v18, %v1153_v61  ;;  %v14877_v21 = vcombine.high %v1157_v34, %v1161_v36  ;;  %v942_v18 = vld [vmem:[%s22314_s1 + $0x1ad8] sm:$0xff] }
 0x4c6   :  { %11055 = vmatmul.mubr.bf16.vlgmr.msra.gmra.mrb[8].mxu1 %v17482_v50  ;;  %v878_v50 = vld [vmem:[%s22314_s1 + $0x18d8] sm:$0xff] }
 0x4c7   :  { %10645 = vmatmul.mubr.bf16.vlgmr.msra.gmra.mrb[4].mxu0 %v17894_v17  ;;  %11064 = vmatpush1.bf16.msra.mxu1 %v14574_v49  ;;  %v14599_v16 = vcombine.high %v878_v50, %v882_v57  ;;  %v14598_v8 = vcombine.low %v878_v50, %v882_v57  ;;  %v1165_v49 = vld [vmem:[%s22314_s1 + $0x21d0] sm:$0xff]  ;;  %v14639_v50 = vcombine.high %v918_v56, %v922_v27  ;;  %v946_v61 = vld [vmem:[%s22314_s1 + $0x1af8] sm:$0xff] }
 0x4c8   :  { %10654 = vmatpush1.bf16.msra.mxu0 %v14828_v51  ;;  %11065 = vmatprep.subr.bf16.mxu1 %v14583_v52  ;;  %v1169_v51 = vld [vmem:[%s22314_s1 + $0x21f0] sm:$0xff]  ;;  %v14622_v52 = vcombine.low %v902_v32, %v906_v33  ;;  %v14663_v32 = vcombine.high %v942_v18, %v946_v61 }
 0x4c9   :  { %10655 = vmatprep.subr.bf16.mxu0 %v14837_v54  ;;  %10685 = vmatprep.mubr.bf16.mxu0 %v17902_v25  ;;  %v14876_v54 = vcombine.low %v1157_v34, %v1161_v36  ;;  %v14885_v55 = vcombine.high %v1165_v49, %v1169_v51  ;;  %v950_v34 = vld [vmem:[%s22314_s1 + $0x1b18] sm:$0xff] }
 0x4ca   :  { %11095 = vmatprep.mubr.bf16.mxu1 %v17490_v58  ;;  %v1141_v58 = vld [vmem:[%s22314_s1 + $0x2110] sm:$0xff]  ;;  %v954_v36 = vld [vmem:[%s22314_s1 + $0x1b38] sm:$0xff] }
 0x4cb   :  { %11066 = vmatpush1.bf16.msra.mxu1 %v14582_v59  ;;  %v14861_v60 = vcombine.high %v1141_v58, %v1145_v7  ;;  %v14860_v23 = vcombine.low %v1141_v58, %v1145_v7  ;;  %v1173_v59 = vld [vmem:[%s22314_s1 + $0x2210] sm:$0xff]  ;;  %v934_v58 = vld [vmem:[%s22314_s1 + $0x1a98] sm:$0xff] }
 0x4cc   :  { %10656 = vmatpush1.bf16.msra.mxu0 %v14836_v62  ;;  %11067 = vmatprep.subr.bf16.mxu1 %v14591_v63  ;;  %v1177_v62 = vld [vmem:[%s22314_s1 + $0x2230] sm:$0xff]  ;;  %v14630_v63 = vcombine.low %v910_v47, %v914_v48  ;;  %v938_v7 = vld [vmem:[%s22314_s1 + $0x1ab8] sm:$0xff]  ;;  %v14671_v47 = vcombine.high %v950_v34, %v954_v36 }
 0x4cd   :  { %10657 = vmatprep.subr.bf16.mxu0 %v14845_v0  ;;  %v14884_v0 = vcombine.low %v1165_v49, %v1169_v51  ;;  %v14893_v57 = vcombine.high %v1173_v59, %v1177_v62  ;;  %v14655_v20 = vcombine.high %v934_v58, %v938_v7  ;;  %v958_v49 = vld [vmem:[%s22314_s1 + $0x1b58] sm:$0xff] }
 0x4ce   :  { %v962_v51 = vld [vmem:[%s22314_s1 + $0x1b78] sm:$0xff] }
 0x4cf   :  { %11068 = vmatpush1.bf16.msra.mxu1 %v14590_v41  ;;  %v1181_v41 = vld [vmem:[%s22314_s1 + $0x2250] sm:$0xff] }
 0x4d0   :  { %10658 = vmatpush1.bf16.msra.mxu0 %v14844_v13  ;;  %11069 = vmatprep.subr.bf16.mxu1 %v14599_v16  ;;  %v1185_v13 = vld [vmem:[%s22314_s1 + $0x2270] sm:$0xff]  ;;  %v14638_v16 = vcombine.low %v918_v56, %v922_v27  ;;  %v14679_v56 = vcombine.high %v958_v49, %v962_v51 }
 0x4d1   :  { %10659 = vmatprep.subr.bf16.mxu0 %v14853_v3  ;;  %v14892_v3 = vcombine.low %v1173_v59, %v1177_v62  ;;  %v14901_v2 = vcombine.high %v1181_v41, %v1185_v13  ;;  %v966_v59 = vld [vmem:[%s22314_s1 + $0x1b98] sm:$0xff] }
 0x4d2   :  { %v970_v62 = vld [vmem:[%s22314_s1 + $0x1bb8] sm:$0xff] }
 0x4d3   :  { %11070 = vmatpush1.bf16.msra.mxu1 %v14598_v8  ;;  %v1189_v8 = vld [vmem:[%s22314_s1 + $0x2290] sm:$0xff] }
 0x4d4   :  { %10660 = vmatpush1.bf16.msra.mxu0 %v14852_v14  ;;  %11071 = vmatprep.subr.bf16.mxu1 %v14607_v15  ;;  %v1193_v14 = vld [vmem:[%s22314_s1 + $0x22b0] sm:$0xff]  ;;  %v14646_v15 = vcombine.low %v926_v1, %v930_v53  ;;  %v14687_v1 = vcombine.high %v966_v59, %v970_v62 }
 0x4d5   :  { %10661 = vmatprep.subr.bf16.mxu0 %v14861_v60  ;;  %v14900_v60 = vcombine.low %v1181_v41, %v1185_v13  ;;  %v14909_v6 = vcombine.high %v1189_v8, %v1193_v14  ;;  %v974_v41 = vld [vmem:[%s22314_s1 + $0x1bd8] sm:$0xff] }
 0x4d6   :  { %v978_v13 = vld [vmem:[%s22314_s1 + $0x1bf8] sm:$0xff] }
 0x4d7   :  { %11072 = vmatpush1.bf16.msra.mxu1 %v14606_v22  ;;  %v1197_v22 = vld [vmem:[%s22314_s1 + $0x22d0] sm:$0xff] }
 0x4d8   :  { %10662 = vmatpush1.bf16.msra.mxu0 %v14860_v23  ;;  %11073 = vmatprep.subr.bf16.mxu1 %v14615_v26  ;;  %v1201_v23 = vld [vmem:[%s22314_s1 + $0x22f0] sm:$0xff]  ;;  %v14654_v26 = vcombine.low %v934_v58, %v938_v7  ;;  %v14695_v58 = vcombine.high %v974_v41, %v978_v13 }
 0x4d9   :  { %10663 = vmatprep.subr.bf16.mxu0 %v14869_v28  ;;  %v14908_v28 = vcombine.low %v1189_v8, %v1193_v14  ;;  %v14917_v33 = vcombine.high %v1197_v22, %v1201_v23  ;;  %v982_v8 = vld [vmem:[%s22314_s1 + $0x1c18] sm:$0xff] }
 0x4da   :  { %v986_v14 = vld [vmem:[%s22314_s1 + $0x1c38] sm:$0xff] }
 0x4db   :  { %11074 = vmatpush1.bf16.msra.mxu1 %v14614_v40  ;;  %v1205_v40 = vld [vmem:[%s22314_s1 + $0x2310] sm:$0xff] }
 0x4dc   :  { %10664 = vmatpush1.bf16.msra.mxu0 %v14868_v43  ;;  %11075 = vmatprep.subr.bf16.mxu1 %v14623_v44  ;;  %v1209_v43 = vld [vmem:[%s22314_s1 + $0x2330] sm:$0xff]  ;;  %v14662_v44 = vcombine.low %v942_v18, %v946_v61  ;;  %v14703_v18 = vcombine.high %v982_v8, %v986_v14 }
 0x4dd   :  { %10665 = vmatprep.subr.bf16.mxu0 %v14877_v21  ;;  %v14916_v21 = vcombine.low %v1197_v22, %v1201_v23  ;;  %v14925_v48 = vcombine.high %v1205_v40, %v1209_v43  ;;  %v990_v22 = vld [vmem:[%s22314_s1 + $0x1c58] sm:$0xff] }
 0x4de   :  { %v994_v23 = vld [vmem:[%s22314_s1 + $0x1c78] sm:$0xff] }
 0x4df   :  { %11076 = vmatpush1.bf16.msra.mxu1 %v14622_v52  ;;  %v1213_v52 = vld [vmem:[%s22314_s1 + $0x2350] sm:$0xff] }
 0x4e0   :  { %10666 = vmatpush1.bf16.msra.mxu0 %v14876_v54  ;;  %11077 = vmatprep.subr.bf16.mxu1 %v14631_v35  ;;  %v1217_v54 = vld [vmem:[%s22314_s1 + $0x2370] sm:$0xff]  ;;  %v14670_v35 = vcombine.low %v950_v34, %v954_v36  ;;  %v14711_v34 = vcombine.high %v990_v22, %v994_v23 }
 0x4e1   :  { %10667 = vmatprep.subr.bf16.mxu0 %v14885_v55  ;;  %v14924_v55 = vcombine.low %v1205_v40, %v1209_v43  ;;  %v14933_v27 = vcombine.high %v1213_v52, %v1217_v54  ;;  %v998_v40 = vld [vmem:[%s22314_s1 + $0x1c98] sm:$0xff] }
 0x4e2   :  { %v1002_v43 = vld [vmem:[%s22314_s1 + $0x1cb8] sm:$0xff] }
 0x4e3   :  { %11078 = vmatpush1.bf16.msra.mxu1 %v14630_v63  ;;  %v1221_v63 = vld [vmem:[%s22314_s1 + $0x2390] sm:$0xff] }
 0x4e4   :  { %10668 = vmatpush1.bf16.msra.mxu0 %v14884_v0  ;;  %11079 = vmatprep.subr.bf16.mxu1 %v14639_v50  ;;  %v1225_v0 = vld [vmem:[%s22314_s1 + $0x23b0] sm:$0xff]  ;;  %v14678_v50 = vcombine.low %v958_v49, %v962_v51  ;;  %v14719_v49 = vcombine.high %v998_v40, %v1002_v43 }
 0x4e5   :  { %10669 = vmatprep.subr.bf16.mxu0 %v14893_v57  ;;  %v14932_v57 = vcombine.low %v1213_v52, %v1217_v54  ;;  %v14941_v53 = vcombine.high %v1221_v63, %v1225_v0  ;;  %v1010_v52 = vld [vmem:[%s22314_s1 + $0x1cf8] sm:$0xff]  ;;  %v1261_v54 = vld [vmem:[%s22314_s1 + $0x24d0] sm:$0xff] }
 0x4e7   :  { %11080 = vmatpush1.bf16.msra.mxu1 %v14638_v16  ;;  %v1229_v16 = vld [vmem:[%s22314_s1 + $0x23d0] sm:$0xff] }
 0x4e8   :  { %10670 = vmatpush1.bf16.msra.mxu0 %v14892_v3  ;;  %11081 = vmatprep.subr.bf16.mxu1 %v14647_v4  ;;  %v1233_v3 = vld [vmem:[%s22314_s1 + $0x23f0] sm:$0xff]  ;;  %v14686_v4 = vcombine.low %v966_v59, %v970_v62  ;;  %v1014_v62 = vld [vmem:[%s22314_s1 + $0x1d18] sm:$0xff] }
 0x4e9   :  { %10671 = vmatprep.subr.bf16.mxu0 %v14901_v2  ;;  %v14940_v2 = vcombine.low %v1221_v63, %v1225_v0  ;;  %v14949_v7 = vcombine.high %v1229_v16, %v1233_v3  ;;  %v1018_v63 = vld [vmem:[%s22314_s1 + $0x1d38] sm:$0xff]  ;;  %v1273_v0 = vld [vmem:[%s22314_s1 + $0x2530] sm:$0xff] }
 0x4eb   :  { %11082 = vmatpush1.bf16.msra.mxu1 %v14646_v15  ;;  %v1237_v15 = vld [vmem:[%s22314_s1 + $0x2410] sm:$0xff] }
 0x4ec   :  { %10672 = vmatpush1.bf16.msra.mxu0 %v14900_v60  ;;  %11083 = vmatprep.subr.bf16.mxu1 %v14655_v20  ;;  %v1241_v60 = vld [vmem:[%s22314_s1 + $0x2430] sm:$0xff]  ;;  %v14694_v20 = vcombine.low %v974_v41, %v978_v13  ;;  %v1022_v41 = vld [vmem:[%s22314_s1 + $0x1d58] sm:$0xff] }
 0x4ed   :  { %10673 = vmatprep.subr.bf16.mxu0 %v14909_v6  ;;  %v14948_v6 = vcombine.low %v1229_v16, %v1233_v3  ;;  %v14957_v61 = vcombine.high %v1237_v15, %v1241_v60  ;;  %v1026_v13 = vld [vmem:[%s22314_s1 + $0x1d78] sm:$0xff]  ;;  %v1277_v16 = vld [vmem:[%s22314_s1 + $0x2550] sm:$0xff] }
 0x4ee   :  { %v1281_v3 = vld [vmem:[%s22314_s1 + $0x2570] sm:$0xff] }
 0x4ef   :  { %11084 = vmatpush1.bf16.msra.mxu1 %v14654_v26  ;;  %v1245_v26 = vld [vmem:[%s22314_s1 + $0x2450] sm:$0xff] }
 0x4f0   :  { %10674 = vmatpush1.bf16.msra.mxu0 %v14908_v28  ;;  %11085 = vmatprep.subr.bf16.mxu1 %v14663_v32  ;;  %v1249_v28 = vld [vmem:[%s22314_s1 + $0x2470] sm:$0xff]  ;;  %v14702_v32 = vcombine.low %v982_v8, %v986_v14  ;;  %v1030_v8 = vld [vmem:[%s22314_s1 + $0x1d98] sm:$0xff] }
 0x4f1   :  { %10675 = vmatprep.subr.bf16.mxu0 %v14917_v33  ;;  %v14956_v33 = vcombine.low %v1237_v15, %v1241_v60  ;;  %v14965_v36 = vcombine.high %v1245_v26, %v1249_v28  ;;  %v1034_v14 = vld [vmem:[%s22314_s1 + $0x1db8] sm:$0xff]  ;;  %v1285_v15 = vld [vmem:[%s22314_s1 + $0x2590] sm:$0xff] }
 0x4f2   :  { %v1289_v60 = vld [vmem:[%s22314_s1 + $0x25b0] sm:$0xff] }
 0x4f3   :  { %11086 = vmatpush1.bf16.msra.mxu1 %v14662_v44  ;;  %v1253_v44 = vld [vmem:[%s22314_s1 + $0x2490] sm:$0xff] }
 0x4f4   :  { %10676 = vmatpush1.bf16.msra.mxu0 %v14916_v21  ;;  %11087 = vmatprep.subr.bf16.mxu1 %v14671_v47  ;;  %v1257_v21 = vld [vmem:[%s22314_s1 + $0x24b0] sm:$0xff]  ;;  %v14710_v47 = vcombine.low %v990_v22, %v994_v23  ;;  %v1038_v22 = vld [vmem:[%s22314_s1 + $0x1dd8] sm:$0xff] }
 0x4f5   :  { %10677 = vmatprep.subr.bf16.mxu0 %v14925_v48  ;;  %v14964_v48 = vcombine.low %v1245_v26, %v1249_v28  ;;  %v14973_v51 = vcombine.high %v1253_v44, %v1257_v21  ;;  %v1042_v23 = vld [vmem:[%s22314_s1 + $0x1df8] sm:$0xff]  ;;  %v1293_v26 = vld [vmem:[%s22314_s1 + $0x25d0] sm:$0xff] }
 0x4f6   :  { %v1297_v28 = vld [vmem:[%s22314_s1 + $0x25f0] sm:$0xff] }
 0x4f7   :  { %11088 = vmatpush1.bf16.msra.mxu1 %v14670_v35  ;;  %v1265_v35 = vld [vmem:[%s22314_s1 + $0x24f0] sm:$0xff] }
 0x4f8   :  { %10678 = vmatpush1.bf16.msra.mxu0 %v14924_v55  ;;  %11089 = vmatprep.subr.bf16.mxu1 %v14679_v56  ;;  %v14718_v55 = vcombine.low %v998_v40, %v1002_v43  ;;  %v14972_v56 = vcombine.low %v1253_v44, %v1257_v21  ;;  %v14981_v59 = vcombine.high %v1261_v54, %v1265_v35  ;;  %v1046_v40 = vld [vmem:[%s22314_s1 + $0x1e18] sm:$0xff]  ;;  %v1301_v44 = vld [vmem:[%s22314_s1 + $0x2610] sm:$0xff] }
 0x4f9   :  { %10679 = vmatprep.subr.bf16.mxu0 %v14933_v27  ;;  %v1050_v43 = vld [vmem:[%s22314_s1 + $0x1e38] sm:$0xff]  ;;  %v1305_v21 = vld [vmem:[%s22314_s1 + $0x2630] sm:$0xff] }
 0x4fb   :  { %11090 = vmatpush1.bf16.msra.mxu1 %v14678_v50 }
 0x4fc   :  { %10680 = vmatpush1.bf16.msra.mxu0 %v14932_v57  ;;  %11091 = vmatprep.subr.bf16.mxu1 %v14687_v1  ;;  %v14980_v57 = vcombine.low %v1261_v54, %v1265_v35  ;;  %v14735_v1 = vcombine.high %v1014_v62, %v1018_v63  ;;  %v1309_v54 = vld [vmem:[%s22314_s1 + $0x2650] sm:$0xff] }
 0x4fd   :  { %10681 = vmatprep.subr.bf16.mxu0 %v14941_v53  ;;  %v1313_v35 = vld [vmem:[%s22314_s1 + $0x2670] sm:$0xff] }
 0x4ff   :  { %11092 = vmatpush1.bf16.msra.mxu1 %v14686_v4  ;;  %v14734_v4 = vcombine.low %v1014_v62, %v1018_v63  ;;  %v1062_v62 = vld [vmem:[%s22314_s1 + $0x1e98] sm:$0xff] }
 0x500   :  { %10682 = vmatpush1.bf16.msra.mxu0 %v14940_v2  ;;  %11093 = vmatprep.subr.bf16.mxu1 %v14695_v58  ;;  %v14743_v58 = vcombine.high %v1022_v41, %v1026_v13  ;;  %v1066_v63 = vld [vmem:[%s22314_s1 + $0x1eb8] sm:$0xff] }
 0x501   :  { %10683 = vmatprep.subr.bf16.mxu0 %v14949_v7  ;;  %v14997_v7 = vcombine.high %v1277_v16, %v1281_v3 }
 0x503   :  { %11094 = vmatpush1.bf16.msra.mxu1 %v14694_v20  ;;  %v14742_v20 = vcombine.low %v1022_v41, %v1026_v13  ;;  %v1070_v41 = vld [vmem:[%s22314_s1 + $0x1ed8] sm:$0xff] }
 0x504   :  { %10684 = vmatpush1.bf16.msra.mxu0 %v14948_v6  ;;  %11104 = vmatprep.subr.bf16.mxu1 %v14703_v18  ;;  %v14996_v6 = vcombine.low %v1277_v16, %v1281_v3  ;;  %v14751_v18 = vcombine.high %v1030_v8, %v1034_v14  ;;  %v1074_v13 = vld [vmem:[%s22314_s1 + $0x1ef8] sm:$0xff]  ;;  %v1325_v16 = vld [vmem:[%s22314_s1 + $0x26d0] sm:$0xff] }
 0x505   :  { %10694 = vmatprep.subr.bf16.mxu0 %v14957_v61  ;;  %v15005_v61 = vcombine.high %v1285_v15, %v1289_v60  ;;  %v1329_v3 = vld [vmem:[%s22314_s1 + $0x26f0] sm:$0xff] }
 0x506   :  { %11096 = vmatmul.mubr.bf16.vlgmr.msra.gmra.mrb[8].mxu1 %v17688_v31  ;;  %v1006_v31 = vld [vmem:[%s22314_s1 + $0x1cd8] sm:$0xff] }
 0x507   :  { %10686 = vmatmul.mubr.bf16.vlgmr.msra.gmra.mrb[4].mxu0 %v18100_v10  ;;  %11105 = vmatpush1.bf16.msra.mxu1 %v14702_v32  ;;  %v14727_v27 = vcombine.high %v1006_v31, %v1010_v52  ;;  %v14726_v50 = vcombine.low %v1006_v31, %v1010_v52  ;;  %v14750_v32 = vcombine.low %v1030_v8, %v1034_v14  ;;  %v1054_v31 = vld [vmem:[%s22314_s1 + $0x1e58] sm:$0xff] }
 0x508   :  { %10695 = vmatpush1.bf16.msra.mxu0 %v14956_v33  ;;  %11106 = vmatprep.subr.bf16.mxu1 %v14711_v34  ;;  %v15004_v33 = vcombine.low %v1285_v15, %v1289_v60  ;;  %v14759_v34 = vcombine.high %v1038_v22, %v1042_v23  ;;  %v1058_v52 = vld [vmem:[%s22314_s1 + $0x1e78] sm:$0xff]  ;;  %v1333_v15 = vld [vmem:[%s22314_s1 + $0x2710] sm:$0xff] }
 0x509   :  { %10696 = vmatprep.subr.bf16.mxu0 %v14965_v36  ;;  %10726 = vmatprep.mubr.bf16.mxu0 %v18108_v19  ;;  %v15013_v36 = vcombine.high %v1293_v26, %v1297_v28  ;;  %v1078_v8 = vld [vmem:[%s22314_s1 + $0x1f18] sm:$0xff]  ;;  %v1337_v60 = vld [vmem:[%s22314_s1 + $0x2730] sm:$0xff] }
 0x50a   :  { %11136 = vmatprep.mubr.bf16.mxu1 %v17696_v38  ;;  %v1269_v38 = vld [vmem:[%s22314_s1 + $0x2510] sm:$0xff]  ;;  %v1082_v14 = vld [vmem:[%s22314_s1 + $0x1f38] sm:$0xff] }
 0x50b   :  { %11107 = vmatpush1.bf16.msra.mxu1 %v14710_v47  ;;  %v14989_v53 = vcombine.high %v1269_v38, %v1273_v0  ;;  %v14988_v2 = vcombine.low %v1269_v38, %v1273_v0  ;;  %v14758_v47 = vcombine.low %v1038_v22, %v1042_v23  ;;  %v1317_v38 = vld [vmem:[%s22314_s1 + $0x2690] sm:$0xff]  ;;  %v1086_v22 = vld [vmem:[%s22314_s1 + $0x1f58] sm:$0xff] }
 0x50c   :  { %10697 = vmatpush1.bf16.msra.mxu0 %v14964_v48  ;;  %11108 = vmatprep.subr.bf16.mxu1 %v14719_v49  ;;  %v15012_v48 = vcombine.low %v1293_v26, %v1297_v28  ;;  %v14767_v49 = vcombine.high %v1046_v40, %v1050_v43  ;;  %v1321_v0 = vld [vmem:[%s22314_s1 + $0x26b0] sm:$0xff]  ;;  %v1090_v23 = vld [vmem:[%s22314_s1 + $0x1f78] sm:$0xff] }
 0x50d   :  { %10698 = vmatprep.subr.bf16.mxu0 %v14973_v51  ;;  %v15021_v51 = vcombine.high %v1301_v44, %v1305_v21  ;;  %v1341_v26 = vld [vmem:[%s22314_s1 + $0x2750] sm:$0xff] }
 0x50e   :  { %v1345_v28 = vld [vmem:[%s22314_s1 + $0x2770] sm:$0xff] }
 0x50f   :  { %11109 = vmatpush1.bf16.msra.mxu1 %v14718_v55  ;;  %v14766_v55 = vcombine.low %v1046_v40, %v1050_v43  ;;  %v1094_v40 = vld [vmem:[%s22314_s1 + $0x1f98] sm:$0xff] }
 0x510   :  { %10699 = vmatpush1.bf16.msra.mxu0 %v14972_v56  ;;  %11110 = vmatprep.subr.bf16.mxu1 %v14727_v27  ;;  %v15020_v56 = vcombine.low %v1301_v44, %v1305_v21  ;;  %v14775_v27 = vcombine.high %v1054_v31, %v1058_v52  ;;  %v1098_v43 = vld [vmem:[%s22314_s1 + $0x1fb8] sm:$0xff]  ;;  %v1349_v44 = vld [vmem:[%s22314_s1 + $0x2790] sm:$0xff] }
 0x511   :  { %10700 = vmatprep.subr.bf16.mxu0 %v14981_v59  ;;  %v15029_v59 = vcombine.high %v1309_v54, %v1313_v35  ;;  %v1353_v21 = vld [vmem:[%s22314_s1 + $0x27b0] sm:$0xff] }
 0x513   :  { %11111 = vmatpush1.bf16.msra.mxu1 %v14726_v50  ;;  %v14774_v50 = vcombine.low %v1054_v31, %v1058_v52  ;;  %v1102_v31 = vld [vmem:[%s22314_s1 + $0x1fd8] sm:$0xff] }
 0x514   :  { %10701 = vmatpush1.bf16.msra.mxu0 %v14980_v57  ;;  %11112 = vmatprep.subr.bf16.mxu1 %v14735_v1  ;;  %v15028_v57 = vcombine.low %v1309_v54, %v1313_v35  ;;  %v14783_v1 = vcombine.high %v1062_v62, %v1066_v63  ;;  %v1106_v52 = vld [vmem:[%s22314_s1 + $0x1ff8] sm:$0xff]  ;;  %v1357_v54 = vld [vmem:[%s22314_s1 + $0x27d0] sm:$0xff] }
 0x515   :  { %10702 = vmatprep.subr.bf16.mxu0 %v14989_v53  ;;  %v15037_v53 = vcombine.high %v1317_v38, %v1321_v0  ;;  %v1361_v35 = vld [vmem:[%s22314_s1 + $0x27f0] sm:$0xff] }
 0x517   :  { %11113 = vmatpush1.bf16.msra.mxu1 %v14734_v4  ;;  %v14782_v4 = vcombine.low %v1062_v62, %v1066_v63  ;;  %v1110_v62 = vld [vmem:[%s22314_s1 + $0x2018] sm:$0xff] }
 0x518   :  { %10703 = vmatpush1.bf16.msra.mxu0 %v14988_v2  ;;  %11114 = vmatprep.subr.bf16.mxu1 %v14743_v58  ;;  %v15036_v2 = vcombine.low %v1317_v38, %v1321_v0  ;;  %v14791_v58 = vcombine.high %v1070_v41, %v1074_v13  ;;  %v1114_v63 = vld [vmem:[%s22314_s1 + $0x2038] sm:$0xff]  ;;  %v1365_v38 = vld [vmem:[%s22314_s1 + $0x2810] sm:$0xff] }
 0x519   :  { %10704 = vmatprep.subr.bf16.mxu0 %v14997_v7  ;;  %v15045_v7 = vcombine.high %v1325_v16, %v1329_v3  ;;  %v1369_v0 = vld [vmem:[%s22314_s1 + $0x2830] sm:$0xff] }
 0x51b   :  { %11115 = vmatpush1.bf16.msra.mxu1 %v14742_v20  ;;  %v14790_v20 = vcombine.low %v1070_v41, %v1074_v13  ;;  %v1118_v41 = vld [vmem:[%s22314_s1 + $0x2058] sm:$0xff] }
 0x51c   :  { %10705 = vmatpush1.bf16.msra.mxu0 %v14996_v6  ;;  %11116 = vmatprep.subr.bf16.mxu1 %v14751_v18  ;;  %v15044_v6 = vcombine.low %v1325_v16, %v1329_v3  ;;  %v14799_v18 = vcombine.high %v1078_v8, %v1082_v14  ;;  %v1122_v13 = vld [vmem:[%s22314_s1 + $0x2078] sm:$0xff]  ;;  %v1373_v16 = vld [vmem:[%s22314_s1 + $0x2850] sm:$0xff] }
 0x51d   :  { %10706 = vmatprep.subr.bf16.mxu0 %v15005_v61  ;;  %v15053_v61 = vcombine.high %v1333_v15, %v1337_v60  ;;  %v1377_v3 = vld [vmem:[%s22314_s1 + $0x2870] sm:$0xff] }
 0x51f   :  { %11117 = vmatpush1.bf16.msra.mxu1 %v14750_v32  ;;  %v14798_v32 = vcombine.low %v1078_v8, %v1082_v14  ;;  %v1126_v8 = vld [vmem:[%s22314_s1 + $0x2098] sm:$0xff]  ;;  %v15093_v14 = vcombine.high %v1373_v16, %v1377_v3 }
 0x520   :  { %10707 = vmatpush1.bf16.msra.mxu0 %v15004_v33  ;;  %11118 = vmatprep.subr.bf16.mxu1 %v14759_v34  ;;  %v15052_v33 = vcombine.low %v1333_v15, %v1337_v60  ;;  %v14807_v34 = vcombine.high %v1086_v22, %v1090_v23  ;;  %v1130_v15 = vld [vmem:[%s22314_s1 + $0x20b8] sm:$0xff]  ;;  %v1385_v60 = vld [vmem:[%s22314_s1 + $0x28b0] sm:$0xff] }
 0x521   :  { %10708 = vmatprep.subr.bf16.mxu0 %v15013_v36  ;;  %v15061_v36 = vcombine.high %v1341_v26, %v1345_v28 }
 0x523   :  { %11119 = vmatpush1.bf16.msra.mxu1 %v14758_v47  ;;  %v14806_v47 = vcombine.low %v1086_v22, %v1090_v23  ;;  %v1134_v23 = vld [vmem:[%s22314_s1 + $0x20d8] sm:$0xff] }
 0x524   :  { %10709 = vmatpush1.bf16.msra.mxu0 %v15012_v48  ;;  %11120 = vmatprep.subr.bf16.mxu1 %v14767_v49  ;;  %v15060_v48 = vcombine.low %v1341_v26, %v1345_v28  ;;  %v14815_v49 = vcombine.high %v1094_v40, %v1098_v43  ;;  %v1138_v26 = vld [vmem:[%s22314_s1 + $0x20f8] sm:$0xff]  ;;  %v14846_v28 = vcombine.low %v1126_v8, %v1130_v15 }
 0x525   :  { %10710 = vmatprep.subr.bf16.mxu0 %v15021_v51  ;;  %v15069_v51 = vcombine.high %v1349_v44, %v1353_v21 }
 0x527   :  { %11121 = vmatpush1.bf16.msra.mxu1 %v14766_v55  ;;  %v14814_v55 = vcombine.low %v1094_v40, %v1098_v43  ;;  %v1142_v40 = vld [vmem:[%s22314_s1 + $0x2118] sm:$0xff] }
 0x528   :  { %10711 = vmatpush1.bf16.msra.mxu0 %v15020_v56  ;;  %11122 = vmatprep.subr.bf16.mxu1 %v14775_v27  ;;  %v15068_v56 = vcombine.low %v1349_v44, %v1353_v21  ;;  %v14823_v27 = vcombine.high %v1102_v31, %v1106_v52  ;;  %v1146_v43 = vld [vmem:[%s22314_s1 + $0x2138] sm:$0xff]  ;;  %v14854_v44 = vcombine.low %v1134_v23, %v1138_v26 }
 0x529   :  { %10712 = vmatprep.subr.bf16.mxu0 %v15029_v59  ;;  %v15077_v59 = vcombine.high %v1357_v54, %v1361_v35 }
 0x52b   :  { %11123 = vmatpush1.bf16.msra.mxu1 %v14774_v50  ;;  %v14822_v50 = vcombine.low %v1102_v31, %v1106_v52  ;;  %v1154_v52 = vld [vmem:[%s22314_s1 + $0x2178] sm:$0xff] }
 0x52c   :  { %10713 = vmatpush1.bf16.msra.mxu0 %v15028_v57  ;;  %11124 = vmatprep.subr.bf16.mxu1 %v14783_v1  ;;  %v15076_v57 = vcombine.low %v1357_v54, %v1361_v35  ;;  %v14831_v1 = vcombine.high %v1110_v62, %v1114_v63  ;;  %v14862_v54 = vcombine.low %v1142_v40, %v1146_v43 }
 0x52d   :  { %10714 = vmatprep.subr.bf16.mxu0 %v15037_v53  ;;  %v15085_v53 = vcombine.high %v1365_v38, %v1369_v0 }
 0x52f   :  { %11125 = vmatpush1.bf16.msra.mxu1 %v14782_v4  ;;  %v14830_v4 = vcombine.low %v1110_v62, %v1114_v63  ;;  %v1162_v63 = vld [vmem:[%s22314_s1 + $0x21b8] sm:$0xff] }
 0x530   :  { %10715 = vmatpush1.bf16.msra.mxu0 %v15036_v2  ;;  %11126 = vmatprep.subr.bf16.mxu1 %v14791_v58  ;;  %v15084_v2 = vcombine.low %v1365_v38, %v1369_v0  ;;  %v14839_v58 = vcombine.high %v1118_v41, %v1122_v13 }
 0x531   :  { %10716 = vmatprep.subr.bf16.mxu0 %v15045_v7  ;;  %v1381_v7 = vld [vmem:[%s22314_s1 + $0x2890] sm:$0xff] }
 0x532   :  { %v15101_v22 = vcombine.high %v1381_v7, %v1385_v60 }
 0x533   :  { %11127 = vmatpush1.bf16.msra.mxu1 %v14790_v20  ;;  %v14838_v20 = vcombine.low %v1118_v41, %v1122_v13  ;;  %v1170_v13 = vld [vmem:[%s22314_s1 + $0x21f8] sm:$0xff] }
 0x534   :  { %10717 = vmatpush1.bf16.msra.mxu0 %v15044_v6  ;;  %11128 = vmatprep.subr.bf16.mxu1 %v14799_v18  ;;  %v15092_v6 = vcombine.low %v1373_v16, %v1377_v3  ;;  %v14847_v18 = vcombine.high %v1126_v8, %v1130_v15 }
 0x535   :  { %10718 = vmatprep.subr.bf16.mxu0 %v15053_v61  ;;  %v1389_v61 = vld [vmem:[%s22314_s1 + $0x28d0] sm:$0xff] }
 0x537   :  { %11129 = vmatpush1.bf16.msra.mxu1 %v14798_v32  ;;  %v15100_v32 = vcombine.low %v1381_v7, %v1385_v60  ;;  %v1174_v7 = vld [vmem:[%s22314_s1 + $0x2218] sm:$0xff] }
 0x538   :  { %10719 = vmatpush1.bf16.msra.mxu0 %v15052_v33  ;;  %11130 = vmatprep.subr.bf16.mxu1 %v14807_v34  ;;  %v14855_v33 = vcombine.high %v1134_v23, %v1138_v26  ;;  %v1397_v34 = vld [vmem:[%s22314_s1 + $0x2910] sm:$0xff] }
 0x539   :  { %10720 = vmatprep.subr.bf16.mxu0 %v15061_v36  ;;  %v1401_v36 = vld [vmem:[%s22314_s1 + $0x2930] sm:$0xff] }
 0x53a   :  { %v15117_v31 = vcombine.high %v1397_v34, %v1401_v36  ;;  %v15116_v35 = vcombine.low %v1397_v34, %v1401_v36  ;;  %v1190_v34 = vld [vmem:[%s22314_s1 + $0x2298] sm:$0xff] }
 0x53b   :  { %11131 = vmatpush1.bf16.msra.mxu1 %v14806_v47  ;;  %v14863_v47 = vcombine.high %v1142_v40, %v1146_v43  ;;  %v1194_v40 = vld [vmem:[%s22314_s1 + $0x22b8] sm:$0xff] }
 0x53c   :  { %10721 = vmatpush1.bf16.msra.mxu0 %v15060_v48  ;;  %11132 = vmatprep.subr.bf16.mxu1 %v14815_v49  ;;  %v1405_v48 = vld [vmem:[%s22314_s1 + $0x2950] sm:$0xff] }
 0x53d   :  { %10722 = vmatprep.subr.bf16.mxu0 %v15069_v51  ;;  %v1409_v49 = vld [vmem:[%s22314_s1 + $0x2970] sm:$0xff]  ;;  %v1150_v51 = vld [vmem:[%s22314_s1 + $0x2158] sm:$0xff] }
 0x53e   :  { %v15125_v62 = vcombine.high %v1405_v48, %v1409_v49  ;;  %v14870_v38 = vcombine.low %v1150_v51, %v1154_v52  ;;  %v15124_v0 = vcombine.low %v1405_v48, %v1409_v49  ;;  %v1198_v48 = vld [vmem:[%s22314_s1 + $0x22d8] sm:$0xff] }
 0x53f   :  { %11133 = vmatpush1.bf16.msra.mxu1 %v14814_v55  ;;  %v14871_v55 = vcombine.high %v1150_v51, %v1154_v52  ;;  %v1202_v51 = vld [vmem:[%s22314_s1 + $0x22f8] sm:$0xff] }
 0x540   :  { %10723 = vmatpush1.bf16.msra.mxu0 %v15068_v56  ;;  %11134 = vmatprep.subr.bf16.mxu1 %v14823_v27  ;;  %v1413_v56 = vld [vmem:[%s22314_s1 + $0x2990] sm:$0xff] }
 0x541   :  { %10724 = vmatprep.subr.bf16.mxu0 %v15077_v59  ;;  %v1417_v27 = vld [vmem:[%s22314_s1 + $0x29b0] sm:$0xff]  ;;  %v1158_v59 = vld [vmem:[%s22314_s1 + $0x2198] sm:$0xff] }
 0x542   :  { %v15133_v41 = vcombine.high %v1413_v56, %v1417_v27  ;;  %v14878_v16 = vcombine.low %v1158_v59, %v1162_v63  ;;  %v15132_v3 = vcombine.low %v1413_v56, %v1417_v27  ;;  %v1206_v56 = vld [vmem:[%s22314_s1 + $0x2318] sm:$0xff] }
 0x543   :  { %11135 = vmatpush1.bf16.msra.mxu1 %v14822_v50  ;;  %v14879_v50 = vcombine.high %v1158_v59, %v1162_v63  ;;  %v1210_v59 = vld [vmem:[%s22314_s1 + $0x2338] sm:$0xff] }
 0x544   :  { %10725 = vmatpush1.bf16.msra.mxu0 %v15076_v57  ;;  %11145 = vmatprep.subr.bf16.mxu1 %v14831_v1  ;;  %v1421_v57 = vld [vmem:[%s22314_s1 + $0x29d0] sm:$0xff] }
 0x545   :  { %10735 = vmatprep.subr.bf16.mxu0 %v15085_v53  ;;  %v1425_v1 = vld [vmem:[%s22314_s1 + $0x29f0] sm:$0xff]  ;;  %v1166_v53 = vld [vmem:[%s22314_s1 + $0x21d8] sm:$0xff] }
 0x546   :  { %11137 = vmatmul.mubr.bf16.vlgmr.msra.gmra.mrb[8].mxu1 %v17894_v17  ;;  %v1393_v17 = vld [vmem:[%s22314_s1 + $0x28f0] sm:$0xff]  ;;  %v15141_v8 = vcombine.high %v1421_v57, %v1425_v1  ;;  %v14886_v15 = vcombine.low %v1166_v53, %v1170_v13  ;;  %v15140_v60 = vcombine.low %v1421_v57, %v1425_v1  ;;  %v1214_v57 = vld [vmem:[%s22314_s1 + $0x2358] sm:$0xff] }
 0x547   :  { %10727 = vmatmul.mubr.bf16.vlgmr.msra.gmra.mrb[4].mxu0 %v18306_v12  ;;  %11146 = vmatpush1.bf16.msra.mxu1 %v14830_v4  ;;  %v15108_v21 = vcombine.low %v1389_v61, %v1393_v17  ;;  %v14887_v4 = vcombine.high %v1166_v53, %v1170_v13  ;;  %v1218_v53 = vld [vmem:[%s22314_s1 + $0x2378] sm:$0xff] }
 0x548   :  { %10736 = vmatpush1.bf16.msra.mxu0 %v15084_v2  ;;  %11147 = vmatprep.subr.bf16.mxu1 %v14839_v58  ;;  %v1429_v2 = vld [vmem:[%s22314_s1 + $0x2a10] sm:$0xff] }
 0x549   :  { %10737 = vmatprep.subr.bf16.mxu0 %v15093_v14  ;;  %10767 = vmatprep.mubr.bf16.mxu0 %v18314_v24  ;;  %v1433_v58 = vld [vmem:[%s22314_s1 + $0x2a30] sm:$0xff]  ;;  %v1178_v14 = vld [vmem:[%s22314_s1 + $0x2238] sm:$0xff] }
 0x54a   :  { %11177 = vmatprep.mubr.bf16.mxu1 %v17902_v25  ;;  %v15109_v25 = vcombine.high %v1389_v61, %v1393_v17  ;;  %v1182_v61 = vld [vmem:[%s22314_s1 + $0x2258] sm:$0xff]  ;;  %v15149_v17 = vcombine.high %v1429_v2, %v1433_v58  ;;  %v14894_v23 = vcombine.low %v1174_v7, %v1178_v14  ;;  %v15148_v26 = vcombine.low %v1429_v2, %v1433_v58 }
 0x54b   :  { %11148 = vmatpush1.bf16.msra.mxu1 %v14838_v20  ;;  %v14895_v20 = vcombine.high %v1174_v7, %v1178_v14  ;;  %v1222_v2 = vld [vmem:[%s22314_s1 + $0x2398] sm:$0xff] }
 0x54c   :  { %10738 = vmatpush1.bf16.msra.mxu0 %v15092_v6  ;;  %11149 = vmatprep.subr.bf16.mxu1 %v14847_v18  ;;  %v1437_v6 = vld [vmem:[%s22314_s1 + $0x2a50] sm:$0xff]  ;;  %v1226_v7 = vld [vmem:[%s22314_s1 + $0x23b8] sm:$0xff] }
 0x54d   :  { %10739 = vmatprep.subr.bf16.mxu0 %v15101_v22  ;;  %v1441_v18 = vld [vmem:[%s22314_s1 + $0x2a70] sm:$0xff]  ;;  %v1186_v22 = vld [vmem:[%s22314_s1 + $0x2278] sm:$0xff] }
 0x54e   :  { %v15157_v36 = vcombine.high %v1437_v6, %v1441_v18  ;;  %v15156_v43 = vcombine.low %v1437_v6, %v1441_v18  ;;  %v1230_v6 = vld [vmem:[%s22314_s1 + $0x23d8] sm:$0xff] }
 0x54f   :  { %11150 = vmatpush1.bf16.msra.mxu1 %v14846_v28  ;;  %v14903_v28 = vcombine.high %v1182_v61, %v1186_v22 }
 0x550   :  { %10740 = vmatpush1.bf16.msra.mxu0 %v15100_v32  ;;  %11151 = vmatprep.subr.bf16.mxu1 %v14855_v33  ;;  %v1445_v32 = vld [vmem:[%s22314_s1 + $0x2a90] sm:$0xff] }
 0x551   :  { %10741 = vmatprep.subr.bf16.mxu0 %v15109_v25  ;;  %v1449_v33 = vld [vmem:[%s22314_s1 + $0x2ab0] sm:$0xff]  ;;  %v14902_v25 = vcombine.low %v1182_v61, %v1186_v22  ;;  %v1234_v61 = vld [vmem:[%s22314_s1 + $0x23f8] sm:$0xff] }
 0x552   :  { %v15165_v49 = vcombine.high %v1445_v32, %v1449_v33  ;;  %v15164_v52 = vcombine.low %v1445_v32, %v1449_v33  ;;  %v1238_v32 = vld [vmem:[%s22314_s1 + $0x2418] sm:$0xff] }
 0x553   :  { %11152 = vmatpush1.bf16.msra.mxu1 %v14854_v44  ;;  %v14911_v44 = vcombine.high %v1190_v34, %v1194_v40 }
 0x554   :  { %10742 = vmatpush1.bf16.msra.mxu0 %v15108_v21  ;;  %11153 = vmatprep.subr.bf16.mxu1 %v14863_v47  ;;  %v1453_v21 = vld [vmem:[%s22314_s1 + $0x2ad0] sm:$0xff] }
 0x555   :  { %10743 = vmatprep.subr.bf16.mxu0 %v15117_v31  ;;  %v1457_v47 = vld [vmem:[%s22314_s1 + $0x2af0] sm:$0xff]  ;;  %v14910_v31 = vcombine.low %v1190_v34, %v1194_v40  ;;  %v1242_v34 = vld [vmem:[%s22314_s1 + $0x2438] sm:$0xff] }
 0x556   :  { %v15173_v27 = vcombine.high %v1453_v21, %v1457_v47  ;;  %v15172_v63 = vcombine.low %v1453_v21, %v1457_v47  ;;  %v1246_v21 = vld [vmem:[%s22314_s1 + $0x2458] sm:$0xff] }
 0x557   :  { %11154 = vmatpush1.bf16.msra.mxu1 %v14862_v54  ;;  %v14919_v54 = vcombine.high %v1198_v48, %v1202_v51 }
 0x558   :  { %10744 = vmatpush1.bf16.msra.mxu0 %v15116_v35  ;;  %11155 = vmatprep.subr.bf16.mxu1 %v14871_v55  ;;  %v1461_v35 = vld [vmem:[%s22314_s1 + $0x2b10] sm:$0xff] }
 0x559   :  { %10745 = vmatprep.subr.bf16.mxu0 %v15125_v62  ;;  %v1465_v55 = vld [vmem:[%s22314_s1 + $0x2b30] sm:$0xff]  ;;  %v14918_v62 = vcombine.low %v1198_v48, %v1202_v51  ;;  %v1250_v48 = vld [vmem:[%s22314_s1 + $0x2478] sm:$0xff] }
 0x55a   :  { %v15181_v1 = vcombine.high %v1461_v35, %v1465_v55  ;;  %v15180_v13 = vcombine.low %v1461_v35, %v1465_v55  ;;  %v1258_v55 = vld [vmem:[%s22314_s1 + $0x24b8] sm:$0xff] }
 0x55b   :  { %11156 = vmatpush1.bf16.msra.mxu1 %v14870_v38  ;;  %v14927_v38 = vcombine.high %v1206_v56, %v1210_v59 }
 0x55c   :  { %10746 = vmatpush1.bf16.msra.mxu0 %v15124_v0  ;;  %11157 = vmatprep.subr.bf16.mxu1 %v14879_v50  ;;  %v1469_v0 = vld [vmem:[%s22314_s1 + $0x2b50] sm:$0xff] }
 0x55d   :  { %10747 = vmatprep.subr.bf16.mxu0 %v15133_v41  ;;  %v1473_v50 = vld [vmem:[%s22314_s1 + $0x2b70] sm:$0xff]  ;;  %v14926_v41 = vcombine.low %v1206_v56, %v1210_v59 }
 0x55e   :  { %v15189_v58 = vcombine.high %v1469_v0, %v1473_v50  ;;  %v15188_v14 = vcombine.low %v1469_v0, %v1473_v50  ;;  %v1513_v56 = vld [vmem:[%s22314_s1 + $0x2cb0] sm:$0xff]  ;;  %v1262_v0 = vld [vmem:[%s22314_s1 + $0x24d8] sm:$0xff] }
 0x55f   :  { %11158 = vmatpush1.bf16.msra.mxu1 %v14878_v16  ;;  %v14935_v16 = vcombine.high %v1214_v57, %v1218_v53  ;;  %v1266_v50 = vld [vmem:[%s22314_s1 + $0x24f8] sm:$0xff] }
 0x560   :  { %10748 = vmatpush1.bf16.msra.mxu0 %v15132_v3  ;;  %11159 = vmatprep.subr.bf16.mxu1 %v14887_v4  ;;  %v1477_v3 = vld [vmem:[%s22314_s1 + $0x2b90] sm:$0xff] }
 0x561   :  { %10749 = vmatprep.subr.bf16.mxu0 %v15141_v8  ;;  %v1481_v4 = vld [vmem:[%s22314_s1 + $0x2bb0] sm:$0xff]  ;;  %v14934_v8 = vcombine.low %v1214_v57, %v1218_v53  ;;  %v14983_v53 = vcombine.high %v1262_v0, %v1266_v50 }
 0x562   :  { %v15197_v18 = vcombine.high %v1477_v3, %v1481_v4  ;;  %v15196_v22 = vcombine.low %v1477_v3, %v1481_v4  ;;  %v1274_v3 = vld [vmem:[%s22314_s1 + $0x2538] sm:$0xff]  ;;  %v14982_v4 = vcombine.low %v1262_v0, %v1266_v50  ;;  %v1573_v50 = vld [vmem:[%s22314_s1 + $0x2e90] sm:$0xff] }
 0x563   :  { %11160 = vmatpush1.bf16.msra.mxu1 %v14886_v15  ;;  %v14943_v15 = vcombine.high %v1222_v2, %v1226_v7 }
 0x564   :  { %10750 = vmatpush1.bf16.msra.mxu0 %v15140_v60  ;;  %11161 = vmatprep.subr.bf16.mxu1 %v14895_v20  ;;  %v1485_v60 = vld [vmem:[%s22314_s1 + $0x2bd0] sm:$0xff] }
 0x565   :  { %10751 = vmatprep.subr.bf16.mxu0 %v15149_v17  ;;  %v1489_v20 = vld [vmem:[%s22314_s1 + $0x2bf0] sm:$0xff]  ;;  %v14942_v17 = vcombine.low %v1222_v2, %v1226_v7 }
 0x566   :  { %v15205_v33 = vcombine.high %v1485_v60, %v1489_v20  ;;  %v15204_v40 = vcombine.low %v1485_v60, %v1489_v20  ;;  %v1533_v7 = vld [vmem:[%s22314_s1 + $0x2d50] sm:$0xff]  ;;  %v1282_v60 = vld [vmem:[%s22314_s1 + $0x2578] sm:$0xff] }
 0x567   :  { %11162 = vmatpush1.bf16.msra.mxu1 %v14894_v23  ;;  %v14951_v23 = vcombine.high %v1230_v6, %v1234_v61 }
 0x568   :  { %10752 = vmatpush1.bf16.msra.mxu0 %v15148_v26  ;;  %11163 = vmatprep.subr.bf16.mxu1 %v14903_v28  ;;  %v1493_v26 = vld [vmem:[%s22314_s1 + $0x2c10] sm:$0xff] }
 0x569   :  { %10753 = vmatprep.subr.bf16.mxu0 %v15157_v36  ;;  %v1497_v28 = vld [vmem:[%s22314_s1 + $0x2c30] sm:$0xff]  ;;  %v14950_v36 = vcombine.low %v1230_v6, %v1234_v61 }
 0x56a   :  { %v15213_v47 = vcombine.high %v1493_v26, %v1497_v28  ;;  %v15212_v51 = vcombine.low %v1493_v26, %v1497_v28  ;;  %v1541_v61 = vld [vmem:[%s22314_s1 + $0x2d90] sm:$0xff]  ;;  %v1290_v26 = vld [vmem:[%s22314_s1 + $0x25b8] sm:$0xff] }
 0x56b   :  { %11164 = vmatpush1.bf16.msra.mxu1 %v14902_v25  ;;  %v14959_v25 = vcombine.high %v1238_v32, %v1242_v34 }
 0x56c   :  { %10754 = vmatpush1.bf16.msra.mxu0 %v15156_v43  ;;  %11165 = vmatprep.subr.bf16.mxu1 %v14911_v44  ;;  %v1501_v43 = vld [vmem:[%s22314_s1 + $0x2c50] sm:$0xff] }
 0x56d   :  { %10755 = vmatprep.subr.bf16.mxu0 %v15165_v49  ;;  %v1505_v44 = vld [vmem:[%s22314_s1 + $0x2c70] sm:$0xff]  ;;  %v14958_v49 = vcombine.low %v1238_v32, %v1242_v34 }
 0x56e   :  { %v15221_v35 = vcombine.high %v1501_v43, %v1505_v44  ;;  %v15220_v59 = vcombine.low %v1501_v43, %v1505_v44  ;;  %v1549_v34 = vld [vmem:[%s22314_s1 + $0x2dd0] sm:$0xff]  ;;  %v1298_v43 = vld [vmem:[%s22314_s1 + $0x25f8] sm:$0xff] }
 0x56f   :  { %11166 = vmatpush1.bf16.msra.mxu1 %v14910_v31  ;;  %v14967_v31 = vcombine.high %v1246_v21, %v1250_v48 }
 0x570   :  { %10756 = vmatpush1.bf16.msra.mxu0 %v15164_v52  ;;  %11167 = vmatprep.subr.bf16.mxu1 %v14919_v54  ;;  %v1509_v52 = vld [vmem:[%s22314_s1 + $0x2c90] sm:$0xff]  ;;  %v1254_v54 = vld [vmem:[%s22314_s1 + $0x2498] sm:$0xff] }
 0x571   :  { %10757 = vmatprep.subr.bf16.mxu0 %v15173_v27  ;;  %v14966_v27 = vcombine.low %v1246_v21, %v1250_v48  ;;  %v14974_v57 = vcombine.low %v1254_v54, %v1258_v55  ;;  %v1557_v48 = vld [vmem:[%s22314_s1 + $0x2e10] sm:$0xff] }
 0x573   :  { %11168 = vmatpush1.bf16.msra.mxu1 %v14918_v62  ;;  %v14975_v62 = vcombine.high %v1254_v54, %v1258_v55 }
 0x574   :  { %10758 = vmatpush1.bf16.msra.mxu0 %v15172_v63  ;;  %11169 = vmatprep.subr.bf16.mxu1 %v14927_v38  ;;  %v1517_v63 = vld [vmem:[%s22314_s1 + $0x2cd0] sm:$0xff]  ;;  %v15229_v38 = vcombine.high %v1509_v52, %v1513_v56 }
 0x575   :  { %10759 = vmatprep.subr.bf16.mxu0 %v15181_v1  ;;  %v15228_v1 = vcombine.low %v1509_v52, %v1513_v56  ;;  %v1306_v52 = vld [vmem:[%s22314_s1 + $0x2638] sm:$0xff]  ;;  %v1565_v56 = vld [vmem:[%s22314_s1 + $0x2e50] sm:$0xff] }
 0x577   :  { %11170 = vmatpush1.bf16.msra.mxu1 %v14926_v41  ;;  %v1525_v41 = vld [vmem:[%s22314_s1 + $0x2d10] sm:$0xff] }
 0x578   :  { %10760 = vmatpush1.bf16.msra.mxu0 %v15180_v13  ;;  %11171 = vmatprep.subr.bf16.mxu1 %v14935_v16  ;;  %v1529_v13 = vld [vmem:[%s22314_s1 + $0x2d30] sm:$0xff]  ;;  %v1270_v16 = vld [vmem:[%s22314_s1 + $0x2518] sm:$0xff] }
 0x579   :  { %10761 = vmatprep.subr.bf16.mxu0 %v15189_v58  ;;  %v14991_v58 = vcombine.high %v1270_v16, %v1274_v3  ;;  %v14990_v20 = vcombine.low %v1270_v16, %v1274_v3  ;;  %v15244_v6 = vcombine.low %v1525_v41, %v1529_v13  ;;  %v1581_v3 = vld [vmem:[%s22314_s1 + $0x2ed0] sm:$0xff] }
 0x57b   :  { %11172 = vmatpush1.bf16.msra.mxu1 %v14934_v8  ;;  %v1537_v8 = vld [vmem:[%s22314_s1 + $0x2d70] sm:$0xff] }
 0x57c   :  { %10762 = vmatpush1.bf16.msra.mxu0 %v15188_v14  ;;  %11173 = vmatprep.subr.bf16.mxu1 %v14943_v15  ;;  %v1278_v14 = vld [vmem:[%s22314_s1 + $0x2558] sm:$0xff]  ;;  %v15245_v15 = vcombine.high %v1525_v41, %v1529_v13  ;;  %v15252_v32 = vcombine.low %v1533_v7, %v1537_v8 }
 0x57d   :  { %10763 = vmatprep.subr.bf16.mxu0 %v15197_v18  ;;  %v14999_v18 = vcombine.high %v1278_v14, %v1282_v60  ;;  %v14998_v28 = vcombine.low %v1278_v14, %v1282_v60  ;;  %v1322_v41 = vld [vmem:[%s22314_s1 + $0x26b8] sm:$0xff]  ;;  %v1589_v60 = vld [vmem:[%s22314_s1 + $0x2f10] sm:$0xff] }
 0x57f   :  { %11174 = vmatpush1.bf16.msra.mxu1 %v14942_v17  ;;  %v1545_v17 = vld [vmem:[%s22314_s1 + $0x2db0] sm:$0xff] }
 0x580   :  { %10764 = vmatpush1.bf16.msra.mxu0 %v15196_v22  ;;  %11175 = vmatprep.subr.bf16.mxu1 %v14951_v23  ;;  %v1286_v22 = vld [vmem:[%s22314_s1 + $0x2598] sm:$0xff]  ;;  %v15253_v23 = vcombine.high %v1533_v7, %v1537_v8  ;;  %v15260_v21 = vcombine.low %v1541_v61, %v1545_v17 }
 0x581   :  { %10765 = vmatprep.subr.bf16.mxu0 %v15205_v33  ;;  %v15007_v33 = vcombine.high %v1286_v22, %v1290_v26  ;;  %v15006_v44 = vcombine.low %v1286_v22, %v1290_v26  ;;  %v1330_v7 = vld [vmem:[%s22314_s1 + $0x26f8] sm:$0xff]  ;;  %v1597_v26 = vld [vmem:[%s22314_s1 + $0x2f50] sm:$0xff] }
 0x583   :  { %11176 = vmatpush1.bf16.msra.mxu1 %v14950_v36  ;;  %v1553_v36 = vld [vmem:[%s22314_s1 + $0x2df0] sm:$0xff] }
 0x584   :  { %10766 = vmatpush1.bf16.msra.mxu0 %v15204_v40  ;;  %11186 = vmatprep.subr.bf16.mxu1 %v14959_v25  ;;  %v1294_v40 = vld [vmem:[%s22314_s1 + $0x25d8] sm:$0xff]  ;;  %v15261_v25 = vcombine.high %v1541_v61, %v1545_v17 }
 0x585   :  { %10776 = vmatprep.subr.bf16.mxu0 %v15213_v47  ;;  %v15015_v47 = vcombine.high %v1294_v40, %v1298_v43  ;;  %v15014_v54 = vcombine.low %v1294_v40, %v1298_v43  ;;  %v1338_v61 = vld [vmem:[%s22314_s1 + $0x2738] sm:$0xff]  ;;  %v1605_v43 = vld [vmem:[%s22314_s1 + $0x2f90] sm:$0xff] }
 0x586   :  { %11178 = vmatmul.mubr.bf16.vlgmr.msra.gmra.mrb[8].mxu1 %v18100_v10  ;;  %v1521_v10 = vld [vmem:[%s22314_s1 + $0x2cf0] sm:$0xff] }
 0x587   :  { %10768 = vmatmul.mubr.bf16.vlgmr.msra.gmra.mrb[4].mxu0 %v18512_v29  ;;  %11187 = vmatpush1.bf16.msra.mxu1 %v14958_v49  ;;  %v15236_v2 = vcombine.low %v1517_v63, %v1521_v10  ;;  %v1561_v49 = vld [vmem:[%s22314_s1 + $0x2e30] sm:$0xff] }
 0x588   :  { %10777 = vmatpush1.bf16.msra.mxu0 %v15212_v51  ;;  %11188 = vmatprep.subr.bf16.mxu1 %v14967_v31  ;;  %v1302_v51 = vld [vmem:[%s22314_s1 + $0x2618] sm:$0xff]  ;;  %v15269_v31 = vcombine.high %v1549_v34, %v1553_v36 }
 0x589   :  { %10778 = vmatprep.subr.bf16.mxu0 %v15221_v35  ;;  %10808 = vmatprep.mubr.bf16.mxu0 %v18520_v37  ;;  %v15268_v35 = vcombine.low %v1549_v34, %v1553_v36  ;;  %v15023_v55 = vcombine.high %v1302_v51, %v1306_v52  ;;  %v1346_v34 = vld [vmem:[%s22314_s1 + $0x2778] sm:$0xff] }
 0x58a   :  { %11218 = vmatprep.mubr.bf16.mxu1 %v18108_v19  ;;  %v15237_v19 = vcombine.high %v1517_v63, %v1521_v10  ;;  %v1314_v63 = vld [vmem:[%s22314_s1 + $0x2678] sm:$0xff]  ;;  %v15022_v10 = vcombine.low %v1302_v51, %v1306_v52  ;;  %v1613_v52 = vld [vmem:[%s22314_s1 + $0x2fd0] sm:$0xff] }
 0x58b   :  { %11189 = vmatpush1.bf16.msra.mxu1 %v14966_v27  ;;  %v1569_v27 = vld [vmem:[%s22314_s1 + $0x2e70] sm:$0xff] }
 0x58c   :  { %10779 = vmatpush1.bf16.msra.mxu0 %v15220_v59  ;;  %11190 = vmatprep.subr.bf16.mxu1 %v14975_v62  ;;  %v1310_v59 = vld [vmem:[%s22314_s1 + $0x2658] sm:$0xff]  ;;  %v15277_v62 = vcombine.high %v1557_v48, %v1561_v49  ;;  %v15284_v16 = vcombine.low %v1565_v56, %v1569_v27 }
 0x58d   :  { %10780 = vmatprep.subr.bf16.mxu0 %v15229_v38  ;;  %v15276_v38 = vcombine.low %v1557_v48, %v1561_v49  ;;  %v15031_v0 = vcombine.high %v1310_v59, %v1314_v63  ;;  %v15030_v13 = vcombine.low %v1310_v59, %v1314_v63  ;;  %v1354_v48 = vld [vmem:[%s22314_s1 + $0x27b8] sm:$0xff] }
 0x58e   :  { %v1366_v63 = vld [vmem:[%s22314_s1 + $0x2818] sm:$0xff] }
 0x58f   :  { %11191 = vmatpush1.bf16.msra.mxu1 %v14974_v57  ;;  %v1577_v57 = vld [vmem:[%s22314_s1 + $0x2eb0] sm:$0xff] }
 0x590   :  { %10781 = vmatpush1.bf16.msra.mxu0 %v15228_v1  ;;  %11192 = vmatprep.subr.bf16.mxu1 %v14983_v53  ;;  %v1318_v1 = vld [vmem:[%s22314_s1 + $0x2698] sm:$0xff]  ;;  %v15285_v53 = vcombine.high %v1565_v56, %v1569_v27  ;;  %v15292_v14 = vcombine.low %v1573_v50, %v1577_v57 }
 0x591   :  { %10782 = vmatprep.subr.bf16.mxu0 %v15237_v19  ;;  %v15039_v19 = vcombine.high %v1318_v1, %v1322_v41  ;;  %v15038_v8 = vcombine.low %v1318_v1, %v1322_v41  ;;  %v1362_v56 = vld [vmem:[%s22314_s1 + $0x27f8] sm:$0xff] }
 0x592   :  { %v1374_v41 = vld [vmem:[%s22314_s1 + $0x2858] sm:$0xff] }
 0x593   :  { %11193 = vmatpush1.bf16.msra.mxu1 %v14982_v4  ;;  %v1585_v4 = vld [vmem:[%s22314_s1 + $0x2ef0] sm:$0xff] }
 0x594   :  { %10783 = vmatpush1.bf16.msra.mxu0 %v15236_v2  ;;  %11194 = vmatprep.subr.bf16.mxu1 %v14991_v58  ;;  %v1326_v2 = vld [vmem:[%s22314_s1 + $0x26d8] sm:$0xff]  ;;  %v15293_v58 = vcombine.high %v1573_v50, %v1577_v57  ;;  %v15300_v22 = vcombine.low %v1581_v3, %v1585_v4 }
 0x595   :  { %10784 = vmatprep.subr.bf16.mxu0 %v15245_v15  ;;  %v15047_v15 = vcombine.high %v1326_v2, %v1330_v7  ;;  %v15046_v17 = vcombine.low %v1326_v2, %v1330_v7  ;;  %v15881_v2 = vld [vmem:[%s22317_s3 + $0x24] ss:$16 sps:$4 sm:$0xff]  }
 0x597   :  { %11195 = vmatpush1.bf16.msra.mxu1 %v14990_v20  ;;  %v1593_v20 = vld [vmem:[%s22314_s1 + $0x2f30] sm:$0xff] }
 0x598   :  { %10785 = vmatpush1.bf16.msra.mxu0 %v15244_v6  ;;  %11196 = vmatprep.subr.bf16.mxu1 %v14999_v18  ;;  %v1334_v6 = vld [vmem:[%s22314_s1 + $0x2718] sm:$0xff]  ;;  %v15301_v18 = vcombine.high %v1581_v3, %v1585_v4  ;;  %v15308_v40 = vcombine.low %v1589_v60, %v1593_v20  ;;  %v15876_v3 = vld [vmem:[%s22317_s3] ss:$16 sps:$4 sm:$0xff]  }
 0x599   :  { %10786 = vmatprep.subr.bf16.mxu0 %v15253_v23  ;;  %v15055_v23 = vcombine.high %v1334_v6, %v1338_v61  ;;  %v15054_v36 = vcombine.low %v1334_v6, %v1338_v61 }
 0x59b   :  { %11197 = vmatpush1.bf16.msra.mxu1 %v14998_v28  ;;  %v1601_v28 = vld [vmem:[%s22314_s1 + $0x2f70] sm:$0xff] }
 0x59c   :  { %10787 = vmatpush1.bf16.msra.mxu0 %v15252_v32  ;;  %11198 = vmatprep.subr.bf16.mxu1 %v15007_v33  ;;  %v1342_v32 = vld [vmem:[%s22314_s1 + $0x2758] sm:$0xff]  ;;  %v15309_v33 = vcombine.high %v1589_v60, %v1593_v20  ;;  %v15316_v51 = vcombine.low %v1597_v26, %v1601_v28 }
 0x59d   :  { %10788 = vmatprep.subr.bf16.mxu0 %v15261_v25  ;;  %v15063_v25 = vcombine.high %v1342_v32, %v1346_v34  ;;  %v15062_v49 = vcombine.low %v1342_v32, %v1346_v34  ;;  %v1390_v60 = vld [vmem:[%s22314_s1 + $0x28d8] sm:$0xff]  ;;  %v15890_v32 = vld [vmem:[%s22317_s3 + $0x84] ss:$16 sps:$4 sm:$0xff]  }
 0x59e   :  { %v1394_v20 = vld [vmem:[%s22314_s1 + $0x28f8] sm:$0xff] }
 0x59f   :  { %11199 = vmatpush1.bf16.msra.mxu1 %v15006_v44  ;;  %v1609_v44 = vld [vmem:[%s22314_s1 + $0x2fb0] sm:$0xff]  ;;  %v15111_v61 = vcombine.high %v1390_v60, %v1394_v20  ;;  %v1410_v34 = vld [vmem:[%s22314_s1 + $0x2978] sm:$0xff] }
 0x5a0   :  { %10789 = vmatpush1.bf16.msra.mxu0 %v15260_v21  ;;  %11200 = vmatprep.subr.bf16.mxu1 %v15015_v47  ;;  %v1350_v21 = vld [vmem:[%s22314_s1 + $0x2798] sm:$0xff]  ;;  %v15317_v47 = vcombine.high %v1597_v26, %v1601_v28  ;;  %v15324_v59 = vcombine.low %v1605_v43, %v1609_v44  ;;  %v15885_v26 = vld [vmem:[%s22317_s3 + $0x60] ss:$16 sps:$4 sm:$0xff]  }
 0x5a1   :  { %10790 = vmatprep.subr.bf16.mxu0 %v15269_v31  ;;  %v15071_v31 = vcombine.high %v1350_v21, %v1354_v48  ;;  %v15070_v27 = vcombine.low %v1350_v21, %v1354_v48  ;;  %v1418_v21 = vld [vmem:[%s22314_s1 + $0x29b8] sm:$0xff]  ;;  %v15891_v48 = vld [vmem:[%s22317_s3 + $0xa0] ss:$16 sps:$4 sm:$0xff]  }
 0x5a3   :  { %11201 = vmatpush1.bf16.msra.mxu1 %v15014_v54  ;;  %v1617_v54 = vld [vmem:[%s22314_s1 + $0x2ff0] sm:$0xff] }
 0x5a4   :  { %10791 = vmatpush1.bf16.msra.mxu0 %v15268_v35  ;;  %11202 = vmatprep.subr.bf16.mxu1 %v15023_v55  ;;  %v1358_v35 = vld [vmem:[%s22314_s1 + $0x27d8] sm:$0xff]  ;;  %v15325_v55 = vcombine.high %v1605_v43, %v1609_v44  ;;  %v15332_v57 = vcombine.low %v1613_v52, %v1617_v54  ;;  %v15893_v43 = vld [vmem:[%s22317_s3 + $0xa4] ss:$16 sps:$4 sm:$0xff]  }
 0x5a5   :  { %10792 = vmatprep.subr.bf16.mxu0 %v15277_v62  ;;  %v15079_v62 = vcombine.high %v1358_v35, %v1362_v56  ;;  %v15078_v50 = vcombine.low %v1358_v35, %v1362_v56  ;;  %v1414_v44 = vld [vmem:[%s22314_s1 + $0x2998] sm:$0xff]  ;;  %v15894_v35 = vld [vmem:[%s22317_s3 + $0xc0] ss:$16 sps:$4 sm:$0xff]   ;;  %v15899_v56 = vld [vmem:[%s22317_s3 + $0xe4] ss:$16 sps:$4 sm:$0xff]  }
 0x5a7   :  { %11203 = vmatpush1.bf16.msra.mxu1 %v15022_v10  ;;  %v15333_v10 = vcombine.high %v1613_v52, %v1617_v54  ;;  %v1426_v52 = vld [vmem:[%s22314_s1 + $0x29f8] sm:$0xff]  ;;  %v15134_v54 = vcombine.low %v1414_v44, %v1418_v21 }
 0x5a8   :  { %10793 = vmatpush1.bf16.msra.mxu0 %v15276_v38  ;;  %11204 = vmatprep.subr.bf16.mxu1 %v15031_v0  ;;  %v1370_v38 = vld [vmem:[%s22314_s1 + $0x2838] sm:$0xff]  ;;  %v11318_v0 = vmul.f32 0.2, %v19398_v9 }
 0x5a9   :  { %10794 = vmatprep.subr.bf16.mxu0 %v15285_v53  ;;  %v15087_v1 = vcombine.high %v1366_v63, %v1370_v38  ;;  %v15878_v53 = vld [vmem:[%s22317_s3 + $0x4] ss:$16 sps:$4 sm:$0xff]  }
 0x5ab   :  { %11205 = vmatpush1.bf16.msra.mxu1 %v15030_v13  ;;  %v1378_v13 = vld [vmem:[%s22314_s1 + $0x2878] sm:$0xff] }
 0x5ac   :  { %10795 = vmatpush1.bf16.msra.mxu0 %v15284_v16  ;;  %11206 = vmatprep.subr.bf16.mxu1 %v15039_v19  ;;  %v15086_v16 = vcombine.low %v1366_v63, %v1370_v38  ;;  %v11326_v19 = vsel %vm11310_vm0, %v19398_v9, %v11318_v0  ;;  %v15095_v4 = vcombine.high %v1374_v41, %v1378_v13  ;;  %v1386_v9 = vld [vmem:[%s22314_s1 + $0x28b8] sm:$0xff]  ;;  %v15897_v63 = vld [vmem:[%s22317_s3 + $0xe0] ss:$16 sps:$4 sm:$0xff]   ;;  %v15902_v38 = vld [vmem:[%s22317_s3 + $0x104] ss:$16 sps:$4 sm:$0xff]  }
 0x5ad   :  { %10796 = vmatprep.subr.bf16.mxu0 %v15293_v58  ;;  %v1382_v58 = vld [vmem:[%s22314_s1 + $0x2898] sm:$0xff]  ;;  %v21099_v7 = vpack.c.bf16 %v11326_v19, %v11326_v19 }
 0x5ae   :  { %v15102_v6 = vcombine.low %v1382_v58, %v1386_v9  ;;  %v1438_v0 = vld [vmem:[%s22314_s1 + $0x2a58] sm:$0xff] }
 0x5af   :  { %11207 = vmatpush1.bf16.msra.mxu1 %v15038_v8  ;;  %v15094_v8 = vcombine.low %v1374_v41, %v1378_v13  ;;  %v15905_v41 = vld [vmem:[%s22317_s3 + $0x124] ss:$16 sps:$4 sm:$0xff]   ;;  %v1446_v13 = vld [vmem:[%s22314_s1 + $0x2a98] sm:$0xff] }
 0x5b0   :  { %10797 = vmatpush1.bf16.msra.mxu0 %v15292_v14  ;;  %11208 = vmatprep.subr.bf16.mxu1 %v15047_v15  ;;  %v15879_v14 = vld [vmem:[%s22317_s3 + $0x20] ss:$16 sps:$4 sm:$0xff]   ;;  %v15103_v15 = vcombine.high %v1382_v58, %v1386_v9  ;;  %v1454_v58 = vld [vmem:[%s22314_s1 + $0x2ad8] sm:$0xff] }
 0x5b1   :  { %10798 = vmatprep.subr.bf16.mxu0 %v15301_v18  ;;  %v15882_v18 = vld [vmem:[%s22317_s3 + $0x40] ss:$16 sps:$4 sm:$0xff]   ;;  %v1458_v9 = vld [vmem:[%s22314_s1 + $0x2af8] sm:$0xff] }
 0x5b3   :  { %11209 = vmatpush1.bf16.msra.mxu1 %v15046_v17  ;;  %v15887_v17 = vld [vmem:[%s22317_s3 + $0x64] ss:$16 sps:$4 sm:$0xff]  }
 0x5b4   :  { %10799 = vmatpush1.bf16.msra.mxu0 %v15300_v22  ;;  %11210 = vmatprep.subr.bf16.mxu1 %v15055_v23  ;;  %v1398_v22 = vld [vmem:[%s22314_s1 + $0x2918] sm:$0xff]  ;;  %v15110_v23 = vcombine.low %v1390_v60, %v1394_v20 }
 0x5b5   :  { %10800 = vmatprep.subr.bf16.mxu0 %v15309_v33  ;;  %v1406_v33 = vld [vmem:[%s22314_s1 + $0x2958] sm:$0xff] }
 0x5b6   :  { %v1462_v60 = vld [vmem:[%s22314_s1 + $0x2b18] sm:$0xff] }
 0x5b7   :  { %11211 = vmatpush1.bf16.msra.mxu1 %v15054_v36  ;;  %v1466_v20 = vld [vmem:[%s22314_s1 + $0x2b38] sm:$0xff] }
 0x5b8   :  { %10801 = vmatpush1.bf16.msra.mxu0 %v15308_v40  ;;  %11212 = vmatprep.subr.bf16.mxu1 %v15063_v25  ;;  %v15888_v40 = vld [vmem:[%s22317_s3 + $0x80] ss:$16 sps:$4 sm:$0xff]   ;;  %v15127_v25 = vcombine.high %v1406_v33, %v1410_v34 }
 0x5b9   :  { %10802 = vmatprep.subr.bf16.mxu0 %v15317_v47  ;;  %v15126_v47 = vcombine.low %v1406_v33, %v1410_v34  ;;  %v15917_v33 = vld [vmem:[%s22317_s3 + $0x1a4] ss:$16 sps:$4 sm:$0xff]   ;;  %v1478_v34 = vld [vmem:[%s22314_s1 + $0x2b98] sm:$0xff] }
 0x5bb   :  { %11213 = vmatpush1.bf16.msra.mxu1 %v15062_v49  ;;  %v15135_v49 = vcombine.high %v1414_v44, %v1418_v21  ;;  %v15915_v44 = vld [vmem:[%s22317_s3 + $0x1a0] ss:$16 sps:$4 sm:$0xff]  }
 0x5bc   :  { %10803 = vmatpush1.bf16.msra.mxu0 %v15316_v51  ;;  %11214 = vmatprep.subr.bf16.mxu1 %v15071_v31  ;;  %v15896_v51 = vld [vmem:[%s22317_s3 + $0xc4] ss:$16 sps:$4 sm:$0xff]   ;;  %v1422_v31 = vld [vmem:[%s22314_s1 + $0x29d8] sm:$0xff] }
 0x5bd   :  { %10804 = vmatprep.subr.bf16.mxu0 %v15325_v55  ;;  %v15143_v55 = vcombine.high %v1422_v31, %v1426_v52 }
 0x5bf   :  { %11215 = vmatpush1.bf16.msra.mxu1 %v15070_v27  ;;  %v1430_v27 = vld [vmem:[%s22314_s1 + $0x2a18] sm:$0xff] }
 0x5c0   :  { %10805 = vmatpush1.bf16.msra.mxu0 %v15324_v59  ;;  %11216 = vmatprep.subr.bf16.mxu1 %v15079_v62  ;;  %v1434_v59 = vld [vmem:[%s22314_s1 + $0x2a38] sm:$0xff]  ;;  %v15142_v62 = vcombine.low %v1422_v31, %v1426_v52  ;;  %v15918_v52 = vld [vmem:[%s22317_s3 + $0x1c0] ss:$16 sps:$4 sm:$0xff]  }
 0x5c1   :  { %10806 = vmatprep.subr.bf16.mxu0 %v15333_v10  ;;  %v15151_v10 = vcombine.high %v1430_v27, %v1434_v59 }
 0x5c3   :  { %11217 = vmatpush1.bf16.msra.mxu1 %v15078_v50  ;;  %v1442_v50 = vld [vmem:[%s22314_s1 + $0x2a78] sm:$0xff] }
 0x5c4   :  { %10807 = vmatpush1.bf16.msra.mxu0 %v15332_v57  ;;  %11227 = vmatprep.subr.bf16.mxu1 %v15087_v1  ;;  %v15150_v57 = vcombine.low %v1430_v27, %v1434_v59  ;;  %v15900_v1 = vld [vmem:[%s22317_s3 + $0x100] ss:$16 sps:$4 sm:$0xff]   ;;  %v15158_v19 = vcombine.low %v1438_v0, %v1442_v50 }
 0x5c5   :  { %12899 = vmatprep.subr.bf16.mxu0 %v15878_v53  ;;  %v15159_v53 = vcombine.high %v1438_v0, %v1442_v50  ;;  %v1502_v0 = vld [vmem:[%s22314_s1 + $0x2c58] sm:$0xff] }
 0x5c6   :  { %11219 = vmatmul.mubr.bf16.vlgmr.msra.gmra.mrb[8].mxu1 %v18306_v12  ;;  %v15884_v12 = vld [vmem:[%s22317_s3 + $0x44] ss:$16 sps:$4 sm:$0xff]   ;;  %v1506_v50 = vld [vmem:[%s22314_s1 + $0x2c78] sm:$0xff] }
 0x5c7   :  { %10809 = vmatmul.mubr.bf16.vlgmr.msra.gmra.mrb[4].mxu0 %v18715_v46  ;;  %11228 = vmatpush1.bf16.msra.mxu1 %v15086_v16  ;;  %v1450_v16 = vld [vmem:[%s22314_s1 + $0x2ab8] sm:$0xff] }
 0x5c8   :  { %12900 = vmatpush1.bf16.msra.mxu0 %v15876_v3  ;;  %12931 = vmatprep.mubr.bf16.mxu0 %v21099_v7  ;;  %v15903_v3 = vld [vmem:[%s22317_s3 + $0x120] ss:$16 sps:$4 sm:$0xff]  }
 0x5c9   :  { %11229 = vmatprep.subr.bf16.mxu1 %v15095_v4  ;;  %12901 = vmatprep.subr.bf16.mxu0 %v15881_v2  ;;  %v15167_v4 = vcombine.high %v1446_v13, %v1450_v16  ;;  %v15908_v2 = vld [vmem:[%s22317_s3 + $0x144] ss:$16 sps:$4 sm:$0xff]  }
 0x5ca   :  { %11259 = vmatprep.mubr.bf16.mxu1 %v18314_v24  ;;  %v1402_v24 = vld [vmem:[%s22314_s1 + $0x2938] sm:$0xff] }
 0x5cb   :  { %11230 = vmatpush1.bf16.msra.mxu1 %v15094_v8  ;;  %v15119_v28 = vcombine.high %v1398_v22, %v1402_v24  ;;  %v15118_v36 = vcombine.low %v1398_v22, %v1402_v24  ;;  %v15166_v8 = vcombine.low %v1446_v13, %v1450_v16  ;;  %v1470_v22 = vld [vmem:[%s22314_s1 + $0x2b58] sm:$0xff]  ;;  %v15929_v13 = vld [vmem:[%s22317_s3 + $0x224] ss:$16 sps:$4 sm:$0xff]  }
 0x5cc   :  { %12902 = vmatpush1.bf16.msra.mxu0 %v15879_v14  ;;  %11231 = vmatprep.subr.bf16.mxu1 %v15103_v15  ;;  %v15906_v14 = vld [vmem:[%s22317_s3 + $0x140] ss:$16 sps:$4 sm:$0xff]   ;;  %v15175_v15 = vcombine.high %v1454_v58, %v1458_v9  ;;  %v1474_v24 = vld [vmem:[%s22314_s1 + $0x2b78] sm:$0xff] }
 0x5cd   :  { %12903 = vmatprep.subr.bf16.mxu0 %v15884_v12  ;;  %v15911_v12 = vld [vmem:[%s22317_s3 + $0x164] ss:$16 sps:$4 sm:$0xff]   ;;  %v1510_v16 = vld [vmem:[%s22314_s1 + $0x2c98] sm:$0xff] }
 0x5cf   :  { %11232 = vmatpush1.bf16.msra.mxu1 %v15102_v6  ;;  %v15174_v6 = vcombine.low %v1454_v58, %v1458_v9  ;;  %v1518_v9 = vld [vmem:[%s22314_s1 + $0x2cd8] sm:$0xff] }
 0x5d0   :  { %12904 = vmatpush1.bf16.msra.mxu0 %v15882_v18  ;;  %11233 = vmatprep.subr.bf16.mxu1 %v15111_v61  ;;  %v15909_v18 = vld [vmem:[%s22317_s3 + $0x160] ss:$16 sps:$4 sm:$0xff]   ;;  %v15183_v61 = vcombine.high %v1462_v60, %v1466_v20 }
 0x5d1   :  { %12905 = vmatprep.subr.bf16.mxu0 %v15887_v17  ;;  %v15914_v17 = vld [vmem:[%s22317_s3 + $0x184] ss:$16 sps:$4 sm:$0xff]  }
 0x5d3   :  { %11234 = vmatpush1.bf16.msra.mxu1 %v15110_v23  ;;  %v1635_v23 = vsub.s32 3, %v19333_v11 }
 0x5d4   :  { %12906 = vmatpush1.bf16.msra.mxu0 %v15885_v26  ;;  %11235 = vmatprep.subr.bf16.mxu1 %v15119_v28  ;;  %v15182_v26 = vcombine.low %v1462_v60, %v1466_v20  ;;  %v15912_v28 = vld [vmem:[%s22317_s3 + $0x180] ss:$16 sps:$4 sm:$0xff]   ;;  %v15935_v60 = vld [vmem:[%s22317_s3 + $0x264] ss:$16 sps:$4 sm:$0xff]   ;;  %v1526_v20 = vld [vmem:[%s22314_s1 + $0x2d18] sm:$0xff] }
 0x5d5   :  { %12907 = vmatprep.subr.bf16.mxu0 %v15890_v32  ;;  %v15191_v32 = vcombine.high %v1470_v22, %v1474_v24 }
 0x5d7   :  { %11236 = vmatpush1.bf16.msra.mxu1 %v15118_v36  ;;  %v1482_v36 = vld [vmem:[%s22314_s1 + $0x2bb8] sm:$0xff] }
 0x5d8   :  { %12908 = vmatpush1.bf16.msra.mxu0 %v15888_v40  ;;  %11237 = vmatprep.subr.bf16.mxu1 %v15127_v25  ;;  %v21252_v40 = vld [vmem:[%s22316_s2] sm:$0xff]  ;;  %v15199_v21 = vcombine.high %v1478_v34, %v1482_v36  ;;  %v15198_v31 = vcombine.low %v1478_v34, %v1482_v36  ;;  %v1542_v34 = vld [vmem:[%s22314_s1 + $0x2d98] sm:$0xff] }
 0x5d9   :  { %12909 = vmatprep.subr.bf16.mxu0 %v15893_v43  ;;  %v1636_v25 = vrot.slane %v21252_v40, %v1635_v23  ;;  %v15190_v43 = vcombine.low %v1470_v22, %v1474_v24  ;;  %v1534_v22 = vld [vmem:[%s22314_s1 + $0x2d58] sm:$0xff] }
 0x5da   :  { %v1538_v24 = vld [vmem:[%s22314_s1 + $0x2d78] sm:$0xff] }
 0x5db   :  { %11238 = vmatpush1.bf16.msra.mxu1 %v15126_v47  ;;  %v15920_v47 = vld [vmem:[%s22317_s3 + $0x1c4] ss:$16 sps:$4 sm:$0xff]   ;;  %v1546_v36 = vld [vmem:[%s22314_s1 + $0x2db8] sm:$0xff] }
 0x5dc   :  { %12910 = vmatpush1.bf16.msra.mxu0 %v15891_v48  ;;  %11239 = vmatprep.subr.bf16.mxu1 %v15135_v49  ;;  %v1486_v48 = vld [vmem:[%s22314_s1 + $0x2bd8] sm:$0xff] }
 0x5dd   :  { %12911 = vmatprep.subr.bf16.mxu0 %v15896_v51  ;;  %v1490_v49 = vld [vmem:[%s22314_s1 + $0x2bf8] sm:$0xff]  ;;  %v15663_v51 = vadd.f32 %v19788_v45, %v1636_v25  ;;  %v15254_v25 = vcombine.low %v1534_v22, %v1538_v24 }
 0x5de   :  { %v1498_v45 = vld [vmem:[%s22314_s1 + $0x2c38] sm:$0xff]  ;;  %v15206_v59 = vcombine.low %v1486_v48, %v1490_v49 }
 0x5df   :  { %11240 = vmatpush1.bf16.msra.mxu1 %v15134_v54  ;;  %v15207_v54 = vcombine.high %v1486_v48, %v1490_v49  ;;  %v11320_v27 = vmul.f32 0.2, %v15663_v51  ;;  %vm11312_vm2 = vcmp.gt.f32.partialorder %v15663_v51, 0.0  ;;  %v1554_v48 = vld [vmem:[%s22314_s1 + $0x2df8] sm:$0xff]  ;;  %v15262_v49 = vcombine.low %v1542_v34, %v1546_v36 }
 0x5e0   :  { %12912 = vmatpush1.bf16.msra.mxu0 %v15894_v35  ;;  %11241 = vmatprep.subr.bf16.mxu1 %v15143_v55  ;;  %v15923_v35 = vld [vmem:[%s22317_s3 + $0x1e4] ss:$16 sps:$4 sm:$0xff]   ;;  %v1494_v55 = vld [vmem:[%s22314_s1 + $0x2c18] sm:$0xff] }
 0x5e1   :  { %12913 = vmatprep.subr.bf16.mxu0 %v15899_v56  ;;  %v11317_v56 = vmul.f32 0.2, %v19396_v5 }
 0x5e3   :  { %11242 = vmatpush1.bf16.msra.mxu1 %v15142_v62  ;;  %v15921_v62 = vld [vmem:[%s22317_s3 + $0x1e0] ss:$16 sps:$4 sm:$0xff]  }
 0x5e4   :  { %12914 = vmatpush1.bf16.msra.mxu0 %v15897_v63  ;;  %11243 = vmatprep.subr.bf16.mxu1 %v15151_v10  ;;  %v15215_v63 = vcombine.high %v1494_v55, %v1498_v45  ;;  %v15926_v10 = vld [vmem:[%s22317_s3 + $0x204] ss:$16 sps:$4 sm:$0xff]  }
 0x5e5   :  { %12915 = vmatprep.subr.bf16.mxu0 %v15902_v38  ;;  %v11325_v38 = vsel %vm11309_vm1, %v19396_v5, %v11317_v56  ;;  %v15223_v5 = vcombine.high %v1502_v0, %v1506_v50 }
 0x5e7   :  { %11244 = vmatpush1.bf16.msra.mxu1 %v15150_v57  ;;  %v15214_v57 = vcombine.low %v1494_v55, %v1498_v45  ;;  %v15945_v45 = vld [vmem:[%s22317_s3 + $0x2e0] ss:$16 sps:$4 sm:$0xff]  }
 0x5e8   :  { %12916 = vmatpush1.bf16.msra.mxu0 %v15900_v1  ;;  %11245 = vmatprep.subr.bf16.mxu1 %v15159_v53  ;;  %v11328_v1 = vsel %vm11312_vm2, %v15663_v51, %v11320_v27  ;;  %v15924_v53 = vld [vmem:[%s22317_s3 + $0x200] ss:$16 sps:$4 sm:$0xff]   ;;  %v15950_v27 = vld [vmem:[%s22317_s3 + $0x304] ss:$16 sps:$4 sm:$0xff]  }
 0x5e9   :  { %12917 = vmatprep.subr.bf16.mxu0 %v15905_v41  ;;  %v21300_v41 = vpack.c.bf16 %v11325_v38, %v11325_v38  ;;  %v15942_v51 = vld [vmem:[%s22317_s3 + $0x2c0] ss:$16 sps:$4 sm:$0xff]  }
 0x5eb   :  { %11246 = vmatpush1.bf16.msra.mxu1 %v15158_v19  ;;  %v1514_v19 = vld [vmem:[%s22314_s1 + $0x2cb8] sm:$0xff] }
 0x5ec   :  { %12918 = vmatpush1.bf16.msra.mxu0 %v15903_v3  ;;  %11247 = vmatprep.subr.bf16.mxu1 %v15167_v4  ;;  %v21312_v3 = vpack.c.bf16 %v11328_v1, %v11328_v1  ;;  %v15222_v4 = vcombine.low %v1502_v0, %v1506_v50  ;;  %v15231_v58 = vcombine.high %v1510_v16, %v1514_v19  ;;  %v15953_v0 = vld [vmem:[%s22317_s3 + $0x324] ss:$16 sps:$4 sm:$0xff]   ;;  %v1574_v50 = vld [vmem:[%s22314_s1 + $0x2e98] sm:$0xff] }
 0x5ed   :  { %12919 = vmatprep.subr.bf16.mxu0 %v15908_v2  ;;  %v15927_v2 = vld [vmem:[%s22317_s3 + $0x220] ss:$16 sps:$4 sm:$0xff]  }
 0x5ef   :  { %11248 = vmatpush1.bf16.msra.mxu1 %v15166_v8  ;;  %v1522_v8 = vld [vmem:[%s22314_s1 + $0x2cf8] sm:$0xff] }
 0x5f0   :  { %12920 = vmatpush1.bf16.msra.mxu0 %v15906_v14  ;;  %11249 = vmatprep.subr.bf16.mxu1 %v15175_v15  ;;  %v15230_v14 = vcombine.low %v1510_v16, %v1514_v19  ;;  %v15930_v15 = vld [vmem:[%s22317_s3 + $0x240] ss:$16 sps:$4 sm:$0xff]   ;;  %v1582_v16 = vld [vmem:[%s22314_s1 + $0x2ed8] sm:$0xff] }
 0x5f1   :  { %12921 = vmatprep.subr.bf16.mxu0 %v15911_v12  ;;  %v15239_v12 = vcombine.high %v1518_v9, %v1522_v8  ;;  %v1586_v19 = vld [vmem:[%s22314_s1 + $0x2ef8] sm:$0xff] }
 0x5f3   :  { %11250 = vmatpush1.bf16.msra.mxu1 %v15174_v6  ;;  %v15238_v6 = vcombine.low %v1518_v9, %v1522_v8  ;;  %v1590_v9 = vld [vmem:[%s22314_s1 + $0x2f18] sm:$0xff] }
 0x5f4   :  { %12922 = vmatpush1.bf16.msra.mxu0 %v15909_v18  ;;  %11251 = vmatprep.subr.bf16.mxu1 %v15183_v61  ;;  %v15933_v18 = vld [vmem:[%s22317_s3 + $0x260] ss:$16 sps:$4 sm:$0xff]   ;;  %v1594_v8 = vld [vmem:[%s22314_s1 + $0x2f38] sm:$0xff] }
 0x5f5   :  { %12923 = vmatprep.subr.bf16.mxu0 %v15914_v17  ;;  %v15938_v17 = vld [vmem:[%s22317_s3 + $0x284] ss:$16 sps:$4 sm:$0xff]  }
 0x5f7   :  { %11252 = vmatpush1.bf16.msra.mxu1 %v15182_v26 }
 0x5f8   :  { %12924 = vmatpush1.bf16.msra.mxu0 %v15912_v28  ;;  %11253 = vmatprep.subr.bf16.mxu1 %v15191_v32  ;;  %v15936_v28 = vld [vmem:[%s22317_s3 + $0x280] ss:$16 sps:$4 sm:$0xff]   ;;  %v15255_v32 = vcombine.high %v1534_v22, %v1538_v24  ;;  %v15965_v22 = vld [vmem:[%s22317_s3 + $0x3a4] ss:$16 sps:$4 sm:$0xff]   ;;  %v1606_v24 = vld [vmem:[%s22314_s1 + $0x2f98] sm:$0xff] }
 0x5f9   :  { %12925 = vmatprep.subr.bf16.mxu0 %v15917_v33  ;;  %v15941_v33 = vld [vmem:[%s22317_s3 + $0x2a4] ss:$16 sps:$4 sm:$0xff]  }
 0x5fb   :  { %11254 = vmatpush1.bf16.msra.mxu1 %v15190_v43  ;;  %v15939_v43 = vld [vmem:[%s22317_s3 + $0x2a0] ss:$16 sps:$4 sm:$0xff]  }
 0x5fc   :  { %12926 = vmatpush1.bf16.msra.mxu0 %v15915_v44  ;;  %11255 = vmatprep.subr.bf16.mxu1 %v15199_v21  ;;  %v15263_v44 = vcombine.high %v1542_v34, %v1546_v36  ;;  %v15944_v21 = vld [vmem:[%s22317_s3 + $0x2c4] ss:$16 sps:$4 sm:$0xff]  }
 0x5fd   :  { %12927 = vmatprep.subr.bf16.mxu0 %v15920_v47  ;;  %v1550_v47 = vld [vmem:[%s22314_s1 + $0x2dd8] sm:$0xff]  ;;  %v15968_v36 = vld [vmem:[%s22317_s3 + $0x3c4] ss:$16 sps:$4 sm:$0xff]  }
 0x5fe   :  { %v15270_v55 = vcombine.low %v1550_v47, %v1554_v48 }
 0x5ff   :  { %11256 = vmatpush1.bf16.msra.mxu1 %v15198_v31  ;;  %v15271_v31 = vcombine.high %v1550_v47, %v1554_v48  ;;  %v15966_v47 = vld [vmem:[%s22317_s3 + $0x3c0] ss:$16 sps:$4 sm:$0xff]  }
 0x600   :  { %12928 = vmatpush1.bf16.msra.mxu0 %v15918_v52  ;;  %11257 = vmatprep.subr.bf16.mxu1 %v15207_v54  ;;  %v15947_v52 = vld [vmem:[%s22317_s3 + $0x2e4] ss:$16 sps:$4 sm:$0xff]   ;;  %v1558_v54 = vld [vmem:[%s22314_s1 + $0x2e18] sm:$0xff] }
 0x601   :  { %12929 = vmatprep.subr.bf16.mxu0 %v15923_v35  ;;  %v1562_v35 = vld [vmem:[%s22314_s1 + $0x2e38] sm:$0xff] }
 0x602   :  { %v15279_v56 = vcombine.high %v1558_v54, %v1562_v35 }
 0x603   :  { %11258 = vmatpush1.bf16.msra.mxu1 %v15206_v59  ;;  %v1566_v59 = vld [vmem:[%s22314_s1 + $0x2e58] sm:$0xff] }
 0x604   :  { %12930 = vmatpush1.bf16.msra.mxu0 %v15921_v62  ;;  %11268 = vmatprep.subr.bf16.mxu1 %v15215_v63  ;;  %v1570_v62 = vld [vmem:[%s22314_s1 + $0x2e78] sm:$0xff]  ;;  %v15278_v63 = vcombine.low %v1558_v54, %v1562_v35  ;;  %v15998_v54 = vld [vmem:[%s22317_s3 + $0x404] ss:$16 sps:$4 sm:$0xff]  }
 0x605   :  { %12940 = vmatprep.subr.bf16.mxu0 %v15926_v10  ;;  %v15948_v10 = vld [vmem:[%s22317_s3 + $0x300] ss:$16 sps:$4 sm:$0xff]   ;;  %v15287_v38 = vcombine.high %v1566_v59, %v1570_v62  ;;  %v15286_v1 = vcombine.low %v1566_v59, %v1570_v62  ;;  %v16004_v59 = vld [vmem:[%s22317_s3 + $0x424] ss:$16 sps:$4 sm:$0xff]   ;;  %v15975_v62 = vld [vmem:[%s22317_s3 + $0x28] ss:$16 sps:$4 sm:$0xff]  }
 0x606   :  { %11260 = vmatmul.mubr.bf16.vlgmr.msra.gmra.mrb[8].mxu1 %v18512_v29  ;;  %v15932_v29 = vld [vmem:[%s22317_s3 + $0x244] ss:$16 sps:$4 sm:$0xff]  }
 0x607   :  { %12932 = vmatmul.mubr.bf16.vlgmr.msra.gmra.mrb[8].mxu0 %v21300_v41  ;;  %11269 = vmatpush1.bf16.msra.mxu1 %v15214_v57  ;;  %v1578_v57 = vld [vmem:[%s22314_s1 + $0x2eb8] sm:$0xff] }
 0x608   :  { %12941 = vmatpush1.bf16.msra.mxu0 %v15924_v53  ;;  %12972 = vmatprep.mubr.bf16.mxu0 %v21312_v3  ;;  %v15951_v53 = vld [vmem:[%s22317_s3 + $0x320] ss:$16 sps:$4 sm:$0xff]  }
 0x609   :  { %11270 = vmatprep.subr.bf16.mxu1 %v15223_v5  ;;  %12942 = vmatprep.subr.bf16.mxu0 %v15929_v13  ;;  %v15295_v5 = vcombine.high %v1574_v50, %v1578_v57  ;;  %v15956_v13 = vld [vmem:[%s22317_s3 + $0x344] ss:$16 sps:$4 sm:$0xff]  }
 0x60a   :  { %11300 = vmatprep.mubr.bf16.mxu1 %v18520_v37  ;;  %v1530_v37 = vld [vmem:[%s22314_s1 + $0x2d38] sm:$0xff] }
 0x60b   :  { %11271 = vmatpush1.bf16.msra.mxu1 %v15222_v4  ;;  %v15247_v61 = vcombine.high %v1526_v20, %v1530_v37  ;;  %v15246_v26 = vcombine.low %v1526_v20, %v1530_v37  ;;  %v15294_v4 = vcombine.low %v1574_v50, %v1578_v57  ;;  %v1598_v20 = vld [vmem:[%s22314_s1 + $0x2f58] sm:$0xff]  ;;  %v16016_v50 = vld [vmem:[%s22317_s3 + $0x464] ss:$16 sps:$4 sm:$0xff]  }
 0x60c   :  { %12943 = vmatpush1.bf16.msra.mxu0 %v15927_v2  ;;  %11272 = vmatprep.subr.bf16.mxu1 %v15231_v58  ;;  %v15954_v2 = vld [vmem:[%s22317_s3 + $0x340] ss:$16 sps:$4 sm:$0xff]   ;;  %v15303_v58 = vcombine.high %v1582_v16, %v1586_v19  ;;  %v1602_v37 = vld [vmem:[%s22314_s1 + $0x2f78] sm:$0xff] }
 0x60d   :  { %12944 = vmatprep.subr.bf16.mxu0 %v15932_v29  ;;  %v15959_v29 = vld [vmem:[%s22317_s3 + $0x364] ss:$16 sps:$4 sm:$0xff]   ;;  %v15981_v57 = vld [vmem:[%s22317_s3 + $0x68] ss:$16 sps:$4 sm:$0xff]  }
 0x60f   :  { %11273 = vmatpush1.bf16.msra.mxu1 %v15230_v14  ;;  %v15302_v14 = vcombine.low %v1582_v16, %v1586_v19  ;;  %v15989_v16 = vld [vmem:[%s22317_s3 + $0xac] ss:$16 sps:$4 sm:$0xff]   ;;  %v16020_v19 = vld [vmem:[%s22317_s3 + $0x480] ss:$16 sps:$4 sm:$0xff]  }
 0x610   :  { %12945 = vmatpush1.bf16.msra.mxu0 %v15930_v15  ;;  %11274 = vmatprep.subr.bf16.mxu1 %v15239_v12  ;;  %v15957_v15 = vld [vmem:[%s22317_s3 + $0x360] ss:$16 sps:$4 sm:$0xff]   ;;  %v15311_v12 = vcombine.high %v1590_v9, %v1594_v8 }
 0x611   :  { %12946 = vmatprep.subr.bf16.mxu0 %v15935_v60  ;;  %v15962_v60 = vld [vmem:[%s22317_s3 + $0x384] ss:$16 sps:$4 sm:$0xff]  }
 0x613   :  { %11275 = vmatpush1.bf16.msra.mxu1 %v15238_v6  ;;  %v1631_v6 = vsub.s32 2, %v19333_v11 }
 0x614   :  { %12947 = vmatpush1.bf16.msra.mxu0 %v15933_v18  ;;  %11276 = vmatprep.subr.bf16.mxu1 %v15247_v61  ;;  %v15310_v18 = vcombine.low %v1590_v9, %v1594_v8  ;;  %v15960_v61 = vld [vmem:[%s22317_s3 + $0x380] ss:$16 sps:$4 sm:$0xff]   ;;  %v16034_v9 = vld [vmem:[%s22317_s3 + $0x4c4] ss:$16 sps:$4 sm:$0xff]   ;;  %v15990_v8 = vld [vmem:[%s22317_s3 + $0xc8] ss:$16 sps:$4 sm:$0xff]  }
 0x615   :  { %12948 = vmatprep.subr.bf16.mxu0 %v15938_v17  ;;  %v15319_v17 = vcombine.high %v1598_v20, %v1602_v37 }
 0x617   :  { %11277 = vmatpush1.bf16.msra.mxu1 %v15246_v26  ;;  %v1610_v26 = vld [vmem:[%s22314_s1 + $0x2fb8] sm:$0xff] }
 0x618   :  { %12949 = vmatpush1.bf16.msra.mxu0 %v15936_v28  ;;  %11278 = vmatprep.subr.bf16.mxu1 %v15255_v32  ;;  %v1632_v28 = vrot.slane %v21252_v40, %v1631_v6  ;;  %v15318_v32 = vcombine.low %v1598_v20, %v1602_v37  ;;  %v15327_v34 = vcombine.high %v1606_v24, %v1610_v26  ;;  %v16001_v20 = vld [vmem:[%s22317_s3 + $0x10c] ss:$16 sps:$4 sm:$0xff]   ;;  %v16038_v37 = vld [vmem:[%s22317_s3 + $0x4e0] ss:$16 sps:$4 sm:$0xff]  }
 0x619   :  { %12950 = vmatprep.subr.bf16.mxu0 %v15941_v33  ;;  %v15963_v33 = vld [vmem:[%s22317_s3 + $0x3a0] ss:$16 sps:$4 sm:$0xff]  }
 0x61b   :  { %11279 = vmatpush1.bf16.msra.mxu1 %v15254_v25  ;;  %v1614_v25 = vld [vmem:[%s22314_s1 + $0x2fd8] sm:$0xff] }
 0x61c   :  { %12951 = vmatpush1.bf16.msra.mxu0 %v15939_v43  ;;  %11280 = vmatprep.subr.bf16.mxu1 %v15263_v44  ;;  %v1618_v43 = vld [vmem:[%s22314_s1 + $0x2ff8] sm:$0xff]  ;;  %v15662_v44 = vadd.f32 %v19780_v42, %v1632_v28  ;;  %v15969_v42 = vld [vmem:[%s22317_s3 + $0x3e0] ss:$16 sps:$4 sm:$0xff]  }
 0x61d   :  { %12952 = vmatprep.subr.bf16.mxu0 %v15944_v21  ;;  %v15326_v21 = vcombine.low %v1606_v24, %v1610_v26  ;;  %v15335_v48 = vcombine.high %v1614_v25, %v1618_v43  ;;  %v16052_v24 = vld [vmem:[%s22317_s3 + $0x524] ss:$16 sps:$4 sm:$0xff]   ;;  %v16005_v26 = vld [vmem:[%s22317_s3 + $0x128] ss:$16 sps:$4 sm:$0xff]   ;;  %v16013_v28 = vld [vmem:[%s22317_s3 + $0x14c] ss:$16 sps:$4 sm:$0xff]  }
 0x61e   :  { %vm11311_vm3 = vcmp.gt.f32.partialorder %v15662_v44, 0.0 }
 0x61f   :  { %11281 = vmatpush1.bf16.msra.mxu1 %v15262_v49  ;;  %v15971_v49 = vld [vmem:[%s22317_s3 + $0x3e4] ss:$16 sps:$4 sm:$0xff]  }
 0x620   :  { %12953 = vmatpush1.bf16.msra.mxu0 %v15942_v51  ;;  %11282 = vmatprep.subr.bf16.mxu1 %v15271_v31  ;;  %v11319_v51 = vmul.f32 0.2, %v15662_v44  ;;  %v15334_v31 = vcombine.low %v1614_v25, %v1618_v43  ;;  %v16056_v25 = vld [vmem:[%s22317_s3 + $0x540] ss:$16 sps:$4 sm:$0xff]   ;;  %v16064_v43 = vld [vmem:[%s22317_s3 + $0x564] ss:$16 sps:$4 sm:$0xff]  }
 0x621   :  { %12954 = vmatprep.subr.bf16.mxu0 %v15947_v52  ;;  %v15974_v52 = vld [vmem:[%s22317_s3 + $0xc] ss:$16 sps:$4 sm:$0xff]  }
 0x622   :  { %v11327_v35 = vsel %vm11311_vm3, %v15662_v44, %v11319_v51  ;;  %v16017_v44 = vld [vmem:[%s22317_s3 + $0x168] ss:$16 sps:$4 sm:$0xff]   ;;  %v16031_v51 = vld [vmem:[%s22317_s3 + $0x1ac] ss:$16 sps:$4 sm:$0xff]  }
 0x623   :  { %11283 = vmatpush1.bf16.msra.mxu1 %v15270_v55  ;;  %v15972_v55 = vld [vmem:[%s22317_s3 + $0x8] ss:$16 sps:$4 sm:$0xff]  }
 0x624   :  { %12955 = vmatpush1.bf16.msra.mxu0 %v15945_v45  ;;  %11284 = vmatprep.subr.bf16.mxu1 %v15279_v56  ;;  %v15977_v45 = vld [vmem:[%s22317_s3 + $0x2c] ss:$16 sps:$4 sm:$0xff]   ;;  %v21499_v56 = vpack.c.bf16 %v11327_v35, %v11327_v35  ;;  %v16074_v35 = vld [vmem:[%s22317_s3 + $0x5a0] ss:$16 sps:$4 sm:$0xff]  }
 0x625   :  { %12956 = vmatprep.subr.bf16.mxu0 %v15950_v27  ;;  %v15996_v27 = vld [vmem:[%s22317_s3 + $0x400] ss:$16 sps:$4 sm:$0xff]  }
 0x627   :  { %11285 = vmatpush1.bf16.msra.mxu1 %v15278_v63  ;;  %v15980_v63 = vld [vmem:[%s22317_s3 + $0x4c] ss:$16 sps:$4 sm:$0xff]  }
 0x628   :  { %12957 = vmatpush1.bf16.msra.mxu0 %v15948_v10  ;;  %11286 = vmatprep.subr.bf16.mxu1 %v15287_v38  ;;  %v16010_v10 = vld [vmem:[%s22317_s3 + $0x444] ss:$16 sps:$4 sm:$0xff]   ;;  %v15983_v38 = vld [vmem:[%s22317_s3 + $0x6c] ss:$16 sps:$4 sm:$0xff]  }
 0x629   :  { %12958 = vmatprep.subr.bf16.mxu0 %v15953_v0  ;;  %v16008_v0 = vld [vmem:[%s22317_s3 + $0x440] ss:$16 sps:$4 sm:$0xff]  }
 0x62b   :  { %11287 = vmatpush1.bf16.msra.mxu1 %v15286_v1  ;;  %v15986_v1 = vld [vmem:[%s22317_s3 + $0x8c] ss:$16 sps:$4 sm:$0xff]  }
 0x62c   :  { %12959 = vmatpush1.bf16.msra.mxu0 %v15951_v53  ;;  %11288 = vmatprep.subr.bf16.mxu1 %v15295_v5  ;;  %v16014_v53 = vld [vmem:[%s22317_s3 + $0x460] ss:$16 sps:$4 sm:$0xff]   ;;  %v16022_v5 = vld [vmem:[%s22317_s3 + $0x484] ss:$16 sps:$4 sm:$0xff]  }
 0x62d   :  { %12960 = vmatprep.subr.bf16.mxu0 %v15956_v13  ;;  %v15984_v13 = vld [vmem:[%s22317_s3 + $0x88] ss:$16 sps:$4 sm:$0xff]  }
 0x62f   :  { %11289 = vmatpush1.bf16.msra.mxu1 %v15294_v4  ;;  %v16028_v4 = vld [vmem:[%s22317_s3 + $0x4a4] ss:$16 sps:$4 sm:$0xff]  }
 0x630   :  { %12961 = vmatpush1.bf16.msra.mxu0 %v15954_v2  ;;  %11290 = vmatprep.subr.bf16.mxu1 %v15303_v58  ;;  %v15987_v2 = vld [vmem:[%s22317_s3 + $0xa8] ss:$16 sps:$4 sm:$0xff]   ;;  %v15992_v58 = vld [vmem:[%s22317_s3 + $0xcc] ss:$16 sps:$4 sm:$0xff]  }
 0x631   :  { %12962 = vmatprep.subr.bf16.mxu0 %v15959_v29  ;;  %v16026_v29 = vld [vmem:[%s22317_s3 + $0x4a0] ss:$16 sps:$4 sm:$0xff]  }
 0x633   :  { %11291 = vmatpush1.bf16.msra.mxu1 %v15302_v14  ;;  %v15995_v14 = vld [vmem:[%s22317_s3 + $0xec] ss:$16 sps:$4 sm:$0xff]  }
 0x634   :  { %12963 = vmatpush1.bf16.msra.mxu0 %v15957_v15  ;;  %11292 = vmatprep.subr.bf16.mxu1 %v15311_v12  ;;  %v16032_v15 = vld [vmem:[%s22317_s3 + $0x4c0] ss:$16 sps:$4 sm:$0xff]   ;;  %v16040_v12 = vld [vmem:[%s22317_s3 + $0x4e4] ss:$16 sps:$4 sm:$0xff]  }
 0x635   :  { %12964 = vmatprep.subr.bf16.mxu0 %v15962_v60  ;;  %v15993_v60 = vld [vmem:[%s22317_s3 + $0xe8] ss:$16 sps:$4 sm:$0xff]  }
 0x637   :  { %11293 = vmatpush1.bf16.msra.mxu1 %v15310_v18  ;;  %v16046_v18 = vld [vmem:[%s22317_s3 + $0x504] ss:$16 sps:$4 sm:$0xff]  }
 0x638   :  { %12965 = vmatpush1.bf16.msra.mxu0 %v15960_v61  ;;  %11294 = vmatprep.subr.bf16.mxu1 %v15319_v17  ;;  %v15999_v61 = vld [vmem:[%s22317_s3 + $0x108] ss:$16 sps:$4 sm:$0xff]   ;;  %v16007_v17 = vld [vmem:[%s22317_s3 + $0x12c] ss:$16 sps:$4 sm:$0xff]  }
 0x639   :  { %12966 = vmatprep.subr.bf16.mxu0 %v15965_v22  ;;  %v16044_v22 = vld [vmem:[%s22317_s3 + $0x500] ss:$16 sps:$4 sm:$0xff]  }
 0x63b   :  { %11295 = vmatpush1.bf16.msra.mxu1 %v15318_v32  ;;  %v16050_v32 = vld [vmem:[%s22317_s3 + $0x520] ss:$16 sps:$4 sm:$0xff]  }
 0x63c   :  { %12967 = vmatpush1.bf16.msra.mxu0 %v15963_v33  ;;  %11296 = vmatprep.subr.bf16.mxu1 %v15327_v34  ;;  %v16058_v33 = vld [vmem:[%s22317_s3 + $0x544] ss:$16 sps:$4 sm:$0xff]   ;;  %v16011_v34 = vld [vmem:[%s22317_s3 + $0x148] ss:$16 sps:$4 sm:$0xff]  }
 0x63d   :  { %12968 = vmatprep.subr.bf16.mxu0 %v15968_v36  ;;  %v16019_v36 = vld [vmem:[%s22317_s3 + $0x16c] ss:$16 sps:$4 sm:$0xff]  }
 0x63f   :  { %11297 = vmatpush1.bf16.msra.mxu1 %v15326_v21  ;;  %v16025_v21 = vld [vmem:[%s22317_s3 + $0x18c] ss:$16 sps:$4 sm:$0xff]  }
 0x640   :  { %12969 = vmatpush1.bf16.msra.mxu0 %v15966_v47  ;;  %11298 = vmatprep.subr.bf16.mxu1 %v15335_v48  ;;  %v16062_v47 = vld [vmem:[%s22317_s3 + $0x560] ss:$16 sps:$4 sm:$0xff]   ;;  %v16070_v48 = vld [vmem:[%s22317_s3 + $0x584] ss:$16 sps:$4 sm:$0xff]  }
 0x641   :  { %12970 = vmatprep.subr.bf16.mxu0 %v15971_v49  ;;  %v16023_v49 = vld [vmem:[%s22317_s3 + $0x188] ss:$16 sps:$4 sm:$0xff]  }
 0x643   :  { %11299 = vmatpush1.bf16.msra.mxu1 %v15334_v31  ;;  %v16068_v31 = vld [vmem:[%s22317_s3 + $0x580] ss:$16 sps:$4 sm:$0xff]  }
 0x644   :  { %12971 = vmatpush1.bf16.msra.mxu0 %v15969_v42  ;;  %13063 = vmatprep.subr.bf16.mxu1 %v15974_v52  ;;  %v16076_v42 = vld [vmem:[%s22317_s3 + $0x5a4] ss:$16 sps:$4 sm:$0xff]   ;;  %v16029_v52 = vld [vmem:[%s22317_s3 + $0x1a8] ss:$16 sps:$4 sm:$0xff]  }
 0x645   :  { %12981 = vmatprep.subr.bf16.mxu0 %v15998_v54  ;;  %v16037_v54 = vld [vmem:[%s22317_s3 + $0x1cc] ss:$16 sps:$4 sm:$0xff]  }
 0x646   :  { %11301 = vmatmul.mubr.bf16.vlgmr.msra.gmra.mrb[8].mxu1 %v18715_v46  ;;  %v16002_v46 = vld [vmem:[%s22317_s3 + $0x420] ss:$16 sps:$4 sm:$0xff]  }
 0x647   :  { %12973 = vmatmul.mubr.bf16.vlgmr.msra.gmra.mrb[8].mxu0 %v21499_v56  ;;  %13064 = vmatpush1.bf16.msra.mxu1 %v15972_v55  ;;  %v16082_v55 = vld [vmem:[%s22317_s3 + $0x5c4] ss:$16 sps:$4 sm:$0xff]  }
 0x648   :  { %13095 = vmatprep.mubr.bf16.mxu1 %v21099_v7  ;;  %13065 = vmatprep.subr.bf16.mxu1 %v15977_v45  ;;  %v15978_v7 = vld [vmem:[%s22317_s3 + $0x48] ss:$16 sps:$4 sm:$0xff]  }
 0x649   :  { %12982 = vmatpush1.bf16.msra.mxu0 %v15996_v27  ;;  %v16035_v45 = vld [vmem:[%s22317_s3 + $0x1c8] ss:$16 sps:$4 sm:$0xff]   ;;  %v16043_v27 = vld [vmem:[%s22317_s3 + $0x1ec] ss:$16 sps:$4 sm:$0xff]  }
 0x64a   :  { %12983 = vmatprep.subr.bf16.mxu0 %v16004_v59  ;;  %v16080_v59 = vld [vmem:[%s22317_s3 + $0x5c0] ss:$16 sps:$4 sm:$0xff]  }
 0x64b   :  { %13066 = vmatpush1.bf16.msra.mxu1 %v15975_v62  ;;  %v16088_v62 = vld [vmem:[%s22317_s3 + $0x5e4] ss:$16 sps:$4 sm:$0xff]  }
 0x64c   :  { %13067 = vmatprep.subr.bf16.mxu1 %v15980_v63  ;;  %v16041_v63 = vld [vmem:[%s22317_s3 + $0x1e8] ss:$16 sps:$4 sm:$0xff]  }
 0x64d   :  { %12984 = vmatpush1.bf16.msra.mxu0 %v16002_v46  ;;  %v16049_v46 = vld [vmem:[%s22317_s3 + $0x20c] ss:$16 sps:$4 sm:$0xff]  }
 0x64e   :  { %12985 = vmatprep.subr.bf16.mxu0 %v16010_v10  ;;  %v16086_v10 = vld [vmem:[%s22317_s3 + $0x5e0] ss:$16 sps:$4 sm:$0xff]  }
 0x64f   :  { %13068 = vmatpush1.bf16.msra.mxu1 %v15978_v7  ;;  %v16142_v7 = vld [vmem:[%s22317_s3 + $0x604] ss:$16 sps:$4 sm:$0xff]  }
 0x650   :  { %13069 = vmatprep.subr.bf16.mxu1 %v15983_v38  ;;  %v16047_v38 = vld [vmem:[%s22317_s3 + $0x208] ss:$16 sps:$4 sm:$0xff]  }
 0x651   :  { %12986 = vmatpush1.bf16.msra.mxu0 %v16008_v0  ;;  %v16055_v0 = vld [vmem:[%s22317_s3 + $0x22c] ss:$16 sps:$4 sm:$0xff]  }
 0x652   :  { %12987 = vmatprep.subr.bf16.mxu0 %v16016_v50  ;;  %v16053_v50 = vld [vmem:[%s22317_s3 + $0x228] ss:$16 sps:$4 sm:$0xff]  }
 0x653   :  { %13070 = vmatpush1.bf16.msra.mxu1 %v15981_v57  ;;  %v16061_v57 = vld [vmem:[%s22317_s3 + $0x24c] ss:$16 sps:$4 sm:$0xff]  }
 0x654   :  { %13071 = vmatprep.subr.bf16.mxu1 %v15986_v1  ;;  %v16059_v1 = vld [vmem:[%s22317_s3 + $0x248] ss:$16 sps:$4 sm:$0xff]  }
 0x655   :  { %12988 = vmatpush1.bf16.msra.mxu0 %v16014_v53  ;;  %v16073_v53 = vld [vmem:[%s22317_s3 + $0x28c] ss:$16 sps:$4 sm:$0xff]  }
 0x656   :  { %12989 = vmatprep.subr.bf16.mxu0 %v16022_v5  ;;  %v16071_v5 = vld [vmem:[%s22317_s3 + $0x288] ss:$16 sps:$4 sm:$0xff]  }
 0x657   :  { %13072 = vmatpush1.bf16.msra.mxu1 %v15984_v13  ;;  %v1639_v13 = vsub.s32 4, %v19333_v11 }
 0x658   :  { %13073 = vmatprep.subr.bf16.mxu1 %v15989_v16  ;;  %v1643_v16 = vsub.s32 5, %v19333_v11 }
 0x659   :  { %12990 = vmatpush1.bf16.msra.mxu0 %v16020_v19  ;;  %v16079_v19 = vld [vmem:[%s22317_s3 + $0x2ac] ss:$16 sps:$4 sm:$0xff]  }
 0x65a   :  { %12991 = vmatprep.subr.bf16.mxu0 %v16028_v4  ;;  %v1640_v4 = vrot.slane %v21252_v40, %v1639_v13  ;;  %v16121_v13 = vld [vmem:[%s22317_s3 + $0x42c] ss:$16 sps:$4 sm:$0xff]  }
 0x65b   :  { %13074 = vmatpush1.bf16.msra.mxu1 %v15987_v2  ;;  %v16077_v2 = vld [vmem:[%s22317_s3 + $0x2a8] ss:$16 sps:$4 sm:$0xff]  }
 0x65c   :  { %13075 = vmatprep.subr.bf16.mxu1 %v15992_v58  ;;  %v1644_v58 = vrot.slane %v21252_v40, %v1643_v16  ;;  %v16091_v40 = vld [vmem:[%s22317_s3 + $0x2ec] ss:$16 sps:$4 sm:$0xff]   ;;  %v16194_v16 = vld [vmem:[%s22317_s3 + $0x720] ss:$16 sps:$4 sm:$0xff]  }
 0x65d   :  { %12992 = vmatpush1.bf16.msra.mxu0 %v16026_v29  ;;  %v16085_v29 = vld [vmem:[%s22317_s3 + $0x2cc] ss:$16 sps:$4 sm:$0xff]  }
 0x65e   :  { %12993 = vmatprep.subr.bf16.mxu0 %v16034_v9 }
 0x65f   :  { %13076 = vmatpush1.bf16.msra.mxu1 %v15990_v8 }
 0x660   :  { %13077 = vmatprep.subr.bf16.mxu1 %v15995_v14 }
 0x661   :  { %12994 = vmatpush1.bf16.msra.mxu0 %v16032_v15  ;;  %v16083_v15 = vld [vmem:[%s22317_s3 + $0x2c8] ss:$16 sps:$4 sm:$0xff]  }
 0x662   :  { %12995 = vmatprep.subr.bf16.mxu0 %v16040_v12 }
 0x663   :  { %13078 = vmatpush1.bf16.msra.mxu1 %v15993_v60 }
 0x664   :  { %13079 = vmatprep.subr.bf16.mxu1 %v16001_v20 }
 0x665   :  { %12996 = vmatpush1.bf16.msra.mxu0 %v16038_v37 }
 0x666   :  { %12997 = vmatprep.subr.bf16.mxu0 %v16046_v18 }
 0x667   :  { %13080 = vmatpush1.bf16.msra.mxu1 %v15999_v61 }
 0x668   :  { %13081 = vmatprep.subr.bf16.mxu1 %v16007_v17  ;;  %v16089_v17 = vld [vmem:[%s22317_s3 + $0x2e8] ss:$16 sps:$4 sm:$0xff]  }
 0x669   :  { %12998 = vmatpush1.bf16.msra.mxu0 %v16044_v22 }
 0x66a   :  { %12999 = vmatprep.subr.bf16.mxu0 %v16052_v24  ;;  %v16094_v24 = vld [vmem:[%s22317_s3 + $0x30c] ss:$16 sps:$4 sm:$0xff]  }
 0x66b   :  { %13082 = vmatpush1.bf16.msra.mxu1 %v16005_v26 }
 0x66c   :  { %13083 = vmatprep.subr.bf16.mxu1 %v16013_v28  ;;  %v16140_v28 = vld [vmem:[%s22317_s3 + $0x600] ss:$16 sps:$4 sm:$0xff]  }
 0x66d   :  { %13000 = vmatpush1.bf16.msra.mxu0 %v16050_v32 }
 0x66e   :  { %13001 = vmatprep.subr.bf16.mxu0 %v16058_v33  ;;  %v16148_v33 = vld [vmem:[%s22317_s3 + $0x624] ss:$16 sps:$4 sm:$0xff]  }
 0x66f   :  { %13084 = vmatpush1.bf16.msra.mxu1 %v16011_v34  ;;  %v16092_v34 = vld [vmem:[%s22317_s3 + $0x308] ss:$16 sps:$4 sm:$0xff]  }
 0x670   :  { %13085 = vmatprep.subr.bf16.mxu1 %v16019_v36  ;;  %v16097_v36 = vld [vmem:[%s22317_s3 + $0x32c] ss:$16 sps:$4 sm:$0xff]  }
 0x671   :  { %13002 = vmatpush1.bf16.msra.mxu0 %v16056_v25  ;;  %v16146_v25 = vld [vmem:[%s22317_s3 + $0x620] ss:$16 sps:$4 sm:$0xff]  }
 0x672   :  { %13003 = vmatprep.subr.bf16.mxu0 %v16064_v43  ;;  %v16154_v43 = vld [vmem:[%s22317_s3 + $0x644] ss:$16 sps:$4 sm:$0xff]  }
 0x673   :  { %13086 = vmatpush1.bf16.msra.mxu1 %v16017_v44  ;;  %v16095_v44 = vld [vmem:[%s22317_s3 + $0x328] ss:$16 sps:$4 sm:$0xff]  }
 0x674   :  { %13087 = vmatprep.subr.bf16.mxu1 %v16025_v21  ;;  %v16100_v21 = vld [vmem:[%s22317_s3 + $0x34c] ss:$16 sps:$4 sm:$0xff]  }
 0x675   :  { %13004 = vmatpush1.bf16.msra.mxu0 %v16062_v47  ;;  %v16152_v47 = vld [vmem:[%s22317_s3 + $0x640] ss:$16 sps:$4 sm:$0xff]  }
 0x676   :  { %13005 = vmatprep.subr.bf16.mxu0 %v16070_v48  ;;  %v16160_v48 = vld [vmem:[%s22317_s3 + $0x664] ss:$16 sps:$4 sm:$0xff]  }
 0x677   :  { %13088 = vmatpush1.bf16.msra.mxu1 %v16023_v49  ;;  %v16098_v49 = vld [vmem:[%s22317_s3 + $0x348] ss:$16 sps:$4 sm:$0xff]  }
 0x678   :  { %13089 = vmatprep.subr.bf16.mxu1 %v16031_v51  ;;  %v16103_v51 = vld [vmem:[%s22317_s3 + $0x36c] ss:$16 sps:$4 sm:$0xff]  }
 0x679   :  { %13006 = vmatpush1.bf16.msra.mxu0 %v16068_v31  ;;  %v16158_v31 = vld [vmem:[%s22317_s3 + $0x660] ss:$16 sps:$4 sm:$0xff]  }
 0x67a   :  { %13007 = vmatprep.subr.bf16.mxu0 %v16076_v42  ;;  %v16166_v42 = vld [vmem:[%s22317_s3 + $0x684] ss:$16 sps:$4 sm:$0xff]  }
 0x67b   :  { %13090 = vmatpush1.bf16.msra.mxu1 %v16029_v52  ;;  %v16101_v52 = vld [vmem:[%s22317_s3 + $0x368] ss:$16 sps:$4 sm:$0xff]  }
 0x67c   :  { %13091 = vmatprep.subr.bf16.mxu1 %v16037_v54  ;;  %v16106_v54 = vld [vmem:[%s22317_s3 + $0x38c] ss:$16 sps:$4 sm:$0xff]  }
 0x67d   :  { %13008 = vmatpush1.bf16.msra.mxu0 %v16074_v35  ;;  %v16164_v35 = vld [vmem:[%s22317_s3 + $0x680] ss:$16 sps:$4 sm:$0xff]  }
 0x67e   :  { %13009 = vmatprep.subr.bf16.mxu0 %v16082_v55  ;;  %v16172_v55 = vld [vmem:[%s22317_s3 + $0x6a4] ss:$16 sps:$4 sm:$0xff]  }
 0x67f   :  { %13092 = vmatpush1.bf16.msra.mxu1 %v16035_v45  ;;  %v16104_v45 = vld [vmem:[%s22317_s3 + $0x388] ss:$16 sps:$4 sm:$0xff]  }
 0x680   :  { %13093 = vmatprep.subr.bf16.mxu1 %v16043_v27  ;;  %v16109_v27 = vld [vmem:[%s22317_s3 + $0x3ac] ss:$16 sps:$4 sm:$0xff]  }
 0x681   :  { %13010 = vmatpush1.bf16.msra.mxu0 %v16080_v59  ;;  %v16170_v59 = vld [vmem:[%s22317_s3 + $0x6a0] ss:$16 sps:$4 sm:$0xff]  }
 0x682   :  { %13011 = vmatprep.subr.bf16.mxu0 %v16088_v62  ;;  %v16178_v62 = vld [vmem:[%s22317_s3 + $0x6c4] ss:$16 sps:$4 sm:$0xff]  }
 0x683   :  { %13094 = vmatpush1.bf16.msra.mxu1 %v16041_v63  ;;  %v16107_v63 = vld [vmem:[%s22317_s3 + $0x3a8] ss:$16 sps:$4 sm:$0xff]  }
 0x684   :  { %13104 = vmatprep.subr.bf16.mxu1 %v16049_v46  ;;  %v16112_v46 = vld [vmem:[%s22317_s3 + $0x3cc] ss:$16 sps:$4 sm:$0xff]  }
 0x685   :  { %13012 = vmatpush1.bf16.msra.mxu0 %v16086_v10  ;;  %v16176_v10 = vld [vmem:[%s22317_s3 + $0x6c0] ss:$16 sps:$4 sm:$0xff]  }
 0x686   :  { %13096 = vmatmul.mubr.bf16.vlgmr.msra.gmra.mrb[12].mxu1 %v21300_v41  ;;  %13022 = vmatprep.subr.bf16.mxu0 %v16142_v7  ;;  %v16067_v41 = vld [vmem:[%s22317_s3 + $0x26c] ss:$16 sps:$4 sm:$0xff]   ;;  %v16184_v7 = vld [vmem:[%s22317_s3 + $0x6e4] ss:$16 sps:$4 sm:$0xff]  }
 0x687   :  { %13105 = vmatpush1.bf16.msra.mxu1 %v16047_v38  ;;  %13136 = vmatprep.mubr.bf16.mxu1 %v21312_v3  ;;  %v16065_v3 = vld [vmem:[%s22317_s3 + $0x268] ss:$16 sps:$4 sm:$0xff]  }
 0x688   :  { %13106 = vmatprep.subr.bf16.mxu1 %v16055_v0  ;;  %v16110_v38 = vld [vmem:[%s22317_s3 + $0x3c8] ss:$16 sps:$4 sm:$0xff]   ;;  %v16115_v0 = vld [vmem:[%s22317_s3 + $0x3ec] ss:$16 sps:$4 sm:$0xff]  }
 0x68b   :  { %13107 = vmatpush1.bf16.msra.mxu1 %v16053_v50  ;;  %v16182_v50 = vld [vmem:[%s22317_s3 + $0x6e0] ss:$16 sps:$4 sm:$0xff]  }
 0x68c   :  { %13108 = vmatprep.subr.bf16.mxu1 %v16061_v57  ;;  %v16190_v57 = vld [vmem:[%s22317_s3 + $0x704] ss:$16 sps:$4 sm:$0xff]  }
 0x68f   :  { %13109 = vmatpush1.bf16.msra.mxu1 %v16059_v1  ;;  %v16113_v1 = vld [vmem:[%s22317_s3 + $0x3e8] ss:$16 sps:$4 sm:$0xff]  }
 0x690   :  { %13110 = vmatprep.subr.bf16.mxu1 %v16067_v41  ;;  %v16118_v41 = vld [vmem:[%s22317_s3 + $0x40c] ss:$16 sps:$4 sm:$0xff]  }
 0x693   :  { %13111 = vmatpush1.bf16.msra.mxu1 %v16065_v3  ;;  %v16188_v3 = vld [vmem:[%s22317_s3 + $0x700] ss:$16 sps:$4 sm:$0xff]  }
 0x694   :  { %13112 = vmatprep.subr.bf16.mxu1 %v16073_v53  ;;  %v16196_v53 = vld [vmem:[%s22317_s3 + $0x724] ss:$16 sps:$4 sm:$0xff]  }
 0x697   :  { %13113 = vmatpush1.bf16.msra.mxu1 %v16071_v5  ;;  %v16116_v5 = vld [vmem:[%s22317_s3 + $0x408] ss:$16 sps:$4 sm:$0xff]  }
 0x698   :  { %13114 = vmatprep.subr.bf16.mxu1 %v16079_v19  ;;  %v16202_v19 = vld [vmem:[%s22317_s3 + $0x744] ss:$16 sps:$4 sm:$0xff]  }
 0x69a   :  { %v10810_v9 = vpop.f32.mrb[4].mxu0 }
 0x69b   :  { %v15664_v8 = vadd.f32 %v10810_v9, %v1640_v4  ;;  %v10812_v14 = vpop.f32.mrb[5].mxu0  ;;  %13115 = vmatpush1.bf16.msra.mxu1 %v16077_v2  ;;  %v16119_v4 = vld [vmem:[%s22317_s3 + $0x428] ss:$16 sps:$4 sm:$0xff]   ;;  %v16124_v2 = vld [vmem:[%s22317_s3 + $0x44c] ss:$16 sps:$4 sm:$0xff]  }
 0x69c   :  { %v15665_v12 = vadd.f32 %v10812_v14, %v1644_v58  ;;  %v10814_v60 = vpop.f32.mrb[6].mxu0  ;;  %13116 = vmatprep.subr.bf16.mxu1 %v16085_v29  ;;  %v16208_v58 = vld [vmem:[%s22317_s3 + $0x764] ss:$16 sps:$4 sm:$0xff]   ;;  %v16122_v29 = vld [vmem:[%s22317_s3 + $0x448] ss:$16 sps:$4 sm:$0xff]  }
 0x69d   :  { %vm11313_vm4 = vcmp.gt.f32.partialorder %v15664_v8, 0.0  ;;  %v11321_v20 = vmul.f32 0.2, %v15664_v8  ;;  %v10815_v37 = vpop.f32.mrb[7].mxu0  ;;  %v16127_v9 = vld [vmem:[%s22317_s3 + $0x46c] ss:$16 sps:$4 sm:$0xff]  }
 0x69e   :  { %vm11314_vm5 = vcmp.gt.f32.partialorder %v15665_v12, 0.0  ;;  %v11322_v18 = vmul.f32 0.2, %v15665_v12  ;;  %v16214_v14 = vld [vmem:[%s22317_s3 + $0x784] ss:$16 sps:$4 sm:$0xff]  }
 0x69f   :  { %v11329_v61 = vsel %vm11313_vm4, %v15664_v8, %v11321_v20  ;;  %13117 = vmatpush1.bf16.msra.mxu1 %v16083_v15  ;;  %v16206_v8 = vld [vmem:[%s22317_s3 + $0x760] ss:$16 sps:$4 sm:$0xff]   ;;  %v16125_v15 = vld [vmem:[%s22317_s3 + $0x468] ss:$16 sps:$4 sm:$0xff]   ;;  %v16133_v37 = vld [vmem:[%s22317_s3 + $0x4ac] ss:$16 sps:$4 sm:$0xff]  }
 0x6a0   :  { %v11330_v22 = vsel %vm11314_vm5, %v15665_v12, %v11322_v18  ;;  %13118 = vmatprep.subr.bf16.mxu1 %v16091_v40  ;;  %v21749_v32 = vpack.c.bf16 %v11329_v61, %v11329_v61  ;;  %v16130_v12 = vld [vmem:[%s22317_s3 + $0x48c] ss:$16 sps:$4 sm:$0xff]   ;;  %v16212_v60 = vld [vmem:[%s22317_s3 + $0x780] ss:$16 sps:$4 sm:$0xff]   ;;  %v16220_v40 = vld [vmem:[%s22317_s3 + $0x7a4] ss:$16 sps:$4 sm:$0xff]  }
 0x6a1   :  { %v21744_v26 = vpack.c.bf16 %v11330_v22, %v11330_v22  ;;  %v16128_v20 = vld [vmem:[%s22317_s3 + $0x488] ss:$16 sps:$4 sm:$0xff]   ;;  %v16218_v18 = vld [vmem:[%s22317_s3 + $0x7a0] ss:$16 sps:$4 sm:$0xff]   ;;  %v16226_v61 = vld [vmem:[%s22317_s3 + $0x7c4] ss:$16 sps:$4 sm:$0xff]  }
 0x6a2   :  { %v16136_v22 = vld [vmem:[%s22317_s3 + $0x4cc] ss:$16 sps:$4 sm:$0xff]  }
 0x6a3   :  { %13013 = vmatprep.mubr.bf16.mxu0 %v21744_v26  ;;  %13119 = vmatpush1.bf16.msra.mxu1 %v16089_v17  ;;  %v16131_v17 = vld [vmem:[%s22317_s3 + $0x4a8] ss:$16 sps:$4 sm:$0xff]  }
 0x6a4   :  { %13014 = vmatmul.mubr.bf16.vlgmr.msra.gmra.mrb[8].mxu0 %v21749_v32  ;;  %13120 = vmatprep.subr.bf16.mxu1 %v16094_v24  ;;  %v16134_v24 = vld [vmem:[%s22317_s3 + $0x4c8] ss:$16 sps:$4 sm:$0xff]  }
 0x6a5   :  { %13023 = vmatpush1.bf16.msra.mxu0 %v16140_v28  ;;  %v16232_v28 = vld [vmem:[%s22317_s3 + $0x7e4] ss:$16 sps:$4 sm:$0xff]  }
 0x6a6   :  { %13024 = vmatprep.subr.bf16.mxu0 %v16148_v33  ;;  %v16139_v33 = vld [vmem:[%s22317_s3 + $0x4ec] ss:$16 sps:$4 sm:$0xff]  }
 0x6a7   :  { %13121 = vmatpush1.bf16.msra.mxu1 %v16092_v34  ;;  %v16230_v34 = vld [vmem:[%s22317_s3 + $0x7e0] ss:$16 sps:$4 sm:$0xff]  }
 0x6a8   :  { %13122 = vmatprep.subr.bf16.mxu1 %v16097_v36  ;;  %v16262_v36 = vld [vmem:[%s22318_s5 + $0x4] ss:$8 sps:$4 sm:$0xff]  }
 0x6a9   :  { %13025 = vmatpush1.bf16.msra.mxu0 %v16146_v25  ;;  %v16137_v25 = vld [vmem:[%s22317_s3 + $0x4e8] ss:$16 sps:$4 sm:$0xff]  }
 0x6aa   :  { %13026 = vmatprep.subr.bf16.mxu0 %v16154_v43  ;;  %v16145_v43 = vld [vmem:[%s22317_s3 + $0x50c] ss:$16 sps:$4 sm:$0xff]  }
 0x6ab   :  { %13123 = vmatpush1.bf16.msra.mxu1 %v16095_v44  ;;  %v16143_v44 = vld [vmem:[%s22317_s3 + $0x508] ss:$16 sps:$4 sm:$0xff]  }
 0x6ac   :  { %13124 = vmatprep.subr.bf16.mxu1 %v16100_v21  ;;  %v16151_v21 = vld [vmem:[%s22317_s3 + $0x52c] ss:$16 sps:$4 sm:$0xff]  }
 0x6ad   :  { %13027 = vmatpush1.bf16.msra.mxu0 %v16152_v47  ;;  %v16149_v47 = vld [vmem:[%s22317_s3 + $0x528] ss:$16 sps:$4 sm:$0xff]  }
 0x6ae   :  { %13028 = vmatprep.subr.bf16.mxu0 %v16160_v48  ;;  %v16157_v48 = vld [vmem:[%s22317_s3 + $0x54c] ss:$16 sps:$4 sm:$0xff]  }
 0x6af   :  { %13125 = vmatpush1.bf16.msra.mxu1 %v16098_v49  ;;  %v16155_v49 = vld [vmem:[%s22317_s3 + $0x548] ss:$16 sps:$4 sm:$0xff]  }
 0x6b0   :  { %13126 = vmatprep.subr.bf16.mxu1 %v16103_v51  ;;  %v16163_v51 = vld [vmem:[%s22317_s3 + $0x56c] ss:$16 sps:$4 sm:$0xff]  }
 0x6b1   :  { %13029 = vmatpush1.bf16.msra.mxu0 %v16158_v31  ;;  %v16161_v31 = vld [vmem:[%s22317_s3 + $0x568] ss:$16 sps:$4 sm:$0xff]  }
 0x6b2   :  { %13030 = vmatprep.subr.bf16.mxu0 %v16166_v42  ;;  %v16169_v42 = vld [vmem:[%s22317_s3 + $0x58c] ss:$16 sps:$4 sm:$0xff]  }
 0x6b3   :  { %13127 = vmatpush1.bf16.msra.mxu1 %v16101_v52  ;;  %v16167_v52 = vld [vmem:[%s22317_s3 + $0x588] ss:$16 sps:$4 sm:$0xff]  }
 0x6b4   :  { %13128 = vmatprep.subr.bf16.mxu1 %v16106_v54  ;;  %v16175_v54 = vld [vmem:[%s22317_s3 + $0x5ac] ss:$16 sps:$4 sm:$0xff]  }
 0x6b5   :  { %13031 = vmatpush1.bf16.msra.mxu0 %v16164_v35  ;;  %v16173_v35 = vld [vmem:[%s22317_s3 + $0x5a8] ss:$16 sps:$4 sm:$0xff]  }
 0x6b6   :  { %13032 = vmatprep.subr.bf16.mxu0 %v16172_v55  ;;  %v16181_v55 = vld [vmem:[%s22317_s3 + $0x5cc] ss:$16 sps:$4 sm:$0xff]  }
 0x6b7   :  { %13129 = vmatpush1.bf16.msra.mxu1 %v16104_v45  ;;  %v16179_v45 = vld [vmem:[%s22317_s3 + $0x5c8] ss:$16 sps:$4 sm:$0xff]  }
 0x6b8   :  { %13130 = vmatprep.subr.bf16.mxu1 %v16109_v27  ;;  %v16187_v27 = vld [vmem:[%s22317_s3 + $0x5ec] ss:$16 sps:$4 sm:$0xff]  }
 0x6b9   :  { %13033 = vmatpush1.bf16.msra.mxu0 %v16170_v59  ;;  %v16185_v59 = vld [vmem:[%s22317_s3 + $0x5e8] ss:$16 sps:$4 sm:$0xff]  }
 0x6ba   :  { %13034 = vmatprep.subr.bf16.mxu0 %v16178_v62  ;;  %v16193_v62 = vld [vmem:[%s22317_s3 + $0x60c] ss:$16 sps:$4 sm:$0xff]  }
 0x6bb   :  { %13131 = vmatpush1.bf16.msra.mxu1 %v16107_v63  ;;  %v16191_v63 = vld [vmem:[%s22317_s3 + $0x608] ss:$16 sps:$4 sm:$0xff]  }
 0x6bc   :  { %13132 = vmatprep.subr.bf16.mxu1 %v16112_v46  ;;  %v16199_v46 = vld [vmem:[%s22317_s3 + $0x62c] ss:$16 sps:$4 sm:$0xff]  }
 0x6bd   :  { %13035 = vmatpush1.bf16.msra.mxu0 %v16176_v10  ;;  %v16197_v10 = vld [vmem:[%s22317_s3 + $0x628] ss:$16 sps:$4 sm:$0xff]  }
 0x6be   :  { %13036 = vmatprep.subr.bf16.mxu0 %v16184_v7  ;;  %v16205_v7 = vld [vmem:[%s22317_s3 + $0x64c] ss:$16 sps:$4 sm:$0xff]  }
 0x6bf   :  { %13133 = vmatpush1.bf16.msra.mxu1 %v16110_v38  ;;  %v16203_v38 = vld [vmem:[%s22317_s3 + $0x648] ss:$16 sps:$4 sm:$0xff]  }
 0x6c0   :  { %13134 = vmatprep.subr.bf16.mxu1 %v16115_v0  ;;  %v16209_v0 = vld [vmem:[%s22317_s3 + $0x668] ss:$16 sps:$4 sm:$0xff]  }
 0x6c1   :  { %13037 = vmatpush1.bf16.msra.mxu0 %v16182_v50  ;;  %v16217_v50 = vld [vmem:[%s22317_s3 + $0x68c] ss:$16 sps:$4 sm:$0xff]  }
 0x6c2   :  { %13038 = vmatprep.subr.bf16.mxu0 %v16190_v57  ;;  %v1647_v57 = vsub.s32 6, %v19333_v11 }
 0x6c3   :  { %13135 = vmatpush1.bf16.msra.mxu1 %v16113_v1  ;;  %v16215_v1 = vld [vmem:[%s22317_s3 + $0x688] ss:$16 sps:$4 sm:$0xff]  }
 0x6c4   :  { %13145 = vmatprep.subr.bf16.mxu1 %v16118_v41  ;;  %v1651_v41 = vsub.s32 7, %v19333_v11  ;;  %v16355_v11 = vld [vmem:[%s22318_s5 + $0x1f4] ss:$8 sps:$4 sm:$0xff]  }
 0x6c5   :  { %13039 = vmatpush1.bf16.msra.mxu0 %v16188_v3  ;;  %v16223_v3 = vld [vmem:[%s22317_s3 + $0x6ac] ss:$16 sps:$4 sm:$0xff]  }
 0x6c6   :  { %13137 = vmatmul.mubr.bf16.vlgmr.msra.gmra.mrb[12].mxu1 %v21499_v56  ;;  %13040 = vmatprep.subr.bf16.mxu0 %v16196_v53  ;;  %v16200_v56 = vld [vmem:[%s22317_s3 + $0x740] ss:$16 sps:$4 sm:$0xff]  }
 0x6c7   :  { %13146 = vmatpush1.bf16.msra.mxu1 %v16116_v5  ;;  %13177 = vmatprep.mubr.bf16.mxu1 %v21744_v26  ;;  %v16224_v26 = vld [vmem:[%s22317_s3 + $0x7c0] ss:$16 sps:$4 sm:$0xff]  }
 0x6c8   :  { %13147 = vmatprep.subr.bf16.mxu1 %v16121_v13  ;;  %v16363_v53 = vld [vmem:[%s22316_s2] sm:$0xff] }
 0x6c9   :  { %13041 = vmatpush1.bf16.msra.mxu0 %v16194_v16  ;;  %v1648_v5 = vrot.slane %v16363_v53, %v1647_v57  ;;  %v1652_v13 = vrot.slane %v16363_v53, %v1651_v41  ;;  %v16221_v16 = vld [vmem:[%s22317_s3 + $0x6a8] ss:$16 sps:$4 sm:$0xff]   ;;  %v16292_v57 = vld [vmem:[%s22318_s5 + $0xa4] ss:$8 sps:$4 sm:$0xff]   ;;  %v16295_v41 = vld [vmem:[%s22318_s5 + $0xb4] ss:$8 sps:$4 sm:$0xff]  }
 0x6ca   :  { %13042 = vmatprep.subr.bf16.mxu0 %v16202_v19  ;;  %v16229_v19 = vld [vmem:[%s22317_s3 + $0x6cc] ss:$16 sps:$4 sm:$0xff]  }
 0x6cb   :  { %13148 = vmatpush1.bf16.msra.mxu1 %v16119_v4  ;;  %v16298_v53 = vld [vmem:[%s22318_s5 + $0xc4] ss:$8 sps:$4 sm:$0xff]  }
 0x6cc   :  { %13149 = vmatprep.subr.bf16.mxu1 %v16124_v2 }
 0x6cd   :  { %13043 = vmatpush1.bf16.msra.mxu0 %v16200_v56 }
 0x6ce   :  { %13044 = vmatprep.subr.bf16.mxu0 %v16208_v58 }
 0x6cf   :  { %13150 = vmatpush1.bf16.msra.mxu1 %v16122_v29 }
 0x6d0   :  { %13151 = vmatprep.subr.bf16.mxu1 %v16127_v9  ;;  %v16227_v9 = vld [vmem:[%s22317_s3 + $0x6c8] ss:$16 sps:$4 sm:$0xff]  }
 0x6d1   :  { %13045 = vmatpush1.bf16.msra.mxu0 %v16206_v8 }
 0x6d2   :  { %13046 = vmatprep.subr.bf16.mxu0 %v16214_v14 }
 0x6d3   :  { %13152 = vmatpush1.bf16.msra.mxu1 %v16125_v15  ;;  %v16235_v15 = vld [vmem:[%s22317_s3 + $0x6ec] ss:$16 sps:$4 sm:$0xff]  }
 0x6d4   :  { %13153 = vmatprep.subr.bf16.mxu1 %v16130_v12 }
 0x6d5   :  { %13047 = vmatpush1.bf16.msra.mxu0 %v16212_v60 }
 0x6d6   :  { %13048 = vmatprep.subr.bf16.mxu0 %v16220_v40 }
 0x6d7   :  { %13154 = vmatpush1.bf16.msra.mxu1 %v16128_v20  ;;  %v16233_v20 = vld [vmem:[%s22317_s3 + $0x6e8] ss:$16 sps:$4 sm:$0xff]  }
 0x6d8   :  { %13155 = vmatprep.subr.bf16.mxu1 %v16133_v37 }
 0x6d9   :  { %13049 = vmatpush1.bf16.msra.mxu0 %v16218_v18  ;;  %v16238_v18 = vld [vmem:[%s22317_s3 + $0x70c] ss:$16 sps:$4 sm:$0xff]  }
 0x6da   :  { %13050 = vmatprep.subr.bf16.mxu0 %v16226_v61  ;;  %v16260_v61 = vld [vmem:[%s22318_s5] ss:$8 sps:$4 sm:$0xff]  }
 0x6db   :  { %13156 = vmatpush1.bf16.msra.mxu1 %v16131_v17 }
 0x6dc   :  { %13157 = vmatprep.subr.bf16.mxu1 %v16136_v22  ;;  %v16265_v22 = vld [vmem:[%s22318_s5 + $0x14] ss:$8 sps:$4 sm:$0xff]  }
 0x6dd   :  { %13051 = vmatpush1.bf16.msra.mxu0 %v16224_v26  ;;  %v16241_v26 = vld [vmem:[%s22317_s3 + $0x72c] ss:$16 sps:$4 sm:$0xff]  }
 0x6de   :  { %13052 = vmatprep.subr.bf16.mxu0 %v16232_v28  ;;  %v16263_v28 = vld [vmem:[%s22318_s5 + $0x10] ss:$8 sps:$4 sm:$0xff]  }
 0x6df   :  { %13158 = vmatpush1.bf16.msra.mxu1 %v16134_v24  ;;  %v16236_v24 = vld [vmem:[%s22317_s3 + $0x708] ss:$16 sps:$4 sm:$0xff]  }
 0x6e0   :  { %13159 = vmatprep.subr.bf16.mxu1 %v16139_v33  ;;  %v16268_v33 = vld [vmem:[%s22318_s5 + $0x24] ss:$8 sps:$4 sm:$0xff]  }
 0x6e1   :  { %13053 = vmatpush1.bf16.msra.mxu0 %v16230_v34  ;;  %v16239_v34 = vld [vmem:[%s22317_s3 + $0x728] ss:$16 sps:$4 sm:$0xff]  }
 0x6e2   :  { %13639 = vmatprep.subr.bf16.mxu0 %v16262_v36  ;;  %v16244_v36 = vld [vmem:[%s22317_s3 + $0x74c] ss:$16 sps:$4 sm:$0xff]  }
 0x6e3   :  { %13160 = vmatpush1.bf16.msra.mxu1 %v16137_v25  ;;  %v16266_v25 = vld [vmem:[%s22318_s5 + $0x20] ss:$8 sps:$4 sm:$0xff]  }
 0x6e4   :  { %13161 = vmatprep.subr.bf16.mxu1 %v16145_v43  ;;  %v16271_v43 = vld [vmem:[%s22318_s5 + $0x34] ss:$8 sps:$4 sm:$0xff]  }
 0x6e7   :  { %13162 = vmatpush1.bf16.msra.mxu1 %v16143_v44  ;;  %v16242_v44 = vld [vmem:[%s22317_s3 + $0x748] ss:$16 sps:$4 sm:$0xff]  }
 0x6e8   :  { %13163 = vmatprep.subr.bf16.mxu1 %v16151_v21  ;;  %v16247_v21 = vld [vmem:[%s22317_s3 + $0x76c] ss:$16 sps:$4 sm:$0xff]  }
 0x6eb   :  { %13164 = vmatpush1.bf16.msra.mxu1 %v16149_v47  ;;  %v16269_v47 = vld [vmem:[%s22318_s5 + $0x30] ss:$8 sps:$4 sm:$0xff]  }
 0x6ec   :  { %13165 = vmatprep.subr.bf16.mxu1 %v16157_v48  ;;  %v16274_v48 = vld [vmem:[%s22318_s5 + $0x44] ss:$8 sps:$4 sm:$0xff]  }
 0x6ef   :  { %13166 = vmatpush1.bf16.msra.mxu1 %v16155_v49  ;;  %v16245_v49 = vld [vmem:[%s22317_s3 + $0x768] ss:$16 sps:$4 sm:$0xff]  }
 0x6f0   :  { %13167 = vmatprep.subr.bf16.mxu1 %v16163_v51  ;;  %v16250_v51 = vld [vmem:[%s22317_s3 + $0x78c] ss:$16 sps:$4 sm:$0xff]  }
 0x6f3   :  { %13168 = vmatpush1.bf16.msra.mxu1 %v16161_v31  ;;  %v16272_v31 = vld [vmem:[%s22318_s5 + $0x40] ss:$8 sps:$4 sm:$0xff]  }
 0x6f4   :  { %13169 = vmatprep.subr.bf16.mxu1 %v16169_v42  ;;  %v16277_v42 = vld [vmem:[%s22318_s5 + $0x54] ss:$8 sps:$4 sm:$0xff]  }
 0x6f7   :  { %13170 = vmatpush1.bf16.msra.mxu1 %v16167_v52  ;;  %v16248_v52 = vld [vmem:[%s22317_s3 + $0x788] ss:$16 sps:$4 sm:$0xff]  }
 0x6f8   :  { %13171 = vmatprep.subr.bf16.mxu1 %v16175_v54  ;;  %v16253_v54 = vld [vmem:[%s22317_s3 + $0x7ac] ss:$16 sps:$4 sm:$0xff]  }
 0x6fb   :  { %13172 = vmatpush1.bf16.msra.mxu1 %v16173_v35  ;;  %v16275_v35 = vld [vmem:[%s22318_s5 + $0x50] ss:$8 sps:$4 sm:$0xff]  }
 0x6fc   :  { %13173 = vmatprep.subr.bf16.mxu1 %v16181_v55  ;;  %v16280_v55 = vld [vmem:[%s22318_s5 + $0x64] ss:$8 sps:$4 sm:$0xff]  }
 0x6ff   :  { %13174 = vmatpush1.bf16.msra.mxu1 %v16179_v45  ;;  %v16251_v45 = vld [vmem:[%s22317_s3 + $0x7a8] ss:$16 sps:$4 sm:$0xff]  }
 0x700   :  { %13175 = vmatprep.subr.bf16.mxu1 %v16187_v27  ;;  %v16256_v27 = vld [vmem:[%s22317_s3 + $0x7cc] ss:$16 sps:$4 sm:$0xff]  }
 0x703   :  { %13176 = vmatpush1.bf16.msra.mxu1 %v16185_v59  ;;  %v16278_v59 = vld [vmem:[%s22318_s5 + $0x60] ss:$8 sps:$4 sm:$0xff]  }
 0x704   :  { %13186 = vmatprep.subr.bf16.mxu1 %v16193_v62  ;;  %v16283_v62 = vld [vmem:[%s22318_s5 + $0x74] ss:$8 sps:$4 sm:$0xff]  }
 0x706   :  { %13178 = vmatmul.mubr.bf16.vlgmr.msra.gmra.mrb[12].mxu1 %v21749_v32  ;;  %v16211_v32 = vld [vmem:[%s22317_s3 + $0x66c] ss:$16 sps:$4 sm:$0xff]  }
 0x707   :  { %13187 = vmatpush1.bf16.msra.mxu1 %v16191_v63  ;;  %v16254_v63 = vld [vmem:[%s22317_s3 + $0x7c8] ss:$16 sps:$4 sm:$0xff]  }
 0x708   :  { %13188 = vmatprep.subr.bf16.mxu1 %v16199_v46  ;;  %v16259_v46 = vld [vmem:[%s22317_s3 + $0x7ec] ss:$16 sps:$4 sm:$0xff]  }
 0x70b   :  { %13189 = vmatpush1.bf16.msra.mxu1 %v16197_v10  ;;  %v16281_v10 = vld [vmem:[%s22318_s5 + $0x70] ss:$8 sps:$4 sm:$0xff]  }
 0x70c   :  { %13190 = vmatprep.subr.bf16.mxu1 %v16205_v7  ;;  %v16286_v7 = vld [vmem:[%s22318_s5 + $0x84] ss:$8 sps:$4 sm:$0xff]  }
 0x70f   :  { %13191 = vmatpush1.bf16.msra.mxu1 %v16203_v38  ;;  %v16257_v38 = vld [vmem:[%s22317_s3 + $0x7e8] ss:$16 sps:$4 sm:$0xff]  }
 0x710   :  { %13192 = vmatprep.subr.bf16.mxu1 %v16211_v32  ;;  %v16284_v32 = vld [vmem:[%s22318_s5 + $0x80] ss:$8 sps:$4 sm:$0xff]  }
 0x713   :  { %13193 = vmatpush1.bf16.msra.mxu1 %v16209_v0  ;;  %v16289_v0 = vld [vmem:[%s22318_s5 + $0x94] ss:$8 sps:$4 sm:$0xff]  }
 0x714   :  { %13194 = vmatprep.subr.bf16.mxu1 %v16217_v50  ;;  %v16287_v50 = vld [vmem:[%s22318_s5 + $0x90] ss:$8 sps:$4 sm:$0xff]  }
 0x717   :  { %13195 = vmatpush1.bf16.msra.mxu1 %v16215_v1  ;;  %v16290_v1 = vld [vmem:[%s22318_s5 + $0xa0] ss:$8 sps:$4 sm:$0xff]  }
 0x718   :  { %13196 = vmatprep.subr.bf16.mxu1 %v16223_v3  ;;  %v16293_v3 = vld [vmem:[%s22318_s5 + $0xb0] ss:$8 sps:$4 sm:$0xff]  }
 0x719   :  { %v11302_v4 = vpop.f32.mrb[8].mxu1 }
 0x71a   :  { %v15666_v2 = vadd.f32 %v11302_v4, %v1648_v5  ;;  %v11304_v56 = vpop.f32.mrb[9].mxu1  ;;  %v16296_v5 = vld [vmem:[%s22318_s5 + $0xc0] ss:$8 sps:$4 sm:$0xff]  }
 0x71b   :  { %v15667_v58 = vadd.f32 %v11304_v56, %v1652_v13  ;;  %v11306_v29 = vpop.f32.mrb[10].mxu1  ;;  %13197 = vmatpush1.bf16.msra.mxu1 %v16221_v16  ;;  %v16301_v13 = vld [vmem:[%s22318_s5 + $0xd4] ss:$8 sps:$4 sm:$0xff]   ;;  %v16299_v16 = vld [vmem:[%s22318_s5 + $0xd0] ss:$8 sps:$4 sm:$0xff]  }
 0x71c   :  { %vm11315_vm6 = vcmp.gt.f32.partialorder %v15666_v2, 0.0  ;;  %v11323_v8 = vmul.f32 0.2, %v15666_v2  ;;  %v11307_v14 = vpop.f32.mrb[11].mxu1  ;;  %13198 = vmatprep.subr.bf16.mxu1 %v16229_v19  ;;  %v16304_v19 = vld [vmem:[%s22318_s5 + $0xe4] ss:$8 sps:$4 sm:$0xff]  }
 0x71d   :  { %vm11316_vm7 = vcmp.gt.f32.partialorder %v15667_v58, 0.0  ;;  %v11324_v12 = vmul.f32 0.2, %v15667_v58  ;;  %v16302_v4 = vld [vmem:[%s22318_s5 + $0xe0] ss:$8 sps:$4 sm:$0xff]  }
 0x71e   :  { %v11331_v60 = vsel %vm11315_vm6, %v15666_v2, %v11323_v8  ;;  %v16307_v2 = vld [vmem:[%s22318_s5 + $0xf4] ss:$8 sps:$4 sm:$0xff]   ;;  %v16305_v56 = vld [vmem:[%s22318_s5 + $0xf0] ss:$8 sps:$4 sm:$0xff]   ;;  %v22194_v29 = vld [vmem:[%s22319_s4] sm:$0xf] }
 0x71f   :  { %13199 = vmatpush1.bf16.msra.mxu1 %v16227_v9  ;;  %v11332_v40 = vsel %vm11316_vm7, %v15667_v58, %v11324_v12  ;;  %v22049_v17 = vpack.c.bf16 %v11331_v60, %v11331_v60  ;;  %v16310_v58 = vld [vmem:[%s22318_s5 + $0x104] ss:$8 sps:$4 sm:$0xff]   ;;  %v11602_v9 = vrot.slane %v22194_v29, %v19348_v30  ;;  %v11606_v8 = vrot.slane %v22194_v29, %v19360_v39 }
 0x720   :  { %v11340_v37 = vpack.c.bf16 %v11332_v40, %v11332_v40  ;;  %13200 = vmatprep.subr.bf16.mxu1 %v16235_v15 }
 0x722   :  { %13054 = vmatprep.mubr.bf16.mxu0 %v11340_v37  ;;  %13218 = vmatprep.mubr.bf16.mxu1 %v11340_v37 }
 0x723   :  { %13055 = vmatmul.mubr.bf16.vlgmr.msra.gmra.mrb[8].mxu0 %v22049_v17  ;;  %13201 = vmatpush1.bf16.msra.mxu1 %v16233_v20 }
 0x724   :  { %13202 = vmatprep.subr.bf16.mxu1 %v16238_v18  ;;  %13640 = vmatpush1.bf16.msra.mxu0 %v16260_v61 }
 0x725   :  { %13641 = vmatprep.subr.bf16.mxu0 %v16265_v22 }
 0x727   :  { %13203 = vmatpush1.bf16.msra.mxu1 %v16236_v24  ;;  %v16308_v24 = vld [vmem:[%s22318_s5 + $0x100] ss:$8 sps:$4 sm:$0xff]  }
 0x728   :  { %13204 = vmatprep.subr.bf16.mxu1 %v16241_v26  ;;  %13642 = vmatpush1.bf16.msra.mxu0 %v16263_v28  ;;  %v16313_v28 = vld [vmem:[%s22318_s5 + $0x114] ss:$8 sps:$4 sm:$0xff]  }
 0x729   :  { %13643 = vmatprep.subr.bf16.mxu0 %v16268_v33  ;;  %v16311_v33 = vld [vmem:[%s22318_s5 + $0x110] ss:$8 sps:$4 sm:$0xff]  }
 0x72b   :  { %13205 = vmatpush1.bf16.msra.mxu1 %v16239_v34  ;;  %v16316_v34 = vld [vmem:[%s22318_s5 + $0x124] ss:$8 sps:$4 sm:$0xff]  }
 0x72c   :  { %13206 = vmatprep.subr.bf16.mxu1 %v16244_v36  ;;  %13644 = vmatpush1.bf16.msra.mxu0 %v16266_v25  ;;  %v16314_v36 = vld [vmem:[%s22318_s5 + $0x120] ss:$8 sps:$4 sm:$0xff]   ;;  %v16319_v25 = vld [vmem:[%s22318_s5 + $0x134] ss:$8 sps:$4 sm:$0xff]  }
 0x72d   :  { %13645 = vmatprep.subr.bf16.mxu0 %v16271_v43  ;;  %v16317_v43 = vld [vmem:[%s22318_s5 + $0x130] ss:$8 sps:$4 sm:$0xff]  }
 0x72f   :  { %13207 = vmatpush1.bf16.msra.mxu1 %v16242_v44  ;;  %v16322_v44 = vld [vmem:[%s22318_s5 + $0x144] ss:$8 sps:$4 sm:$0xff]  }
 0x730   :  { %13208 = vmatprep.subr.bf16.mxu1 %v16247_v21  ;;  %13646 = vmatpush1.bf16.msra.mxu0 %v16269_v47  ;;  %v16320_v21 = vld [vmem:[%s22318_s5 + $0x140] ss:$8 sps:$4 sm:$0xff]   ;;  %v16325_v47 = vld [vmem:[%s22318_s5 + $0x154] ss:$8 sps:$4 sm:$0xff]  }
 0x731   :  { %13647 = vmatprep.subr.bf16.mxu0 %v16274_v48  ;;  %v16323_v48 = vld [vmem:[%s22318_s5 + $0x150] ss:$8 sps:$4 sm:$0xff]  }
 0x733   :  { %13209 = vmatpush1.bf16.msra.mxu1 %v16245_v49  ;;  %v16328_v49 = vld [vmem:[%s22318_s5 + $0x164] ss:$8 sps:$4 sm:$0xff]  }
 0x734   :  { %13210 = vmatprep.subr.bf16.mxu1 %v16250_v51  ;;  %13648 = vmatpush1.bf16.msra.mxu0 %v16272_v31  ;;  %v16326_v51 = vld [vmem:[%s22318_s5 + $0x160] ss:$8 sps:$4 sm:$0xff]   ;;  %v16331_v31 = vld [vmem:[%s22318_s5 + $0x174] ss:$8 sps:$4 sm:$0xff]  }
 0x735   :  { %13649 = vmatprep.subr.bf16.mxu0 %v16277_v42  ;;  %v11614_v42 = vrot.slane %v22194_v29, %v1635_v23  ;;  %v16332_v23 = vld [vmem:[%s22318_s5 + $0x180] ss:$8 sps:$4 sm:$0xff]  }
 0x737   :  { %13211 = vmatpush1.bf16.msra.mxu1 %v16248_v52 }
 0x738   :  { %13212 = vmatprep.subr.bf16.mxu1 %v16253_v54  ;;  %13650 = vmatpush1.bf16.msra.mxu0 %v16275_v35  ;;  %v16329_v54 = vld [vmem:[%s22318_s5 + $0x170] ss:$8 sps:$4 sm:$0xff]  }
 0x739   :  { %13651 = vmatprep.subr.bf16.mxu0 %v16280_v55  ;;  %v16334_v55 = vld [vmem:[%s22318_s5 + $0x184] ss:$8 sps:$4 sm:$0xff]  }
 0x73b   :  { %13213 = vmatpush1.bf16.msra.mxu1 %v16251_v45 }
 0x73c   :  { %13214 = vmatprep.subr.bf16.mxu1 %v16256_v27  ;;  %13652 = vmatpush1.bf16.msra.mxu0 %v16278_v59 }
 0x73d   :  { %13653 = vmatprep.subr.bf16.mxu0 %v16283_v62 }
 0x73f   :  { %13215 = vmatpush1.bf16.msra.mxu1 %v16254_v63  ;;  %v16337_v63 = vld [vmem:[%s22318_s5 + $0x194] ss:$8 sps:$4 sm:$0xff]  }
 0x740   :  { %13216 = vmatprep.subr.bf16.mxu1 %v16259_v46  ;;  %13654 = vmatpush1.bf16.msra.mxu0 %v16281_v10 }
 0x741   :  { %13655 = vmatprep.subr.bf16.mxu0 %v16286_v7  ;;  %v16335_v7 = vld [vmem:[%s22318_s5 + $0x190] ss:$8 sps:$4 sm:$0xff]  }
 0x743   :  { %13217 = vmatpush1.bf16.msra.mxu1 %v16257_v38  ;;  %v16340_v38 = vld [vmem:[%s22318_s5 + $0x1a4] ss:$8 sps:$4 sm:$0xff]  }
 0x744   :  { %13656 = vmatpush1.bf16.msra.mxu0 %v16284_v32  ;;  %v16338_v32 = vld [vmem:[%s22318_s5 + $0x1a0] ss:$8 sps:$4 sm:$0xff]  }
 0x745   :  { %13657 = vmatprep.subr.bf16.mxu0 %v16289_v0  ;;  %v16343_v0 = vld [vmem:[%s22318_s5 + $0x1b4] ss:$8 sps:$4 sm:$0xff]  }
 0x746   :  { %13219 = vmatmul.mubr.bf16.vlgmr.msra.gmra.mrb[12].mxu1 %v22049_v17 }
 0x748   :  { %13658 = vmatpush1.bf16.msra.mxu0 %v16287_v50  ;;  %v16341_v50 = vld [vmem:[%s22318_s5 + $0x1b0] ss:$8 sps:$4 sm:$0xff]  }
 0x749   :  { %13659 = vmatprep.subr.bf16.mxu0 %v16292_v57  ;;  %v16346_v57 = vld [vmem:[%s22318_s5 + $0x1c4] ss:$8 sps:$4 sm:$0xff]  }
 0x74c   :  { %13660 = vmatpush1.bf16.msra.mxu0 %v16290_v1  ;;  %v16344_v1 = vld [vmem:[%s22318_s5 + $0x1c0] ss:$8 sps:$4 sm:$0xff]  }
 0x74d   :  { %13661 = vmatprep.subr.bf16.mxu0 %v16295_v41  ;;  %v16349_v41 = vld [vmem:[%s22318_s5 + $0x1d4] ss:$8 sps:$4 sm:$0xff]  }
 0x750   :  { %13662 = vmatpush1.bf16.msra.mxu0 %v16293_v3  ;;  %v11610_v3 = vrot.slane %v22194_v29, %v1631_v6  ;;  %v16364_v29 = vmov 0  }
 0x751   :  { %13663 = vmatprep.subr.bf16.mxu0 %v16298_v53  ;;  %v16347_v53 = vld [vmem:[%s22318_s5 + $0x1d0] ss:$8 sps:$4 sm:$0xff]   ;;  %15875 = vset.pattern.permute.xlu0 %v16364_v29 }
 0x754   :  { %13664 = vmatpush1.bf16.msra.mxu0 %v16296_v5  ;;  %v16352_v5 = vld [vmem:[%s22318_s5 + $0x1e4] ss:$8 sps:$4 sm:$0xff]  }
 0x755   :  { %13665 = vmatprep.subr.bf16.mxu0 %v16301_v13 }
 0x758   :  { %13666 = vmatpush1.bf16.msra.mxu0 %v16299_v16  ;;  %v16350_v16 = vld [vmem:[%s22318_s5 + $0x1e0] ss:$8 sps:$4 sm:$0xff]  }
 0x759   :  { %13667 = vmatprep.subr.bf16.mxu0 %v16304_v19  ;;  %v16353_v19 = vld [vmem:[%s22318_s5 + $0x1f0] ss:$8 sps:$4 sm:$0xff]  }
 0x75c   :  { %13668 = vmatpush1.bf16.msra.mxu0 %v16302_v4 }
 0x75d   :  { %13669 = vmatprep.subr.bf16.mxu0 %v16307_v2 }
 0x760   :  { %13670 = vmatpush1.bf16.msra.mxu0 %v16305_v56  ;;  %v13727_v56 = vld [vmem:[%s22320_s7] sm:$0xff] }
 0x761   :  { %13680 = vmatprep.subr.bf16.mxu0 %v16310_v58  ;;  %v15657_v58 = vcombine.high %v13727_v56, %v13727_v56 }
 0x763   :  { %13769 = vmatprep.mubr.bf16.mxu1 %v15657_v58 }
 0x7f6   :  { %v13056_v14 = vpop.f32.mrb[8].mxu0 }
 0x7f7   :  { %v15668_v15 = vadd.f32 %v13056_v14, %v11602_v9  ;;  %v13058_v12 = vpop.f32.mrb[9].mxu0  ;;  %v14_v9 = vstv %s22321_s8  ;;  %v13307_v14 = vld [vmem:[%s22322_s6] sm:$0x3] }
 0x7f8   :  { %v15669_v60 = vadd.f32 %v13058_v12, %v11606_v8  ;;  %v13060_v40 = vpop.f32.mrb[10].mxu0  ;;  %15 = vst [vmem:[#allocation2] sm:$0x1] %v14_v9  ;;  %v13316_v12 = vrot.slane %v13307_v14, %v19360_v39 }
 0x7f9   :  { %vm13227_vm8 = vcmp.gt.f32.partialorder %v15668_v15, 0.0  ;;  %v13231_v20 = vmul.f32 0.2, %v15668_v15  ;;  %v13061_v37 = vpop.f32.mrb[11].mxu0 }
 0x7fa   :  { %vm13228_vm9 = vcmp.gt.f32.partialorder %v15669_v60, 0.0  ;;  %v13232_v18 = vmul.f32 0.2, %v15669_v60 }
 0x7fb   :  { %v13235_v61 = vsel %vm13227_vm8, %v15668_v15, %v13231_v20  ;;  %v13312_v15 = vrot.slane %v13307_v14, %v19348_v30 }
 0x7fc   :  { %v13236_v17 = vsel %vm13228_vm9, %v15669_v60, %v13232_v18  ;;  %v13239_v26 = vpack.c.bf16 %v13235_v61, %v13235_v61 }
 0x7fd   :  { %v13240_v22 = vpack.c.bf16 %v13236_v17, %v13236_v17 }
 0x7ff   :  { %13671 = vmatprep.mubr.bf16.mxu0 %v13240_v22  ;;  %v13777_v8 = vld [vmem:[#allocation2] sm:$0x1] }
 0x800   :  { %13672 = vmatmul.mubr.bf16.vlgmr.msra.gmra.mrb[12].mxu0 %v13239_v26  ;;  %13780 = vperm.xlu0 %15875, %v13777_v8  }
 0x801   :  { %13681 = vmatpush1.bf16.msra.mxu0 %v16308_v24 }
 0x802   :  { %13682 = vmatprep.subr.bf16.mxu0 %v16313_v28 }
 0x805   :  { %13683 = vmatpush1.bf16.msra.mxu0 %v16311_v33 }
 0x806   :  { %13684 = vmatprep.subr.bf16.mxu0 %v16316_v34  ;;  %v15656_v34 = vcombine.low %v13727_v56, %v13727_v56 }
 0x809   :  { %13685 = vmatpush1.bf16.msra.mxu0 %v16314_v36 }
 0x80a   :  { %13686 = vmatprep.subr.bf16.mxu0 %v16319_v25 }
 0x80d   :  { %13687 = vmatpush1.bf16.msra.mxu0 %v16317_v43 }
 0x80e   :  { %13688 = vmatprep.subr.bf16.mxu0 %v16322_v44 }
 0x811   :  { %13689 = vmatpush1.bf16.msra.mxu0 %v16320_v21 }
 0x812   :  { %13690 = vmatprep.subr.bf16.mxu0 %v16325_v47 }
 0x815   :  { %13691 = vmatpush1.bf16.msra.mxu0 %v16323_v48 }
 0x816   :  { %13692 = vmatprep.subr.bf16.mxu0 %v16328_v49 }
 0x819   :  { %13693 = vmatpush1.bf16.msra.mxu0 %v16326_v51  ;;  %v13220_v52 = vpop.f32.mrb[12].mxu1 }
 0x81a   :  { %v13222_v35 = vpop.f32.mrb[13].mxu1  ;;  %13694 = vmatprep.subr.bf16.mxu0 %v16331_v31  ;;  %v15670_v13 = vadd.f32 %v13220_v52, %v11610_v3 }
 0x81b   :  { %v15671_v45 = vadd.f32 %v13222_v35, %v11614_v42  ;;  %v13224_v27 = vpop.f32.mrb[14].mxu1 }
 0x81c   :  { %v13225_v59 = vpop.f32.mrb[15].mxu1  ;;  %v13233_v6 = vmul.f32 0.2, %v15670_v13  ;;  %vm13229_vm11 = vcmp.gt.f32.partialorder %v15670_v13, 0.0 }
 0x81d   :  { %vm13230_vm10 = vcmp.gt.f32.partialorder %v15671_v45, 0.0  ;;  %v13234_v62 = vmul.f32 0.2, %v15671_v45  ;;  %13695 = vmatpush1.bf16.msra.mxu0 %v16329_v54 }
 0x81e   :  { %13696 = vmatprep.subr.bf16.mxu0 %v16334_v55  ;;  %v13237_v4 = vsel %vm13229_vm11, %v15670_v13, %v13233_v6 }
 0x81f   :  { %v13238_v46 = vsel %vm13230_vm10, %v15671_v45, %v13234_v62  ;;  %v13241_v2 = vpack.c.bf16 %v13237_v4, %v13237_v4 }
 0x820   :  { %v13242_v10 = vpack.c.bf16 %v13238_v46, %v13238_v46 }
 0x821   :  { %13697 = vmatpush1.bf16.msra.mxu0 %v16332_v23 }
 0x822   :  { %13712 = vmatprep.mubr.bf16.mxu0 %v13242_v10  ;;  %13698 = vmatprep.subr.bf16.mxu0 %v16337_v63 }
 0x825   :  { %13699 = vmatpush1.bf16.msra.mxu0 %v16335_v7 }
 0x826   :  { %13700 = vmatprep.subr.bf16.mxu0 %v16340_v38 }
 0x829   :  { %13701 = vmatpush1.bf16.msra.mxu0 %v16338_v32 }
 0x82a   :  { %13702 = vmatprep.subr.bf16.mxu0 %v16343_v0 }
 0x82d   :  { %13703 = vmatpush1.bf16.msra.mxu0 %v16341_v50 }
 0x82e   :  { %13704 = vmatprep.subr.bf16.mxu0 %v16346_v57 }
 0x831   :  { %13705 = vmatpush1.bf16.msra.mxu0 %v16344_v1 }
 0x832   :  { %13706 = vmatprep.subr.bf16.mxu0 %v16349_v41 }
 0x835   :  { %13707 = vmatpush1.bf16.msra.mxu0 %v16347_v53 }
 0x836   :  { %13708 = vmatprep.subr.bf16.mxu0 %v16352_v5 }
 0x839   :  { %13709 = vmatpush1.bf16.msra.mxu0 %v16350_v16 }
 0x83a   :  { %13710 = vmatprep.subr.bf16.mxu0 %v16355_v11 }
 0x83d   :  { %13711 = vmatpush1.bf16.msra.mxu0 %v16353_v19 }
 0x840   :  { %13713 = vmatmul.mubr.bf16.vlgmr.msra.gmra.mrb[12].mxu0 %v13241_v2 }
 0x87f   :  { %v13781_v36 = vpop.permute.xlu0 %13780 }
 0x880   :  { %v13786_v39 = vrot.slane %v13781_v36, %v19348_v30 }
 0x913   :  { %v13714_v60 = vpop.f32.mrb[12].mxu0 }
 0x914   :  { %v15672_v40 = vadd.f32 %v13714_v60, %v13312_v15  ;;  %v13716_v20 = vpop.f32.mrb[13].mxu0 }
 0x915   :  { %v15673_v37 = vadd.f32 %v13716_v20, %v13316_v12  ;;  %v13718_v18 = vpop.f32.mrb[14].mxu0 }
 0x916   :  { %vm13721_vm12 = vcmp.gt.f32.partialorder %v15672_v40, 0.0  ;;  %v13723_v61 = vmul.f32 0.2, %v15672_v40  ;;  %v13719_v17 = vpop.f32.mrb[15].mxu0 }
 0x917   :  { %vm13722_vm13 = vcmp.gt.f32.partialorder %v15673_v37, 0.0  ;;  %v13724_v22 = vmul.f32 0.2, %v15673_v37 }
 0x918   :  { %v13725_v24 = vsel %vm13721_vm12, %v15672_v40, %v13723_v61 }
 0x919   :  { %v13726_v26 = vsel %vm13722_vm13, %v15673_v37, %v13724_v22  ;;  %v13728_v33 = vpack.c.bf16 %v13725_v24, %v13725_v24 }
 0x91a   :  { %v13729_v28 = vpack.c.bf16 %v13726_v26, %v13726_v26 }
 0x91c   :  { %13737 = vmatprep.subr.bf16.mxu1 %v13729_v28 }
 0x91d   :  { %13738 = vmatpush1.bf16.xpose.msra.mxu1 %v13728_v33 }
 0x924   :  { %13770 = vmatmul.mubr.bf16.vlgmr.msra.gmra.mrb[16].mxu1 %v15656_v34 }
 0x9f7   :  { %v13771_v25 = vpop.f32.mrb[16].mxu1 }
 0x9f8   :  { %v13787_v43 = vadd.f32 %v13786_v39, %v13771_v25  ;;  %v13773_v44 = vpop.f32.mrb[17].mxu1 }
 0x9f9   :  { %v13774_v21 = vpop.f32.mrb[18].mxu1 }
 0x9fa   :  { %v13788_v47 = vsub.f32 0.0, %v13787_v43  ;;  %v13775_v48 = vpop.f32.mrb[19].mxu1 }
 0x9fc   :  { %v13789_v49 = vmul.f32 1.442695, %v13788_v47 }
 0x9fe   :  { %16358 = vpow2.f32 %v13789_v49 }
 0xa08   :  { %v16359_v51 = vpop.eup %16358 }
 0xa09   :  { %v13791_v31 = vadd.f32 1.0, %v16359_v51 }
 0xa0b   :  { %16360 = vrcp.f32 %v13791_v31 }
 0xa15   :  { %v16361_v42 = vpop.eup %16360 }
 0xa16   :  { %13795 = vst.msk [vmem:[%s22323_s9] sm:$0x1] %vm13794_vm14, %v16361_v42 }

</bundles_post_ra>
